<compile_context>
chip_gen: v6e
topology: v6e:2x2x1
jax: 0.10.0
libtpu: 0.0.40
codegen_flags: <defaults>
</compile_context>

<pallas_src>
import jax
import jax.numpy as jnp
from jax import lax
from jax.experimental import pallas as pl
from jax.experimental.pallas import tpu as pltpu


# --------------------------- fused Pallas kernel -----------------------------

def _edge_kernel(xcol_ref, q_ref, p_ref,
                 w1_ref, b1_ref, w2_ref, b2_ref,
                 wd_ref, bd_ref, w3_ref, b3_ref,
                 o_ref, pad_ref):
    """One image per grid step; everything stays in VMEM.

    xcol_ref: (1, H*W, 27)      bf16  im2col of the padded input (conv1)
    q_ref   : (H*W, H*W)        bf16  one-hot permutation for 2x2 max-pool grouping
    p_ref   : (H*W, H*W)        bf16  one-hot permutation for deconv phase interleave
    w1_ref  : (27, 64) bf16, b1_ref: (1, 64) f32
    w2_ref  : (3, 3, 64, 128) bf16, b2_ref: (1, 128) f32
    wd_ref  : (2, 2, 128, 64) bf16, bd_ref: (1, 64) f32
    w3_ref  : (3, 3, 64, 128) bf16 (Cout zero-padded 1->128), b3_ref: (1, 128) f32
    o_ref   : (1, H*W, 128) f32  (only channel 0 is meaningful)
    pad_ref : VMEM scratch (H+2, W+2, 64) f32, reused for both padded activations.
    """
    f32, bf16 = jnp.float32, jnp.bfloat16
    Hp2, Wp2, C1 = pad_ref.shape
    H, W = Hp2 - 2, Wp2 - 2
    HW = H * W
    C2 = w2_ref.shape[-1]          # 128
    Cd = wd_ref.shape[-1]          # 64
    C3 = w3_ref.shape[-1]          # 128 (padded)

    # Zero once per step: only the 1-pixel border needs to stay zero, the interior is
    # fully overwritten before every read.
    pad_ref[...] = jnp.zeros_like(pad_ref)

    # ---- conv1 + ReLU: one im2col matmul (HW, 27) x (27, 64) ----
    a1 = jnp.dot(xcol_ref[0], w1_ref[...], preferred_element_type=f32)
    a1 = jnp.maximum(a1 + b1_ref[...], 0.0)                       # (HW, 64) f32
    pad_ref[1:1 + H, 1:1 + W, :] = a1.reshape(H, W, C1)

    # ---- conv2 + ReLU: 9 shifted (HW, 64) x (64, 128) matmuls, f32 accumulation ----
    acc2 = jnp.zeros((HW, C2), f32)
    for dy in range(3):
        for dx in range(3):
            tap = pad_ref[dy:dy + H, dx:dx + W, :].reshape(HW, C1).astype(bf16)
            acc2 = acc2 + jnp.dot(tap, w2_ref[dy, dx], preferred_element_type=f32)
    a2 = jnp.maximum(acc2 + b2_ref[...], 0.0)                     # (HW, 128) f32

    # ---- 2x2 max-pool: one-hot permutation matmul gathers the 4 window members into
    #      4 contiguous row slabs, then an element-wise max of the slabs ----
    t = jnp.dot(q_ref[...], a2.astype(bf16), preferred_element_type=f32)   # (HW, 128)
    t = t.reshape(4, HW // 4, C2)
    pooled = jnp.maximum(jnp.maximum(t[0], t[1]), jnp.maximum(t[2], t[3]))  # (HW/4,128)
    pooled = pooled.astype(bf16)

    # ---- ConvTranspose2d(k=2, s=2) + ReLU: 4 phase matmuls, then in-kernel spatial
    #      interleave via a second one-hot permutation matmul ----
    ys = []
    for i in range(2):
        for j in range(2):
            y = jnp.dot(pooled, wd_ref[i, j], preferred_element_type=f32)   # (HW/4, 64)
            ys.append(jnp.maximum(y + bd_ref[...], 0.0))
    ycat = jnp.concatenate(ys, axis=0).astype(bf16)               # (HW, 64) phase-major
    d = jnp.dot(p_ref[...], ycat, preferred_element_type=f32)     # (HW, 64) spatial
    pad_ref[1:1 + H, 1:1 + W, :] = d.reshape(H, W, Cd)

    # ---- conv3 (Cout padded to 128) + sigmoid, lane-dense output store ----
    acc3 = jnp.zeros((HW, C3), f32)
    for dy in range(3):
        for dx in range(3):
            tap = pad_ref[dy:dy + H, dx:dx + W, :].reshape(HW, Cd).astype(bf16)
            acc3 = acc3 + jnp.dot(tap, w3_ref[dy, dx], preferred_element_type=f32)
    o_ref[0] = jax.nn.sigmoid(acc3 + b3_ref[...]).astype(o_ref.dtype)


# --------------------------- wrapper ------------------------------------------

def edge_detector_pallas(x_nhwc, params):
    N, H, W, Cin = x_nhwc.shape
    HW = H * W
    Hp, Wp = H // 2, W // 2
    C1 = params["w1"].shape[-1]     # 64
    C2 = params["w2"].shape[-1]     # 128
    Cd = params["wd"].shape[-1]     # 64
    C3 = 128                        # conv3 Cout zero-padded 1 -> 128 (lane-dense store)
    assert Cd == C1                 # padded scratch is reused for both activations
    bf16, f32 = jnp.bfloat16, jnp.float32

    # conv1 im2col on the (tiny) input, once, at the boundary: K = 9*Cin = 27.
    xp = jnp.pad(x_nhwc, ((0, 0), (1, 1), (1, 1), (0, 0)))
    cols = [xp[:, dy:dy + H, dx:dx + W, :] for dy in range(3) for dx in range(3)]
    xcol = jnp.concatenate(cols, axis=-1).reshape(N, HW, 9 * Cin).astype(bf16)
    w1c = params["w1"].reshape(9 * Cin, C1).astype(bf16)

    w2 = params["w2"].astype(bf16)
    wd = params["wd"].astype(bf16)
    w3 = jnp.pad(params["w3"],
                 ((0, 0), (0, 0), (0, 0), (0, C3 - params["w3"].shape[-1]))).astype(bf16)

    b1 = params["b1"].reshape(1, C1).astype(f32)
    b2 = params["b2"].reshape(1, C2).astype(f32)
    bd = params["bd"].reshape(1, Cd).astype(f32)
    b3 = jnp.pad(params["b3"], ((0, C3 - params["b3"].shape[0]),)).reshape(1, C3).astype(f32)

    # One-hot permutation matrices (depend only on shapes -> constant-folded by XLA).
    r = jnp.arange(HW)[:, None]
    s = jnp.arange(HW)[None, :]
    # Q: pool-group order.  Row q*(Hp*Wp) + hp*Wp + wp (q = 2*di + dj) picks conv2
    #    pixel (2*hp + di, 2*wp + dj).
    hp = (r % (Hp * Wp)) // Wp
    wp = r % Wp
    di = (r // (Hp * Wp)) // 2
    dj = (r // (Hp * Wp)) % 2
    Q = (s == (2 * hp + di) * W + (2 * wp + dj)).astype(bf16)
    # P: spatial interleave.  Row h*W + w (h = 2*hp + i, w = 2*wp + j) picks phase-major
    #    row (2*i + j)*(Hp*Wp) + hp*Wp + wp of the stacked deconv phase outputs.
    hp2 = (r // W) // 2
    i2 = (r // W) % 2
    wp2 = (r % W) // 2
    j2 = r % 2
    P = (s == (2 * i2 + j2) * (Hp * Wp) + hp2 * Wp + wp2).astype(bf16)

    out = pl.pallas_call(
        _edge_kernel,
        out_shape=jax.ShapeDtypeStruct((N, HW, C3), f32),
        grid_spec=pltpu.PrefetchScalarGridSpec(
            num_scalar_prefetch=0,
            grid=(N,),
            in_specs=[
                pl.BlockSpec((1, HW, 9 * Cin), lambda n: (n, 0, 0)),
                pl.BlockSpec((HW, HW), lambda n: (0, 0)),
                pl.BlockSpec((HW, HW), lambda n: (0, 0)),
                pl.BlockSpec((9 * Cin, C1), lambda n: (0, 0)),
                pl.BlockSpec((1, C1), lambda n: (0, 0)),
                pl.BlockSpec((3, 3, C1, C2), lambda n: (0, 0, 0, 0)),
                pl.BlockSpec((1, C2), lambda n: (0, 0)),
                pl.BlockSpec((2, 2, C2, Cd), lambda n: (0, 0, 0, 0)),
                pl.BlockSpec((1, Cd), lambda n: (0, 0)),
                pl.BlockSpec((3, 3, Cd, C3), lambda n: (0, 0, 0, 0)),
                pl.BlockSpec((1, C3), lambda n: (0, 0)),
            ],
            out_specs=pl.BlockSpec((1, HW, C3), lambda n: (n, 0, 0)),
            scratch_shapes=[pltpu.VMEM((H + 2, W + 2, C1), jnp.float32)],
        ),
        compiler_params=pltpu.CompilerParams(
            dimension_semantics=("parallel",),
            vmem_limit_bytes=32 * 1024 * 1024,
        ),
    )(xcol, Q, P, w1c, b1, w2, b2, wd, bd, w3, b3)

    # Only channel 0 of the padded conv3 output is real.
    return out[:, :, 0].reshape(N, H, W, 1)


# --------------------------- pure-JAX reference -------------------------------

def _conv_ref(x, w, b):
    y = lax.conv_general_dilated(
        x, w, window_strides=(1, 1), padding="SAME",
        dimension_numbers=("NHWC", "HWIO", "NHWC"),
        precision=lax.Precision.HIGHEST)
    return y + b


def edge_detector_ref(x, p):
    h = jax.nn.relu(_conv_ref(x, p["w1"], p["b1"]))
    h = jax.nn.relu(_conv_ref(h, p["w2"], p["b2"]))
    h = lax.reduce_window(h, -jnp.inf, lax.max,
                          (1, 2, 2, 1), (1, 2, 2, 1), "VALID")
    t = jnp.einsum("nhwc,ijco->nhiwjo", h, p["wd"])
    n, ho, _, wo, _, co = t.shape
    h = jax.nn.relu(t.reshape(n, 2 * ho, 2 * wo, co) + p["bd"])
    return jax.nn.sigmoid(_conv_ref(h, p["w3"], p["b3"]))


# --------------------------- main --------------------------------------------

if __name__ == "__main__":
    key = jax.random.PRNGKey(0)
    ks = jax.random.split(key, 9)
    N, Cin, H, W = 2, 3, 16, 16

    # Deterministic synthetic parameters in kernel layouts:
    #   convs: HWIO (PyTorch OIHW -> transpose); deconv: (kh, kw, Cin, Cout)
    #   (PyTorch ConvTranspose2d weight layout is (Cin, Cout, kh, kw)).
    s = 0.05
    params = {
        "w1": s * jax.random.normal(ks[0], (3, 3, 3, 64), jnp.float32),
        "b1": s * jax.random.normal(ks[1], (64,), jnp.float32),
        "w2": s * jax.random.normal(ks[2], (3, 3, 64, 128), jnp.float32),
        "b2": s * jax.random.normal(ks[3], (128,), jnp.float32),
        "wd": s * jax.random.normal(ks[4], (2, 2, 128, 64), jnp.float32),
        "bd": s * jax.random.normal(ks[5], (64,), jnp.float32),
        "w3": s * jax.random.normal(ks[6], (3, 3, 64, 1), jnp.float32),
        "b3": s * jax.random.normal(ks[7], (1,), jnp.float32),
    }

    x_nchw = jax.random.normal(ks[8], (N, Cin, H, W), jnp.float32)
    x_nhwc = jnp.transpose(x_nchw, (0, 2, 3, 1))          # NCHW -> NHWC

    fwd = jax.jit(lambda x: edge_detector_pallas(x, params))
    out_nhwc = fwd(x_nhwc)
    out_nchw = jnp.transpose(out_nhwc, (0, 3, 1, 2))      # back to NCHW
    jax.block_until_ready(out_nchw)

    assert out_nchw.shape == (N, 1, H, W), out_nchw.shape

    ref = edge_detector_ref(x_nhwc, params)
    err = float(jnp.max(jnp.abs(out_nhwc - ref)))
    assert err < 1e-2, f"mismatch vs reference: {err}"

    print("KERNEL_OK")
</pallas_src>

<mosaic_0001>
module attributes {stable_mosaic.version = 11 : i64} {
  func.func @_edge_kernel(%arg0: i32, %arg1: memref<1x256x27xbf16, #tpu.memory_space<vmem>>, %arg2: memref<256x256xbf16, #tpu.memory_space<vmem>>, %arg3: memref<256x256xbf16, #tpu.memory_space<vmem>>, %arg4: memref<27x64xbf16, #tpu.memory_space<vmem>>, %arg5: memref<1x64xf32, #tpu.memory_space<vmem>>, %arg6: memref<3x3x64x128xbf16, #tpu.memory_space<vmem>>, %arg7: memref<1x128xf32, #tpu.memory_space<vmem>>, %arg8: memref<2x2x128x64xbf16, #tpu.memory_space<vmem>>, %arg9: memref<1x64xf32, #tpu.memory_space<vmem>>, %arg10: memref<3x3x64x128xbf16, #tpu.memory_space<vmem>>, %arg11: memref<1x128xf32, #tpu.memory_space<vmem>>, %arg12: memref<1x256x128xf32, #tpu.memory_space<vmem>>, %arg13: memref<18x18x64xf32, #tpu.memory_space<vmem>>) attributes {dimension_semantics = [#tpu.dimension_semantics<parallel>], iteration_bounds = array<i64: 2>, scalar_prefetch = 0 : i64, scratch_operands = 1 : i64, tpu.core_type = #tpu.core_type<tc>, window_params = [{transform_indices = @transform_0, window_bounds = array<i64: 1, 256, 27>}, {pipeline_mode = #tpu.pipeline_mode<synchronous>, transform_indices = @transform_1, window_bounds = array<i64: 256, 256>}, {pipeline_mode = #tpu.pipeline_mode<synchronous>, transform_indices = @transform_2, window_bounds = array<i64: 256, 256>}, {pipeline_mode = #tpu.pipeline_mode<synchronous>, transform_indices = @transform_3, window_bounds = array<i64: 27, 64>}, {pipeline_mode = #tpu.pipeline_mode<synchronous>, transform_indices = @transform_4, window_bounds = array<i64: 1, 64>}, {pipeline_mode = #tpu.pipeline_mode<synchronous>, transform_indices = @transform_5, window_bounds = array<i64: 3, 3, 64, 128>}, {pipeline_mode = #tpu.pipeline_mode<synchronous>, transform_indices = @transform_6, window_bounds = array<i64: 1, 128>}, {pipeline_mode = #tpu.pipeline_mode<synchronous>, transform_indices = @transform_7, window_bounds = array<i64: 2, 2, 128, 64>}, {pipeline_mode = #tpu.pipeline_mode<synchronous>, transform_indices = @transform_8, window_bounds = array<i64: 1, 64>}, {pipeline_mode = #tpu.pipeline_mode<synchronous>, transform_indices = @transform_9, window_bounds = array<i64: 3, 3, 64, 128>}, {pipeline_mode = #tpu.pipeline_mode<synchronous>, transform_indices = @transform_10, window_bounds = array<i64: 1, 128>}, {transform_indices = @transform_11, window_bounds = array<i64: 1, 256, 128>}]} {
    %cst = arith.constant 0.000000e+00 : f32
    %0 = vector.broadcast %cst : f32 to vector<18x18x64xf32>
    %c0 = arith.constant 0 : index
    %c0_0 = arith.constant 0 : index
    %c0_1 = arith.constant 0 : index
    %1 = vector.load %arg13[%c0, %c0_0, %c0_1] : memref<18x18x64xf32, #tpu.memory_space<vmem>>, vector<18x18x64xf32>
    tpu.vector_store %arg13[%c0, %c0_0, %c0_1], %0 {strides = array<i32>} : memref<18x18x64xf32, #tpu.memory_space<vmem>>, vector<18x18x64xf32>,
    %c0_2 = arith.constant 0 : index
    %c0_3 = arith.constant 0 : index
    %c0_4 = arith.constant 0 : index
    %2 = vector.load %arg1[%c0_2, %c0_3, %c0_4] : memref<1x256x27xbf16, #tpu.memory_space<vmem>>, vector<1x256x27xbf16>
    %3 = vector.shape_cast %2 : vector<1x256x27xbf16> to vector<256x27xbf16>
    %c0_5 = arith.constant 0 : index
    %c0_6 = arith.constant 0 : index
    %4 = vector.load %arg4[%c0_5, %c0_6] : memref<27x64xbf16, #tpu.memory_space<vmem>>, vector<27x64xbf16>
    %cst_7 = arith.constant dense<0.000000e+00> : vector<256x64xf32>
    %5 = tpu.matmul %3, %4, %cst_7 {dimension_numbers = #tpu.dot_dimension_numbers<[1], [0], [0], [1], [0, 0, 1, 1], [], []>} : vector<256x27xbf16>, vector<27x64xbf16>, vector<256x64xf32> -> vector<256x64xf32>
    %c0_8 = arith.constant 0 : index
    %c0_9 = arith.constant 0 : index
    %6 = vector.load %arg5[%c0_8, %c0_9] : memref<1x64xf32, #tpu.memory_space<vmem>>, vector<1x64xf32>
    %7 = vector.broadcast %6 : vector<1x64xf32> to vector<256x64xf32>
    %8 = arith.addf %5, %7 : vector<256x64xf32>
    %cst_10 = arith.constant 0.000000e+00 : f32
    %9 = vector.broadcast %cst_10 : f32 to vector<256x64xf32>
    %10 = arith.maximumf %8, %9 : vector<256x64xf32>
    %11 = vector.shape_cast %10 : vector<256x64xf32> to vector<16x16x64xf32>
    %c1 = arith.constant 1 : index
    %c1_11 = arith.constant 1 : index
    %c0_12 = arith.constant 0 : index
    %12 = vector.load %arg13[%c1, %c1_11, %c0_12] : memref<18x18x64xf32, #tpu.memory_space<vmem>>, vector<16x16x64xf32>
    tpu.vector_store %arg13[%c1, %c1_11, %c0_12], %11 {strides = array<i32>} : memref<18x18x64xf32, #tpu.memory_space<vmem>>, vector<16x16x64xf32>,
    %cst_13 = arith.constant 0.000000e+00 : f32
    %13 = vector.broadcast %cst_13 : f32 to vector<256x128xf32>
    %c0_14 = arith.constant 0 : index
    %c0_15 = arith.constant 0 : index
    %c0_16 = arith.constant 0 : index
    %14 = vector.load %arg13[%c0_14, %c0_15, %c0_16] : memref<18x18x64xf32, #tpu.memory_space<vmem>>, vector<16x16x64xf32>
    %15 = vector.shape_cast %14 : vector<16x16x64xf32> to vector<256x64xf32>
    %16 = arith.truncf %15 : vector<256x64xf32> to vector<256x64xbf16>
    %c0_17 = arith.constant 0 : index
    %c0_18 = arith.constant 0 : index
    %c0_19 = arith.constant 0 : index
    %c0_20 = arith.constant 0 : index
    %17 = vector.load %arg6[%c0_17, %c0_18, %c0_19, %c0_20] : memref<3x3x64x128xbf16, #tpu.memory_space<vmem>>, vector<1x1x64x128xbf16>
    %18 = vector.shape_cast %17 : vector<1x1x64x128xbf16> to vector<64x128xbf16>
    %cst_21 = arith.constant dense<0.000000e+00> : vector<256x128xf32>
    %19 = tpu.matmul %16, %18, %cst_21 {dimension_numbers = #tpu.dot_dimension_numbers<[1], [0], [0], [1], [0, 0, 1, 1], [], []>} : vector<256x64xbf16>, vector<64x128xbf16>, vector<256x128xf32> -> vector<256x128xf32>
    %20 = arith.addf %13, %19 : vector<256x128xf32>
    %c0_22 = arith.constant 0 : index
    %c1_23 = arith.constant 1 : index
    %c0_24 = arith.constant 0 : index
    %21 = vector.load %arg13[%c0_22, %c1_23, %c0_24] : memref<18x18x64xf32, #tpu.memory_space<vmem>>, vector<16x16x64xf32>
    %22 = vector.shape_cast %21 : vector<16x16x64xf32> to vector<256x64xf32>
    %23 = arith.truncf %22 : vector<256x64xf32> to vector<256x64xbf16>
    %c0_25 = arith.constant 0 : index
    %c1_26 = arith.constant 1 : index
    %c0_27 = arith.constant 0 : index
    %c0_28 = arith.constant 0 : index
    %24 = vector.load %arg6[%c0_25, %c1_26, %c0_27, %c0_28] : memref<3x3x64x128xbf16, #tpu.memory_space<vmem>>, vector<1x1x64x128xbf16>
    %25 = vector.shape_cast %24 : vector<1x1x64x128xbf16> to vector<64x128xbf16>
    %cst_29 = arith.constant dense<0.000000e+00> : vector<256x128xf32>
    %26 = tpu.matmul %23, %25, %cst_29 {dimension_numbers = #tpu.dot_dimension_numbers<[1], [0], [0], [1], [0, 0, 1, 1], [], []>} : vector<256x64xbf16>, vector<64x128xbf16>, vector<256x128xf32> -> vector<256x128xf32>
    %27 = arith.addf %20, %26 : vector<256x128xf32>
    %c0_30 = arith.constant 0 : index
    %c2 = arith.constant 2 : index
    %c0_31 = arith.constant 0 : index
    %28 = vector.load %arg13[%c0_30, %c2, %c0_31] : memref<18x18x64xf32, #tpu.memory_space<vmem>>, vector<16x16x64xf32>
    %29 = vector.shape_cast %28 : vector<16x16x64xf32> to vector<256x64xf32>
    %30 = arith.truncf %29 : vector<256x64xf32> to vector<256x64xbf16>
    %c0_32 = arith.constant 0 : index
    %c2_33 = arith.constant 2 : index
    %c0_34 = arith.constant 0 : index
    %c0_35 = arith.constant 0 : index
    %31 = vector.load %arg6[%c0_32, %c2_33, %c0_34, %c0_35] : memref<3x3x64x128xbf16, #tpu.memory_space<vmem>>, vector<1x1x64x128xbf16>
    %32 = vector.shape_cast %31 : vector<1x1x64x128xbf16> to vector<64x128xbf16>
    %cst_36 = arith.constant dense<0.000000e+00> : vector<256x128xf32>
    %33 = tpu.matmul %30, %32, %cst_36 {dimension_numbers = #tpu.dot_dimension_numbers<[1], [0], [0], [1], [0, 0, 1, 1], [], []>} : vector<256x64xbf16>, vector<64x128xbf16>, vector<256x128xf32> -> vector<256x128xf32>
    %34 = arith.addf %27, %33 : vector<256x128xf32>
    %c1_37 = arith.constant 1 : index
    %c0_38 = arith.constant 0 : index
    %c0_39 = arith.constant 0 : index
    %35 = vector.load %arg13[%c1_37, %c0_38, %c0_39] : memref<18x18x64xf32, #tpu.memory_space<vmem>>, vector<16x16x64xf32>
    %36 = vector.shape_cast %35 : vector<16x16x64xf32> to vector<256x64xf32>
    %37 = arith.truncf %36 : vector<256x64xf32> to vector<256x64xbf16>
    %c1_40 = arith.constant 1 : index
    %c0_41 = arith.constant 0 : index
    %c0_42 = arith.constant 0 : index
    %c0_43 = arith.constant 0 : index
    %38 = vector.load %arg6[%c1_40, %c0_41, %c0_42, %c0_43] : memref<3x3x64x128xbf16, #tpu.memory_space<vmem>>, vector<1x1x64x128xbf16>
    %39 = vector.shape_cast %38 : vector<1x1x64x128xbf16> to vector<64x128xbf16>
    %cst_44 = arith.constant dense<0.000000e+00> : vector<256x128xf32>
    %40 = tpu.matmul %37, %39, %cst_44 {dimension_numbers = #tpu.dot_dimension_numbers<[1], [0], [0], [1], [0, 0, 1, 1], [], []>} : vector<256x64xbf16>, vector<64x128xbf16>, vector<256x128xf32> -> vector<256x128xf32>
    %41 = arith.addf %34, %40 : vector<256x128xf32>
    %c1_45 = arith.constant 1 : index
    %c1_46 = arith.constant 1 : index
    %c0_47 = arith.constant 0 : index
    %42 = vector.load %arg13[%c1_45, %c1_46, %c0_47] : memref<18x18x64xf32, #tpu.memory_space<vmem>>, vector<16x16x64xf32>
    %43 = vector.shape_cast %42 : vector<16x16x64xf32> to vector<256x64xf32>
    %44 = arith.truncf %43 : vector<256x64xf32> to vector<256x64xbf16>
    %c1_48 = arith.constant 1 : index
    %c1_49 = arith.constant 1 : index
    %c0_50 = arith.constant 0 : index
    %c0_51 = arith.constant 0 : index
    %45 = vector.load %arg6[%c1_48, %c1_49, %c0_50, %c0_51] : memref<3x3x64x128xbf16, #tpu.memory_space<vmem>>, vector<1x1x64x128xbf16>
    %46 = vector.shape_cast %45 : vector<1x1x64x128xbf16> to vector<64x128xbf16>
    %cst_52 = arith.constant dense<0.000000e+00> : vector<256x128xf32>
    %47 = tpu.matmul %44, %46, %cst_52 {dimension_numbers = #tpu.dot_dimension_numbers<[1], [0], [0], [1], [0, 0, 1, 1], [], []>} : vector<256x64xbf16>, vector<64x128xbf16>, vector<256x128xf32> -> vector<256x128xf32>
    %48 = arith.addf %41, %47 : vector<256x128xf32>
    %c1_53 = arith.constant 1 : index
    %c2_54 = arith.constant 2 : index
    %c0_55 = arith.constant 0 : index
    %49 = vector.load %arg13[%c1_53, %c2_54, %c0_55] : memref<18x18x64xf32, #tpu.memory_space<vmem>>, vector<16x16x64xf32>
    %50 = vector.shape_cast %49 : vector<16x16x64xf32> to vector<256x64xf32>
    %51 = arith.truncf %50 : vector<256x64xf32> to vector<256x64xbf16>
    %c1_56 = arith.constant 1 : index
    %c2_57 = arith.constant 2 : index
    %c0_58 = arith.constant 0 : index
    %c0_59 = arith.constant 0 : index
    %52 = vector.load %arg6[%c1_56, %c2_57, %c0_58, %c0_59] : memref<3x3x64x128xbf16, #tpu.memory_space<vmem>>, vector<1x1x64x128xbf16>
    %53 = vector.shape_cast %52 : vector<1x1x64x128xbf16> to vector<64x128xbf16>
    %cst_60 = arith.constant dense<0.000000e+00> : vector<256x128xf32>
    %54 = tpu.matmul %51, %53, %cst_60 {dimension_numbers = #tpu.dot_dimension_numbers<[1], [0], [0], [1], [0, 0, 1, 1], [], []>} : vector<256x64xbf16>, vector<64x128xbf16>, vector<256x128xf32> -> vector<256x128xf32>
    %55 = arith.addf %48, %54 : vector<256x128xf32>
    %c2_61 = arith.constant 2 : index
    %c0_62 = arith.constant 0 : index
    %c0_63 = arith.constant 0 : index
    %56 = vector.load %arg13[%c2_61, %c0_62, %c0_63] : memref<18x18x64xf32, #tpu.memory_space<vmem>>, vector<16x16x64xf32>
    %57 = vector.shape_cast %56 : vector<16x16x64xf32> to vector<256x64xf32>
    %58 = arith.truncf %57 : vector<256x64xf32> to vector<256x64xbf16>
    %c2_64 = arith.constant 2 : index
    %c0_65 = arith.constant 0 : index
    %c0_66 = arith.constant 0 : index
    %c0_67 = arith.constant 0 : index
    %59 = vector.load %arg6[%c2_64, %c0_65, %c0_66, %c0_67] : memref<3x3x64x128xbf16, #tpu.memory_space<vmem>>, vector<1x1x64x128xbf16>
    %60 = vector.shape_cast %59 : vector<1x1x64x128xbf16> to vector<64x128xbf16>
    %cst_68 = arith.constant dense<0.000000e+00> : vector<256x128xf32>
    %61 = tpu.matmul %58, %60, %cst_68 {dimension_numbers = #tpu.dot_dimension_numbers<[1], [0], [0], [1], [0, 0, 1, 1], [], []>} : vector<256x64xbf16>, vector<64x128xbf16>, vector<256x128xf32> -> vector<256x128xf32>
    %62 = arith.addf %55, %61 : vector<256x128xf32>
    %c2_69 = arith.constant 2 : index
    %c1_70 = arith.constant 1 : index
    %c0_71 = arith.constant 0 : index
    %63 = vector.load %arg13[%c2_69, %c1_70, %c0_71] : memref<18x18x64xf32, #tpu.memory_space<vmem>>, vector<16x16x64xf32>
    %64 = vector.shape_cast %63 : vector<16x16x64xf32> to vector<256x64xf32>
    %65 = arith.truncf %64 : vector<256x64xf32> to vector<256x64xbf16>
    %c2_72 = arith.constant 2 : index
    %c1_73 = arith.constant 1 : index
    %c0_74 = arith.constant 0 : index
    %c0_75 = arith.constant 0 : index
    %66 = vector.load %arg6[%c2_72, %c1_73, %c0_74, %c0_75] : memref<3x3x64x128xbf16, #tpu.memory_space<vmem>>, vector<1x1x64x128xbf16>
    %67 = vector.shape_cast %66 : vector<1x1x64x128xbf16> to vector<64x128xbf16>
    %cst_76 = arith.constant dense<0.000000e+00> : vector<256x128xf32>
    %68 = tpu.matmul %65, %67, %cst_76 {dimension_numbers = #tpu.dot_dimension_numbers<[1], [0], [0], [1], [0, 0, 1, 1], [], []>} : vector<256x64xbf16>, vector<64x128xbf16>, vector<256x128xf32> -> vector<256x128xf32>
    %69 = arith.addf %62, %68 : vector<256x128xf32>
    %c2_77 = arith.constant 2 : index
    %c2_78 = arith.constant 2 : index
    %c0_79 = arith.constant 0 : index
    %70 = vector.load %arg13[%c2_77, %c2_78, %c0_79] : memref<18x18x64xf32, #tpu.memory_space<vmem>>, vector<16x16x64xf32>
    %71 = vector.shape_cast %70 : vector<16x16x64xf32> to vector<256x64xf32>
    %72 = arith.truncf %71 : vector<256x64xf32> to vector<256x64xbf16>
    %c2_80 = arith.constant 2 : index
    %c2_81 = arith.constant 2 : index
    %c0_82 = arith.constant 0 : index
    %c0_83 = arith.constant 0 : index
    %73 = vector.load %arg6[%c2_80, %c2_81, %c0_82, %c0_83] : memref<3x3x64x128xbf16, #tpu.memory_space<vmem>>, vector<1x1x64x128xbf16>
    %74 = vector.shape_cast %73 : vector<1x1x64x128xbf16> to vector<64x128xbf16>
    %cst_84 = arith.constant dense<0.000000e+00> : vector<256x128xf32>
    %75 = tpu.matmul %72, %74, %cst_84 {dimension_numbers = #tpu.dot_dimension_numbers<[1], [0], [0], [1], [0, 0, 1, 1], [], []>} : vector<256x64xbf16>, vector<64x128xbf16>, vector<256x128xf32> -> vector<256x128xf32>
    %76 = arith.addf %69, %75 : vector<256x128xf32>
    %c0_85 = arith.constant 0 : index
    %c0_86 = arith.constant 0 : index
    %77 = vector.load %arg7[%c0_85, %c0_86] : memref<1x128xf32, #tpu.memory_space<vmem>>, vector<1x128xf32>
    %78 = vector.broadcast %77 : vector<1x128xf32> to vector<256x128xf32>
    %79 = arith.addf %76, %78 : vector<256x128xf32>
    %cst_87 = arith.constant 0.000000e+00 : f32
    %80 = vector.broadcast %cst_87 : f32 to vector<256x128xf32>
    %81 = arith.maximumf %79, %80 : vector<256x128xf32>
    %c0_88 = arith.constant 0 : index
    %c0_89 = arith.constant 0 : index
    %82 = vector.load %arg2[%c0_88, %c0_89] : memref<256x256xbf16, #tpu.memory_space<vmem>>, vector<256x256xbf16>
    %83 = arith.truncf %81 : vector<256x128xf32> to vector<256x128xbf16>
    %cst_90 = arith.constant dense<0.000000e+00> : vector<256x128xf32>
    %84 = tpu.matmul %82, %83, %cst_90 {dimension_numbers = #tpu.dot_dimension_numbers<[1], [0], [0], [1], [0, 0, 1, 1], [], []>} : vector<256x256xbf16>, vector<256x128xbf16>, vector<256x128xf32> -> vector<256x128xf32>
    %85 = vector.shape_cast %84 : vector<256x128xf32> to vector<4x64x128xf32>
    %86 = vector.extract_strided_slice %85 {offsets = [0, 0, 0], sizes = [1, 64, 128], strides = [1, 1, 1]} : vector<4x64x128xf32> to vector<1x64x128xf32>
    %87 = vector.shape_cast %86 : vector<1x64x128xf32> to vector<64x128xf32>
    %88 = vector.extract_strided_slice %85 {offsets = [1, 0, 0], sizes = [1, 64, 128], strides = [1, 1, 1]} : vector<4x64x128xf32> to vector<1x64x128xf32>
    %89 = vector.shape_cast %88 : vector<1x64x128xf32> to vector<64x128xf32>
    %90 = arith.maximumf %87, %89 : vector<64x128xf32>
    %91 = vector.extract_strided_slice %85 {offsets = [2, 0, 0], sizes = [1, 64, 128], strides = [1, 1, 1]} : vector<4x64x128xf32> to vector<1x64x128xf32>
    %92 = vector.shape_cast %91 : vector<1x64x128xf32> to vector<64x128xf32>
    %93 = vector.extract_strided_slice %85 {offsets = [3, 0, 0], sizes = [1, 64, 128], strides = [1, 1, 1]} : vector<4x64x128xf32> to vector<1x64x128xf32>
    %94 = vector.shape_cast %93 : vector<1x64x128xf32> to vector<64x128xf32>
    %95 = arith.maximumf %92, %94 : vector<64x128xf32>
    %96 = arith.maximumf %90, %95 : vector<64x128xf32>
    %97 = arith.truncf %96 : vector<64x128xf32> to vector<64x128xbf16>
    %c0_91 = arith.constant 0 : index
    %c0_92 = arith.constant 0 : index
    %c0_93 = arith.constant 0 : index
    %c0_94 = arith.constant 0 : index
    %98 = vector.load %arg8[%c0_91, %c0_92, %c0_93, %c0_94] : memref<2x2x128x64xbf16, #tpu.memory_space<vmem>>, vector<1x1x128x64xbf16>
    %99 = vector.shape_cast %98 : vector<1x1x128x64xbf16> to vector<128x64xbf16>
    %cst_95 = arith.constant dense<0.000000e+00> : vector<64x64xf32>
    %100 = tpu.matmul %97, %99, %cst_95 {dimension_numbers = #tpu.dot_dimension_numbers<[1], [0], [0], [1], [0, 0, 1, 1], [], []>} : vector<64x128xbf16>, vector<128x64xbf16>, vector<64x64xf32> -> vector<64x64xf32>
    %c0_96 = arith.constant 0 : index
    %c0_97 = arith.constant 0 : index
    %101 = vector.load %arg9[%c0_96, %c0_97] : memref<1x64xf32, #tpu.memory_space<vmem>>, vector<1x64xf32>
    %102 = vector.broadcast %101 : vector<1x64xf32> to vector<64x64xf32>
    %103 = arith.addf %100, %102 : vector<64x64xf32>
    %cst_98 = arith.constant 0.000000e+00 : f32
    %104 = vector.broadcast %cst_98 : f32 to vector<64x64xf32>
    %105 = arith.maximumf %103, %104 : vector<64x64xf32>
    %c0_99 = arith.constant 0 : index
    %c1_100 = arith.constant 1 : index
    %c0_101 = arith.constant 0 : index
    %c0_102 = arith.constant 0 : index
    %106 = vector.load %arg8[%c0_99, %c1_100, %c0_101, %c0_102] : memref<2x2x128x64xbf16, #tpu.memory_space<vmem>>, vector<1x1x128x64xbf16>
    %107 = vector.shape_cast %106 : vector<1x1x128x64xbf16> to vector<128x64xbf16>
    %cst_103 = arith.constant dense<0.000000e+00> : vector<64x64xf32>
    %108 = tpu.matmul %97, %107, %cst_103 {dimension_numbers = #tpu.dot_dimension_numbers<[1], [0], [0], [1], [0, 0, 1, 1], [], []>} : vector<64x128xbf16>, vector<128x64xbf16>, vector<64x64xf32> -> vector<64x64xf32>
    %c0_104 = arith.constant 0 : index
    %c0_105 = arith.constant 0 : index
    %109 = vector.load %arg9[%c0_104, %c0_105] : memref<1x64xf32, #tpu.memory_space<vmem>>, vector<1x64xf32>
    %110 = vector.broadcast %109 : vector<1x64xf32> to vector<64x64xf32>
    %111 = arith.addf %108, %110 : vector<64x64xf32>
    %cst_106 = arith.constant 0.000000e+00 : f32
    %112 = vector.broadcast %cst_106 : f32 to vector<64x64xf32>
    %113 = arith.maximumf %111, %112 : vector<64x64xf32>
    %c1_107 = arith.constant 1 : index
    %c0_108 = arith.constant 0 : index
    %c0_109 = arith.constant 0 : index
    %c0_110 = arith.constant 0 : index
    %114 = vector.load %arg8[%c1_107, %c0_108, %c0_109, %c0_110] : memref<2x2x128x64xbf16, #tpu.memory_space<vmem>>, vector<1x1x128x64xbf16>
    %115 = vector.shape_cast %114 : vector<1x1x128x64xbf16> to vector<128x64xbf16>
    %cst_111 = arith.constant dense<0.000000e+00> : vector<64x64xf32>
    %116 = tpu.matmul %97, %115, %cst_111 {dimension_numbers = #tpu.dot_dimension_numbers<[1], [0], [0], [1], [0, 0, 1, 1], [], []>} : vector<64x128xbf16>, vector<128x64xbf16>, vector<64x64xf32> -> vector<64x64xf32>
    %c0_112 = arith.constant 0 : index
    %c0_113 = arith.constant 0 : index
    %117 = vector.load %arg9[%c0_112, %c0_113] : memref<1x64xf32, #tpu.memory_space<vmem>>, vector<1x64xf32>
    %118 = vector.broadcast %117 : vector<1x64xf32> to vector<64x64xf32>
    %119 = arith.addf %116, %118 : vector<64x64xf32>
    %cst_114 = arith.constant 0.000000e+00 : f32
    %120 = vector.broadcast %cst_114 : f32 to vector<64x64xf32>
    %121 = arith.maximumf %119, %120 : vector<64x64xf32>
    %c1_115 = arith.constant 1 : index
    %c1_116 = arith.constant 1 : index
    %c0_117 = arith.constant 0 : index
    %c0_118 = arith.constant 0 : index
    %122 = vector.load %arg8[%c1_115, %c1_116, %c0_117, %c0_118] : memref<2x2x128x64xbf16, #tpu.memory_space<vmem>>, vector<1x1x128x64xbf16>
    %123 = vector.shape_cast %122 : vector<1x1x128x64xbf16> to vector<128x64xbf16>
    %cst_119 = arith.constant dense<0.000000e+00> : vector<64x64xf32>
    %124 = tpu.matmul %97, %123, %cst_119 {dimension_numbers = #tpu.dot_dimension_numbers<[1], [0], [0], [1], [0, 0, 1, 1], [], []>} : vector<64x128xbf16>, vector<128x64xbf16>, vector<64x64xf32> -> vector<64x64xf32>
    %c0_120 = arith.constant 0 : index
    %c0_121 = arith.constant 0 : index
    %125 = vector.load %arg9[%c0_120, %c0_121] : memref<1x64xf32, #tpu.memory_space<vmem>>, vector<1x64xf32>
    %126 = vector.broadcast %125 : vector<1x64xf32> to vector<64x64xf32>
    %127 = arith.addf %124, %126 : vector<64x64xf32>
    %cst_122 = arith.constant 0.000000e+00 : f32
    %128 = vector.broadcast %cst_122 : f32 to vector<64x64xf32>
    %129 = arith.maximumf %127, %128 : vector<64x64xf32>
    %130 = tpu.concatenate %105, %113, %121, %129 in 0 : vector<64x64xf32>, vector<64x64xf32>, vector<64x64xf32>, vector<64x64xf32> -> vector<256x64xf32>
    %131 = arith.truncf %130 : vector<256x64xf32> to vector<256x64xbf16>
    %c0_123 = arith.constant 0 : index
    %c0_124 = arith.constant 0 : index
    %132 = vector.load %arg3[%c0_123, %c0_124] : memref<256x256xbf16, #tpu.memory_space<vmem>>, vector<256x256xbf16>
    %cst_125 = arith.constant dense<0.000000e+00> : vector<256x64xf32>
    %133 = tpu.matmul %132, %131, %cst_125 {dimension_numbers = #tpu.dot_dimension_numbers<[1], [0], [0], [1], [0, 0, 1, 1], [], []>} : vector<256x256xbf16>, vector<256x64xbf16>, vector<256x64xf32> -> vector<256x64xf32>
    %134 = vector.shape_cast %133 : vector<256x64xf32> to vector<16x16x64xf32>
    %c1_126 = arith.constant 1 : index
    %c1_127 = arith.constant 1 : index
    %c0_128 = arith.constant 0 : index
    %135 = vector.load %arg13[%c1_126, %c1_127, %c0_128] : memref<18x18x64xf32, #tpu.memory_space<vmem>>, vector<16x16x64xf32>
    tpu.vector_store %arg13[%c1_126, %c1_127, %c0_128], %134 {strides = array<i32>} : memref<18x18x64xf32, #tpu.memory_space<vmem>>, vector<16x16x64xf32>,
    %cst_129 = arith.constant 0.000000e+00 : f32
    %136 = vector.broadcast %cst_129 : f32 to vector<256x128xf32>
    %c0_130 = arith.constant 0 : index
    %c0_131 = arith.constant 0 : index
    %c0_132 = arith.constant 0 : index
    %137 = vector.load %arg13[%c0_130, %c0_131, %c0_132] : memref<18x18x64xf32, #tpu.memory_space<vmem>>, vector<16x16x64xf32>
    %138 = vector.shape_cast %137 : vector<16x16x64xf32> to vector<256x64xf32>
    %139 = arith.truncf %138 : vector<256x64xf32> to vector<256x64xbf16>
    %c0_133 = arith.constant 0 : index
    %c0_134 = arith.constant 0 : index
    %c0_135 = arith.constant 0 : index
    %c0_136 = arith.constant 0 : index
    %140 = vector.load %arg10[%c0_133, %c0_134, %c0_135, %c0_136] : memref<3x3x64x128xbf16, #tpu.memory_space<vmem>>, vector<1x1x64x128xbf16>
    %141 = vector.shape_cast %140 : vector<1x1x64x128xbf16> to vector<64x128xbf16>
    %cst_137 = arith.constant dense<0.000000e+00> : vector<256x128xf32>
    %142 = tpu.matmul %139, %141, %cst_137 {dimension_numbers = #tpu.dot_dimension_numbers<[1], [0], [0], [1], [0, 0, 1, 1], [], []>} : vector<256x64xbf16>, vector<64x128xbf16>, vector<256x128xf32> -> vector<256x128xf32>
    %143 = arith.addf %136, %142 : vector<256x128xf32>
    %c0_138 = arith.constant 0 : index
    %c1_139 = arith.constant 1 : index
    %c0_140 = arith.constant 0 : index
    %144 = vector.load %arg13[%c0_138, %c1_139, %c0_140] : memref<18x18x64xf32, #tpu.memory_space<vmem>>, vector<16x16x64xf32>
    %145 = vector.shape_cast %144 : vector<16x16x64xf32> to vector<256x64xf32>
    %146 = arith.truncf %145 : vector<256x64xf32> to vector<256x64xbf16>
    %c0_141 = arith.constant 0 : index
    %c1_142 = arith.constant 1 : index
    %c0_143 = arith.constant 0 : index
    %c0_144 = arith.constant 0 : index
    %147 = vector.load %arg10[%c0_141, %c1_142, %c0_143, %c0_144] : memref<3x3x64x128xbf16, #tpu.memory_space<vmem>>, vector<1x1x64x128xbf16>
    %148 = vector.shape_cast %147 : vector<1x1x64x128xbf16> to vector<64x128xbf16>
    %cst_145 = arith.constant dense<0.000000e+00> : vector<256x128xf32>
    %149 = tpu.matmul %146, %148, %cst_145 {dimension_numbers = #tpu.dot_dimension_numbers<[1], [0], [0], [1], [0, 0, 1, 1], [], []>} : vector<256x64xbf16>, vector<64x128xbf16>, vector<256x128xf32> -> vector<256x128xf32>
    %150 = arith.addf %143, %149 : vector<256x128xf32>
    %c0_146 = arith.constant 0 : index
    %c2_147 = arith.constant 2 : index
    %c0_148 = arith.constant 0 : index
    %151 = vector.load %arg13[%c0_146, %c2_147, %c0_148] : memref<18x18x64xf32, #tpu.memory_space<vmem>>, vector<16x16x64xf32>
    %152 = vector.shape_cast %151 : vector<16x16x64xf32> to vector<256x64xf32>
    %153 = arith.truncf %152 : vector<256x64xf32> to vector<256x64xbf16>
    %c0_149 = arith.constant 0 : index
    %c2_150 = arith.constant 2 : index
    %c0_151 = arith.constant 0 : index
    %c0_152 = arith.constant 0 : index
    %154 = vector.load %arg10[%c0_149, %c2_150, %c0_151, %c0_152] : memref<3x3x64x128xbf16, #tpu.memory_space<vmem>>, vector<1x1x64x128xbf16>
    %155 = vector.shape_cast %154 : vector<1x1x64x128xbf16> to vector<64x128xbf16>
    %cst_153 = arith.constant dense<0.000000e+00> : vector<256x128xf32>
    %156 = tpu.matmul %153, %155, %cst_153 {dimension_numbers = #tpu.dot_dimension_numbers<[1], [0], [0], [1], [0, 0, 1, 1], [], []>} : vector<256x64xbf16>, vector<64x128xbf16>, vector<256x128xf32> -> vector<256x128xf32>
    %157 = arith.addf %150, %156 : vector<256x128xf32>
    %c1_154 = arith.constant 1 : index
    %c0_155 = arith.constant 0 : index
    %c0_156 = arith.constant 0 : index
    %158 = vector.load %arg13[%c1_154, %c0_155, %c0_156] : memref<18x18x64xf32, #tpu.memory_space<vmem>>, vector<16x16x64xf32>
    %159 = vector.shape_cast %158 : vector<16x16x64xf32> to vector<256x64xf32>
    %160 = arith.truncf %159 : vector<256x64xf32> to vector<256x64xbf16>
    %c1_157 = arith.constant 1 : index
    %c0_158 = arith.constant 0 : index
    %c0_159 = arith.constant 0 : index
    %c0_160 = arith.constant 0 : index
    %161 = vector.load %arg10[%c1_157, %c0_158, %c0_159, %c0_160] : memref<3x3x64x128xbf16, #tpu.memory_space<vmem>>, vector<1x1x64x128xbf16>
    %162 = vector.shape_cast %161 : vector<1x1x64x128xbf16> to vector<64x128xbf16>
    %cst_161 = arith.constant dense<0.000000e+00> : vector<256x128xf32>
    %163 = tpu.matmul %160, %162, %cst_161 {dimension_numbers = #tpu.dot_dimension_numbers<[1], [0], [0], [1], [0, 0, 1, 1], [], []>} : vector<256x64xbf16>, vector<64x128xbf16>, vector<256x128xf32> -> vector<256x128xf32>
    %164 = arith.addf %157, %163 : vector<256x128xf32>
    %c1_162 = arith.constant 1 : index
    %c1_163 = arith.constant 1 : index
    %c0_164 = arith.constant 0 : index
    %165 = vector.load %arg13[%c1_162, %c1_163, %c0_164] : memref<18x18x64xf32, #tpu.memory_space<vmem>>, vector<16x16x64xf32>
    %166 = vector.shape_cast %165 : vector<16x16x64xf32> to vector<256x64xf32>
    %167 = arith.truncf %166 : vector<256x64xf32> to vector<256x64xbf16>
    %c1_165 = arith.constant 1 : index
    %c1_166 = arith.constant 1 : index
    %c0_167 = arith.constant 0 : index
    %c0_168 = arith.constant 0 : index
    %168 = vector.load %arg10[%c1_165, %c1_166, %c0_167, %c0_168] : memref<3x3x64x128xbf16, #tpu.memory_space<vmem>>, vector<1x1x64x128xbf16>
    %169 = vector.shape_cast %168 : vector<1x1x64x128xbf16> to vector<64x128xbf16>
    %cst_169 = arith.constant dense<0.000000e+00> : vector<256x128xf32>
    %170 = tpu.matmul %167, %169, %cst_169 {dimension_numbers = #tpu.dot_dimension_numbers<[1], [0], [0], [1], [0, 0, 1, 1], [], []>} : vector<256x64xbf16>, vector<64x128xbf16>, vector<256x128xf32> -> vector<256x128xf32>
    %171 = arith.addf %164, %170 : vector<256x128xf32>
    %c1_170 = arith.constant 1 : index
    %c2_171 = arith.constant 2 : index
    %c0_172 = arith.constant 0 : index
    %172 = vector.load %arg13[%c1_170, %c2_171, %c0_172] : memref<18x18x64xf32, #tpu.memory_space<vmem>>, vector<16x16x64xf32>
    %173 = vector.shape_cast %172 : vector<16x16x64xf32> to vector<256x64xf32>
    %174 = arith.truncf %173 : vector<256x64xf32> to vector<256x64xbf16>
    %c1_173 = arith.constant 1 : index
    %c2_174 = arith.constant 2 : index
    %c0_175 = arith.constant 0 : index
    %c0_176 = arith.constant 0 : index
    %175 = vector.load %arg10[%c1_173, %c2_174, %c0_175, %c0_176] : memref<3x3x64x128xbf16, #tpu.memory_space<vmem>>, vector<1x1x64x128xbf16>
    %176 = vector.shape_cast %175 : vector<1x1x64x128xbf16> to vector<64x128xbf16>
    %cst_177 = arith.constant dense<0.000000e+00> : vector<256x128xf32>
    %177 = tpu.matmul %174, %176, %cst_177 {dimension_numbers = #tpu.dot_dimension_numbers<[1], [0], [0], [1], [0, 0, 1, 1], [], []>} : vector<256x64xbf16>, vector<64x128xbf16>, vector<256x128xf32> -> vector<256x128xf32>
    %178 = arith.addf %171, %177 : vector<256x128xf32>
    %c2_178 = arith.constant 2 : index
    %c0_179 = arith.constant 0 : index
    %c0_180 = arith.constant 0 : index
    %179 = vector.load %arg13[%c2_178, %c0_179, %c0_180] : memref<18x18x64xf32, #tpu.memory_space<vmem>>, vector<16x16x64xf32>
    %180 = vector.shape_cast %179 : vector<16x16x64xf32> to vector<256x64xf32>
    %181 = arith.truncf %180 : vector<256x64xf32> to vector<256x64xbf16>
    %c2_181 = arith.constant 2 : index
    %c0_182 = arith.constant 0 : index
    %c0_183 = arith.constant 0 : index
    %c0_184 = arith.constant 0 : index
    %182 = vector.load %arg10[%c2_181, %c0_182, %c0_183, %c0_184] : memref<3x3x64x128xbf16, #tpu.memory_space<vmem>>, vector<1x1x64x128xbf16>
    %183 = vector.shape_cast %182 : vector<1x1x64x128xbf16> to vector<64x128xbf16>
    %cst_185 = arith.constant dense<0.000000e+00> : vector<256x128xf32>
    %184 = tpu.matmul %181, %183, %cst_185 {dimension_numbers = #tpu.dot_dimension_numbers<[1], [0], [0], [1], [0, 0, 1, 1], [], []>} : vector<256x64xbf16>, vector<64x128xbf16>, vector<256x128xf32> -> vector<256x128xf32>
    %185 = arith.addf %178, %184 : vector<256x128xf32>
    %c2_186 = arith.constant 2 : index
    %c1_187 = arith.constant 1 : index
    %c0_188 = arith.constant 0 : index
    %186 = vector.load %arg13[%c2_186, %c1_187, %c0_188] : memref<18x18x64xf32, #tpu.memory_space<vmem>>, vector<16x16x64xf32>
    %187 = vector.shape_cast %186 : vector<16x16x64xf32> to vector<256x64xf32>
    %188 = arith.truncf %187 : vector<256x64xf32> to vector<256x64xbf16>
    %c2_189 = arith.constant 2 : index
    %c1_190 = arith.constant 1 : index
    %c0_191 = arith.constant 0 : index
    %c0_192 = arith.constant 0 : index
    %189 = vector.load %arg10[%c2_189, %c1_190, %c0_191, %c0_192] : memref<3x3x64x128xbf16, #tpu.memory_space<vmem>>, vector<1x1x64x128xbf16>
    %190 = vector.shape_cast %189 : vector<1x1x64x128xbf16> to vector<64x128xbf16>
    %cst_193 = arith.constant dense<0.000000e+00> : vector<256x128xf32>
    %191 = tpu.matmul %188, %190, %cst_193 {dimension_numbers = #tpu.dot_dimension_numbers<[1], [0], [0], [1], [0, 0, 1, 1], [], []>} : vector<256x64xbf16>, vector<64x128xbf16>, vector<256x128xf32> -> vector<256x128xf32>
    %192 = arith.addf %185, %191 : vector<256x128xf32>
    %c2_194 = arith.constant 2 : index
    %c2_195 = arith.constant 2 : index
    %c0_196 = arith.constant 0 : index
    %193 = vector.load %arg13[%c2_194, %c2_195, %c0_196] : memref<18x18x64xf32, #tpu.memory_space<vmem>>, vector<16x16x64xf32>
    %194 = vector.shape_cast %193 : vector<16x16x64xf32> to vector<256x64xf32>
    %195 = arith.truncf %194 : vector<256x64xf32> to vector<256x64xbf16>
    %c2_197 = arith.constant 2 : index
    %c2_198 = arith.constant 2 : index
    %c0_199 = arith.constant 0 : index
    %c0_200 = arith.constant 0 : index
    %196 = vector.load %arg10[%c2_197, %c2_198, %c0_199, %c0_200] : memref<3x3x64x128xbf16, #tpu.memory_space<vmem>>, vector<1x1x64x128xbf16>
    %197 = vector.shape_cast %196 : vector<1x1x64x128xbf16> to vector<64x128xbf16>
    %cst_201 = arith.constant dense<0.000000e+00> : vector<256x128xf32>
    %198 = tpu.matmul %195, %197, %cst_201 {dimension_numbers = #tpu.dot_dimension_numbers<[1], [0], [0], [1], [0, 0, 1, 1], [], []>} : vector<256x64xbf16>, vector<64x128xbf16>, vector<256x128xf32> -> vector<256x128xf32>
    %199 = arith.addf %192, %198 : vector<256x128xf32>
    %c0_202 = arith.constant 0 : index
    %c0_203 = arith.constant 0 : index
    %200 = vector.load %arg11[%c0_202, %c0_203] : memref<1x128xf32, #tpu.memory_space<vmem>>, vector<1x128xf32>
    %201 = vector.broadcast %200 : vector<1x128xf32> to vector<256x128xf32>
    %202 = arith.addf %199, %201 : vector<256x128xf32>
    %203 = arith.negf %202 : vector<256x128xf32>
    %204 = math.exp %203 : vector<256x128xf32>
    %cst_204 = arith.constant 1.000000e+00 : f32
    %205 = vector.broadcast %cst_204 : f32 to vector<256x128xf32>
    %206 = arith.addf %205, %204 : vector<256x128xf32>
    %207 = arith.divf %205, %206 : vector<256x128xf32>
    %c0_205 = arith.constant 0 : index
    %c0_206 = arith.constant 0 : index
    %c0_207 = arith.constant 0 : index
    %208 = vector.load %arg12[%c0_205, %c0_206, %c0_207] : memref<1x256x128xf32, #tpu.memory_space<vmem>>, vector<1x256x128xf32>
    %209 = vector.shape_cast %208 : vector<1x256x128xf32> to vector<256x128xf32>
    %210 = vector.shape_cast %207 : vector<256x128xf32> to vector<1x256x128xf32>
    tpu.vector_store %arg12[%c0_205, %c0_206, %c0_207], %210 {strides = array<i32>} : memref<1x256x128xf32, #tpu.memory_space<vmem>>, vector<1x256x128xf32>,
    return
  }
  func.func @transform_0(%arg0: i32) -> (i32, i32, i32) {
    %c0_i32 = arith.constant 0 : i32
    %c0_i32_0 = arith.constant 0 : i32
    %c0_i32_1 = arith.constant 0 : i32
    return %arg0, %c0_i32, %c0_i32_0 : i32, i32, i32
  }
  func.func @transform_1(%arg0: i32) -> (i32, i32) {
    %c0_i32 = arith.constant 0 : i32
    %c0_i32_0 = arith.constant 0 : i32
    %c0_i32_1 = arith.constant 0 : i32
    return %c0_i32, %c0_i32_0 : i32, i32
  }
  func.func @transform_2(%arg0: i32) -> (i32, i32) {
    %c0_i32 = arith.constant 0 : i32
    %c0_i32_0 = arith.constant 0 : i32
    %c0_i32_1 = arith.constant 0 : i32
    return %c0_i32, %c0_i32_0 : i32, i32
  }
  func.func @transform_3(%arg0: i32) -> (i32, i32) {
    %c0_i32 = arith.constant 0 : i32
    %c0_i32_0 = arith.constant 0 : i32
    %c0_i32_1 = arith.constant 0 : i32
    return %c0_i32, %c0_i32_0 : i32, i32
  }
  func.func @transform_4(%arg0: i32) -> (i32, i32) {
    %c0_i32 = arith.constant 0 : i32
    %c0_i32_0 = arith.constant 0 : i32
    %c0_i32_1 = arith.constant 0 : i32
    return %c0_i32, %c0_i32_0 : i32, i32
  }
  func.func @transform_5(%arg0: i32) -> (i32, i32, i32, i32) {
    %c0_i32 = arith.constant 0 : i32
    %c0_i32_0 = arith.constant 0 : i32
    %c0_i32_1 = arith.constant 0 : i32
    %c0_i32_2 = arith.constant 0 : i32
    %c0_i32_3 = arith.constant 0 : i32
    return %c0_i32, %c0_i32_0, %c0_i32_1, %c0_i32_2 : i32, i32, i32, i32
  }
  func.func @transform_6(%arg0: i32) -> (i32, i32) {
    %c0_i32 = arith.constant 0 : i32
    %c0_i32_0 = arith.constant 0 : i32
    %c0_i32_1 = arith.constant 0 : i32
    return %c0_i32, %c0_i32_0 : i32, i32
  }
  func.func @transform_7(%arg0: i32) -> (i32, i32, i32, i32) {
    %c0_i32 = arith.constant 0 : i32
    %c0_i32_0 = arith.constant 0 : i32
    %c0_i32_1 = arith.constant 0 : i32
    %c0_i32_2 = arith.constant 0 : i32
    %c0_i32_3 = arith.constant 0 : i32
    return %c0_i32, %c0_i32_0, %c0_i32_1, %c0_i32_2 : i32, i32, i32, i32
  }
  func.func @transform_8(%arg0: i32) -> (i32, i32) {
    %c0_i32 = arith.constant 0 : i32
    %c0_i32_0 = arith.constant 0 : i32
    %c0_i32_1 = arith.constant 0 : i32
    return %c0_i32, %c0_i32_0 : i32, i32
  }
  func.func @transform_9(%arg0: i32) -> (i32, i32, i32, i32) {
    %c0_i32 = arith.constant 0 : i32
    %c0_i32_0 = arith.constant 0 : i32
    %c0_i32_1 = arith.constant 0 : i32
    %c0_i32_2 = arith.constant 0 : i32
    %c0_i32_3 = arith.constant 0 : i32
    return %c0_i32, %c0_i32_0, %c0_i32_1, %c0_i32_2 : i32, i32, i32, i32
  }
  func.func @transform_10(%arg0: i32) -> (i32, i32) {
    %c0_i32 = arith.constant 0 : i32
    %c0_i32_0 = arith.constant 0 : i32
    %c0_i32_1 = arith.constant 0 : i32
    return %c0_i32, %c0_i32_0 : i32, i32
  }
  func.func @transform_11(%arg0: i32) -> (i32, i32, i32) {
    %c0_i32 = arith.constant 0 : i32
    %c0_i32_0 = arith.constant 0 : i32
    %c0_i32_1 = arith.constant 0 : i32
    return %arg0, %c0_i32, %c0_i32_0 : i32, i32, i32
  }
}

</mosaic_0001>

<bundles_post_ra>
// kernel: squeeze.1
= control target key start
LH: loop header
LB: loop body
LE: loop exit
PB: predicated region body
PF: predicated region fallthrough
CT: control target
= control target key end

     0   :  { %s139_s0 = inlined_call_operand.vmem [shape: f32[2,256], index: 0, kind: input, shape index: {}]   ;;  %s140_s1 = inlined_call_operand.hbm [shape: f32[2,16,16,1], index: 1, kind: output, shape index: {}]  }
   0x1   :  { %v72_v0 = vld [vmem:[%s139_s0 + $0x2] sm:$0x3]  ;;  %v10_v1 = vld [vmem:[%s139_s0] sm:$0x3] }
   0x2   :  { %9 = vst [vmem:[#allocation2 + $0x8] sm:$0x3] %v72_v0  ;;  %11 = vst [vmem:[#allocation2] sm:$0x3] %v10_v1 }
   0x3   :  { %2 = vsyncpa [#allocation1], 0  ;;  %vm13_vm0 = vcmask 130048   ;;  %s103_s0 = smov 112   ;;  %s104_s10 = smov 80  }
   0x4   :  { %s105_s11 = smov 96   ;;  %s106_s12 = smov 64  }
   0x5   :  { %s107_s13 = smov 48   ;;  %s108_s14 = smov 32  }
   0x6   :  { %s109_s15 = smov 16   ;;  %s110_s16 = smov [#allocation0]  }
   0x7   :  { %s66_s17 = sshll.u32 %s110_s16, 4  ;;  %s67_s17 = int_to_ptr.vmem [resolvable:$true] %s66_s17 }
   0x8   :  { %s81_s18 = scalar_lea.vmem %s67_s17, 512  ;;  %p86_p1 = scmp.lt.s32.totalorder %s67_s17, %s67_s17 }
   0x9   :  { %v20_v2 = vld.sshfl [vmem:[#allocation2] sm:$0xff pattern:$0x99999180]   ;;  %p82_p0 = scmp.ne.s32.totalorder %s67_s17, %s81_s18  ;;  %p87_p2 = scmp.lt.s32.totalorder %s81_s18, %s81_s18 }
   0xa   :  { %v12_v3 = vld [vmem:[#allocation2] sm:$0x3]   ;;  %21 = vrot.lane.b32.xlu0 %v20_v2, %s103_s0  ;;  %33 = vrot.lane.b32.xlu1 %v20_v2, %s104_s10  ;;  %v16_v4 = vld [vmem:[#allocation2 + $0x8] sm:$0x3]  }
   0xb   :  { %14 = vst.msk [vmem:[#allocation0] ss:$16 sm:$0x3] %vm13_vm0, %v12_v3   ;;  %19 = vst.msk [vmem:[#allocation0 + $0x8] ss:$16 sm:$0x3] %vm13_vm0, %v16_v4   ;;  %p88_p3 = por %p87_p2, %p86_p1 }
   0xd   :  { %p89_p4 = pnand %p88_p3, %p82_p0 }
   0xe   :  { %27 = vrot.lane.b32.xlu0 %v20_v2, %s105_s11  ;;  %39 = vrot.lane.b32.xlu1 %v20_v2, %s106_s12 }
  0x12   :  { %45 = vrot.lane.b32.xlu0 %v20_v2, %s107_s13  ;;  %51 = vrot.lane.b32.xlu1 %v20_v2, %s108_s14 }
  0x16   :  { %57 = vrot.lane.b32.xlu0 %v20_v2, %s109_s15 }
  0x7c   :  { %v22_v5 = vpop.permute.xlu0 %21   ;;  %v34_v6 = vpop.permute.xlu1 %33  }
  0x7d   :  { %25 = vst.msk [vmem:[#allocation0 + $0x1] ss:$8 sm:$0xf] %vm13_vm0, %v22_v5   ;;  %37 = vst.msk [vmem:[#allocation0 + $0x3] ss:$8 sm:$0xf] %vm13_vm0, %v34_v6  }
  0x80   :  { %v28_v7 = vpop.permute.xlu0 %27   ;;  %v40_v8 = vpop.permute.xlu1 %39  }
  0x81   :  { %31 = vst.msk [vmem:[#allocation0 + $0x2] ss:$8 sm:$0xf] %vm13_vm0, %v28_v7   ;;  %43 = vst.msk [vmem:[#allocation0 + $0x4] ss:$8 sm:$0xf] %vm13_vm0, %v40_v8  }
  0x84   :  { %v46_v9 = vpop.permute.xlu0 %45   ;;  %v52_v10 = vpop.permute.xlu1 %51  }
  0x85   :  { %49 = vst.msk [vmem:[#allocation0 + $0x5] ss:$8 sm:$0xf] %vm13_vm0, %v46_v9   ;;  %55 = vst.msk [vmem:[#allocation0 + $0x6] ss:$8 sm:$0xf] %vm13_vm0, %v52_v10  }
  0x88   :  { %v58_v11 = vpop.permute.xlu0 %57  }
  0x89   :  { %61 = vst.msk [vmem:[#allocation0 + $0x7] ss:$8 sm:$0xf] %vm13_vm0, %v58_v11  }
  0x8a   :  { %92 = shalt.err (!%p89_p4)
}
  0x8b   :  { %69 = dma.vmem_to_hbm [thread:$0]  %s67_s17, 512, %s140_s1, [#allocation1]  }
  0x8c   :  { %101 = dma.done.wait [#allocation1], 512  }
  0x8d   :  { %102 = vsyncadd [#allocation1], 4294966784 }
  0x8e   :  { %71 = vsyncpa [#allocation1], 1 }

// kernel: _lambda_.1
= control target key start
LH: loop header
LB: loop body
LE: loop exit
PB: predicated region body
PF: predicated region fallthrough
CT: control target
= control target key end

     0   :  { %s10923_s17 = smov 0   ;;  %s14065_s0 = inlined_call_operand.vmem [shape: bf16[2,256,27], index: 0, kind: input, shape index: {}]   ;;  %s14066_s1 = inlined_call_operand.vmem [shape: bf16[256,256], index: 1, kind: input, shape index: {}]   ;;  %s14067_s2 = inlined_call_operand.vmem [shape: bf16[256,256], index: 2, kind: input, shape index: {}]   ;;  %s14068_s3 = inlined_call_operand.vmem [shape: bf16[27,64], index: 3, kind: input, shape index: {}]   ;;  %s14069_s4 = inlined_call_operand.vmem [shape: f32[1,64], index: 4, kind: input, shape index: {}]   ;;  %s14070_s5 = inlined_call_operand.vmem [shape: bf16[3,3,64,128], index: 5, kind: input, shape index: {}]   ;;  %s14071_s6 = inlined_call_operand.vmem [shape: f32[1,128], index: 6, kind: input, shape index: {}]   ;;  %s14072_s7 = inlined_call_operand.vmem [shape: bf16[2,2,128,64], index: 7, kind: input, shape index: {}]   ;;  %s14073_s8 = inlined_call_operand.vmem [shape: f32[1,64], index: 8, kind: input, shape index: {}]   ;;  %s14074_s9 = inlined_call_operand.vmem [shape: bf16[3,3,64,128], index: 9, kind: input, shape index: {}]   ;;  %s14075_s10 = inlined_call_operand.vmem [shape: f32[1,128], index: 10, kind: input, shape index: {}]   ;;  %s14076_s11 = inlined_call_operand.vmem [shape: f32[2,256,128], index: 11, kind: output, shape index: {}]  }
   0x1 LB: > { %s8272_s18 = sadd.s32 4294967295, %s10859_s17   ;;  %p8276_p0 = scmp.ge.s32.totalorder %s10859_s17, 1  ;;  %s10859_s17 = sphi %s10923_s17, %s21_s17  }
   0x2   : > { %p337_p1 = scmp.lt.s32.totalorder %s10859_s17, 3 }
   0x4   : > { %p338_p2 = pnand %p8276_p0, %p337_p1 }
   0x6   : > { %341 = sbr.rel (%p338_p2) target bundleno = 2316 (0x90c), region = 64 }
   0xb   : > { %v10507_v0 = vld [vmem:[%s14068_s3 + $0x8] sm:$0x3f]   ;;  %vm627_vm0 = vcmask 1044480   ;;  %vm628_vm1 = vcmask 1045504   ;;  %v10861_v1 = vmov 65535   ;;  %v10508_v3 = vld [vmem:[%s14068_s3] sm:$0xff]  }
   0xc   : > { %v629_v2 = vsel %vm627_vm0, 4294967295, %v10861_v1  ;;  %p377_p3 = scmp.lt.s32.totalorder %s8272_s18, 1  ;;  %vm388_vm2 = vcmask 523264   ;;  %v10862_v6 = vmov 0.0   ;;  %vm578_vm3 = vcmask 220160   ;;  %v10525_v23 = vld [vmem:[%s14070_s5 + $0x38] sm:$0xff]  }
   0xd   : > { %v630_v4 = vsel %vm628_vm1, %v629_v2, 0  ;;  %396 = vst.msk [vmem:[#allocation2 + $0x30] sm:$0xff] %vm388_vm2, %v10862_v6  ;;  %397 = vst.msk [vmem:[#allocation2 + $0x38] sm:$0xff] %vm388_vm2, %v10862_v6  ;;  %10489 = vmatprep.subr.bf16.mxu1 %v10525_v23  ;;  %vm391_vm4 = vcmask 517120   ;;  %v10526_v24 = vld [vmem:[%s14070_s5 + $0x30] sm:$0xff]   ;;  %v10527_v25 = vld [vmem:[%s14070_s5 + $0x28] sm:$0xff]  }
   0xe   : > { %v632_v5 = vand.u32 %v10507_v0, %v630_v4  ;;  %s14340_s18 = smov (!%p377_p3, %s8272_s18), 1  ;;  %389 = vst.msk [vmem:[#allocation2] sm:$0xff] %vm388_vm2, %v10862_v6  ;;  %390 = vst.msk [vmem:[#allocation2 + $0x8] sm:$0xff] %vm388_vm2, %v10862_v6  ;;  %10493 = vmatpush3.bf16.msra.mxu1 %v10525_v23  ;;  %v10528_v26 = vld [vmem:[%s14070_s5 + $0x20] sm:$0xff]   ;;  %v10529_v30 = vld [vmem:[%s14070_s5 + $0x18] sm:$0xff]  }
   0xf   : > { %393 = vst.msk [vmem:[#allocation2 + $0x18] sm:$0xff] %vm388_vm2, %v10862_v6  ;;  %394 = vst.msk [vmem:[#allocation2 + $0x20] sm:$0xff] %vm388_vm2, %v10862_v6  ;;  %s8985_s23 = sshll.u32 %s14340_s18, 7  ;;  %10490 = vmatprep.subr.bf16.mxu1 %v10526_v24  ;;  %v11104_v31 = vld [vmem:[%s14070_s5 + $0x58] sm:$0xff]   ;;  %v11110_v32 = vld [vmem:[%s14069_s4] ss:$0 sm:$0xff] }
  0x10   : > { %399 = vst.msk [vmem:[#allocation2 + $0x48] sm:$0xff] %vm388_vm2, %v10862_v6  ;;  %400 = vst.msk [vmem:[#allocation2 + $0x50] sm:$0xff] %vm388_vm2, %v10862_v6  ;;  %9637 = vmatprep.subr.bf16.mxu0 %v632_v5  ;;  %s11015_s26 = scalar_lea.vmem %s14065_s0, %s8985_s23  ;;  %s8986_s12 = sshll.u32 %s14340_s18, 8 }
  0x11   : > { %402 = vst.msk [vmem:[#allocation2 + $0x60] sm:$0xff] %vm388_vm2, %v10862_v6  ;;  %403 = vst.msk [vmem:[#allocation2 + $0x68] sm:$0xff] %vm388_vm2, %v10862_v6  ;;  %9638 = vmatpush3.bf16.msra.mxu0 %v632_v5  ;;  %v10509_v7 = vld [vmem:[%s11015_s26] sm:$0xff]   ;;  %v10510_v8 = vld [vmem:[%s11015_s26 + $0x8] sm:$0xff]   ;;  %s13967_s14 = scalar_lea.vmem %s14076_s11, %s8986_s12 }
  0x12   : > { %405 = vst.msk [vmem:[#allocation2 + $0x78] sm:$0xff] %vm388_vm2, %v10862_v6  ;;  %406 = vst.msk [vmem:[#allocation2 + $0x80] sm:$0xff] %vm388_vm2, %v10862_v6  ;;  %9639 = vmatprep.subr.bf16.mxu0 %v10508_v3  ;;  %9641 = vmatprep.mubr.msk.bf16.mxu0 %vm578_vm3, %v10509_v7  ;;  %v10511_v9 = vld [vmem:[%s11015_s26 + $0x10] sm:$0xff]   ;;  %v10512_v10 = vld [vmem:[%s11015_s26 + $0x18] sm:$0xff]  }
  0x13   : > { %408 = vst.msk [vmem:[#allocation2 + $0x90] sm:$0xff] %vm388_vm2, %v10862_v6  ;;  %409 = vst.msk [vmem:[#allocation2 + $0x98] sm:$0xff] %vm388_vm2, %v10862_v6  ;;  %v10513_v11 = vld [vmem:[%s11015_s26 + $0x20] sm:$0xff]   ;;  %v10514_v12 = vld [vmem:[%s11015_s26 + $0x28] sm:$0xff]   ;;  %10494 = vmatpush3.bf16.msra.mxu1 %v10526_v24 }
  0x14   : > { %411 = vst.msk [vmem:[#allocation2 + $0xa8] sm:$0xff] %vm388_vm2, %v10862_v6  ;;  %412 = vst.msk [vmem:[#allocation2 + $0xb0] sm:$0xff] %vm388_vm2, %v10862_v6  ;;  %v10515_v13 = vld [vmem:[%s11015_s26 + $0x30] sm:$0xff]   ;;  %v10516_v14 = vld [vmem:[%s11015_s26 + $0x38] sm:$0xff]   ;;  %10491 = vmatprep.subr.bf16.mxu1 %v10527_v25 }
  0x15   : > { %414 = vst.msk [vmem:[#allocation2 + $0xc0] sm:$0xff] %vm388_vm2, %v10862_v6  ;;  %415 = vst.msk [vmem:[#allocation2 + $0xc8] sm:$0xff] %vm388_vm2, %v10862_v6  ;;  %9640 = vmatpush3.bf16.msra.mxu0 %v10508_v3  ;;  %v10517_v15 = vld [vmem:[%s11015_s26 + $0x40] sm:$0xff]   ;;  %v10518_v16 = vld [vmem:[%s11015_s26 + $0x48] sm:$0xff]  }
  0x16   : > { %417 = vst.msk [vmem:[#allocation2 + $0xd8] sm:$0xff] %vm388_vm2, %v10862_v6  ;;  %418 = vst.msk [vmem:[#allocation2 + $0xe0] sm:$0xff] %vm388_vm2, %v10862_v6  ;;  %v10519_v17 = vld [vmem:[%s11015_s26 + $0x50] sm:$0xff]   ;;  %v10520_v18 = vld [vmem:[%s11015_s26 + $0x58] sm:$0xff]   ;;  %9673 = vmatprep.subr.bf16.mxu0 %v10525_v23 }
  0x17   : > { %420 = vst.msk [vmem:[#allocation2 + $0xf0] sm:$0xff] %vm388_vm2, %v10862_v6  ;;  %421 = vst.msk [vmem:[#allocation2 + $0xf8] sm:$0xff] %vm388_vm2, %v10862_v6  ;;  %v10521_v19 = vld [vmem:[%s11015_s26 + $0x60] sm:$0xff]   ;;  %v10522_v20 = vld [vmem:[%s11015_s26 + $0x68] sm:$0xff]   ;;  %10495 = vmatpush3.bf16.msra.mxu1 %v10527_v25 }
  0x18   : > { %423 = vst.msk [vmem:[#allocation2 + $0x108] sm:$0xff] %vm388_vm2, %v10862_v6  ;;  %424 = vst.msk [vmem:[#allocation2 + $0x110] sm:$0xff] %vm388_vm2, %v10862_v6  ;;  %9642 = vmatmul.mubr.msk.bf16.vlgmr.msra.gmra.mxu0 %vm578_vm3, %v10510_v8  ;;  %v10523_v21 = vld [vmem:[%s11015_s26 + $0x70] sm:$0xff]   ;;  %v10524_v22 = vld [vmem:[%s11015_s26 + $0x78] sm:$0xff]   ;;  %10492 = vmatprep.subr.bf16.mxu1 %v10528_v26 }
  0x19   : > { %426 = vst.msk [vmem:[#allocation2 + $0x120] sm:$0xff] %vm388_vm2, %v10862_v6  ;;  %427 = vst.msk [vmem:[#allocation2 + $0x128] sm:$0xff] %vm388_vm2, %v10862_v6  ;;  %9645 = vmatprep.mubr.msk.bf16.mxu0 %vm578_vm3, %v10511_v9  ;;  %9674 = vmatpush3.bf16.msra.mxu0 %v10525_v23  ;;  %v916_v27 = vld [vmem:[#allocation2 + $0x1] sm:$0xff]  ;;  %v10530_v3 = vld [vmem:[%s14070_s5 + $0x10] sm:$0xff]  }
  0x1a   : > { %429 = vst.msk [vmem:[#allocation2 + $0x138] sm:$0xff] %vm388_vm2, %v10862_v6  ;;  %430 = vst.msk [vmem:[#allocation2 + $0x140] sm:$0xff] %vm388_vm2, %v10862_v6  ;;  %9675 = vmatprep.subr.bf16.mxu0 %v10526_v24  ;;  %v10532_v23 = vld [vmem:[%s14070_s5] sm:$0xff]  }
  0x1b   : > { %432 = vst.msk [vmem:[#allocation2 + $0x150] sm:$0xff] %vm388_vm2, %v10862_v6  ;;  %433 = vst.msk [vmem:[#allocation2 + $0x158] sm:$0xff] %vm388_vm2, %v10862_v6  ;;  %10496 = vmatpush3.bf16.msra.mxu1 %v10528_v26 }
  0x1c   : > { %435 = vst.msk [vmem:[#allocation2 + $0x168] sm:$0xff] %vm388_vm2, %v10862_v6  ;;  %436 = vst.msk [vmem:[#allocation2 + $0x170] sm:$0xff] %vm388_vm2, %v10862_v6  ;;  %9753 = vmatprep.subr.bf16.mxu1 %v11104_v31 }
  0x1d   : > { %438 = vst.msk [vmem:[#allocation2 + $0x180] sm:$0xff] %vm388_vm2, %v10862_v6  ;;  %439 = vst.msk [vmem:[#allocation2 + $0x188] sm:$0xff] %vm388_vm2, %v10862_v6  ;;  %9676 = vmatpush3.bf16.msra.mxu0 %v10526_v24 }
  0x1e   : > { %441 = vst.msk [vmem:[#allocation2 + $0x198] sm:$0xff] %vm388_vm2, %v10862_v6  ;;  %442 = vst.msk [vmem:[#allocation2 + $0x1a0] sm:$0xff] %vm388_vm2, %v10862_v6  ;;  %9677 = vmatprep.subr.bf16.mxu0 %v10527_v25 }
  0x1f   : > { %398 = vst.msk [vmem:[#allocation2 + $0x40] sm:$0x3] %vm391_vm4, %v10862_v6  ;;  %392 = vst.msk [vmem:[#allocation2 + $0x10] sm:$0x3] %vm391_vm4, %v10862_v6 }
  0x20   : > { %9646 = vmatmul.mubr.msk.bf16.gmra.mxu0 %vm578_vm3, %v10512_v10  ;;  %395 = vst.msk [vmem:[#allocation2 + $0x28] sm:$0x3] %vm391_vm4, %v10862_v6  ;;  %401 = vst.msk [vmem:[#allocation2 + $0x58] sm:$0x3] %vm391_vm4, %v10862_v6 }
  0x21   : > { %9649 = vmatprep.mubr.msk.bf16.mxu0 %vm578_vm3, %v10513_v11  ;;  %404 = vst.msk [vmem:[#allocation2 + $0x70] sm:$0x3] %vm391_vm4, %v10862_v6  ;;  %407 = vst.msk [vmem:[#allocation2 + $0x88] sm:$0x3] %vm391_vm4, %v10862_v6  ;;  %9678 = vmatpush3.bf16.msra.mxu0 %v10527_v25  ;;  %v10531_v11 = vld [vmem:[%s14070_s5 + $0x8] sm:$0xff]  }
  0x22   : > { %410 = vst.msk [vmem:[#allocation2 + $0xa0] sm:$0x3] %vm391_vm4, %v10862_v6  ;;  %413 = vst.msk [vmem:[#allocation2 + $0xb8] sm:$0x3] %vm391_vm4, %v10862_v6  ;;  %9679 = vmatprep.subr.bf16.mxu0 %v10528_v26 }
  0x23   : > { %416 = vst.msk [vmem:[#allocation2 + $0xd0] sm:$0x3] %vm391_vm4, %v10862_v6  ;;  %419 = vst.msk [vmem:[#allocation2 + $0xe8] sm:$0x3] %vm391_vm4, %v10862_v6 }
  0x24   : > { %422 = vst.msk [vmem:[#allocation2 + $0x100] sm:$0x3] %vm391_vm4, %v10862_v6  ;;  %425 = vst.msk [vmem:[#allocation2 + $0x118] sm:$0x3] %vm391_vm4, %v10862_v6 }
  0x25   : > { %428 = vst.msk [vmem:[#allocation2 + $0x130] sm:$0x3] %vm391_vm4, %v10862_v6  ;;  %431 = vst.msk [vmem:[#allocation2 + $0x148] sm:$0x3] %vm391_vm4, %v10862_v6  ;;  %9680 = vmatpush3.bf16.msra.mxu0 %v10528_v26 }
  0x26   : > { %434 = vst.msk [vmem:[#allocation2 + $0x160] sm:$0x3] %vm391_vm4, %v10862_v6  ;;  %437 = vst.msk [vmem:[#allocation2 + $0x178] sm:$0x3] %vm391_vm4, %v10862_v6  ;;  %v917_v28 = vld [vmem:[#allocation2 + $0x9] sm:$0xff]  ;;  %9713 = vmatprep.subr.bf16.mxu0 %v10529_v30 }
  0x27   : > { %440 = vst.msk [vmem:[#allocation2 + $0x190] sm:$0x3] %vm391_vm4, %v10862_v6  ;;  %443 = vst.msk [vmem:[#allocation2 + $0x1a8] sm:$0x3] %vm391_vm4, %v10862_v6  ;;  %v948_v29 = vpack.c.bf16 %v917_v28, %v916_v27 }
  0x28   : > { %9650 = vmatmul.mubr.msk.bf16.gmra.mxu0 %vm578_vm3, %v10514_v12 }
  0x29   : > { %9653 = vmatprep.mubr.msk.bf16.mxu0 %vm578_vm3, %v10515_v13 }
  0x30   : > { %9654 = vmatmul.mubr.msk.bf16.gmra.mxu0 %vm578_vm3, %v10516_v14 }
  0x31   : > { %9657 = vmatprep.mubr.msk.bf16.mxu0 %vm578_vm3, %v10517_v15 }
  0x38   : > { %9658 = vmatmul.mubr.msk.bf16.gmra.mxu0 %vm578_vm3, %v10518_v16 }
  0x39   : > { %9661 = vmatprep.mubr.msk.bf16.mxu0 %vm578_vm3, %v10519_v17 }
  0x40   : > { %9662 = vmatmul.mubr.msk.bf16.gmra.mxu0 %vm578_vm3, %v10520_v18 }
  0x41   : > { %9665 = vmatprep.mubr.msk.bf16.mxu0 %vm578_vm3, %v10521_v19 }
  0x48   : > { %9666 = vmatmul.mubr.msk.bf16.gmra.mxu0 %vm578_vm3, %v10522_v20 }
  0x49   : > { %9669 = vmatprep.mubr.msk.bf16.mxu0 %vm578_vm3, %v10523_v21 }
  0x50   : > { %9670 = vmatmul.mubr.msk.bf16.gmra.mxu0 %vm578_vm3, %v10524_v22 }
  0x51   : > { %9681 = vmatprep.mubr.msk.bf16.mxu0 %vm388_vm2, %v948_v29 }
  0xd8   : > { %v9643_v33 = vpop.f32.mrf.mxu0 }
  0xd9   : > { %v677_v34 = vadd.f32 %v9643_v33, %v11110_v32  ;;  %v860_v33 = vld [vmem:[#allocation2] sm:$0xff] }
  0xda   : > { %v668_v35 = vpop.f32.mrf.mxu0 }
  0xdb   : > { %v797_v36 = vmax.f32 %v677_v34, 0.0  ;;  %v669_v37 = vadd.f32 %v11110_v32, %v668_v35  ;;  %v861_v34 = vld [vmem:[#allocation2 + $0x8] sm:$0xff]  ;;  %v11170_v35 = vld [vmem:[%s14070_s5 + $0x78] sm:$0xff]  }
  0xdc   : > { %v9644_v38 = vpop.f32.mrf.mxu0 }
  0xdd   : > { %830 = vst.msk [vmem:[#allocation2 + $0x31] sm:$0xff] %vm388_vm2, %v797_v36  ;;  %v795_v39 = vmax.f32 %v669_v37, 0.0  ;;  %v680_v40 = vadd.f32 %v9644_v38, %v11110_v32 }
  0xde   : > { %v671_v41 = vpop.f32.mrf.mxu0 }
  0xdf   : > { %828 = vst.msk [vmem:[#allocation2 + $0x19] sm:$0xff] %vm388_vm2, %v795_v39  ;;  %v798_v42 = vmax.f32 %v680_v40, 0.0  ;;  %v672_v43 = vadd.f32 %v11110_v32, %v671_v41 }
  0xe0   : > { %v9647_v44 = vpop.f32.mrf.mxu0 }
  0xe1   : > { %831 = vst.msk [vmem:[#allocation2 + $0x39] sm:$0xff] %vm388_vm2, %v798_v42  ;;  %v796_v45 = vmax.f32 %v672_v43, 0.0  ;;  %v693_v46 = vadd.f32 %v9647_v44, %v11110_v32 }
  0xe2   : > { %v684_v47 = vpop.f32.mrf.mxu0 }
  0xe3   : > { %829 = vst.msk [vmem:[#allocation2 + $0x21] sm:$0xff] %vm388_vm2, %v796_v45  ;;  %v801_v48 = vmax.f32 %v693_v46, 0.0  ;;  %v685_v49 = vadd.f32 %v11110_v32, %v684_v47  ;;  %v892_v45 = vpack.c.bf16 %v861_v34, %v860_v33 }
  0xe4   : > { %v9648_v50 = vpop.f32.mrf.mxu0  ;;  %v920_v2 = vld [vmem:[#allocation2 + $0x31] sm:$0xff] }
  0xe5   : > { %834 = vst.msk [vmem:[#allocation2 + $0x61] sm:$0xff] %vm388_vm2, %v801_v48  ;;  %v799_v51 = vmax.f32 %v685_v49, 0.0  ;;  %v696_v52 = vadd.f32 %v9648_v50, %v11110_v32 }
  0xe6   : > { %v687_v53 = vpop.f32.mrf.mxu0  ;;  %v918_v61 = vld [vmem:[#allocation2 + $0x19] sm:$0xff] }
  0xe7   : > { %832 = vst.msk [vmem:[#allocation2 + $0x49] sm:$0xff] %vm388_vm2, %v799_v51  ;;  %v802_v54 = vmax.f32 %v696_v52, 0.0  ;;  %v688_v55 = vadd.f32 %v11110_v32, %v687_v53 }
  0xe8   : > { %v9651_v56 = vpop.f32.mrf.mxu0  ;;  %v921_v59 = vld [vmem:[#allocation2 + $0x39] sm:$0xff] }
  0xe9   : > { %835 = vst.msk [vmem:[#allocation2 + $0x69] sm:$0xff] %vm388_vm2, %v802_v54  ;;  %v800_v57 = vmax.f32 %v688_v55, 0.0  ;;  %v709_v58 = vadd.f32 %v9651_v56, %v11110_v32  ;;  %v11135_v5 = vpack.c.bf16 %v921_v59, %v920_v2 }
  0xea   : > { %v700_v60 = vpop.f32.mrf.mxu0  ;;  %v919_v62 = vld [vmem:[#allocation2 + $0x21] sm:$0xff] }
  0xeb   : > { %833 = vst.msk [vmem:[#allocation2 + $0x51] sm:$0xff] %vm388_vm2, %v800_v57  ;;  %v805_v63 = vmax.f32 %v709_v58, 0.0  ;;  %v701_v0 = vadd.f32 %v11110_v32, %v700_v60  ;;  %v11130_v1 = vpack.c.bf16 %v919_v62, %v918_v61  ;;  %v863_v56 = vld [vmem:[#allocation2 + $0x20] sm:$0xff]  ;;  %v865_v60 = vld [vmem:[#allocation2 + $0x38] sm:$0xff] }
  0xec   : > { %v9652_v4 = vpop.f32.mrf.mxu0  ;;  %v924_v22 = vld [vmem:[#allocation2 + $0x61] sm:$0xff] }
  0xed   : > { %838 = vst.msk [vmem:[#allocation2 + $0x91] sm:$0xff] %vm388_vm2, %v805_v63  ;;  %v803_v6 = vmax.f32 %v701_v0, 0.0  ;;  %v712_v7 = vadd.f32 %v9652_v4, %v11110_v32  ;;  %9682 = vmatmul.mubr.msk.bf16.vlgmr.msra.gmra.mxu0 %vm388_vm2, %v11130_v1  ;;  %v862_v0 = vld [vmem:[#allocation2 + $0x18] sm:$0xff] }
  0xee   : > { %v703_v8 = vpop.f32.mrf.mxu0  ;;  %9685 = vmatprep.mubr.msk.bf16.mxu0 %vm388_vm2, %v11135_v5  ;;  %9714 = vmatpush3.bf16.msra.mxu0 %v10529_v30  ;;  %v922_v17 = vld [vmem:[#allocation2 + $0x49] sm:$0xff] }
  0xef   : > { %836 = vst.msk [vmem:[#allocation2 + $0x79] sm:$0xff] %vm388_vm2, %v803_v6  ;;  %v806_v9 = vmax.f32 %v712_v7, 0.0  ;;  %v704_v10 = vadd.f32 %v11110_v32, %v703_v8  ;;  %9715 = vmatprep.subr.bf16.mxu0 %v10530_v3  ;;  %v11196_v6 = vpack.c.bf16 %v863_v56, %v862_v0  ;;  %v864_v8 = vld [vmem:[#allocation2 + $0x30] sm:$0xff]  ;;  %v866_v33 = vld [vmem:[#allocation2 + $0x48] sm:$0xff] }
  0xf0   : > { %v9655_v12 = vpop.f32.mrf.mxu0  ;;  %v925_v15 = vld [vmem:[#allocation2 + $0x69] sm:$0xff] }
  0xf1   : > { %839 = vst.msk [vmem:[#allocation2 + $0x99] sm:$0xff] %vm388_vm2, %v806_v9  ;;  %v804_v13 = vmax.f32 %v704_v10, 0.0  ;;  %v725_v14 = vadd.f32 %v9655_v12, %v11110_v32  ;;  %v11157_v25 = vpack.c.bf16 %v925_v15, %v924_v22  ;;  %v10534_v12 = vld [vmem:[%s14070_s5 + $0x50] sm:$0xff]   ;;  %v10535_v22 = vld [vmem:[%s14070_s5 + $0x48] sm:$0xff]  }
  0xf2   : > { %v716_v16 = vpop.f32.mrf.mxu0  ;;  %v923_v18 = vld [vmem:[#allocation2 + $0x51] sm:$0xff]  ;;  %9716 = vmatpush3.bf16.msra.mxu0 %v10530_v3 }
  0xf3   : > { %837 = vst.msk [vmem:[#allocation2 + $0x81] sm:$0xff] %vm388_vm2, %v804_v13  ;;  %v809_v19 = vmax.f32 %v725_v14, 0.0  ;;  %v717_v20 = vadd.f32 %v11110_v32, %v716_v16  ;;  %v11152_v21 = vpack.c.bf16 %v923_v18, %v922_v17  ;;  %9717 = vmatprep.subr.bf16.mxu0 %v10531_v11  ;;  %v10538_v13 = vld [vmem:[%s14070_s5 + $0x70] sm:$0xff]  }
  0xf4   : > { %v9656_v24 = vpop.f32.mrf.mxu0  ;;  %v928_v37 = vld [vmem:[#allocation2 + $0x91] sm:$0xff] }
  0xf5   : > { %842 = vst.msk [vmem:[#allocation2 + $0xc1] sm:$0xff] %vm388_vm2, %v809_v19  ;;  %v807_v26 = vmax.f32 %v717_v20, 0.0  ;;  %v728_v27 = vadd.f32 %v9656_v24, %v11110_v32  ;;  %9686 = vmatmul.mubr.msk.bf16.gmra.mxu0 %vm388_vm2, %v11152_v21  ;;  %v867_v20 = vld [vmem:[#allocation2 + $0x50] sm:$0xff] }
  0xf6   : > { %v719_v28 = vpop.f32.mrf.mxu0  ;;  %9689 = vmatprep.mubr.msk.bf16.mxu0 %vm388_vm2, %v11157_v25  ;;  %9718 = vmatpush3.bf16.msra.mxu0 %v10531_v11  ;;  %v926_v43 = vld [vmem:[#allocation2 + $0x79] sm:$0xff]  ;;  %v11200_v11 = vpack.c.bf16 %v865_v60, %v864_v8 }
  0xf7   : > { %840 = vst.msk [vmem:[#allocation2 + $0xa9] sm:$0xff] %vm388_vm2, %v807_v26  ;;  %v810_v29 = vmax.f32 %v728_v27, 0.0  ;;  %v720_v30 = vadd.f32 %v11110_v32, %v719_v28  ;;  %9719 = vmatprep.subr.bf16.mxu0 %v10532_v23  ;;  %v869_v27 = vld [vmem:[#allocation2 + $0x68] sm:$0xff] }
  0xf8   : > { %v9659_v36 = vpop.f32.mrf.mxu0  ;;  %v929_v38 = vld [vmem:[#allocation2 + $0x99] sm:$0xff] }
  0xf9   : > { %843 = vst.msk [vmem:[#allocation2 + $0xc9] sm:$0xff] %vm388_vm2, %v810_v29  ;;  %v808_v39 = vmax.f32 %v720_v30, 0.0  ;;  %v741_v40 = vadd.f32 %v9659_v36, %v11110_v32  ;;  %v11174_v41 = vpack.c.bf16 %v929_v38, %v928_v37  ;;  %v11234_v37 = vpack.c.bf16 %v867_v20, %v866_v33 }
  0xfa   : > { %v732_v42 = vpop.f32.mrf.mxu0  ;;  %v927_v44 = vld [vmem:[#allocation2 + $0x81] sm:$0xff]  ;;  %9720 = vmatpush3.bf16.msra.mxu0 %v10532_v23 }
  0xfb   : > { %841 = vst.msk [vmem:[#allocation2 + $0xb1] sm:$0xff] %vm388_vm2, %v808_v39  ;;  %v813_v46 = vmax.f32 %v741_v40, 0.0  ;;  %v733_v47 = vadd.f32 %v11110_v32, %v732_v42  ;;  %9693 = vmatprep.mubr.msk.bf16.mxu1 %vm388_vm2, %v11174_v41  ;;  %v11180_v48 = vpack.c.bf16 %v927_v44, %v926_v43  ;;  %9793 = vmatprep.subr.bf16.mxu0 %v11170_v35  ;;  %v10539_v23 = vld [vmem:[%s14070_s5 + $0x68] sm:$0xff]   ;;  %v868_v39 = vld [vmem:[#allocation2 + $0x60] sm:$0xff] }
  0xfc   : > { %v9660_v49 = vpop.f32.mrf.mxu0  ;;  %v932_v7 = vld [vmem:[#allocation2 + $0xc1] sm:$0xff]  ;;  %v11238_v43 = vpack.c.bf16 %v869_v27, %v868_v39 }
  0xfd   : > { %846 = vst.msk [vmem:[#allocation2 + $0xf1] sm:$0xff] %vm388_vm2, %v813_v46  ;;  %v811_v50 = vmax.f32 %v733_v47, 0.0  ;;  %v744_v51 = vadd.f32 %v9660_v49, %v11110_v32  ;;  %9690 = vmatmul.mubr.msk.bf16.gmra.mxu0 %vm388_vm2, %v11180_v48  ;;  %v10536_v44 = vld [vmem:[%s14070_s5 + $0x40] sm:$0xff]  }
  0xfe   : > { %v735_v52 = vpop.f32.mrf.mxu0  ;;  %9721 = vmatprep.mubr.msk.bf16.mxu0 %vm388_vm2, %v892_v45  ;;  %v930_v62 = vld [vmem:[#allocation2 + $0xa9] sm:$0xff]  ;;  %v10540_v45 = vld [vmem:[%s14070_s5 + $0x60] sm:$0xff]  }
  0xff   : > { %844 = vst.msk [vmem:[#allocation2 + $0xd9] sm:$0xff] %vm388_vm2, %v811_v50  ;;  %v814_v53 = vmax.f32 %v744_v51, 0.0  ;;  %v736_v54 = vadd.f32 %v11110_v32, %v735_v52  ;;  %v874_v27 = vld [vmem:[#allocation2 + $0xa8] sm:$0xff]  ;;  %v876_v33 = vld [vmem:[#allocation2 + $0xc0] sm:$0xff] }
 0x100   : > { %v9663_v55 = vpop.f32.mrf.mxu0  ;;  %v933_v59 = vld [vmem:[#allocation2 + $0xc9] sm:$0xff] }
 0x101   : > { %847 = vst.msk [vmem:[#allocation2 + $0xf9] sm:$0xff] %vm388_vm2, %v814_v53  ;;  %v812_v57 = vmax.f32 %v736_v54, 0.0  ;;  %v757_v58 = vadd.f32 %v9663_v55, %v11110_v32  ;;  %v11198_v10 = vpack.c.bf16 %v933_v59, %v932_v7  ;;  %v871_v53 = vld [vmem:[#allocation2 + $0x80] sm:$0xff]  ;;  %v11261_v54 = vld [vmem:[%s14070_s5 + $0x98] sm:$0xff]  }
 0x102   : > { %v748_v61 = vpop.f32.mrf.mxu0  ;;  %v931_v63 = vld [vmem:[#allocation2 + $0xb1] sm:$0xff] }
 0x103   : > { %845 = vst.msk [vmem:[#allocation2 + $0xe1] sm:$0xff] %vm388_vm2, %v812_v57  ;;  %v817_v2 = vmax.f32 %v757_v58, 0.0  ;;  %v749_v3 = vadd.f32 %v11110_v32, %v748_v61  ;;  %v11194_v4 = vpack.c.bf16 %v931_v63, %v930_v62  ;;  %v11266_v55 = vld [vmem:[%s14070_s5 + $0xb8] sm:$0xff]   ;;  %v875_v20 = vld [vmem:[#allocation2 + $0xb0] sm:$0xff] }
 0x104   : > { %v9664_v9 = vpop.f32.mrf.mxu0  ;;  %v936_v38 = vld [vmem:[#allocation2 + $0xf1] sm:$0xff] }
 0x105   : > { %850 = vst.msk [vmem:[#allocation2 + $0x121] sm:$0xff] %vm388_vm2, %v817_v2  ;;  %v815_v14 = vmax.f32 %v749_v3, 0.0  ;;  %v760_v15 = vadd.f32 %v9664_v9, %v11110_v32  ;;  %9694 = vmatmul.mubr.msk.bf16.vlgmr.msra.gmra.mxu1 %vm388_vm2, %v11194_v4  ;;  %9722 = vmatmul.mubr.msk.bf16.vlgmr.msra.gmra.mxu0 %vm388_vm2, %v11196_v6  ;;  %v873_v59 = vld [vmem:[#allocation2 + $0x98] sm:$0xff]  ;;  %v872_v9 = vld [vmem:[#allocation2 + $0x90] sm:$0xff] }
 0x106   : > { %v751_v16 = vpop.f32.mrf.mxu0  ;;  %9697 = vmatprep.mubr.msk.bf16.mxu1 %vm388_vm2, %v11198_v10  ;;  %9725 = vmatprep.mubr.msk.bf16.mxu0 %vm388_vm2, %v11200_v11  ;;  %v934_v29 = vld [vmem:[#allocation2 + $0xd9] sm:$0xff] }
 0x107   : > { %848 = vst.msk [vmem:[#allocation2 + $0x109] sm:$0xff] %vm388_vm2, %v815_v14  ;;  %v818_v17 = vmax.f32 %v760_v15, 0.0  ;;  %v752_v18 = vadd.f32 %v11110_v32, %v751_v16  ;;  %9754 = vmatpush3.bf16.msra.mxu1 %v11104_v31  ;;  %9794 = vmatpush3.bf16.msra.mxu0 %v11170_v35  ;;  %v870_v63 = vld [vmem:[#allocation2 + $0x78] sm:$0xff]  ;;  %v11278_v14 = vpack.c.bf16 %v873_v59, %v872_v9  ;;  %v10542_v9 = vld [vmem:[%s14070_s5 + $0x90] sm:$0xff]  }
 0x108   : > { %v9667_v19 = vpop.f32.mrf.mxu0  ;;  %9755 = vmatprep.subr.bf16.mxu1 %v10534_v12  ;;  %9795 = vmatprep.subr.bf16.mxu0 %v10538_v13  ;;  %v937_v31 = vld [vmem:[#allocation2 + $0xf9] sm:$0xff]  ;;  %v11274_v7 = vpack.c.bf16 %v871_v53, %v870_v63 }
 0x109   : > { %851 = vst.msk [vmem:[#allocation2 + $0x129] sm:$0xff] %vm388_vm2, %v818_v17  ;;  %v816_v24 = vmax.f32 %v752_v18, 0.0  ;;  %v773_v26 = vadd.f32 %v9667_v19, %v11110_v32  ;;  %v11236_v42 = vpack.c.bf16 %v937_v31, %v936_v38  ;;  %v1440_v38 = vld [vmem:[#allocation2 + $0xa] sm:$0xff]  ;;  %v1443_v59 = vld [vmem:[#allocation2 + $0x32] sm:$0xff] }
 0x10a   : > { %v764_v28 = vpop.f32.mrf.mxu0  ;;  %v935_v30 = vld [vmem:[#allocation2 + $0xe1] sm:$0xff] }
 0x10b   : > { %849 = vst.msk [vmem:[#allocation2 + $0x111] sm:$0xff] %vm388_vm2, %v816_v24  ;;  %v821_v34 = vmax.f32 %v773_v26, 0.0  ;;  %v765_v35 = vadd.f32 %v11110_v32, %v764_v28  ;;  %v11232_v36 = vpack.c.bf16 %v935_v30, %v934_v29  ;;  %9756 = vmatpush3.bf16.msra.mxu1 %v10534_v12  ;;  %9796 = vmatpush3.bf16.msra.mxu0 %v10538_v13  ;;  %v877_v24 = vld [vmem:[#allocation2 + $0xc8] sm:$0xff]  ;;  %v879_v39 = vld [vmem:[#allocation2 + $0xe0] sm:$0xff] }
 0x10c   : > { %v9668_v40 = vpop.f32.mrf.mxu0  ;;  %9757 = vmatprep.subr.bf16.mxu1 %v10535_v22  ;;  %9797 = vmatprep.subr.bf16.mxu0 %v10539_v23  ;;  %v940_v8 = vld [vmem:[#allocation2 + $0x121] sm:$0xff]  ;;  %v11298_v29 = vpack.c.bf16 %v875_v20, %v874_v27  ;;  %v1448_v20 = vld [vmem:[#allocation2 + $0x6a] sm:$0xff] }
 0x10d   : > { %854 = vst.msk [vmem:[#allocation2 + $0x151] sm:$0xff] %vm388_vm2, %v821_v34  ;;  %v819_v46 = vmax.f32 %v765_v35, 0.0  ;;  %v776_v47 = vadd.f32 %v9668_v40, %v11110_v32  ;;  %9698 = vmatmul.mubr.msk.bf16.gmra.mxu1 %vm388_vm2, %v11232_v36  ;;  %9726 = vmatmul.mubr.msk.bf16.gmra.mxu0 %vm388_vm2, %v11234_v37  ;;  %v1439_v35 = vld [vmem:[#allocation2 + $0x2] sm:$0xff]  ;;  %v881_v40 = vld [vmem:[#allocation2 + $0xf8] sm:$0xff] }
 0x10e   : > { %v767_v49 = vpop.f32.mrf.mxu0  ;;  %9701 = vmatprep.mubr.msk.bf16.mxu1 %vm388_vm2, %v11236_v42  ;;  %9729 = vmatprep.mubr.msk.bf16.mxu0 %vm388_vm2, %v11238_v43  ;;  %v938_v61 = vld [vmem:[#allocation2 + $0x109] sm:$0xff]  ;;  %v10544_v27 = vld [vmem:[%s14070_s5 + $0x80] sm:$0xff]  }
 0x10f   : > { %852 = vst.msk [vmem:[#allocation2 + $0x139] sm:$0xff] %vm388_vm2, %v819_v46  ;;  %v822_v50 = vmax.f32 %v776_v47, 0.0  ;;  %v768_v51 = vadd.f32 %v11110_v32, %v767_v49  ;;  %9758 = vmatpush3.bf16.msra.mxu1 %v10535_v22  ;;  %9798 = vmatpush3.bf16.msra.mxu0 %v10539_v23  ;;  %v878_v46 = vld [vmem:[#allocation2 + $0xd8] sm:$0xff]  ;;  %v1471_v47 = vpack.c.bf16 %v1440_v38, %v1439_v35  ;;  %v1450_v35 = vld [vmem:[#allocation2 + $0x82] sm:$0xff] }
 0x110   : > { %v9671_v52 = vpop.f32.mrf.mxu0  ;;  %9759 = vmatprep.subr.bf16.mxu1 %v10536_v44  ;;  %9799 = vmatprep.subr.bf16.mxu0 %v10540_v45  ;;  %v941_v58 = vld [vmem:[#allocation2 + $0x129] sm:$0xff]  ;;  %v11370_v38 = vld [vmem:[%s14070_s5 + $0xd8] sm:$0xff]  }
 0x111   : > { %855 = vst.msk [vmem:[#allocation2 + $0x159] sm:$0xff] %vm388_vm2, %v822_v50  ;;  %v820_v56 = vmax.f32 %v768_v51, 0.0  ;;  %v789_v57 = vadd.f32 %v9671_v52, %v11110_v32  ;;  %v11276_v13 = vpack.c.bf16 %v941_v58, %v940_v8  ;;  %v11314_v50 = vpack.c.bf16 %v879_v39, %v878_v46  ;;  %v880_v51 = vld [vmem:[#allocation2 + $0xf0] sm:$0xff]  ;;  %v885_v58 = vld [vmem:[#allocation2 + $0x128] sm:$0xff] }
 0x112   : > { %v780_v60 = vpop.f32.mrf.mxu0  ;;  %v939_v62 = vld [vmem:[#allocation2 + $0x111] sm:$0xff]  ;;  %v11316_v52 = vpack.c.bf16 %v881_v40, %v880_v51  ;;  %v1452_v40 = vld [vmem:[#allocation2 + $0x9a] sm:$0xff] }
 0x113   : > { %853 = vst.msk [vmem:[#allocation2 + $0x141] sm:$0xff] %vm388_vm2, %v820_v56  ;;  %v825_v0 = vmax.f32 %v789_v57, 0.0  ;;  %v781_v2 = vadd.f32 %v11110_v32, %v780_v60  ;;  %v11272_v3 = vpack.c.bf16 %v939_v62, %v938_v61  ;;  %9760 = vmatpush3.bf16.msra.mxu1 %v10536_v44  ;;  %9800 = vmatpush3.bf16.msra.mxu0 %v10540_v45  ;;  %v883_v53 = vld [vmem:[#allocation2 + $0x110] sm:$0xff]  ;;  %v1441_v56 = vld [vmem:[#allocation2 + $0x1a] sm:$0xff]  ;;  %v1442_v57 = vld [vmem:[#allocation2 + $0x22] sm:$0xff] }
 0x114   : > { %v9672_v12 = vpop.f32.mrf.mxu0  ;;  %9833 = vmatprep.subr.bf16.mxu1 %v11261_v54  ;;  %9873 = vmatprep.subr.bf16.mxu0 %v11266_v55  ;;  %v944_v30 = vld [vmem:[#allocation2 + $0x151] sm:$0xff]  ;;  %v1444_v60 = vld [vmem:[#allocation2 + $0x3a] sm:$0xff]  ;;  %v882_v61 = vld [vmem:[#allocation2 + $0x108] sm:$0xff]  ;;  %v11327_v63 = vpack.c.bf16 %v1442_v57, %v1441_v56 }
 0x115   : > { %858 = vst.msk [vmem:[#allocation2 + $0x181] sm:$0xff] %vm388_vm2, %v825_v0  ;;  %v823_v15 = vmax.f32 %v781_v2, 0.0  ;;  %v792_v16 = vadd.f32 %v9672_v12, %v11110_v32  ;;  %9702 = vmatmul.mubr.msk.bf16.gmra.mxu1 %vm388_vm2, %v11272_v3  ;;  %9730 = vmatmul.mubr.msk.bf16.gmra.mxu0 %vm388_vm2, %v11274_v7  ;;  %v11325_v62 = vpack.c.bf16 %v883_v53, %v882_v61  ;;  %v884_v0 = vld [vmem:[#allocation2 + $0x120] sm:$0xff]  ;;  %v10543_v12 = vld [vmem:[%s14070_s5 + $0x88] sm:$0xff]   ;;  %v1451_v39 = vld [vmem:[#allocation2 + $0x92] sm:$0xff] }
 0x116   : > { %v783_v17 = vpop.f32.mrf.mxu0  ;;  %9705 = vmatprep.mubr.msk.bf16.mxu1 %vm388_vm2, %v11276_v13  ;;  %9733 = vmatprep.mubr.msk.bf16.mxu0 %vm388_vm2, %v11278_v14  ;;  %v942_v26 = vld [vmem:[#allocation2 + $0x139] sm:$0xff]  ;;  %v11329_v2 = vpack.c.bf16 %v885_v58, %v884_v0  ;;  %v11331_v8 = vpack.c.bf16 %v1444_v60, %v1443_v59  ;;  %v1453_v51 = vld [vmem:[#allocation2 + $0xaa] sm:$0xff]  ;;  %v1455_v56 = vld [vmem:[#allocation2 + $0xc2] sm:$0xff] }
 0x117   : > { %856 = vst.msk [vmem:[#allocation2 + $0x169] sm:$0xff] %vm388_vm2, %v823_v15  ;;  %v826_v18 = vmax.f32 %v792_v16, 0.0  ;;  %v784_v19 = vadd.f32 %v11110_v32, %v783_v17  ;;  %v11302_v32 = vpack.c.bf16 %v877_v24, %v876_v33  ;;  %v1445_v16 = vld [vmem:[#allocation2 + $0x4a] sm:$0xff]  ;;  %v1446_v17 = vld [vmem:[#allocation2 + $0x52] sm:$0xff]  ;;  %v1458_v61 = vld [vmem:[#allocation2 + $0xe2] sm:$0xff] }
 0x118   : > { %v945_v23 = vld [vmem:[#allocation2 + $0x159] sm:$0xff]  ;;  %v11350_v24 = vpack.c.bf16 %v1446_v17, %v1445_v16  ;;  %v1456_v57 = vld [vmem:[#allocation2 + $0xca] sm:$0xff] }
 0x119   : > { %859 = vst.msk [vmem:[#allocation2 + $0x189] sm:$0xff] %vm388_vm2, %v826_v18  ;;  %v824_v22 = vmax.f32 %v784_v19, 0.0  ;;  %v11300_v34 = vpack.c.bf16 %v945_v23, %v944_v30  ;;  %v889_v18 = vld [vmem:[#allocation2 + $0x158] sm:$0xff]  ;;  %v1447_v19 = vld [vmem:[#allocation2 + $0x62] sm:$0xff]  ;;  %v11389_v59 = vpack.c.bf16 %v1456_v57, %v1455_v56  ;;  %v10546_v60 = vld [vmem:[%s14070_s5 + $0xb0] sm:$0xff]  }
 0x11a   : > { %v943_v31 = vld [vmem:[#allocation2 + $0x141] sm:$0xff]  ;;  %v1454_v53 = vld [vmem:[#allocation2 + $0xb2] sm:$0xff] }
 0x11b   : > { %857 = vst.msk [vmem:[#allocation2 + $0x171] sm:$0xff] %vm388_vm2, %v824_v22  ;;  %v11296_v28 = vpack.c.bf16 %v943_v31, %v942_v26  ;;  %v887_v15 = vld [vmem:[#allocation2 + $0x140] sm:$0xff]  ;;  %v886_v22 = vld [vmem:[#allocation2 + $0x138] sm:$0xff]  ;;  %v888_v26 = vld [vmem:[#allocation2 + $0x150] sm:$0xff]  ;;  %v11387_v58 = vpack.c.bf16 %v1454_v53, %v1453_v51 }
 0x11c   : > { %v11348_v23 = vpack.c.bf16 %v887_v15, %v886_v22  ;;  %v11352_v31 = vpack.c.bf16 %v889_v18, %v888_v26  ;;  %v1449_v30 = vld [vmem:[#allocation2 + $0x7a] sm:$0xff]  ;;  %v10547_v0 = vld [vmem:[%s14070_s5 + $0xa8] sm:$0xff]   ;;  %v1462_v18 = vld [vmem:[#allocation2 + $0x112] sm:$0xff] }
 0x11d   : > { %9706 = vmatmul.mubr.msk.bf16.gmra.mxu1 %vm388_vm2, %v11296_v28  ;;  %9734 = vmatmul.mubr.msk.bf16.gmra.mxu0 %vm388_vm2, %v11298_v29  ;;  %v11374_v46 = vpack.c.bf16 %v1450_v35, %v1449_v30  ;;  %v10548_v17 = vld [vmem:[%s14070_s5 + $0xa0] sm:$0xff]   ;;  %v1464_v22 = vld [vmem:[#allocation2 + $0x12a] sm:$0xff]  ;;  %v1467_v35 = vld [vmem:[#allocation2 + $0x152] sm:$0xff] }
 0x11e   : > { %9709 = vmatprep.mubr.msk.bf16.mxu1 %vm388_vm2, %v11300_v34  ;;  %9737 = vmatprep.mubr.msk.bf16.mxu0 %vm388_vm2, %v11302_v32  ;;  %v946_v44 = vld [vmem:[#allocation2 + $0x169] sm:$0xff]  ;;  %v1465_v30 = vld [vmem:[#allocation2 + $0x13a] sm:$0xff] }
 0x11f   : > { %v10550_v57 = vld [vmem:[%s14070_s5 + $0xd0] sm:$0xff]  }
 0x122   : > { %v947_v45 = vld [vmem:[#allocation2 + $0x171] sm:$0xff] }
 0x123   : > { %v11312_v49 = vpack.c.bf16 %v947_v45, %v946_v44  ;;  %v891_v33 = vld [vmem:[#allocation2 + $0x170] sm:$0xff]  ;;  %v890_v44 = vld [vmem:[#allocation2 + $0x168] sm:$0xff] }
 0x124   : > { %v11372_v45 = vpack.c.bf16 %v891_v33, %v890_v44  ;;  %v1466_v33 = vld [vmem:[#allocation2 + $0x142] sm:$0xff]  ;;  %v1469_v51 = vld [vmem:[#allocation2 + $0x16a] sm:$0xff]  ;;  %v1470_v53 = vld [vmem:[#allocation2 + $0x172] sm:$0xff] }
 0x125   : > { %9710 = vmatmul.mubr.msk.bf16.gmra.mxu1 %vm388_vm2, %v11312_v49  ;;  %9738 = vmatmul.mubr.msk.bf16.gmra.mxu0 %vm388_vm2, %v11314_v50  ;;  %v11448_v56 = vpack.c.bf16 %v1470_v53, %v1469_v51 }
 0x126   : > { %9741 = vmatprep.mubr.msk.bf16.mxu0 %vm388_vm2, %v11316_v52  ;;  %9761 = vmatprep.mubr.msk.bf16.mxu1 %vm388_vm2, %v1471_v47  ;;  %v11376_v47 = vpack.c.bf16 %v1452_v40, %v1451_v39  ;;  %v1468_v39 = vld [vmem:[#allocation2 + $0x15a] sm:$0xff]  ;;  %v11436_v40 = vpack.c.bf16 %v1466_v33, %v1465_v30 }
 0x127   : > { %v11438_v44 = vpack.c.bf16 %v1468_v39, %v1467_v35  ;;  %v3059_v33 = vld [vmem:[#allocation2 + $0x99] sm:$0xff] }
 0x128   : > { %v3056_v35 = vld [vmem:[#allocation2 + $0x79] sm:$0xff] }
 0x12d   : > { %9742 = vmatmul.mubr.msk.bf16.gmra.mxu0 %vm388_vm2, %v11325_v62  ;;  %9762 = vmatmul.mubr.msk.bf16.vlgmr.msra.gmra.mxu1 %vm388_vm2, %v11327_v63 }
 0x12e   : > { %9745 = vmatprep.mubr.msk.bf16.mxu0 %vm388_vm2, %v11329_v2  ;;  %9765 = vmatprep.mubr.msk.bf16.mxu1 %vm388_vm2, %v11331_v8 }
 0x12f   : > { %9834 = vmatpush3.bf16.msra.mxu1 %v11261_v54  ;;  %v11354_v54 = vpack.c.bf16 %v1448_v20, %v1447_v19  ;;  %v10553_v19 = vld [vmem:[%s14070_s5 + $0xf8] sm:$0xff]   ;;  %v1463_v20 = vld [vmem:[#allocation2 + $0x122] sm:$0xff] }
 0x130   : > { %9835 = vmatprep.subr.bf16.mxu1 %v10542_v9 }
 0x133   : > { %9836 = vmatpush3.bf16.msra.mxu1 %v10542_v9  ;;  %v1459_v9 = vld [vmem:[#allocation2 + $0xf2] sm:$0xff] }
 0x134   : > { %9837 = vmatprep.subr.bf16.mxu1 %v10543_v12 }
 0x135   : > { %9746 = vmatmul.mubr.msk.bf16.gmra.mxu0 %vm388_vm2, %v11348_v23  ;;  %9766 = vmatmul.mubr.msk.bf16.gmra.mxu1 %vm388_vm2, %v11350_v24 }
 0x136   : > { %9749 = vmatprep.mubr.msk.bf16.mxu0 %vm388_vm2, %v11352_v31  ;;  %9769 = vmatprep.mubr.msk.bf16.mxu1 %vm388_vm2, %v11354_v54 }
 0x137   : > { %9838 = vmatpush3.bf16.msra.mxu1 %v10543_v12  ;;  %v1460_v12 = vld [vmem:[#allocation2 + $0xfa] sm:$0xff] }
 0x138   : > { %9839 = vmatprep.subr.bf16.mxu1 %v10544_v27  ;;  %v11408_v16 = vpack.c.bf16 %v1460_v12, %v1459_v9  ;;  %v3055_v9 = vld [vmem:[#allocation2 + $0x69] sm:$0xff] }
 0x139   : > { %v3052_v12 = vld [vmem:[#allocation2 + $0x49] sm:$0xff] }
 0x13b   : > { %9840 = vmatpush3.bf16.msra.mxu1 %v10544_v27  ;;  %v11426_v27 = vpack.c.bf16 %v1464_v22, %v1463_v20 }
 0x13c   : > { %9913 = vmatprep.subr.bf16.mxu1 %v11370_v38 }
 0x13d   : > { %9750 = vmatmul.mubr.msk.bf16.gmra.mxu0 %vm388_vm2, %v11372_v45  ;;  %9770 = vmatmul.mubr.msk.bf16.gmra.mxu1 %vm388_vm2, %v11374_v46 }
 0x13e   : > { %9773 = vmatprep.mubr.msk.bf16.mxu1 %vm388_vm2, %v11376_v47  ;;  %9801 = vmatprep.mubr.msk.bf16.mxu0 %vm388_vm2, %v11196_v6  ;;  %v1457_v6 = vld [vmem:[#allocation2 + $0xda] sm:$0xff] }
 0x13f   : > { %v11406_v15 = vpack.c.bf16 %v1458_v61, %v1457_v6  ;;  %v3053_v61 = vld [vmem:[#allocation2 + $0x51] sm:$0xff] }
 0x145   : > { %9774 = vmatmul.mubr.msk.bf16.gmra.mxu1 %vm388_vm2, %v11387_v58  ;;  %9802 = vmatmul.mubr.msk.bf16.vlgmr.msra.gmra.mxu0 %vm388_vm2, %v11200_v11 }
 0x146   : > { %9777 = vmatprep.mubr.msk.bf16.mxu1 %vm388_vm2, %v11389_v59  ;;  %9805 = vmatprep.mubr.msk.bf16.mxu0 %vm388_vm2, %v11234_v37 }
 0x147   : > { %9874 = vmatpush3.bf16.msra.mxu0 %v11266_v55  ;;  %v1461_v55 = vld [vmem:[#allocation2 + $0x10a] sm:$0xff] }
 0x148   : > { %9875 = vmatprep.subr.bf16.mxu0 %v10546_v60  ;;  %v11424_v26 = vpack.c.bf16 %v1462_v18, %v1461_v55 }
 0x14b   : > { %9876 = vmatpush3.bf16.msra.mxu0 %v10546_v60  ;;  %v10552_v60 = vld [vmem:[%s14070_s5 + $0xc0] sm:$0xff]  }
 0x14c   : > { %9877 = vmatprep.subr.bf16.mxu0 %v10547_v0 }
 0x14d   : > { %9778 = vmatmul.mubr.msk.bf16.gmra.mxu1 %vm388_vm2, %v11406_v15  ;;  %9806 = vmatmul.mubr.msk.bf16.gmra.mxu0 %vm388_vm2, %v11238_v43 }
 0x14e   : > { %9781 = vmatprep.mubr.msk.bf16.mxu1 %vm388_vm2, %v11408_v16  ;;  %9809 = vmatprep.mubr.msk.bf16.mxu0 %vm388_vm2, %v11274_v7 }
 0x14f   : > { %9878 = vmatpush3.bf16.msra.mxu0 %v10547_v0 }
 0x150   : > { %9879 = vmatprep.subr.bf16.mxu0 %v10548_v17 }
 0x153   : > { %9880 = vmatpush3.bf16.msra.mxu0 %v10548_v17  ;;  %v3054_v17 = vld [vmem:[#allocation2 + $0x61] sm:$0xff] }
 0x154   : > { %9953 = vmatprep.subr.bf16.mxu0 %v10553_v19  ;;  %v3084_v55 = vpack.c.bf16 %v3055_v9, %v3054_v17  ;;  %v2758_v17 = vld [vmem:[#allocation2 + $0x198] sm:$0xff] }
 0x155   : > { %9782 = vmatmul.mubr.msk.bf16.gmra.mxu1 %vm388_vm2, %v11424_v26  ;;  %9810 = vmatmul.mubr.msk.bf16.gmra.mxu0 %vm388_vm2, %v11278_v14 }
 0x156   : > { %9785 = vmatprep.mubr.msk.bf16.mxu1 %vm388_vm2, %v11426_v27  ;;  %9813 = vmatprep.mubr.msk.bf16.mxu0 %vm388_vm2, %v11298_v29 }
 0x15d   : > { %9786 = vmatmul.mubr.msk.bf16.gmra.mxu1 %vm388_vm2, %v11436_v40  ;;  %9814 = vmatmul.mubr.msk.bf16.gmra.mxu0 %vm388_vm2, %v11302_v32 }
 0x15e   : > { %9789 = vmatprep.mubr.msk.bf16.mxu1 %vm388_vm2, %v11438_v44  ;;  %9817 = vmatprep.mubr.msk.bf16.mxu0 %vm388_vm2, %v11314_v50 }
 0x165   : > { %9790 = vmatmul.mubr.msk.bf16.gmra.mxu1 %vm388_vm2, %v11448_v56  ;;  %9818 = vmatmul.mubr.msk.bf16.gmra.mxu0 %vm388_vm2, %v11316_v52 }
 0x166   : > { %9821 = vmatprep.mubr.msk.bf16.mxu0 %vm388_vm2, %v11325_v62  ;;  %9841 = vmatprep.mubr.msk.bf16.mxu1 %vm388_vm2, %v11130_v1  ;;  %v10551_v1 = vld [vmem:[%s14070_s5 + $0xc8] sm:$0xff]  }
 0x16d   : > { %9822 = vmatmul.mubr.msk.bf16.gmra.mxu0 %vm388_vm2, %v11329_v2  ;;  %9842 = vmatmul.mubr.msk.bf16.vlgmr.msra.gmra.mxu1 %vm388_vm2, %v11135_v5  ;;  %v1792_v5 = vld [vmem:[#allocation2 + $0x188] sm:$0xff] }
 0x16e   : > { %9825 = vmatprep.mubr.msk.bf16.mxu0 %vm388_vm2, %v11348_v23  ;;  %9845 = vmatprep.mubr.msk.bf16.mxu1 %vm388_vm2, %v11152_v21  ;;  %v10557_v21 = vld [vmem:[%s14070_s5 + $0x118] sm:$0xff]  }
 0x16f   : > { %9914 = vmatpush3.bf16.msra.mxu1 %v11370_v38  ;;  %v1791_v38 = vld [vmem:[#allocation2 + $0x180] sm:$0xff] }
 0x170   : > { %9915 = vmatprep.subr.bf16.mxu1 %v10550_v57  ;;  %v11487_v6 = vpack.c.bf16 %v1792_v5, %v1791_v38  ;;  %v3061_v38 = vld [vmem:[#allocation2 + $0xb1] sm:$0xff] }
 0x173   : > { %9916 = vmatpush3.bf16.msra.mxu1 %v10550_v57 }
 0x174   : > { %9917 = vmatprep.subr.bf16.mxu1 %v10551_v1 }
 0x175   : > { %9826 = vmatmul.mubr.msk.bf16.gmra.mxu0 %vm388_vm2, %v11352_v31  ;;  %9846 = vmatmul.mubr.msk.bf16.gmra.mxu1 %vm388_vm2, %v11157_v25  ;;  %v10554_v25 = vld [vmem:[%s14070_s5 + $0xf0] sm:$0xff]  }
 0x176   : > { %9829 = vmatprep.mubr.msk.bf16.mxu0 %vm388_vm2, %v11372_v45  ;;  %9849 = vmatprep.mubr.msk.bf16.mxu1 %vm388_vm2, %v11180_v48  ;;  %v10556_v48 = vld [vmem:[%s14070_s5 + $0xe0] sm:$0xff]  }
 0x177   : > { %9918 = vmatpush3.bf16.msra.mxu1 %v10551_v1 }
 0x178   : > { %9919 = vmatprep.subr.bf16.mxu1 %v10552_v60 }
 0x17b   : > { %9920 = vmatpush3.bf16.msra.mxu1 %v10552_v60 }
 0x17c   : > { %9993 = vmatprep.subr.bf16.mxu1 %v10557_v21 }
 0x17d   : > { %9830 = vmatmul.mubr.msk.bf16.gmra.mxu0 %vm388_vm2, %v11487_v6  ;;  %9850 = vmatmul.mubr.msk.bf16.gmra.mxu1 %vm388_vm2, %v11174_v41  ;;  %v10555_v41 = vld [vmem:[%s14070_s5 + $0xe8] sm:$0xff]  }
 0x17e   : > { %9853 = vmatprep.mubr.msk.bf16.mxu1 %vm388_vm2, %v11194_v4  ;;  %9881 = vmatprep.mubr.msk.bf16.mxu0 %vm388_vm2, %v11327_v63  ;;  %v2114_v4 = vld [vmem:[#allocation2 + $0x189] sm:$0xff] }
 0x17f   : > { %v2435_v63 = vld [vmem:[#allocation2 + $0x182] sm:$0xff] }
 0x185   : > { %9854 = vmatmul.mubr.msk.bf16.gmra.mxu1 %vm388_vm2, %v11198_v10  ;;  %9882 = vmatmul.mubr.msk.bf16.vlgmr.msra.gmra.mxu0 %vm388_vm2, %v11331_v8  ;;  %v2113_v10 = vld [vmem:[#allocation2 + $0x181] sm:$0xff]  ;;  %v2436_v8 = vld [vmem:[#allocation2 + $0x18a] sm:$0xff] }
 0x186   : > { %9857 = vmatprep.mubr.msk.bf16.mxu1 %vm388_vm2, %v11232_v36  ;;  %9885 = vmatprep.mubr.msk.bf16.mxu0 %vm388_vm2, %v11350_v24  ;;  %v11538_v36 = vpack.c.bf16 %v2114_v4, %v2113_v10  ;;  %v3060_v4 = vld [vmem:[#allocation2 + $0xa9] sm:$0xff] }
 0x187   : > { %9954 = vmatpush3.bf16.msra.mxu0 %v10553_v19 }
 0x188   : > { %9955 = vmatprep.subr.bf16.mxu0 %v10554_v25 }
 0x18b   : > { %9956 = vmatpush3.bf16.msra.mxu0 %v10554_v25 }
 0x18c   : > { %9957 = vmatprep.subr.bf16.mxu0 %v10555_v41 }
 0x18d   : > { %9858 = vmatmul.mubr.msk.bf16.gmra.mxu1 %vm388_vm2, %v11236_v42  ;;  %9886 = vmatmul.mubr.msk.bf16.gmra.mxu0 %vm388_vm2, %v11354_v54  ;;  %v10558_v42 = vld [vmem:[%s14070_s5 + $0x110] sm:$0xff]   ;;  %v3051_v54 = vld [vmem:[#allocation2 + $0x39] sm:$0xff] }
 0x18e   : > { %9861 = vmatprep.mubr.msk.bf16.mxu1 %vm388_vm2, %v11272_v3  ;;  %9889 = vmatprep.mubr.msk.bf16.mxu0 %vm388_vm2, %v11374_v46 }
 0x18f   : > { %9958 = vmatpush3.bf16.msra.mxu0 %v10555_v41 }
 0x190   : > { %9959 = vmatprep.subr.bf16.mxu0 %v10556_v48 }
 0x193   : > { %9960 = vmatpush3.bf16.msra.mxu0 %v10556_v48  ;;  %v3063_v48 = vld [vmem:[#allocation2 + $0xc9] sm:$0xff] }
 0x195   : > { %9862 = vmatmul.mubr.msk.bf16.gmra.mxu1 %vm388_vm2, %v11276_v13  ;;  %9890 = vmatmul.mubr.msk.bf16.gmra.mxu0 %vm388_vm2, %v11376_v47  ;;  %v11573_v47 = vpack.c.bf16 %v2436_v8, %v2435_v63  ;;  %v3065_v8 = vld [vmem:[#allocation2 + $0xe1] sm:$0xff] }
 0x196   : > { %9865 = vmatprep.mubr.msk.bf16.mxu1 %vm388_vm2, %v11296_v28  ;;  %9893 = vmatprep.mubr.msk.bf16.mxu0 %vm388_vm2, %v11387_v58  ;;  %v3050_v58 = vld [vmem:[#allocation2 + $0x31] sm:$0xff] }
 0x19d   : > { %9866 = vmatmul.mubr.msk.bf16.gmra.mxu1 %vm388_vm2, %v11300_v34  ;;  %9894 = vmatmul.mubr.msk.bf16.gmra.mxu0 %vm388_vm2, %v11389_v59  ;;  %v3082_v59 = vpack.c.bf16 %v3051_v54, %v3050_v58  ;;  %v3064_v58 = vld [vmem:[#allocation2 + $0xd9] sm:$0xff] }
 0x19e   : > { %9869 = vmatprep.mubr.msk.bf16.mxu1 %vm388_vm2, %v11312_v49  ;;  %9897 = vmatprep.mubr.msk.bf16.mxu0 %vm388_vm2, %v11406_v15 }
 0x1a5   : > { %9870 = vmatmul.mubr.msk.bf16.gmra.mxu1 %vm388_vm2, %v11538_v36  ;;  %9898 = vmatmul.mubr.msk.bf16.gmra.mxu0 %vm388_vm2, %v11408_v16  ;;  %v3083_v16 = vpack.c.bf16 %v3053_v61, %v3052_v12  ;;  %v3066_v61 = vld [vmem:[#allocation2 + $0xf1] sm:$0xff] }
 0x1a6   : > { %9901 = vmatprep.mubr.msk.bf16.mxu0 %vm388_vm2, %v11424_v26  ;;  %9921 = vmatprep.mubr.msk.bf16.mxu1 %vm388_vm2, %v11200_v11  ;;  %v10559_v11 = vld [vmem:[%s14070_s5 + $0x108] sm:$0xff]  }
 0x1a7   : > { %v3057_v26 = vld [vmem:[#allocation2 + $0x81] sm:$0xff] }
 0x1ad   : > { %v9683_v3 = vpop.f32.mrf.mxu0  ;;  %9902 = vmatmul.mubr.msk.bf16.gmra.mxu0 %vm388_vm2, %v11426_v27  ;;  %9922 = vmatmul.mubr.msk.bf16.vlgmr.msra.gmra.mxu1 %vm388_vm2, %v11234_v37  ;;  %v10560_v37 = vld [vmem:[%s14070_s5 + $0x100] sm:$0xff]  }
 0x1ae   : > { %9905 = vmatprep.mubr.msk.bf16.mxu0 %vm388_vm2, %v11436_v40  ;;  %9925 = vmatprep.mubr.msk.bf16.mxu1 %vm388_vm2, %v11238_v43 }
 0x1af   : > { %v1079_v13 = vpop.f32.mrf.mxu0  ;;  %9994 = vmatpush3.bf16.msra.mxu1 %v10557_v21 }
 0x1b0   : > { %9995 = vmatprep.subr.bf16.mxu1 %v10558_v42 }
 0x1b1   : > { %v9684_v28 = vpop.f32.mrf.mxu0 }
 0x1b3   : > { %v1082_v34 = vpop.f32.mrf.mxu0  ;;  %9996 = vmatpush3.bf16.msra.mxu1 %v10558_v42 }
 0x1b4   : > { %9997 = vmatprep.subr.bf16.mxu1 %v10559_v11 }
 0x1b5   : > { %v9687_v49 = vpop.f32.mrf.mxu0  ;;  %9906 = vmatmul.mubr.msk.bf16.gmra.mxu0 %vm388_vm2, %v11438_v44  ;;  %9926 = vmatmul.mubr.msk.bf16.gmra.mxu1 %vm388_vm2, %v11274_v7  ;;  %v3085_v44 = vpack.c.bf16 %v3057_v26, %v3056_v35  ;;  %v3069_v26 = vld [vmem:[#allocation2 + $0x111] sm:$0xff] }
 0x1b6   : > { %9909 = vmatprep.mubr.msk.bf16.mxu0 %vm388_vm2, %v11448_v56  ;;  %9929 = vmatprep.mubr.msk.bf16.mxu1 %vm388_vm2, %v11278_v14  ;;  %v3372_v35 = vld [vmem:[#allocation2 + $0x32] sm:$0xff] }
 0x1b7   : > { %v1095_v43 = vpop.f32.mrf.mxu0  ;;  %9998 = vmatpush3.bf16.msra.mxu1 %v10559_v11 }
 0x1b8   : > { %9999 = vmatprep.subr.bf16.mxu1 %v10560_v37 }
 0x1b9   : > { %v9688_v24 = vpop.f32.mrf.mxu0 }
 0x1bb   : > { %v1098_v46 = vpop.f32.mrf.mxu0  ;;  %10000 = vmatpush3.bf16.msra.mxu1 %v10560_v37 }
 0x1bd   : > { %v9691_v7 = vpop.f32.mrf.mxu0  ;;  %9910 = vmatmul.mubr.msk.bf16.gmra.mxu0 %vm388_vm2, %v11573_v47  ;;  %9930 = vmatmul.mubr.msk.bf16.gmra.mxu1 %vm388_vm2, %v11298_v29 }
 0x1be   : > { %9933 = vmatprep.mubr.msk.bf16.mxu1 %vm388_vm2, %v11302_v32  ;;  %9961 = vmatprep.mubr.msk.bf16.mxu0 %vm388_vm2, %v3082_v59 }
 0x1bf   : > { %v1111_v14 = vpop.f32.mrf.mxu0 }
 0x1c1   : > { %v11582_v0 = vpop.f32.mrf.mxu0 }
 0x1c3   : > { %v11584_v15 = vpop.f32.mrf.mxu0 }
 0x1c5   : > { %v11586_v18 = vpop.f32.mrf.mxu1  ;;  %v9723_v19 = vpop.f32.mrf.mxu0  ;;  %9934 = vmatmul.mubr.msk.bf16.gmra.mxu1 %vm388_vm2, %v11314_v50  ;;  %9962 = vmatmul.mubr.msk.bf16.vlgmr.msra.gmra.mxu0 %vm388_vm2, %v3083_v16 }
 0x1c6   : > { %v11591_v29 = vadd.f32 %v9723_v19, %v9683_v3  ;;  %9937 = vmatprep.mubr.msk.bf16.mxu1 %vm388_vm2, %v11316_v52  ;;  %9965 = vmatprep.mubr.msk.bf16.mxu0 %vm388_vm2, %v3084_v55  ;;  %v3058_v52 = vld [vmem:[#allocation2 + $0x91] sm:$0xff]  ;;  %v3087_v3 = vpack.c.bf16 %v3061_v38, %v3060_v4 }
 0x1c7   : > { %v11596_v32 = vpop.f32.mrf.mxu1  ;;  %v1312_v20 = vpop.f32.mrf.mxu0  ;;  %v3086_v53 = vpack.c.bf16 %v3059_v33, %v3058_v52 }
 0x1c8   : > { %v11598_v22 = vadd.f32 %v1312_v20, %v1079_v13 }
 0x1c9   : > { %v11600_v27 = vpop.f32.mrf.mxu1  ;;  %v9724_v30 = vpop.f32.mrf.mxu0 }
 0x1ca   : > { %v11602_v50 = vadd.f32 %v9724_v30, %v9684_v28 }
 0x1cb   : > { %v11604_v39 = vpop.f32.mrf.mxu1  ;;  %v1315_v40 = vpop.f32.mrf.mxu0 }
 0x1cc   : > { %v11606_v51 = vadd.f32 %v1315_v40, %v1082_v34  ;;  %v3373_v40 = vld [vmem:[#allocation2 + $0x3a] sm:$0xff] }
 0x1cd   : > { %v11608_v56 = vpop.f32.mrf.mxu1  ;;  %v9727_v57 = vpop.f32.mrf.mxu0  ;;  %9938 = vmatmul.mubr.msk.bf16.gmra.mxu1 %vm388_vm2, %v11325_v62  ;;  %9966 = vmatmul.mubr.msk.bf16.gmra.mxu0 %vm388_vm2, %v3085_v44  ;;  %v3068_v44 = vld [vmem:[#allocation2 + $0x109] sm:$0xff] }
 0x1ce   : > { %v11613_v1 = vadd.f32 %v9727_v57, %v9687_v49  ;;  %9941 = vmatprep.mubr.msk.bf16.mxu1 %vm388_vm2, %v11329_v2  ;;  %9969 = vmatprep.mubr.msk.bf16.mxu0 %vm388_vm2, %v3086_v53  ;;  %v3062_v2 = vld [vmem:[#allocation2 + $0xc1] sm:$0xff]  ;;  %v3091_v57 = vpack.c.bf16 %v3069_v26, %v3068_v44  ;;  %v3077_v44 = vld [vmem:[#allocation2 + $0x171] sm:$0xff] }
 0x1cf   : > { %v11618_v60 = vpop.f32.mrf.mxu1  ;;  %v1328_v5 = vpop.f32.mrf.mxu0  ;;  %v3088_v11 = vpack.c.bf16 %v3063_v48, %v3062_v2  ;;  %v3073_v2 = vld [vmem:[#allocation2 + $0x141] sm:$0xff] }
 0x1d0   : > { %v11620_v21 = vadd.f32 %v1328_v5, %v1095_v43  ;;  %v3070_v5 = vld [vmem:[#allocation2 + $0x121] sm:$0xff] }
 0x1d1   : > { %v11622_v25 = vpop.f32.mrf.mxu1  ;;  %v9728_v41 = vpop.f32.mrf.mxu0 }
 0x1d2   : > { %v11624_v62 = vadd.f32 %v9728_v41, %v9688_v24  ;;  %v3404_v41 = vpack.c.bf16 %v3373_v40, %v3372_v35 }
 0x1d3   : > { %v11626_v10 = vpop.f32.mrf.mxu1  ;;  %v1331_v42 = vpop.f32.mrf.mxu0 }
 0x1d4   : > { %v11628_v13 = vadd.f32 %v1331_v42, %v1098_v46  ;;  %v3067_v46 = vld [vmem:[#allocation2 + $0xf9] sm:$0xff] }
 0x1d5   : > { %v11630_v28 = vpop.f32.mrf.mxu1  ;;  %v9731_v34 = vpop.f32.mrf.mxu0  ;;  %9942 = vmatmul.mubr.msk.bf16.gmra.mxu1 %vm388_vm2, %v11348_v23  ;;  %9970 = vmatmul.mubr.msk.bf16.gmra.mxu0 %vm388_vm2, %v3087_v3  ;;  %v3090_v12 = vpack.c.bf16 %v3067_v46, %v3066_v61  ;;  %v3376_v46 = vld [vmem:[#allocation2 + $0x62] sm:$0xff] }
 0x1d6   : > { %v11635_v37 = vadd.f32 %v9731_v34, %v9691_v7  ;;  %9945 = vmatprep.mubr.msk.bf16.mxu1 %vm388_vm2, %v11352_v31  ;;  %9973 = vmatprep.mubr.msk.bf16.mxu0 %vm388_vm2, %v3088_v11  ;;  %v3089_v31 = vpack.c.bf16 %v3065_v8, %v3064_v58  ;;  %v3374_v11 = vld [vmem:[#allocation2 + $0x4a] sm:$0xff]  ;;  %v3375_v34 = vld [vmem:[#allocation2 + $0x52] sm:$0xff] }
 0x1d7   : > { %v11640_v49 = vpop.f32.mrf.mxu1  ;;  %v1344_v43 = vpop.f32.mrf.mxu0 }
 0x1d8   : > { %v11642_v63 = vadd.f32 %v1344_v43, %v1111_v14 }
 0x1d9   : > { %v11644_v24 = vpop.f32.mrf.mxu1  ;;  %v9732_v54 = vpop.f32.mrf.mxu0 }
 0x1da   : > { %v11647_v23 = vadd.f32 %v9732_v54, %v11582_v0  ;;  %v3075_v54 = vld [vmem:[#allocation2 + $0x159] sm:$0xff] }
 0x1db   : > { %v11649_v59 = vpop.f32.mrf.mxu1  ;;  %v1347_v7 = vpop.f32.mrf.mxu0 }
 0x1dc   : > { %v11652_v9 = vadd.f32 %v1347_v7, %v11584_v15  ;;  %v2759_v15 = vld [vmem:[#allocation2 + $0x1a0] sm:$0xff] }
 0x1dd   : > { %v11654_v14 = vpop.f32.mrf.mxu1  ;;  %v9735_v16 = vpop.f32.mrf.mxu0  ;;  %9946 = vmatmul.mubr.msk.bf16.gmra.mxu1 %vm388_vm2, %v11372_v45  ;;  %9974 = vmatmul.mubr.msk.bf16.gmra.mxu0 %vm388_vm2, %v3089_v31  ;;  %v2775_v33 = vpack.c.bf16 %v2759_v15, %v2758_v17  ;;  %v3072_v7 = vld [vmem:[#allocation2 + $0x139] sm:$0xff] }
 0x1de   : > { %v11660_v0 = vadd.f32 %v9735_v16, %v11586_v18  ;;  %9949 = vmatprep.mubr.msk.bf16.mxu1 %vm388_vm2, %v11487_v6  ;;  %9977 = vmatprep.mubr.msk.bf16.mxu0 %vm388_vm2, %v3090_v12  ;;  %v3071_v18 = vld [vmem:[#allocation2 + $0x129] sm:$0xff]  ;;  %v3093_v12 = vpack.c.bf16 %v3073_v2, %v3072_v7  ;;  %v3074_v16 = vld [vmem:[#allocation2 + $0x151] sm:$0xff] }
 0x1df   : > { %v11665_v55 = vpop.f32.mrf.mxu1  ;;  %v1360_v19 = vpop.f32.mrf.mxu0  ;;  %v3092_v38 = vpack.c.bf16 %v3071_v18, %v3070_v5  ;;  %v3094_v17 = vpack.c.bf16 %v3075_v54, %v3074_v16 }
 0x1e0   : > { %v11668_v20 = vadd.f32 %v1360_v19, %v11596_v32 }
 0x1e1   : > { %v11670_v45 = vpop.f32.mrf.mxu1  ;;  %v9736_v30 = vpop.f32.mrf.mxu0 }
 0x1e2   : > { %v11673_v6 = vadd.f32 %v9736_v30, %v11600_v27 }
 0x1e3   : > { %v11675_v52 = vpop.f32.mrf.mxu1  ;;  %v1363_v53 = vpop.f32.mrf.mxu0 }
 0x1e4   : > { %14077 = vst [vmem:[#allocation3_spill] sm:$0xff] %v11675_v52  ;;  %v11678_v32 = vadd.f32 %v1363_v53, %v11604_v39  ;;  %v3378_v53 = vld [vmem:[#allocation2 + $0x7a] sm:$0xff] }
 0x1e5   : > { %v11680_v48 = vpop.f32.mrf.mxu1  ;;  %v9739_v4 = vpop.f32.mrf.mxu0  ;;  %9950 = vmatmul.mubr.msk.bf16.gmra.mxu1 %vm388_vm2, %v2775_v33  ;;  %9978 = vmatmul.mubr.msk.bf16.gmra.mxu0 %vm388_vm2, %v3091_v57  ;;  %v3379_v57 = vld [vmem:[#allocation2 + $0x82] sm:$0xff] }
 0x1e6   : > { %v11685_v27 = vadd.f32 %v9739_v4, %v11608_v56  ;;  %9981 = vmatprep.mubr.msk.bf16.mxu0 %vm388_vm2, %v3092_v38  ;;  %10001 = vmatprep.mubr.msk.bf16.mxu1 %vm388_vm2, %v3404_v41  ;;  %v3377_v56 = vld [vmem:[#allocation2 + $0x6a] sm:$0xff]  ;;  %v3380_v38 = vld [vmem:[#allocation2 + $0x92] sm:$0xff] }
 0x1e7   : > { %v11689_v42 = vpop.f32.mrf.mxu1  ;;  %v1376_v39 = vpop.f32.mrf.mxu0  ;;  %v3406_v15 = vpack.c.bf16 %v3377_v56, %v3376_v46  ;;  %v3081_v56 = vld [vmem:[#allocation2 + $0x1a1] sm:$0xff] }
 0x1e8   : > { %v11692_v3 = vadd.f32 %v1376_v39, %v11618_v60  ;;  %v3405_v60 = vpack.c.bf16 %v3375_v34, %v3374_v11  ;;  %v3076_v39 = vld [vmem:[#allocation2 + $0x169] sm:$0xff] }
 0x1e9   : > { %v11694_v43 = vpop.f32.mrf.mxu1  ;;  %v9740_v8 = vpop.f32.mrf.mxu0  ;;  %v3095_v11 = vpack.c.bf16 %v3077_v44, %v3076_v39 }
 0x1ea   : > { %v11697_v58 = vadd.f32 %v9740_v8, %v11622_v25 }
 0x1eb   : > { %v11699_v31 = vpop.f32.mrf.mxu1  ;;  %v11701_v61 = vpop.f32.mrf.mxu0 }
 0x1ec   : > { %14078 = vst [vmem:[#allocation4_spill] sm:$0xff] %v11699_v31 }
 0x1ed   : > { %v9743_v19 = vpop.f32.mrf.mxu0  ;;  %v9763_v26 = vpop.f32.mrf.mxu1  ;;  %9982 = vmatmul.mubr.msk.bf16.gmra.mxu0 %vm388_vm2, %v3093_v12  ;;  %10002 = vmatmul.mubr.msk.bf16.vlgmr.msra.gmra.mxu1 %vm388_vm2, %v3405_v60 }
 0x1ee   : > { %v11706_v30 = vadd.f32 %v9743_v19, %v11630_v28  ;;  %v11709_v25 = vadd.f32 %v9763_v26, %v11591_v29  ;;  %9985 = vmatprep.mubr.msk.bf16.mxu0 %vm388_vm2, %v3094_v17  ;;  %10005 = vmatprep.mubr.msk.bf16.mxu1 %vm388_vm2, %v3406_v15  ;;  %v3381_v29 = vld [vmem:[#allocation2 + $0x9a] sm:$0xff]  ;;  %v3383_v17 = vld [vmem:[#allocation2 + $0xb2] sm:$0xff]  ;;  %v3384_v26 = vld [vmem:[#allocation2 + $0xc2] sm:$0xff] }
 0x1ef   : > { %v1392_v33 = vpop.f32.mrf.mxu0  ;;  %v1602_v18 = vpop.f32.mrf.mxu1  ;;  %v3408_v8 = vpack.c.bf16 %v3381_v29, %v3380_v38 }
 0x1f0   : > { %v11714_v35 = vadd.f32 %v1392_v33, %v11640_v49  ;;  %v11717_v40 = vadd.f32 %v1602_v18, %v11598_v22  ;;  %v3407_v22 = vpack.c.bf16 %v3379_v57, %v3378_v53  ;;  %v3385_v33 = vld [vmem:[#allocation2 + $0xca] sm:$0xff] }
 0x1f1   : > { %v9744_v28 = vpop.f32.mrf.mxu0  ;;  %v9764_v5 = vpop.f32.mrf.mxu1  ;;  %v3410_v57 = vpack.c.bf16 %v3385_v33, %v3384_v26  ;;  %v3391_v26 = vld [vmem:[#allocation2 + $0x112] sm:$0xff] }
 0x1f2   : > { %v11720_v41 = vadd.f32 %v9744_v28, %v11644_v24  ;;  %v11723_v4 = vadd.f32 %v9764_v5, %v11602_v50 }
 0x1f3   : > { %v11725_v2 = vpop.f32.mrf.mxu0  ;;  %v1605_v49 = vpop.f32.mrf.mxu1 }
 0x1f4   : > { %14079 = vst [vmem:[#allocation5_spill] sm:$0xff] %v11725_v2  ;;  %v11728_v34 = vadd.f32 %v1605_v49, %v11606_v51  ;;  %v3080_v51 = vld [vmem:[#allocation2 + $0x199] sm:$0xff] }
 0x1f5   : > { %v9747_v54 = vpop.f32.mrf.mxu0  ;;  %v9767_v46 = vpop.f32.mrf.mxu1  ;;  %9986 = vmatmul.mubr.msk.bf16.gmra.mxu0 %vm388_vm2, %v3095_v11  ;;  %10006 = vmatmul.mubr.msk.bf16.gmra.mxu1 %vm388_vm2, %v3407_v22  ;;  %v3097_v19 = vpack.c.bf16 %v3081_v56, %v3080_v51  ;;  %v3386_v49 = vld [vmem:[#allocation2 + $0xda] sm:$0xff]  ;;  %v3387_v11 = vld [vmem:[#allocation2 + $0xe2] sm:$0xff] }
 0x1f6   : > { %v11733_v24 = vadd.f32 %v9747_v54, %v11654_v14  ;;  %v11736_v50 = vadd.f32 %v9767_v46, %v11613_v1  ;;  %9989 = vmatprep.mubr.msk.bf16.mxu0 %vm388_vm2, %v11538_v36  ;;  %10009 = vmatprep.mubr.msk.bf16.mxu1 %vm388_vm2, %v3408_v8  ;;  %v3382_v14 = vld [vmem:[#allocation2 + $0xaa] sm:$0xff]  ;;  %v3388_v54 = vld [vmem:[#allocation2 + $0xf2] sm:$0xff] }
 0x1f7   : > { %v1408_v7 = vpop.f32.mrf.mxu0  ;;  %v1618_v12 = vpop.f32.mrf.mxu1  ;;  %v3409_v53 = vpack.c.bf16 %v3383_v17, %v3382_v14 }
 0x1f8   : > { %v11742_v60 = vadd.f32 %v1408_v7, %v11665_v55  ;;  %v11745_v16 = vadd.f32 %v1618_v12, %v11620_v21 }
 0x1f9   : > { %v9748_v15 = vpop.f32.mrf.mxu0  ;;  %v9768_v1 = vpop.f32.mrf.mxu1 }
 0x1fa   : > { %v11748_v36 = vadd.f32 %v9748_v15, %v11670_v45  ;;  %v11751_v18 = vadd.f32 %v9768_v1, %v11624_v62 }
 0x1fb   : > { %v11753_v44 = vpop.f32.mrf.mxu0  ;;  %v1621_v55 = vpop.f32.mrf.mxu1 }
 0x1fc   : > { %14080 = vst [vmem:[#allocation6_spill] sm:$0xff] %v11753_v44  ;;  %v11756_v21 = vadd.f32 %v1621_v55, %v11628_v13 }
 0x1fd   : > { %v9751_v28 = vpop.f32.mrf.mxu0  ;;  %v9771_v5 = vpop.f32.mrf.mxu1  ;;  %9990 = vmatmul.mubr.msk.bf16.gmra.mxu0 %vm388_vm2, %v3097_v19  ;;  %10010 = vmatmul.mubr.msk.bf16.gmra.mxu1 %vm388_vm2, %v3409_v53  ;;  %v3390_v19 = vld [vmem:[#allocation2 + $0x10a] sm:$0xff]  ;;  %v3392_v53 = vld [vmem:[#allocation2 + $0x122] sm:$0xff] }
 0x1fe   : > { %v11761_v45 = vadd.f32 %v9751_v28, %v11680_v48  ;;  %v11764_v62 = vadd.f32 %v9771_v5, %v11635_v37  ;;  %10013 = vmatprep.mubr.msk.bf16.mxu1 %vm388_vm2, %v3410_v57  ;;  %v3389_v48 = vld [vmem:[#allocation2 + $0xfa] sm:$0xff] }
 0x1ff   : > { %v1424_v38 = vpop.f32.mrf.mxu0  ;;  %v1634_v29 = vpop.f32.mrf.mxu1 }
 0x200   : > { %v11768_v13 = vadd.f32 %v1424_v38, %v11689_v42  ;;  %v11771_v39 = vadd.f32 %v1634_v29, %v11642_v63  ;;  %v3411_v42 = vpack.c.bf16 %v3387_v11, %v3386_v49  ;;  %v3412_v63 = vpack.c.bf16 %v3389_v48, %v3388_v54  ;;  %v3395_v48 = vld [vmem:[#allocation2 + $0x142] sm:$0xff] }
 0x201   : > { %v9752_v22 = vpop.f32.mrf.mxu0  ;;  %v9772_v8 = vpop.f32.mrf.mxu1 }
 0x202   : > { %v11774_v46 = vadd.f32 %v9752_v22, %v11694_v43  ;;  %v11777_v37 = vadd.f32 %v9772_v8, %v11647_v23 }
 0x203   : > { %v11779_v51 = vpop.f32.mrf.mxu0  ;;  %v1637_v56 = vpop.f32.mrf.mxu1 }
 0x204   : > { %14081 = vst [vmem:[#allocation7_spill] sm:$0xff] %v11779_v51  ;;  %v11782_v7 = vadd.f32 %v1637_v56, %v11652_v9 }
 0x205   : > { %v9775_v12 = vpop.f32.mrf.mxu1  ;;  %v9803_v14 = vpop.f32.mrf.mxu0  ;;  %10014 = vmatmul.mubr.msk.bf16.gmra.mxu1 %vm388_vm2, %v3411_v42 }
 0x206   : > { %v11786_v17 = vadd.f32 %v9775_v12, %v11660_v0  ;;  %v11789_v43 = vadd.f32 %v9803_v14, %v11709_v25  ;;  %10017 = vmatprep.mubr.msk.bf16.mxu1 %vm388_vm2, %v3412_v63  ;;  %v3393_v0 = vld [vmem:[#allocation2 + $0x12a] sm:$0xff]  ;;  %v3396_v63 = vld [vmem:[#allocation2 + $0x152] sm:$0xff]  ;;  %v3397_v12 = vld [vmem:[#allocation2 + $0x15a] sm:$0xff] }
 0x207   : > { %v1650_v23 = vpop.f32.mrf.mxu1  ;;  %v1924_v15 = vpop.f32.mrf.mxu0 }
 0x208   : > { %v11793_v1 = vadd.f32 %v1650_v23, %v11668_v20  ;;  %v11796_v9 = vadd.f32 %v1924_v15, %v11717_v40  ;;  %v3413_v20 = vpack.c.bf16 %v3391_v26, %v3390_v19  ;;  %v3414_v40 = vpack.c.bf16 %v3393_v0, %v3392_v53  ;;  %v3398_v0 = vld [vmem:[#allocation2 + $0x16a] sm:$0xff] }
 0x209   : > { %v9776_v33 = vpop.f32.mrf.mxu1  ;;  %v9804_v55 = vpop.f32.mrf.mxu0 }
 0x20a   : > { %v11799_v57 = vadd.f32 %v9776_v33, %v11673_v6  ;;  %v11802_v25 = vadd.f32 %v9804_v55, %v11723_v4 }
 0x20b   : > { %v1653_v28 = vpop.f32.mrf.mxu1  ;;  %v11804_v5 = vpop.f32.mrf.mxu0 }
 0x20c   : > { %v11807_v38 = vadd.f32 %v1653_v28, %v11678_v32  ;;  %v3394_v32 = vld [vmem:[#allocation2 + $0x13a] sm:$0xff]  ;;  %v3399_v28 = vld [vmem:[#allocation2 + $0x172] sm:$0xff] }
 0x20d   : > { %v9779_v29 = vpop.f32.mrf.mxu1  ;;  %v9807_v49 = vpop.f32.mrf.mxu0  ;;  %10018 = vmatmul.mubr.msk.bf16.gmra.mxu1 %vm388_vm2, %v3413_v20  ;;  %v3415_v15 = vpack.c.bf16 %v3395_v48, %v3394_v32 }
 0x20e   : > { %v1747_v11 = vadd.f32 %v9779_v29, %v11685_v27  ;;  %v11812_v6 = vadd.f32 %v9807_v49, %v11736_v50  ;;  %10021 = vmatprep.mubr.msk.bf16.mxu1 %vm388_vm2, %v3414_v40 }
 0x20f   : > { %v1666_v4 = vpop.f32.mrf.mxu1  ;;  %v1940_v22 = vpop.f32.mrf.mxu0 }
 0x210   : > { %v1745_v8 = vadd.f32 %v1666_v4, %v11692_v3  ;;  %v11817_v54 = vadd.f32 %v1940_v22, %v11745_v16  ;;  %v3416_v3 = vpack.c.bf16 %v3397_v12, %v3396_v63  ;;  %v3417_v4 = vpack.c.bf16 %v3399_v28, %v3398_v0 }
 0x211   : > { %v9780_v56 = vpop.f32.mrf.mxu1  ;;  %v9808_v42 = vpop.f32.mrf.mxu0 }
 0x212   : > { %v1748_v27 = vadd.f32 %v9780_v56, %v11697_v58  ;;  %v11821_v50 = vadd.f32 %v9808_v42, %v11751_v18 }
 0x213   : > { %v11823_v14 = vpop.f32.mrf.mxu1  ;;  %v11825_v23 = vpop.f32.mrf.mxu0 }
 0x215   : > { %v9783_v19 = vpop.f32.mrf.mxu1  ;;  %v9811_v16 = vpop.f32.mrf.mxu0  ;;  %10022 = vmatmul.mubr.msk.bf16.gmra.mxu1 %vm388_vm2, %v3415_v15 }
 0x216   : > { %v1751_v26 = vadd.f32 %v9783_v19, %v11706_v30  ;;  %v11830_v33 = vadd.f32 %v9811_v16, %v11764_v62  ;;  %10025 = vmatprep.mubr.msk.bf16.mxu1 %vm388_vm2, %v3416_v3 }
 0x217   : > { %v1682_v58 = vpop.f32.mrf.mxu1  ;;  %v1956_v18 = vpop.f32.mrf.mxu0 }
 0x218   : > { %v1749_v55 = vadd.f32 %v1682_v58, %v11714_v35  ;;  %v11835_v53 = vadd.f32 %v1956_v18, %v11771_v39 }
 0x219   : > { %v9784_v20 = vpop.f32.mrf.mxu1  ;;  %v9812_v40 = vpop.f32.mrf.mxu0 }
 0x21a   : > { %v1752_v29 = vadd.f32 %v9784_v20, %v11720_v41  ;;  %v11839_v30 = vadd.f32 %v9812_v40, %v11777_v37  ;;  %v3402_v41 = vld [vmem:[#allocation2 + $0x19a] sm:$0xff]  ;;  %v3403_v37 = vld [vmem:[#allocation2 + $0x1a2] sm:$0xff] }
 0x21b   : > { %v11841_v62 = vpop.f32.mrf.mxu1  ;;  %v11843_v49 = vpop.f32.mrf.mxu0  ;;  %v3419_v3 = vpack.c.bf16 %v3403_v37, %v3402_v41 }
 0x21c   : > { %14082 = vst [vmem:[#allocation8_spill] sm:$0xff] %v11841_v62 }
 0x21d   : > { %v9787_v22 = vpop.f32.mrf.mxu1  ;;  %v9815_v32 = vpop.f32.mrf.mxu0  ;;  %10026 = vmatmul.mubr.msk.bf16.gmra.mxu1 %vm388_vm2, %v3417_v4 }
 0x21e   : > { %v1755_v35 = vadd.f32 %v9787_v22, %v11733_v24  ;;  %v11848_v39 = vadd.f32 %v9815_v32, %v11786_v17  ;;  %10029 = vmatprep.mubr.msk.bf16.mxu1 %vm388_vm2, %v11573_v47 }
 0x21f   : > { %v1698_v48 = vpop.f32.mrf.mxu1  ;;  %v1972_v56 = vpop.f32.mrf.mxu0 }
 0x220   : > { %v1753_v42 = vadd.f32 %v1698_v48, %v11742_v60  ;;  %v11854_v63 = vadd.f32 %v1972_v56, %v11793_v1 }
 0x221   : > { %v9788_v12 = vpop.f32.mrf.mxu1  ;;  %v9816_v15 = vpop.f32.mrf.mxu0 }
 0x222   : > { %v1756_v24 = vadd.f32 %v9788_v12, %v11748_v36  ;;  %v11858_v17 = vadd.f32 %v9816_v15, %v11799_v57 }
 0x223   : > { %v11860_v19 = vpop.f32.mrf.mxu1  ;;  %v11862_v47 = vpop.f32.mrf.mxu0 }
 0x224   : > { %14083 = vst [vmem:[#allocation9_spill] sm:$0xff] %v11860_v19 }
 0x225   : > { %v9791_v16 = vpop.f32.mrf.mxu1  ;;  %v9819_v58 = vpop.f32.mrf.mxu0  ;;  %10030 = vmatmul.mubr.msk.bf16.gmra.mxu1 %vm388_vm2, %v3419_v3 }
 0x226   : > { %v1759_v60 = vadd.f32 %v9791_v16, %v11761_v45  ;;  %v11866_v1 = vadd.f32 %v9819_v58, %v1747_v11 }
 0x227   : > { %v1714_v18 = vpop.f32.mrf.mxu1  ;;  %v1988_v0 = vpop.f32.mrf.mxu0 }
 0x228   : > { %v1757_v28 = vadd.f32 %v1714_v18, %v11768_v13  ;;  %v11869_v36 = vadd.f32 %v1988_v0, %v1745_v8 }
 0x229   : > { %v9792_v57 = vpop.f32.mrf.mxu1  ;;  %v9820_v20 = vpop.f32.mrf.mxu0 }
 0x22a   : > { %v1760_v40 = vadd.f32 %v9792_v57, %v11774_v46  ;;  %v11872_v4 = vadd.f32 %v9820_v20, %v1748_v27 }
 0x22b   : > { %v11874_v22 = vpop.f32.mrf.mxu1  ;;  %v11876_v32 = vpop.f32.mrf.mxu0 }
 0x22c   : > { %14084 = vst [vmem:[#allocation10_spill] sm:$0xff] %v11874_v22 }
 0x22d   : > { %v9823_v41 = vpop.f32.mrf.mxu0  ;;  %v9843_v45 = vpop.f32.mrf.mxu1 }
 0x22e   : > { %v11878_v11 = vadd.f32 %v9823_v41, %v1751_v26  ;;  %v2375_v37 = vadd.f32 %v9843_v45, %v11789_v43 }
 0x22f   : > { %v2004_v48 = vpop.f32.mrf.mxu0  ;;  %v2246_v13 = vpop.f32.mrf.mxu1 }
 0x230   : > { %v11881_v8 = vadd.f32 %v2004_v48, %v1749_v55  ;;  %v2373_v56 = vadd.f32 %v2246_v13, %v11796_v9 }
 0x231   : > { %v9824_v12 = vpop.f32.mrf.mxu0  ;;  %v9844_v46 = vpop.f32.mrf.mxu1 }
 0x232   : > { %v11884_v27 = vadd.f32 %v9824_v12, %v1752_v29  ;;  %v2376_v15 = vadd.f32 %v9844_v46, %v11802_v25 }
 0x233   : > { %v11887_v3 = vpop.f32.mrf.mxu0  ;;  %v11889_v16 = vpop.f32.mrf.mxu1 }
 0x234   : > { %14085 = vst [vmem:[#allocation11_spill] sm:$0xff] %v11887_v3 }
 0x235   : > { %v9827_v26 = vpop.f32.mrf.mxu0  ;;  %v9847_v58 = vpop.f32.mrf.mxu1 }
 0x236   : > { %v11891_v18 = vadd.f32 %v9827_v26, %v1755_v35  ;;  %v2379_v43 = vadd.f32 %v9847_v58, %v11812_v6 }
 0x237   : > { %v2020_v55 = vpop.f32.mrf.mxu0  ;;  %v2262_v0 = vpop.f32.mrf.mxu1 }
 0x238   : > { %v11894_v57 = vadd.f32 %v2020_v55, %v1753_v42  ;;  %v2377_v9 = vadd.f32 %v2262_v0, %v11817_v54 }
 0x239   : > { %v9828_v29 = vpop.f32.mrf.mxu0  ;;  %v9848_v20 = vpop.f32.mrf.mxu1 }
 0x23a   : > { %v11897_v41 = vadd.f32 %v9828_v29, %v1756_v24  ;;  %v2380_v25 = vadd.f32 %v9848_v20, %v11821_v50 }
 0x23b   : > { %v11900_v45 = vpop.f32.mrf.mxu0  ;;  %v11902_v48 = vpop.f32.mrf.mxu1 }
 0x23c   : > { %14086 = vst [vmem:[#allocation12_spill] sm:$0xff] %v11900_v45 }
 0x23d   : > { %v9831_v35 = vpop.f32.mrf.mxu0  ;;  %v9851_v13 = vpop.f32.mrf.mxu1 }
 0x23e   : > { %v11904_v12 = vadd.f32 %v9831_v35, %v1759_v60  ;;  %v2383_v6 = vadd.f32 %v9851_v13, %v11830_v33 }
 0x23f   : > { %v2036_v42 = vpop.f32.mrf.mxu0  ;;  %v2278_v46 = vpop.f32.mrf.mxu1 }
 0x240   : > { %v11907_v26 = vadd.f32 %v2036_v42, %v1757_v28  ;;  %v2381_v54 = vadd.f32 %v2278_v46, %v11835_v53 }
 0x241   : > { %v9832_v24 = vpop.f32.mrf.mxu0  ;;  %v9852_v58 = vpop.f32.mrf.mxu1 }
 0x242   : > { %v11910_v55 = vadd.f32 %v9832_v24, %v1760_v40  ;;  %v2384_v50 = vadd.f32 %v9852_v58, %v11839_v30 }
 0x243   : > { %v11913_v0 = vpop.f32.mrf.mxu0  ;;  %v11915_v29 = vpop.f32.mrf.mxu1 }
 0x244   : > { %14087 = vst [vmem:[#allocation13_spill] sm:$0xff] %v11913_v0 }
 0x245   : > { %v9855_v60 = vpop.f32.mrf.mxu1  ;;  %v9883_v20 = vpop.f32.mrf.mxu0 }
 0x246   : > { %v2387_v33 = vadd.f32 %v9855_v60, %v11848_v39  ;;  %v11918_v35 = vadd.f32 %v9883_v20, %v2375_v37 }
 0x247   : > { %v2294_v28 = vpop.f32.mrf.mxu1  ;;  %v2568_v13 = vpop.f32.mrf.mxu0 }
 0x248   : > { %v2385_v53 = vadd.f32 %v2294_v28, %v11854_v63  ;;  %v11921_v42 = vadd.f32 %v2568_v13, %v2373_v56 }
 0x249   : > { %v9856_v40 = vpop.f32.mrf.mxu1  ;;  %v9884_v46 = vpop.f32.mrf.mxu0 }
 0x24a   : > { %v2388_v30 = vadd.f32 %v9856_v40, %v11858_v17  ;;  %v11924_v24 = vadd.f32 %v9884_v46, %v2376_v15 }
 0x24b   : > { %v11926_v58 = vpop.f32.mrf.mxu1  ;;  %v11928_v0 = vpop.f32.mrf.mxu0 }
 0x24d   : > { %v9859_v22 = vpop.f32.mrf.mxu1  ;;  %v9887_v39 = vpop.f32.mrf.mxu0 }
 0x24e   : > { %v2391_v37 = vadd.f32 %v9859_v22, %v11866_v1  ;;  %v11931_v60 = vadd.f32 %v9887_v39, %v2379_v43 }
 0x24f   : > { %v2310_v20 = vpop.f32.mrf.mxu1  ;;  %v2584_v63 = vpop.f32.mrf.mxu0 }
 0x250   : > { %v2389_v56 = vadd.f32 %v2310_v20, %v11869_v36  ;;  %v11934_v28 = vadd.f32 %v2584_v63, %v2377_v9 }
 0x251   : > { %v9860_v13 = vpop.f32.mrf.mxu1  ;;  %v9888_v17 = vpop.f32.mrf.mxu0 }
 0x252   : > { %v2392_v15 = vadd.f32 %v9860_v13, %v11872_v4  ;;  %v11937_v40 = vadd.f32 %v9888_v17, %v2380_v25 }
 0x253   : > { %v11939_v46 = vpop.f32.mrf.mxu1  ;;  %v11941_v51 = vpop.f32.mrf.mxu0 }
 0x255   : > { %v9863_v31 = vpop.f32.mrf.mxu1  ;;  %v9891_v1 = vpop.f32.mrf.mxu0 }
 0x256   : > { %v2395_v22 = vadd.f32 %v9863_v31, %v11878_v11  ;;  %v11944_v43 = vadd.f32 %v9891_v1, %v2383_v6 }
 0x257   : > { %v2326_v39 = vpop.f32.mrf.mxu1  ;;  %v2600_v36 = vpop.f32.mrf.mxu0 }
 0x258   : > { %v2393_v9 = vadd.f32 %v2326_v39, %v11881_v8  ;;  %v11947_v20 = vadd.f32 %v2600_v36, %v2381_v54 }
 0x259   : > { %v9864_v63 = vpop.f32.mrf.mxu1  ;;  %v9892_v4 = vpop.f32.mrf.mxu0 }
 0x25a   : > { %v2396_v25 = vadd.f32 %v9864_v63, %v11884_v27  ;;  %v11950_v13 = vadd.f32 %v9892_v4, %v2384_v50 }
 0x25b   : > { %v11952_v17 = vpop.f32.mrf.mxu1  ;;  %v11954_v45 = vpop.f32.mrf.mxu0 }
 0x25c   : > { %14088 = vst [vmem:[#allocation14_spill] sm:$0xff] %v11952_v17 }
 0x25d   : > { %v9867_v19 = vpop.f32.mrf.mxu1  ;;  %v9895_v31 = vpop.f32.mrf.mxu0 }
 0x25e   : > { %v2399_v11 = vadd.f32 %v9867_v19, %v11891_v18  ;;  %v11957_v6 = vadd.f32 %v9895_v31, %v2387_v33 }
 0x25f   : > { %v2342_v1 = vpop.f32.mrf.mxu1  ;;  %v2616_v8 = vpop.f32.mrf.mxu0 }
 0x260   : > { %v2397_v54 = vadd.f32 %v2342_v1, %v11894_v57  ;;  %v11960_v39 = vadd.f32 %v2616_v8, %v2385_v53 }
 0x261   : > { %v9868_v36 = vpop.f32.mrf.mxu1  ;;  %v9896_v27 = vpop.f32.mrf.mxu0 }
 0x262   : > { %v2400_v50 = vadd.f32 %v9868_v36, %v11897_v41  ;;  %v11963_v63 = vadd.f32 %v9896_v27, %v2388_v30 }
 0x263   : > { %v11965_v4 = vpop.f32.mrf.mxu1  ;;  %v11967_v44 = vpop.f32.mrf.mxu0 }
 0x264   : > { %14089 = vst [vmem:[#allocation15_spill] sm:$0xff] %v11965_v4 }
 0x265   : > { %v9871_v52 = vpop.f32.mrf.mxu1  ;;  %v9899_v19 = vpop.f32.mrf.mxu0 }
 0x266   : > { %v2403_v18 = vadd.f32 %v9871_v52, %v11904_v12  ;;  %v11970_v33 = vadd.f32 %v9899_v19, %v2391_v37 }
 0x267   : > { %v2358_v31 = vpop.f32.mrf.mxu1  ;;  %v2632_v57 = vpop.f32.mrf.mxu0 }
 0x268   : > { %v2401_v53 = vadd.f32 %v2358_v31, %v11907_v26  ;;  %v11973_v1 = vadd.f32 %v2632_v57, %v2389_v56 }
 0x269   : > { %v9872_v8 = vpop.f32.mrf.mxu1  ;;  %v9900_v41 = vpop.f32.mrf.mxu0 }
 0x26a   : > { %v11976_v30 = vadd.f32 %v9872_v8, %v11910_v55  ;;  %v11978_v36 = vadd.f32 %v9900_v41, %v2392_v15 }
 0x26b   : > { %v11980_v27 = vpop.f32.mrf.mxu1  ;;  %v11982_v4 = vpop.f32.mrf.mxu0 }
 0x26c   : > { %14090 = vst [vmem:[#allocation16_spill] sm:$0xff] %v11976_v30  ;;  %14091 = vst [vmem:[#allocation17_spill] sm:$0xff] %v11980_v27 }
 0x26d   : > { %14092 = vst [vmem:[#allocation18_spill] sm:$0xff] %v11982_v4  ;;  %v9903_v52 = vpop.f32.mrf.mxu0  ;;  %v9923_v12 = vpop.f32.mrf.mxu1 }
 0x26e   : > { %v11984_v37 = vadd.f32 %v9903_v52, %v2395_v22  ;;  %v3020_v19 = vadd.f32 %v9923_v12, %v11918_v35 }
 0x26f   : > { %v2648_v26 = vpop.f32.mrf.mxu0  ;;  %v2891_v56 = vpop.f32.mrf.mxu1 }
 0x270   : > { %v11987_v31 = vadd.f32 %v2648_v26, %v2393_v9  ;;  %v3018_v57 = vadd.f32 %v2891_v56, %v11921_v42 }
 0x271   : > { %v9904_v55 = vpop.f32.mrf.mxu0  ;;  %v9924_v8 = vpop.f32.mrf.mxu1 }
 0x272   : > { %v11990_v15 = vadd.f32 %v9904_v55, %v2396_v25  ;;  %v3021_v41 = vadd.f32 %v9924_v8, %v11924_v24 }
 0x273   : > { %v11993_v30 = vpop.f32.mrf.mxu0  ;;  %v11995_v27 = vpop.f32.mrf.mxu1 }
 0x274   : > { %14093 = vst [vmem:[#allocation19_spill] sm:$0xff] %v11993_v30 }
 0x275   : > { %v9907_v22 = vpop.f32.mrf.mxu0  ;;  %v9927_v52 = vpop.f32.mrf.mxu1 }
 0x276   : > { %v11997_v17 = vadd.f32 %v9907_v22, %v2399_v11  ;;  %v3024_v35 = vadd.f32 %v9927_v52, %v11931_v60 }
 0x277   : > { %v2664_v9 = vpop.f32.mrf.mxu0  ;;  %v2907_v12 = vpop.f32.mrf.mxu1 }
 0x278   : > { %v12000_v26 = vadd.f32 %v2664_v9, %v2397_v54  ;;  %v3022_v42 = vadd.f32 %v2907_v12, %v11934_v28 }
 0x279   : > { %v9908_v25 = vpop.f32.mrf.mxu0  ;;  %v9928_v56 = vpop.f32.mrf.mxu1 }
 0x27a   : > { %v12003_v55 = vadd.f32 %v9908_v25, %v2400_v50  ;;  %v3025_v24 = vadd.f32 %v9928_v56, %v11937_v40 }
 0x27b   : > { %v12006_v8 = vpop.f32.mrf.mxu0  ;;  %v12008_v30 = vpop.f32.mrf.mxu1 }
 0x27c   : > { %14094 = vst [vmem:[#allocation20_spill] sm:$0xff] %v12006_v8 }
 0x27d   : > { %v9911_v11 = vpop.f32.mrf.mxu0  ;;  %v9931_v22 = vpop.f32.mrf.mxu1 }
 0x27e   : > { %v12010_v3 = vadd.f32 %v9911_v11, %v2403_v18  ;;  %v12013_v60 = vadd.f32 %v9931_v22, %v11944_v43 }
 0x27f   : > { %v2680_v54 = vpop.f32.mrf.mxu0  ;;  %v2923_v52 = vpop.f32.mrf.mxu1 }
 0x280   : > { %v2723_v28 = vadd.f32 %v2680_v54, %v2401_v53  ;;  %v12016_v9 = vadd.f32 %v2923_v52, %v11947_v20 }
 0x281   : > { %v12018_v50 = vpop.f32.mrf.mxu0  ;;  %v9932_v40 = vpop.f32.mrf.mxu1 }
 0x282   : > { %14095 = vst [vmem:[#allocation21_spill] sm:$0xff] %v12018_v50  ;;  %v12021_v12 = vadd.f32 %v9932_v40, %v11950_v13 }
 0x283   : > { %v12023_v25 = vpop.f32.mrf.mxu0  ;;  %v12025_v56 = vpop.f32.mrf.mxu1 }
 0x284   : > { %14096 = vst [vmem:[#allocation22_spill] sm:$0xff] %v12023_v25 }
 0x285   : > { %v9935_v18 = vpop.f32.mrf.mxu1  ;;  %v9963_v11 = vpop.f32.mrf.mxu0 }
 0x286   : > { %v12028_v43 = vadd.f32 %v9935_v18, %v11957_v6  ;;  %v3342_v22 = vadd.f32 %v9963_v11, %v3020_v19 }
 0x287   : > { %v2939_v53 = vpop.f32.mrf.mxu1  ;;  %v3213_v54 = vpop.f32.mrf.mxu0 }
 0x288   : > { %v12031_v20 = vadd.f32 %v2939_v53, %v11960_v39  ;;  %v3340_v52 = vadd.f32 %v3213_v54, %v3018_v57  ;;  %v10563_v57 = vld [vmem:[%s14066_s1 + $0x4] ss:$8 sps:$4 sm:$0xff]  }
 0x289   : > { %v9936_v50 = vpop.f32.mrf.mxu1  ;;  %v9964_v8 = vpop.f32.mrf.mxu0  ;;  %4005 = vmatprep.mubr.bf16.mxu0 %v10563_v57 }
 0x28a   : > { %v12034_v13 = vadd.f32 %v9936_v50, %v11963_v63  ;;  %v3343_v40 = vadd.f32 %v9964_v8, %v3021_v41 }
 0x28b   : > { %v12036_v25 = vpop.f32.mrf.mxu1  ;;  %v3216_v62 = vpop.f32.mrf.mxu0 }
 0x28d   : > { %v9939_v4 = vpop.f32.mrf.mxu1  ;;  %v9967_v2 = vpop.f32.mrf.mxu0 }
 0x28e   : > { %v12039_v6 = vadd.f32 %v9939_v4, %v11970_v33  ;;  %v12041_v19 = vadd.f32 %v9967_v2, %v3024_v35 }
 0x28f   : > { %v2955_v18 = vpop.f32.mrf.mxu1  ;;  %v3229_v39 = vpop.f32.mrf.mxu0 }
 0x290   : > { %v12047_v63 = vadd.f32 %v2955_v18, %v11973_v1  ;;  %v12049_v41 = vadd.f32 %v3229_v39, %v3022_v42 }
 0x291   : > { %v9940_v8 = vpop.f32.mrf.mxu1  ;;  %v9968_v50 = vpop.f32.mrf.mxu0 }
 0x292   : > { %v12052_v11 = vadd.f32 %v9940_v8, %v11978_v36  ;;  %v12054_v4 = vadd.f32 %v9968_v50, %v3025_v24 }
 0x293   : > { %v12056_v2 = vpop.f32.mrf.mxu1  ;;  %v12058_v33 = vpop.f32.mrf.mxu0 }
 0x294   : > { %14097 = vst [vmem:[#allocation23_spill] sm:$0xff] %v12052_v11  ;;  %14098 = vst [vmem:[#allocation24_spill] sm:$0xff] %v12056_v2 }
 0x295   : > { %v9943_v35 = vpop.f32.mrf.mxu1  ;;  %v12060_v53 = vpop.f32.mrf.mxu0 }
 0x296   : > { %v12063_v1 = vadd.f32 %v9943_v35, %v11984_v37 }
 0x297   : > { %v2971_v42 = vpop.f32.mrf.mxu1  ;;  %v12065_v54 = vpop.f32.mrf.mxu0 }
 0x298   : > { %14099 = vst [vmem:[#allocation25_spill] sm:$0xff] %v12063_v1  ;;  %v12068_v18 = vadd.f32 %v2971_v42, %v11987_v31 }
 0x299   : > { %v9944_v36 = vpop.f32.mrf.mxu1  ;;  %v12070_v39 = vpop.f32.mrf.mxu0 }
 0x29a   : > { %14100 = vst [vmem:[#allocation26_spill] sm:$0xff] %v12068_v18  ;;  %v12073_v24 = vadd.f32 %v9944_v36, %v11990_v15 }
 0x29b   : > { %v12075_v57 = vpop.f32.mrf.mxu1  ;;  %v12077_v8 = vpop.f32.mrf.mxu0 }
 0x29c   : > { %14101 = vst [vmem:[#allocation27_spill] sm:$0xff] %v12073_v24  ;;  %14102 = vst [vmem:[#allocation28_spill] sm:$0xff] %v12075_v57 }
 0x29d   : > { %v9947_v50 = vpop.f32.mrf.mxu1  ;;  %v12079_v11 = vpop.f32.mrf.mxu0 }
 0x29e   : > { %v12082_v37 = vadd.f32 %v9947_v50, %v11997_v17 }
 0x29f   : > { %v2987_v35 = vpop.f32.mrf.mxu1  ;;  %v12084_v1 = vpop.f32.mrf.mxu0 }
 0x2a0   : > { %14103 = vst [vmem:[#allocation29_spill] sm:$0xff] %v12082_v37  ;;  %v12087_v31 = vadd.f32 %v2987_v35, %v12000_v26  ;;  %v2052_v26 = vadd.f32 %v11804_v5, %v11728_v34 }
 0x2a1   : > { %v9948_v42 = vpop.f32.mrf.mxu1  ;;  %v12092_v36 = vpop.f32.mrf.mxu0 }
 0x2a2   : > { %14104 = vst [vmem:[#allocation30_spill] sm:$0xff] %v12087_v31  ;;  %v12090_v15 = vadd.f32 %v9948_v42, %v12003_v55  ;;  %v2374_v42 = vadd.f32 %v11889_v16, %v2052_v26 }
 0x2a3   : > { %v12094_v24 = vpop.f32.mrf.mxu1  ;;  %v12099_v17 = vpop.f32.mrf.mxu0 }
 0x2a4   : > { %14105 = vst [vmem:[#allocation31_spill] sm:$0xff] %v12090_v15  ;;  %14106 = vst [vmem:[#allocation32_spill] sm:$0xff] %v12094_v24 }
 0x2a5   : > { %v9951_v57 = vpop.f32.mrf.mxu1  ;;  %v12107_v55 = vpop.f32.mrf.mxu0 }
 0x2a6   : > { %v12097_v18 = vadd.f32 %v9951_v57, %v12010_v3  ;;  %v2696_v3 = vadd.f32 %v11928_v0, %v2374_v42 }
 0x2a7   : > { %v3003_v50 = vpop.f32.mrf.mxu1 }
 0x2a8   : > { %14107 = vst [vmem:[#allocation33_spill] sm:$0xff] %v12097_v18  ;;  %v12101_v37 = vadd.f32 %v3003_v50, %v2723_v28  ;;  %v12113_v18 = vpop.f32.mrf.mxu0  ;;  %v12118_v28 = vld [vmem:[%s14071_s6] ss:$0 sm:$0xff]  ;;  %v3019_v34 = vadd.f32 %v11995_v27, %v2696_v3 }
 0x2a9   : > { %v12103_v2 = vpop.f32.mrf.mxu1 }
 0x2aa   : > { %14108 = vst [vmem:[#allocation34_spill] sm:$0xff] %v12101_v37  ;;  %14109 = vst [vmem:[#allocation35_spill] sm:$0xff] %v12103_v2  ;;  %v3341_v16 = vadd.f32 %v3216_v62, %v3019_v34  ;;  %v2060_v34 = vadd.f32 %v11843_v49, %v11782_v7 }
 0x2ab   : > { %v12109_v35 = vpop.f32.mrf.mxu1 }
 0x2ac   : > { %14110 = vst [vmem:[#allocation36_spill] sm:$0xff] %v12109_v35  ;;  %v2056_v35 = vadd.f32 %v11825_v23, %v11756_v21 }
 0x2ad   : > { %v10003_v15 = vpop.f32.mrf.mxu1 }
 0x2ae   : > { %v3664_v57 = vadd.f32 %v10003_v15, %v3342_v22  ;;  %v2378_v22 = vadd.f32 %v11902_v48, %v2056_v35  ;;  %v12125_v15 = vpop.f32.mrf.mxu0 }
 0x2af   : > { %v3535_v50 = vpop.f32.mrf.mxu1 }
 0x2b0   : > { %v3662_v5 = vadd.f32 %v3535_v50, %v3340_v52  ;;  %v3703_v26 = vadd.f32 %v12118_v28, %v3664_v57  ;;  %v2700_v27 = vadd.f32 %v11941_v51, %v2378_v22 }
 0x2b1   : > { %v10004_v37 = vpop.f32.mrf.mxu1 }
 0x2b2   : > { %v3665_v0 = vadd.f32 %v10004_v37, %v3343_v40  ;;  %v3701_v2 = vadd.f32 %v12118_v28, %v3662_v5  ;;  %v3735_v3 = vmax.f32 %v3703_v26, 0.0  ;;  %v12132_v40 = vpop.f32.mrf.mxu0  ;;  %v3023_v37 = vadd.f32 %v12008_v30, %v2700_v27 }
 0x2b3   : > { %v3538_v42 = vpop.f32.mrf.mxu1  ;;  %v2382_v30 = vadd.f32 %v11915_v29, %v2060_v34 }
 0x2b4   : > { %v3704_v24 = vadd.f32 %v12118_v28, %v3665_v0  ;;  %v3663_v31 = vadd.f32 %v3538_v42, %v3341_v16  ;;  %v3733_v35 = vmax.f32 %v3701_v2, 0.0  ;;  %v12146_v2 = vpop.f32.mrf.mxu0  ;;  %v3350_v0 = vadd.f32 %v12060_v53, %v12013_v60 }
 0x2b5   : > { %v10007_v52 = vpop.f32.mrf.mxu1  ;;  %v3351_v53 = vadd.f32 %v12070_v39, %v12021_v12  ;;  %v3354_v39 = vadd.f32 %v12079_v11, %v12028_v43 }
 0x2b6   : > { %v3736_v21 = vmax.f32 %v3704_v24, 0.0  ;;  %v3702_v23 = vadd.f32 %v12118_v28, %v3663_v31  ;;  %v3668_v62 = vadd.f32 %v10007_v52, %v12041_v19  ;;  %v3345_v24 = vadd.f32 %v12058_v33, %v3023_v37 }
 0x2b7   : > { %v3551_v48 = vpop.f32.mrf.mxu1  ;;  %v2704_v33 = vadd.f32 %v11954_v45, %v2382_v30 }
 0x2b8   : > { %v12135_v57 = vpack.c.bf16 %v3736_v21, %v3735_v3  ;;  %v3734_v50 = vmax.f32 %v3702_v23, 0.0  ;;  %v3666_v51 = vadd.f32 %v3551_v48, %v12049_v41  ;;  %v3707_v19 = vadd.f32 %v12118_v28, %v3668_v62  ;;  %v12157_v21 = vpop.f32.mrf.mxu0 }
 0x2b9   : > { %v10008_v5 = vpop.f32.mrf.mxu1  ;;  %v3027_v29 = vadd.f32 %v12025_v56, %v2704_v33  ;;  %v3348_v3 = vadd.f32 %v12065_v54, %v12016_v9  ;;  %v2064_v48 = vadd.f32 %v11862_v47, %v11807_v38 }
 0x2ba   : > { %v12141_v31 = vpack.c.bf16 %v3734_v50, %v3733_v35  ;;  %v3669_v16 = vadd.f32 %v10008_v5, %v12054_v4  ;;  %v3705_v7 = vadd.f32 %v12118_v28, %v3666_v51  ;;  %v3739_v42 = vmax.f32 %v3707_v19, 0.0  ;;  %v12170_v51 = vpop.f32.mrf.mxu0 }
 0x2bb   : > { %v3554_v26 = vpop.f32.mrf.mxu1  ;;  %v3349_v56 = vadd.f32 %v12077_v8, %v3027_v29  ;;  %v2386_v34 = vadd.f32 %v11926_v58, %v2064_v48  ;;  %v1380_v8 = vadd.f32 %v11701_v61, %v11626_v10  ;;  %v3352_v19 = vadd.f32 %v12084_v1, %v12031_v20 }
 0x2bc   : > { %v3708_v49 = vadd.f32 %v12118_v28, %v3669_v16  ;;  %v3667_v41 = vadd.f32 %v3554_v26, %v3345_v24  ;;  %v3737_v23 = vmax.f32 %v3705_v7, 0.0  ;;  %v3355_v7 = vadd.f32 %v12092_v36, %v12034_v13 }
 0x2bd   : > { %v10011_v22 = vpop.f32.mrf.mxu1  ;;  %v2708_v24 = vadd.f32 %v11967_v44, %v2386_v34  ;;  %v1746_v43 = vadd.f32 %v11823_v14, %v1380_v8 }
 0x2be   : > { %v3740_v27 = vmax.f32 %v3708_v49, 0.0  ;;  %v3706_v4 = vadd.f32 %v12118_v28, %v3667_v41  ;;  %v3672_v52 = vadd.f32 %v10011_v22, %v3350_v0  ;;  %v12186_v49 = vpop.f32.mrf.mxu0 }
 0x2bf   : > { %v3567_v60 = vpop.f32.mrf.mxu1  ;;  %v3031_v11 = vadd.f32 %v12036_v25, %v2708_v24  ;;  %v2068_v41 = vadd.f32 %v11876_v32, %v1746_v43  ;;  %v14118_v43 = vld [vmem:[#allocation25_spill] sm:$0xff] }
 0x2c0   : > { %v12161_v62 = vpack.c.bf16 %v3740_v27, %v3739_v42  ;;  %v3738_v45 = vmax.f32 %v3706_v4, 0.0  ;;  %v3670_v37 = vadd.f32 %v3567_v60, %v3348_v3  ;;  %v3711_v9 = vadd.f32 %v12118_v28, %v3672_v52  ;;  %v9987_v36 = vpop.f32.mrf.mxu0  ;;  %v14111_v3 = vld [vmem:[#allocation5_spill] sm:$0xff]  ;;  %v14112_v60 = vld [vmem:[#allocation18_spill] sm:$0xff] }
 0x2c1   : > { %v10012_v35 = vpop.f32.mrf.mxu1  ;;  %v3353_v22 = vadd.f32 %v12099_v17, %v3031_v11  ;;  %v2390_v13 = vadd.f32 %v11939_v46, %v2068_v41  ;;  %v3358_v4 = vadd.f32 %v12107_v55, %v12039_v6  ;;  %v1396_v17 = vadd.f32 %v14111_v3, %v11649_v59  ;;  %v14113_v6 = vld [vmem:[#allocation8_spill] sm:$0xff]  ;;  %v14121_v41 = vld [vmem:[#allocation19_spill] sm:$0xff] }
 0x2c2   : > { %v12166_v50 = vpack.c.bf16 %v3738_v45, %v3737_v23  ;;  %v3673_v54 = vadd.f32 %v10012_v35, %v3351_v53  ;;  %v3709_v5 = vadd.f32 %v12118_v28, %v3670_v37  ;;  %v3743_v16 = vmax.f32 %v3711_v9, 0.0 }
 0x2c3   : > { %v3570_v12 = vpop.f32.mrf.mxu1  ;;  %v2712_v53 = vadd.f32 %v14112_v60, %v2390_v13  ;;  %v3356_v23 = vadd.f32 %v12113_v18, %v12047_v63  ;;  %v1750_v55 = vadd.f32 %v14113_v6, %v1396_v17  ;;  %v14116_v18 = vld [vmem:[#allocation11_spill] sm:$0xff]  ;;  %v3362_v11 = vadd.f32 %v12146_v2, %v14118_v43  ;;  %v14123_v2 = vld [vmem:[#allocation9_spill] sm:$0xff] }
 0x2c4   : > { %v3712_v38 = vadd.f32 %v12118_v28, %v3673_v54  ;;  %v3671_v47 = vadd.f32 %v3570_v12, %v3349_v56  ;;  %v3741_v61 = vmax.f32 %v3709_v5, 0.0  ;;  %v14114_v56 = vld [vmem:[#allocation24_spill] sm:$0xff]  ;;  %v14115_v54 = vld [vmem:[#allocation23_spill] sm:$0xff]  ;;  %v3309_v12 = vpop.f32.mrf.mxu0 }
 0x2c5   : > { %v10015_v58 = vpop.f32.mrf.mxu1  ;;  %v3035_v9 = vadd.f32 %v14114_v56, %v2712_v53  ;;  %v3359_v34 = vadd.f32 %v12125_v15, %v14115_v54  ;;  %v14125_v17 = vld [vmem:[#allocation27_spill] sm:$0xff] }
 0x2c6   : > { %v3744_v30 = vmax.f32 %v3712_v38, 0.0  ;;  %v3710_v26 = vadd.f32 %v12118_v28, %v3671_v47  ;;  %v3676_v0 = vadd.f32 %v10015_v58, %v3354_v39  ;;  %v2072_v47 = vadd.f32 %v14116_v18, %v1750_v55  ;;  %v9988_v15 = vpop.f32.mrf.mxu0 }
 0x2c7   : > { %v3583_v10 = vpop.f32.mrf.mxu1  ;;  %v3357_v24 = vadd.f32 %v12132_v40, %v3035_v9  ;;  %v3363_v60 = vadd.f32 %v12170_v51, %v14125_v17 }
 0x2c8   : > { %v12188_v44 = vpack.c.bf16 %v3744_v30, %v3743_v16  ;;  %v3742_v20 = vmax.f32 %v3710_v26, 0.0  ;;  %v3674_v1 = vadd.f32 %v3583_v10, %v3352_v19  ;;  %v3715_v14 = vadd.f32 %v12118_v28, %v3676_v0  ;;  %v14117_v30 = vld [vmem:[#allocation14_spill] sm:$0xff]  ;;  %v3312_v53 = vpop.f32.mrf.mxu0 }
 0x2c9   : > { %v10016_v33 = vpop.f32.mrf.mxu1  ;;  %v2394_v26 = vadd.f32 %v14117_v30, %v2072_v47 }
 0x2ca   : > { %v12192_v42 = vpack.c.bf16 %v3742_v20, %v3741_v61  ;;  %v3677_v25 = vadd.f32 %v10016_v33, %v3355_v7  ;;  %v3713_v52 = vadd.f32 %v12118_v28, %v3674_v1  ;;  %v3747_v46 = vmax.f32 %v3715_v14, 0.0  ;;  %v14119_v20 = vld [vmem:[#allocation3_spill] sm:$0xff]  ;;  %v14120_v1 = vld [vmem:[#allocation6_spill] sm:$0xff]  ;;  %v9991_v51 = vpop.f32.mrf.mxu0 }
 0x2cb   : > { %v3586_v27 = vpop.f32.mrf.mxu1  ;;  %v1412_v40 = vadd.f32 %v14120_v1, %v14119_v20  ;;  %v2716_v33 = vadd.f32 %v14121_v41, %v2394_v26  ;;  %v14132_v26 = vld [vmem:[#allocation30_spill] sm:$0xff]  ;;  %v14134_v1 = vld [vmem:[#allocation32_spill] sm:$0xff]  ;;  %v14135_v41 = vld [vmem:[#allocation31_spill] sm:$0xff] }
 0x2cc   : > { %v3716_v29 = vadd.f32 %v12118_v28, %v3677_v25  ;;  %v3675_v32 = vadd.f32 %v3586_v27, %v3353_v22  ;;  %v3745_v39 = vmax.f32 %v3713_v52, 0.0  ;;  %v14122_v22 = vld [vmem:[#allocation26_spill] sm:$0xff] }
 0x2cd   : > { %v10019_v45 = vpop.f32.mrf.mxu1  ;;  %v3360_v14 = vadd.f32 %v12157_v21, %v14122_v22  ;;  %v14126_v21 = vld [vmem:[#allocation12_spill] sm:$0xff]  ;;  %v14133_v20 = vld [vmem:[#allocation10_spill] sm:$0xff]  ;;  %v3325_v22 = vpop.f32.mrf.mxu0 }
 0x2ce   : > { %v3748_v48 = vmax.f32 %v3716_v29, 0.0  ;;  %v3714_v37 = vadd.f32 %v12118_v28, %v3675_v32  ;;  %v3680_v35 = vadd.f32 %v10019_v45, %v3358_v4  ;;  %v1754_v29 = vadd.f32 %v14123_v2, %v1412_v40  ;;  %v14124_v32 = vld [vmem:[#allocation28_spill] sm:$0xff] }
 0x2cf   : > { %v3599_v59 = vpop.f32.mrf.mxu1  ;;  %v3039_v3 = vadd.f32 %v14124_v32, %v2716_v33  ;;  %v3367_v33 = vadd.f32 %v9988_v15, %v14135_v41  ;;  %v9992_v15 = vpop.f32.mrf.mxu0 }
 0x2d0   : > { %v12210_v5 = vpack.c.bf16 %v3748_v48, %v3747_v46  ;;  %v3746_v38 = vmax.f32 %v3714_v37, 0.0  ;;  %v3678_v63 = vadd.f32 %v3599_v59, %v3356_v23  ;;  %v3719_v58 = vadd.f32 %v12118_v28, %v3680_v35 }
 0x2d1   : > { %v10020_v8 = vpop.f32.mrf.mxu1  ;;  %v2076_v35 = vadd.f32 %v14126_v21, %v1754_v29  ;;  %v3361_v55 = vadd.f32 %v12186_v49, %v3039_v3  ;;  %v14131_v49 = vld [vmem:[#allocation20_spill] sm:$0xff] }
 0x2d2   : > { %v12214_v19 = vpack.c.bf16 %v3746_v38, %v3745_v39  ;;  %v3681_v16 = vadd.f32 %v10020_v8, %v3359_v34  ;;  %v3717_v7 = vadd.f32 %v12118_v28, %v3678_v63  ;;  %v3751_v13 = vmax.f32 %v3719_v58, 0.0  ;;  %v14127_v34 = vld [vmem:[#allocation15_spill] sm:$0xff]  ;;  %v14128_v38 = vld [vmem:[#allocation29_spill] sm:$0xff] }
 0x2d3   : > { %v3602_v0 = vpop.f32.mrf.mxu1  ;;  %v2398_v59 = vadd.f32 %v14127_v34, %v2076_v35  ;;  %v3366_v63 = vadd.f32 %v9987_v36, %v14128_v38  ;;  %v14130_v58 = vld [vmem:[#allocation7_spill] sm:$0xff]  ;;  %v14140_v35 = vld [vmem:[#allocation33_spill] sm:$0xff]  ;;  %v14141_v34 = vld [vmem:[#allocation22_spill] sm:$0xff] }
 0x2d4   : > { %v3720_v10 = vadd.f32 %v12118_v28, %v3681_v16  ;;  %v3679_v61 = vadd.f32 %v3602_v0, %v3357_v24  ;;  %v3749_v45 = vmax.f32 %v3717_v7, 0.0  ;;  %v14129_v24 = vld [vmem:[#allocation4_spill] sm:$0xff]  ;;  %v3364_v0 = vadd.f32 %v3309_v12, %v14132_v26  ;;  %v14143_v38 = vld [vmem:[#allocation34_spill] sm:$0xff] }
 0x2d5   : > { %v10023_v25 = vpop.f32.mrf.mxu1  ;;  %v1428_v16 = vadd.f32 %v14130_v58, %v14129_v24  ;;  %v2720_v30 = vadd.f32 %v14131_v49, %v2398_v59  ;;  %v14142_v59 = vld [vmem:[#allocation35_spill] sm:$0xff] }
 0x2d6   : > { %v3752_v27 = vmax.f32 %v3720_v10, 0.0  ;;  %v3718_v4 = vadd.f32 %v12118_v28, %v3679_v61  ;;  %v3684_v52 = vadd.f32 %v10023_v25, %v3362_v11 }
 0x2d7   : > { %v3615_v23 = vpop.f32.mrf.mxu1  ;;  %v1758_v36 = vadd.f32 %v14133_v20, %v1428_v16  ;;  %v3043_v40 = vadd.f32 %v14134_v1, %v2720_v30  ;;  %v14144_v16 = vld [vmem:[#allocation36_spill] sm:$0xff]  ;;  %v3328_v30 = vpop.f32.mrf.mxu0 }
 0x2d8   : > { %v3750_v46 = vmax.f32 %v3718_v4, 0.0  ;;  %v3682_v48 = vadd.f32 %v3615_v23, %v3360_v14  ;;  %v12232_v37 = vpack.c.bf16 %v3752_v27, %v3751_v13  ;;  %v3723_v56 = vadd.f32 %v12118_v28, %v3684_v52  ;;  %v14136_v52 = vld [vmem:[#allocation13_spill] sm:$0xff] }
 0x2d9   : > { %v10024_v6 = vpop.f32.mrf.mxu1  ;;  %v2080_v12 = vadd.f32 %v14136_v52, %v1758_v36  ;;  %v3365_v29 = vadd.f32 %v3312_v53, %v3043_v40 }
 0x2da   : > { %v3685_v9 = vadd.f32 %v10024_v6, %v3363_v60  ;;  %v12237_v54 = vpack.c.bf16 %v3750_v46, %v3749_v45  ;;  %v3721_v18 = vadd.f32 %v12118_v28, %v3682_v48  ;;  %v3755_v11 = vmax.f32 %v3723_v56, 0.0  ;;  %v14137_v60 = vld [vmem:[#allocation17_spill] sm:$0xff]  ;;  %v14138_v45 = vld [vmem:[#allocation16_spill] sm:$0xff] }
 0x2db   : > { %v3618_v39 = vpop.f32.mrf.mxu1  ;;  %v2402_v23 = vadd.f32 %v14137_v60, %v2080_v12  ;;  %v14139_v46 = vld [vmem:[#allocation21_spill] sm:$0xff]  ;;  %v3370_v6 = vadd.f32 %v9991_v51, %v14140_v35 }
 0x2dc   : > { %v3724_v47 = vadd.f32 %v12118_v28, %v3685_v9  ;;  %v3683_v8 = vadd.f32 %v3618_v39, %v3361_v55  ;;  %v3753_v25 = vmax.f32 %v3721_v18, 0.0  ;;  %v2726_v48 = vadd.f32 %v14139_v46, %v14138_v45  ;;  %v10585_v60 = vld [vmem:[%s14066_s1 + $0x80] ss:$8 sps:$4 sm:$0xff]   ;;  %v10588_v45 = vld [vmem:[%s14066_s1 + $0x90] ss:$8 sps:$4 sm:$0xff]  }
 0x2dd   : > { %v10027_v43 = vpop.f32.mrf.mxu1  ;;  %v2724_v53 = vadd.f32 %v14141_v34, %v2402_v23  ;;  %v10590_v23 = vld [vmem:[%s14066_s1 + $0x94] ss:$8 sps:$4 sm:$0xff]   ;;  %v10593_v46 = vld [vmem:[%s14066_s1 + $0xa4] ss:$8 sps:$4 sm:$0xff]   ;;  %v10603_v34 = vld [vmem:[%s14066_s1 + $0xe0] ss:$8 sps:$4 sm:$0xff]  }
 0x2de   : > { %v3756_v7 = vmax.f32 %v3724_v47, 0.0  ;;  %v3722_v10 = vadd.f32 %v12118_v28, %v3683_v8  ;;  %v3688_v61 = vadd.f32 %v10027_v43, %v3366_v63  ;;  %v3049_v39 = vadd.f32 %v14142_v59, %v2726_v48  ;;  %v10591_v48 = vld [vmem:[%s14066_s1 + $0xa0] ss:$8 sps:$4 sm:$0xff]   ;;  %v10599_v35 = vld [vmem:[%s14066_s1 + $0xc4] ss:$8 sps:$4 sm:$0xff]  }
 0x2df   : > { %v3631_v14 = vpop.f32.mrf.mxu1  ;;  %v3368_v63 = vadd.f32 %v3325_v22, %v14143_v38  ;;  %v3047_v49 = vadd.f32 %v14144_v16, %v2724_v53  ;;  %v10608_v53 = vld [vmem:[%s14066_s1 + $0xf4] ss:$8 sps:$4 sm:$0xff]   ;;  %v10606_v59 = vld [vmem:[%s14066_s1 + $0xf0] ss:$8 sps:$4 sm:$0xff]  }
 0x2e0   : > { %v3754_v13 = vmax.f32 %v3722_v10, 0.0  ;;  %v3686_v27 = vadd.f32 %v3631_v14, %v3364_v0  ;;  %v3808_v4 = vpack.c.bf16 %v3756_v7, %v3755_v11  ;;  %v3727_v32 = vadd.f32 %v12118_v28, %v3688_v61  ;;  %v10610_v38 = vld [vmem:[%s14072_s7 + $0x30] sm:$0xff]   ;;  %v12398_v16 = vld [vmem:[%s14072_s7 + $0x78] sm:$0xff]  }
 0x2e1   : > { %v10028_v2 = vpop.f32.mrf.mxu1  ;;  %v3371_v51 = vadd.f32 %v9992_v15, %v3049_v39  ;;  %v3369_v61 = vadd.f32 %v3328_v30, %v3047_v49  ;;  %v10596_v15 = vld [vmem:[%s14066_s1 + $0xb4] ss:$8 sps:$4 sm:$0xff]  }
 0x2e2   : > { %v3689_v3 = vadd.f32 %v10028_v2, %v3367_v33  ;;  %v3807_v17 = vpack.c.bf16 %v3754_v13, %v3753_v25  ;;  %v3725_v55 = vadd.f32 %v12118_v28, %v3686_v27  ;;  %v3759_v47 = vmax.f32 %v3727_v32, 0.0  ;;  %v10584_v32 = vld [vmem:[%s14066_s1 + $0x74] ss:$8 sps:$4 sm:$0xff]  }
 0x2e3   : > { %v3634_v21 = vpop.f32.mrf.mxu1  ;;  %v10609_v39 = vld [vmem:[%s14072_s7 + $0x38] sm:$0xff]  }
 0x2e4   : > { %v3728_v56 = vadd.f32 %v12118_v28, %v3689_v3  ;;  %v3687_v9 = vadd.f32 %v3634_v21, %v3365_v29  ;;  %v3757_v0 = vmax.f32 %v3725_v55, 0.0  ;;  %v10579_v29 = vld [vmem:[%s14066_s1 + $0x60] ss:$8 sps:$4 sm:$0xff]   ;;  %v10582_v3 = vld [vmem:[%s14066_s1 + $0x70] ss:$8 sps:$4 sm:$0xff]   ;;  %10033 = vmatprep.subr.bf16.mxu1 %v10609_v39 }
 0x2e5   : > { %v10031_v18 = vpop.f32.mrf.mxu1  ;;  %v10594_v21 = vld [vmem:[%s14066_s1 + $0xb0] ss:$8 sps:$4 sm:$0xff]   ;;  %v10602_v55 = vld [vmem:[%s14066_s1 + $0xd4] ss:$8 sps:$4 sm:$0xff]   ;;  %10034 = vmatpush3.bf16.msra.mxu1 %v10609_v39 }
 0x2e6   : > { %v3760_v8 = vmax.f32 %v3728_v56, 0.0  ;;  %v3726_v24 = vadd.f32 %v12118_v28, %v3687_v9  ;;  %v3692_v58 = vadd.f32 %v10031_v18, %v3370_v6  ;;  %v10597_v6 = vld [vmem:[%s14066_s1 + $0xc0] ss:$8 sps:$4 sm:$0xff]   ;;  %v10600_v56 = vld [vmem:[%s14066_s1 + $0xd0] ss:$8 sps:$4 sm:$0xff]   ;;  %10035 = vmatprep.subr.bf16.mxu1 %v10610_v38 }
 0x2e7   : > { %v3647_v26 = vpop.f32.mrf.mxu1  ;;  %v10605_v9 = vld [vmem:[%s14066_s1 + $0xe4] ss:$8 sps:$4 sm:$0xff]  }
 0x2e8   : > { %v3758_v43 = vmax.f32 %v3726_v24, 0.0  ;;  %v3690_v11 = vadd.f32 %v3647_v26, %v3368_v63  ;;  %v3810_v7 = vpack.c.bf16 %v3760_v8, %v3759_v47  ;;  %v3731_v20 = vadd.f32 %v12118_v28, %v3692_v58  ;;  %v10611_v63 = vld [vmem:[%s14072_s7 + $0x28] sm:$0xff]   ;;  %v10612_v18 = vld [vmem:[%s14072_s7 + $0x20] sm:$0xff]   ;;  %v10613_v47 = vld [vmem:[%s14072_s7 + $0x18] sm:$0xff]  }
 0x2e9   : > { %v10032_v10 = vpop.f32.mrf.mxu1  ;;  %10036 = vmatpush3.bf16.msra.mxu1 %v10610_v38  ;;  %v10614_v8 = vld [vmem:[%s14072_s7 + $0x10] sm:$0xff]   ;;  %v10615_v24 = vld [vmem:[%s14072_s7 + $0x8] sm:$0xff]   ;;  %v10616_v58 = vld [vmem:[%s14072_s7] sm:$0xff]  }
 0x2ea   : > { %v3693_v36 = vadd.f32 %v10032_v10, %v3371_v51  ;;  %v3809_v1 = vpack.c.bf16 %v3758_v43, %v3757_v0  ;;  %v3729_v41 = vadd.f32 %v12118_v28, %v3690_v11  ;;  %v3763_v14 = vmax.f32 %v3731_v20, 0.0  ;;  %10037 = vmatprep.subr.bf16.mxu1 %v10611_v63 }
 0x2eb   : > { %v3650_v40 = vpop.f32.mrf.mxu1 }
 0x2ec   : > { %v3732_v33 = vadd.f32 %v12118_v28, %v3693_v36  ;;  %v3691_v22 = vadd.f32 %v3650_v40, %v3369_v61  ;;  %v3761_v27 = vmax.f32 %v3729_v41, 0.0 }
 0x2ed   : > { %10038 = vmatpush3.bf16.msra.mxu1 %v10611_v63 }
 0x2ee   : > { %v3764_v25 = vmax.f32 %v3732_v33, 0.0  ;;  %v3730_v13 = vadd.f32 %v12118_v28, %v3691_v22  ;;  %v10561_v28 = vld [vmem:[%s14066_s1] ss:$8 sps:$4 sm:$0xff]   ;;  %10039 = vmatprep.subr.bf16.mxu1 %v10612_v18 }
 0x2f0   : > { %v3762_v52 = vmax.f32 %v3730_v13, 0.0  ;;  %v3812_v12 = vpack.c.bf16 %v3764_v25, %v3763_v14 }
 0x2f1   : > { %10040 = vmatpush3.bf16.msra.mxu1 %v10612_v18 }
 0x2f2   : > { %9185 = vmatprep.subr.bf16.mxu0 %v3812_v12  ;;  %v3811_v2 = vpack.c.bf16 %v3762_v52, %v3761_v27  ;;  %10041 = vmatprep.subr.bf16.mxu1 %v10613_v47 }
 0x2f3   : > { %9186 = vmatpush3.bf16.msra.mxu0 %v12210_v5  ;;  %v10575_v5 = vld [vmem:[%s14066_s1 + $0x44] ss:$8 sps:$4 sm:$0xff]  }
 0x2f4   : > { %9187 = vmatprep.subr.bf16.mxu0 %v3811_v2 }
 0x2f5   : > { %10042 = vmatpush3.bf16.msra.mxu1 %v10613_v47 }
 0x2f6   : > { %10043 = vmatprep.subr.bf16.mxu1 %v10614_v8 }
 0x2f7   : > { %9188 = vmatpush3.bf16.msra.mxu0 %v12214_v19  ;;  %v10573_v19 = vld [vmem:[%s14066_s1 + $0x40] ss:$8 sps:$4 sm:$0xff]  }
 0x2f8   : > { %9189 = vmatprep.subr.bf16.mxu0 %v3810_v7 }
 0x2f9   : > { %10044 = vmatpush3.bf16.msra.mxu1 %v10614_v8 }
 0x2fa   : > { %10045 = vmatprep.subr.bf16.mxu1 %v10615_v24 }
 0x2fb   : > { %9190 = vmatpush3.bf16.msra.mxu0 %v12188_v44  ;;  %v10566_v44 = vld [vmem:[%s14066_s1 + $0x14] ss:$8 sps:$4 sm:$0xff]  }
 0x2fc   : > { %9191 = vmatprep.subr.bf16.mxu0 %v3809_v1 }
 0x2fd   : > { %10046 = vmatpush3.bf16.msra.mxu1 %v10615_v24 }
 0x2fe   : > { %10047 = vmatprep.subr.bf16.mxu1 %v10616_v58 }
 0x2ff   : > { %9192 = vmatpush3.bf16.msra.mxu0 %v12192_v42  ;;  %v10570_v42 = vld [vmem:[%s14066_s1 + $0x30] ss:$8 sps:$4 sm:$0xff]  }
 0x300   : > { %9193 = vmatprep.subr.bf16.mxu0 %v3808_v4  ;;  %v10581_v4 = vld [vmem:[%s14066_s1 + $0x64] ss:$8 sps:$4 sm:$0xff]  }
 0x301   : > { %10048 = vmatpush3.bf16.msra.mxu1 %v10616_v58 }
 0x302   : > { %10057 = vmatprep.subr.bf16.mxu1 %v12398_v16 }
 0x303   : > { %9194 = vmatpush3.bf16.msra.mxu0 %v12161_v62  ;;  %v10564_v62 = vld [vmem:[%s14066_s1 + $0x10] ss:$8 sps:$4 sm:$0xff]  }
 0x304   : > { %9195 = vmatprep.subr.bf16.mxu0 %v3807_v17  ;;  %v10587_v17 = vld [vmem:[%s14066_s1 + $0x84] ss:$8 sps:$4 sm:$0xff]  }
 0x307   : > { %9196 = vmatpush3.bf16.msra.mxu0 %v12166_v50  ;;  %v10572_v50 = vld [vmem:[%s14066_s1 + $0x34] ss:$8 sps:$4 sm:$0xff]  }
 0x308   : > { %9197 = vmatprep.subr.bf16.mxu0 %v12232_v37  ;;  %v10578_v37 = vld [vmem:[%s14066_s1 + $0x54] ss:$8 sps:$4 sm:$0xff]  }
 0x30b   : > { %9198 = vmatpush3.bf16.msra.mxu0 %v12135_v57  ;;  %v10569_v57 = vld [vmem:[%s14066_s1 + $0x24] ss:$8 sps:$4 sm:$0xff]  }
 0x30c   : > { %9199 = vmatprep.subr.bf16.mxu0 %v12237_v54  ;;  %v10576_v54 = vld [vmem:[%s14066_s1 + $0x50] ss:$8 sps:$4 sm:$0xff]  }
 0x30f   : > { %9200 = vmatpush3.bf16.msra.mxu0 %v12141_v31  ;;  %v10567_v31 = vld [vmem:[%s14066_s1 + $0x20] ss:$8 sps:$4 sm:$0xff]  }
 0x312   : > { %4006 = vmatmul.mubr.bf16.vlgmr.msra.gmra.mxu0 %v10561_v28 }
 0x313   : > { %4013 = vmatprep.mubr.bf16.mxu0 %v10566_v44 }
 0x31a   : > { %4014 = vmatmul.mubr.bf16.gmra.mxu0 %v10564_v62 }
 0x31b   : > { %4021 = vmatprep.mubr.bf16.mxu0 %v10569_v57 }
 0x322   : > { %4022 = vmatmul.mubr.bf16.gmra.mxu0 %v10567_v31 }
 0x323   : > { %4029 = vmatprep.mubr.bf16.mxu0 %v10572_v50 }
 0x32a   : > { %4030 = vmatmul.mubr.bf16.gmra.mxu0 %v10570_v42 }
 0x32b   : > { %4037 = vmatprep.mubr.bf16.mxu0 %v10575_v5 }
 0x332   : > { %4038 = vmatmul.mubr.bf16.gmra.mxu0 %v10573_v19 }
 0x333   : > { %4045 = vmatprep.mubr.bf16.mxu0 %v10578_v37 }
 0x33a   : > { %4046 = vmatmul.mubr.bf16.gmra.mxu0 %v10576_v54 }
 0x33b   : > { %4053 = vmatprep.mubr.bf16.mxu0 %v10581_v4 }
 0x342   : > { %4054 = vmatmul.mubr.bf16.gmra.mxu0 %v10579_v29 }
 0x343   : > { %4061 = vmatprep.mubr.bf16.mxu0 %v10584_v32 }
 0x34a   : > { %4062 = vmatmul.mubr.bf16.gmra.mxu0 %v10582_v3 }
 0x34b   : > { %4069 = vmatprep.mubr.bf16.mxu0 %v10587_v17 }
 0x352   : > { %4070 = vmatmul.mubr.bf16.gmra.mxu0 %v10585_v60 }
 0x353   : > { %4077 = vmatprep.mubr.bf16.mxu0 %v10590_v23 }
 0x35a   : > { %4078 = vmatmul.mubr.bf16.gmra.mxu0 %v10588_v45 }
 0x35b   : > { %4085 = vmatprep.mubr.bf16.mxu0 %v10593_v46 }
 0x362   : > { %4086 = vmatmul.mubr.bf16.gmra.mxu0 %v10591_v48 }
 0x363   : > { %4093 = vmatprep.mubr.bf16.mxu0 %v10596_v15 }
 0x36a   : > { %4094 = vmatmul.mubr.bf16.gmra.mxu0 %v10594_v21 }
 0x36b   : > { %4101 = vmatprep.mubr.bf16.mxu0 %v10599_v35 }
 0x372   : > { %4102 = vmatmul.mubr.bf16.gmra.mxu0 %v10597_v6 }
 0x373   : > { %4109 = vmatprep.mubr.bf16.mxu0 %v10602_v55 }
 0x37a   : > { %4110 = vmatmul.mubr.bf16.gmra.mxu0 %v10600_v56 }
 0x37b   : > { %4117 = vmatprep.mubr.bf16.mxu0 %v10605_v9 }
 0x382   : > { %4118 = vmatmul.mubr.bf16.gmra.mxu0 %v10603_v34 }
 0x383   : > { %4125 = vmatprep.mubr.bf16.mxu0 %v10608_v53 }
 0x38a   : > { %4126 = vmatmul.mubr.bf16.gmra.mxu0 %v10606_v59 }
 0x3d2   : > { %v9201_v49 = vpop.f32.mrf.mxu0 }
 0x3d4   : > { %v9202_v51 = vpop.f32.mrf.mxu0 }
 0x3d5   : > { %v12401_v30 = vadd.f32 %v9202_v51, %v9201_v49 }
 0x3d6   : > { %v9204_v26 = vpop.f32.mrf.mxu0 }
 0x3d8   : > { %v9205_v0 = vpop.f32.mrf.mxu0 }
 0x3d9   : > { %v9206_v62 = vadd.f32 %v9205_v0, %v9204_v26 }
 0x3da   : > { %v9207_v43 = vpop.f32.mrf.mxu0 }
 0x3dc   : > { %v9208_v11 = vpop.f32.mrf.mxu0 }
 0x3dd   : > { %v12403_v7 = vadd.f32 %v9208_v11, %v9207_v43 }
 0x3de   : > { %v9210_v10 = vpop.f32.mrf.mxu0 }
 0x3e0   : > { %v9211_v61 = vpop.f32.mrf.mxu0 }
 0x3e1   : > { %v12417_v4 = vadd.f32 %v9211_v61, %v9210_v10 }
 0x3e2   : > { %v9213_v20 = vpop.f32.mrf.mxu0 }
 0x3e4   : > { %v9214_v36 = vpop.f32.mrf.mxu0 }
 0x3e5   : > { %v12405_v1 = vadd.f32 %v9214_v36, %v9213_v20 }
 0x3e6   : > { %v9216_v40 = vpop.f32.mrf.mxu0 }
 0x3e8   : > { %v9217_v41 = vpop.f32.mrf.mxu0 }
 0x3e9   : > { %v12427_v48 = vadd.f32 %v9217_v41, %v9216_v40 }
 0x3ea   : > { %v9219_v33 = vpop.f32.mrf.mxu0 }
 0x3ec   : > { %v9220_v22 = vpop.f32.mrf.mxu0 }
 0x3ed   : > { %v12407_v14 = vadd.f32 %v9220_v22, %v9219_v33 }
 0x3ee   : > { %v9222_v25 = vpop.f32.mrf.mxu0 }
 0x3f0   : > { %v9223_v13 = vpop.f32.mrf.mxu0 }
 0x3f1   : > { %v12437_v53 = vadd.f32 %v9223_v13, %v9222_v25 }
 0x3f2   : > { %v9225_v27 = vpop.f32.mrf.mxu0 }
 0x3f4   : > { %v9226_v52 = vpop.f32.mrf.mxu0 }
 0x3f5   : > { %v12409_v12 = vadd.f32 %v9226_v52, %v9225_v27 }
 0x3f6   : > { %v9228_v2 = vpop.f32.mrf.mxu0 }
 0x3f7   : > { %v4134_v28 = vmax.f32 %v12401_v30, %v12409_v12 }
 0x3f8   : > { %v9229_v44 = vpop.f32.mrf.mxu0 }
 0x3f9   : > { %v9230_v57 = vadd.f32 %v9229_v44, %v9228_v2 }
 0x3fa   : > { %v9231_v31 = vpop.f32.mrf.mxu0 }
 0x3fb   : > { %v4135_v50 = vmax.f32 %v9206_v62, %v9230_v57 }
 0x3fc   : > { %v9232_v42 = vpop.f32.mrf.mxu0 }
 0x3fd   : > { %v12413_v5 = vadd.f32 %v9232_v42, %v9231_v31 }
 0x3fe   : > { %v9234_v19 = vpop.f32.mrf.mxu0 }
 0x3ff   : > { %v4136_v37 = vmax.f32 %v12403_v7, %v12413_v5 }
 0x400   : > { %v9235_v54 = vpop.f32.mrf.mxu0 }
 0x401   : > { %v12419_v29 = vadd.f32 %v9235_v54, %v9234_v19 }
 0x402   : > { %v9237_v32 = vpop.f32.mrf.mxu0 }
 0x403   : > { %v4137_v3 = vmax.f32 %v12417_v4, %v12419_v29 }
 0x404   : > { %v9238_v17 = vpop.f32.mrf.mxu0 }
 0x405   : > { %v12423_v60 = vadd.f32 %v9238_v17, %v9237_v32 }
 0x406   : > { %v9240_v23 = vpop.f32.mrf.mxu0 }
 0x407   : > { %v4138_v45 = vmax.f32 %v12405_v1, %v12423_v60 }
 0x408   : > { %v9241_v46 = vpop.f32.mrf.mxu0 }
 0x409   : > { %v12429_v15 = vadd.f32 %v9241_v46, %v9240_v23 }
 0x40a   : > { %v9243_v21 = vpop.f32.mrf.mxu0 }
 0x40b   : > { %v4139_v35 = vmax.f32 %v12427_v48, %v12429_v15 }
 0x40c   : > { %v9244_v6 = vpop.f32.mrf.mxu0 }
 0x40d   : > { %v12433_v55 = vadd.f32 %v9244_v6, %v9243_v21 }
 0x40e   : > { %v9246_v56 = vpop.f32.mrf.mxu0 }
 0x40f   : > { %v4140_v9 = vmax.f32 %v12407_v14, %v12433_v55  ;;  %v10623_v14 = vld [vmem:[%s14072_s7 + $0x48] sm:$0xff]   ;;  %v10624_v55 = vld [vmem:[%s14072_s7 + $0x40] sm:$0xff]  }
 0x410   : > { %v9247_v34 = vpop.f32.mrf.mxu0 }
 0x411   : > { %v12439_v59 = vadd.f32 %v9247_v34, %v9246_v56 }
 0x412   : > { %v9249_v39 = vpop.f32.mrf.mxu0 }
 0x413   : > { %v4141_v38 = vmax.f32 %v12437_v53, %v12439_v59  ;;  %v10626_v53 = vld [vmem:[%s14072_s7 + $0xb0] sm:$0xff]   ;;  %v10627_v59 = vld [vmem:[%s14072_s7 + $0xa8] sm:$0xff]  }
 0x414   : > { %v9250_v63 = vpop.f32.mrf.mxu0 }
 0x415   : > { %v9251_v33 = vadd.f32 %v9250_v63, %v9249_v39  ;;  %v10618_v39 = vld [vmem:[%s14072_s7 + $0x70] sm:$0xff]  }
 0x416   : > { %v9252_v18 = vpop.f32.mrf.mxu0 }
 0x418   : > { %v9253_v47 = vpop.f32.mrf.mxu0 }
 0x419   : > { %v9254_v25 = vadd.f32 %v9253_v47, %v9252_v18 }
 0x41a   : > { %v9255_v8 = vpop.f32.mrf.mxu0 }
 0x41c   : > { %v9256_v24 = vpop.f32.mrf.mxu0 }
 0x41d   : > { %v9257_v42 = vadd.f32 %v9256_v24, %v9255_v8 }
 0x41e   : > { %v9258_v58 = vpop.f32.mrf.mxu0 }
 0x420   : > { %v9259_v49 = vpop.f32.mrf.mxu0 }
 0x421   : > { %v9260_v4 = vadd.f32 %v9259_v49, %v9258_v58 }
 0x422   : > { %v9261_v51 = vpop.f32.mrf.mxu0 }
 0x424   : > { %v9262_v30 = vpop.f32.mrf.mxu0 }
 0x425   : > { %v9263_v56 = vadd.f32 %v9262_v30, %v9261_v51 }
 0x426   : > { %v9264_v26 = vpop.f32.mrf.mxu0 }
 0x428   : > { %v9265_v0 = vpop.f32.mrf.mxu0 }
 0x429   : > { %v9266_v18 = vadd.f32 %v9265_v0, %v9264_v26  ;;  %v10620_v26 = vld [vmem:[%s14072_s7 + $0x60] sm:$0xff]  }
 0x42a   : > { %v9267_v43 = vpop.f32.mrf.mxu0 }
 0x42c   : > { %v9268_v11 = vpop.f32.mrf.mxu0 }
 0x42e   : > { %v9270_v10 = vpop.f32.mrf.mxu0 }
 0x430   : > { %v9271_v61 = vpop.f32.mrf.mxu0 }
 0x432   : > { %v9273_v20 = vpop.f32.mrf.mxu0 }
 0x434   : > { %v9274_v36 = vpop.f32.mrf.mxu0 }
 0x435   : > { %v9275_v40 = vadd.f32 %v9274_v36, %v9273_v20  ;;  %v9272_v20 = vadd.f32 %v9271_v61, %v9270_v10  ;;  %v10630_v10 = vld [vmem:[%s14072_s7 + $0x90] sm:$0xff]   ;;  %v10631_v61 = vld [vmem:[%s14072_s7 + $0x88] sm:$0xff]  }
 0x436   : > { %v9276_v41 = vpop.f32.mrf.mxu0 }
 0x437   : > { %v4142_v13 = vmax.f32 %v9251_v33, %v9275_v40  ;;  %v10632_v40 = vld [vmem:[%s14072_s7 + $0x80] sm:$0xff]   ;;  %v10634_v33 = vld [vmem:[%s14072_s7 + $0xf0] sm:$0xff]  }
 0x438   : > { %v9277_v22 = vpop.f32.mrf.mxu0 }
 0x439   : > { %v9278_v27 = vadd.f32 %v9277_v22, %v9276_v41  ;;  %v4150_v44 = vmax.f32 %v4134_v28, %v4142_v13  ;;  %v10633_v41 = vld [vmem:[%s14072_s7 + $0xf8] sm:$0xff]   ;;  %v10635_v22 = vld [vmem:[%s14072_s7 + $0xe8] sm:$0xff]  }
 0x43a   : > { %v9279_v52 = vpop.f32.mrf.mxu0  ;;  %v10637_v13 = vld [vmem:[%s14072_s7 + $0xd8] sm:$0xff]  }
 0x43b   : > { %v4143_v12 = vmax.f32 %v9254_v25, %v9278_v27  ;;  %v10636_v25 = vld [vmem:[%s14072_s7 + $0xe0] sm:$0xff]   ;;  %v10638_v27 = vld [vmem:[%s14072_s7 + $0xd0] sm:$0xff]  }
 0x43c   : > { %v9280_v2 = vpop.f32.mrf.mxu0 }
 0x43d   : > { %v4151_v62 = vmax.f32 %v4135_v50, %v4143_v12  ;;  %v9281_v57 = vadd.f32 %v9280_v2, %v9279_v52  ;;  %v10639_v52 = vld [vmem:[%s14072_s7 + $0xc8] sm:$0xff]   ;;  %v10640_v12 = vld [vmem:[%s14072_s7 + $0xc0] sm:$0xff]  }
 0x43e   : > { %v9282_v31 = vpop.f32.mrf.mxu0 }
 0x43f   : > { %v12443_v19 = vpack.c.bf16 %v4151_v62, %v4150_v44  ;;  %v4144_v29 = vmax.f32 %v9257_v42, %v9281_v57  ;;  %v12555_v44 = vld [vmem:[%s14073_s8] ss:$0 sm:$0xff] }
 0x440   : > { %v9283_v54 = vpop.f32.mrf.mxu0 }
 0x441   : > { %v9284_v32 = vadd.f32 %v9283_v54, %v9282_v31  ;;  %10049 = vmatprep.mubr.bf16.mxu1 %v12443_v19  ;;  %v4152_v21 = vmax.f32 %v4136_v37, %v4144_v29  ;;  %v10619_v37 = vld [vmem:[%s14072_s7 + $0x68] sm:$0xff]  }
 0x442   : > { %v9285_v17 = vpop.f32.mrf.mxu0 }
 0x443   : > { %v4145_v23 = vmax.f32 %v9260_v4, %v9284_v32 }
 0x444   : > { %v9286_v46 = vpop.f32.mrf.mxu0 }
 0x445   : > { %v4153_v28 = vmax.f32 %v4137_v3, %v4145_v23  ;;  %v9287_v50 = vadd.f32 %v9286_v46, %v9285_v17  ;;  %v10643_v17 = vld [vmem:[%s14067_s2 + $0x4] ss:$8 sps:$4 sm:$0xff]  }
 0x446   : > { %v9288_v6 = vpop.f32.mrf.mxu0  ;;  %4960 = vmatprep.mubr.bf16.mxu0 %v10643_v17 }
 0x447   : > { %v12449_v34 = vpack.c.bf16 %v4153_v28, %v4152_v21  ;;  %v4146_v47 = vmax.f32 %v9263_v56, %v9287_v50 }
 0x448   : > { %v9289_v63 = vpop.f32.mrf.mxu0 }
 0x449   : > { %v9290_v8 = vadd.f32 %v9289_v63, %v9288_v6  ;;  %10050 = vmatmul.mubr.bf16.vlgmr.msra.gmra.mxu1 %v12449_v34  ;;  %v4154_v24 = vmax.f32 %v4138_v45, %v4146_v47  ;;  %v10621_v45 = vld [vmem:[%s14072_s7 + $0x58] sm:$0xff]  }
 0x44a   : > { %10058 = vmatpush3.bf16.msra.mxu1 %v12398_v16  ;;  %v9291_v7 = vpop.f32.mrf.mxu0  ;;  %v9269_v16 = vadd.f32 %v9268_v11, %v9267_v43  ;;  %v10622_v43 = vld [vmem:[%s14072_s7 + $0x50] sm:$0xff]   ;;  %v10629_v11 = vld [vmem:[%s14072_s7 + $0x98] sm:$0xff]  }
 0x44b   : > { %v4147_v5 = vmax.f32 %v9266_v18, %v9290_v8  ;;  %10059 = vmatprep.subr.bf16.mxu1 %v10618_v39 }
 0x44c   : > { %v9292_v3 = vpop.f32.mrf.mxu0 }
 0x44d   : > { %v4155_v58 = vmax.f32 %v4139_v35, %v4147_v5  ;;  %v9293_v49 = vadd.f32 %v9292_v3, %v9291_v7 }
 0x44e   : > { %10060 = vmatpush3.bf16.msra.mxu1 %v10618_v39  ;;  %v9294_v51 = vpop.f32.mrf.mxu0 }
 0x44f   : > { %10061 = vmatprep.subr.bf16.mxu1 %v10619_v37  ;;  %v12465_v30 = vpack.c.bf16 %v4155_v58, %v4154_v24  ;;  %v4148_v36 = vmax.f32 %v9269_v16, %v9293_v49 }
 0x450   : > { %v9295_v0 = vpop.f32.mrf.mxu0 }
 0x451   : > { %v9296_v1 = vadd.f32 %v9295_v0, %v9294_v51  ;;  %10053 = vmatprep.mubr.bf16.mxu1 %v12465_v30  ;;  %v4156_v48 = vmax.f32 %v4140_v9, %v4148_v36  ;;  %v10625_v9 = vld [vmem:[%s14072_s7 + $0xb8] sm:$0xff]  }
 0x452   : > { %10062 = vmatpush3.bf16.msra.mxu1 %v10619_v37 }
 0x453   : > { %v4149_v60 = vmax.f32 %v9272_v20, %v9296_v1  ;;  %10063 = vmatprep.subr.bf16.mxu1 %v10620_v26 }
 0x455   : > { %v4157_v15 = vmax.f32 %v4141_v38, %v4149_v60  ;;  %v10628_v38 = vld [vmem:[%s14072_s7 + $0xa0] sm:$0xff]  }
 0x456   : > { %10064 = vmatpush3.bf16.msra.mxu1 %v10620_v26 }
 0x457   : > { %10065 = vmatprep.subr.bf16.mxu1 %v10621_v45  ;;  %v12480_v35 = vpack.c.bf16 %v4157_v15, %v4156_v48 }
 0x459   : > { %10054 = vmatmul.mubr.bf16.gmra.mxu1 %v12480_v35 }
 0x45a   : > { %10066 = vmatpush3.bf16.msra.mxu1 %v10621_v45  ;;  %10073 = vmatprep.mubr.bf16.mxu1 %v12443_v19 }
 0x45b   : > { %10067 = vmatprep.subr.bf16.mxu1 %v10622_v43 }
 0x45e   : > { %10068 = vmatpush3.bf16.msra.mxu1 %v10622_v43 }
 0x45f   : > { %10069 = vmatprep.subr.bf16.mxu1 %v10623_v14 }
 0x462   : > { %10070 = vmatpush3.bf16.msra.mxu1 %v10623_v14 }
 0x463   : > { %10071 = vmatprep.subr.bf16.mxu1 %v10624_v55 }
 0x466   : > { %10072 = vmatpush3.bf16.msra.mxu1 %v10624_v55 }
 0x467   : > { %10081 = vmatprep.subr.bf16.mxu1 %v10625_v9 }
 0x469   : > { %10074 = vmatmul.mubr.bf16.vlgmr.msra.gmra.mxu1 %v12449_v34 }
 0x46a   : > { %10077 = vmatprep.mubr.bf16.mxu1 %v12465_v30  ;;  %10082 = vmatpush3.bf16.msra.mxu1 %v10625_v9 }
 0x46b   : > { %10083 = vmatprep.subr.bf16.mxu1 %v10626_v53 }
 0x46e   : > { %10084 = vmatpush3.bf16.msra.mxu1 %v10626_v53 }
 0x46f   : > { %10085 = vmatprep.subr.bf16.mxu1 %v10627_v59 }
 0x471   : > { %10078 = vmatmul.mubr.bf16.gmra.mxu1 %v12480_v35 }
 0x472   : > { %10086 = vmatpush3.bf16.msra.mxu1 %v10627_v59  ;;  %10097 = vmatprep.mubr.bf16.mxu1 %v12443_v19 }
 0x473   : > { %10087 = vmatprep.subr.bf16.mxu1 %v10628_v38 }
 0x476   : > { %10088 = vmatpush3.bf16.msra.mxu1 %v10628_v38 }
 0x477   : > { %10089 = vmatprep.subr.bf16.mxu1 %v10629_v11 }
 0x47a   : > { %10090 = vmatpush3.bf16.msra.mxu1 %v10629_v11 }
 0x47b   : > { %10091 = vmatprep.subr.bf16.mxu1 %v10630_v10 }
 0x47e   : > { %10092 = vmatpush3.bf16.msra.mxu1 %v10630_v10 }
 0x47f   : > { %10093 = vmatprep.subr.bf16.mxu1 %v10631_v61 }
 0x482   : > { %10094 = vmatpush3.bf16.msra.mxu1 %v10631_v61 }
 0x483   : > { %10095 = vmatprep.subr.bf16.mxu1 %v10632_v40 }
 0x486   : > { %10096 = vmatpush3.bf16.msra.mxu1 %v10632_v40 }
 0x487   : > { %10105 = vmatprep.subr.bf16.mxu1 %v10633_v41 }
 0x489   : > { %10098 = vmatmul.mubr.bf16.vlgmr.msra.gmra.mxu1 %v12449_v34 }
 0x48a   : > { %10101 = vmatprep.mubr.bf16.mxu1 %v12465_v30  ;;  %10106 = vmatpush3.bf16.msra.mxu1 %v10633_v41 }
 0x48b   : > { %10107 = vmatprep.subr.bf16.mxu1 %v10634_v33 }
 0x48e   : > { %10108 = vmatpush3.bf16.msra.mxu1 %v10634_v33 }
 0x48f   : > { %10109 = vmatprep.subr.bf16.mxu1 %v10635_v22 }
 0x491   : > { %10102 = vmatmul.mubr.bf16.gmra.mxu1 %v12480_v35 }
 0x492   : > { %10110 = vmatpush3.bf16.msra.mxu1 %v10635_v22  ;;  %10121 = vmatprep.mubr.bf16.mxu1 %v12443_v19 }
 0x493   : > { %10111 = vmatprep.subr.bf16.mxu1 %v10636_v25 }
 0x496   : > { %10112 = vmatpush3.bf16.msra.mxu1 %v10636_v25 }
 0x497   : > { %10113 = vmatprep.subr.bf16.mxu1 %v10637_v13 }
 0x49a   : > { %10114 = vmatpush3.bf16.msra.mxu1 %v10637_v13 }
 0x49b   : > { %10115 = vmatprep.subr.bf16.mxu1 %v10638_v27 }
 0x49e   : > { %10116 = vmatpush3.bf16.msra.mxu1 %v10638_v27 }
 0x49f   : > { %10117 = vmatprep.subr.bf16.mxu1 %v10639_v52 }
 0x4a2   : > { %10118 = vmatpush3.bf16.msra.mxu1 %v10639_v52 }
 0x4a3   : > { %10119 = vmatprep.subr.bf16.mxu1 %v10640_v12 }
 0x4a6   : > { %10120 = vmatpush3.bf16.msra.mxu1 %v10640_v12 }
 0x4a9   : > { %10122 = vmatmul.mubr.bf16.vlgmr.msra.gmra.mxu1 %v12449_v34 }
 0x4aa   : > { %10125 = vmatprep.mubr.bf16.mxu1 %v12465_v30 }
 0x4b1   : > { %10126 = vmatmul.mubr.bf16.gmra.mxu1 %v12480_v35 }
 0x509   : > { %v10051_v2 = vpop.f32.mrf.mxu1 }
 0x50a   : > { %v4276_v57 = vadd.f32 %v10051_v2, %v12555_v44 }
 0x50b   : > { %v12557_v62 = vpop.f32.mrf.mxu1 }
 0x50c   : > { %v4300_v19 = vmax.f32 %v4276_v57, 0.0 }
 0x50d   : > { %v10052_v31 = vpop.f32.mrf.mxu1 }
 0x50e   : > { %v4279_v42 = vadd.f32 %v10052_v31, %v12555_v44 }
 0x50f   : > { %v12563_v29 = vpop.f32.mrf.mxu1 }
 0x510   : > { %v4301_v54 = vmax.f32 %v4279_v42, 0.0 }
 0x512   : > { %v12561_v4 = vpack.c.bf16 %v4301_v54, %v4300_v19 }
 0x519   : > { %v10055_v32 = vpop.f32.mrf.mxu1 }
 0x51a   : > { %v4292_v46 = vadd.f32 %v10055_v32, %v12555_v44 }
 0x51b   : > { %v12568_v23 = vpop.f32.mrf.mxu1 }
 0x51c   : > { %v4304_v50 = vmax.f32 %v4292_v46, 0.0 }
 0x51d   : > { %v10056_v21 = vpop.f32.mrf.mxu1 }
 0x51e   : > { %v4295_v28 = vadd.f32 %v10056_v21, %v12555_v44 }
 0x51f   : > { %v12574_v34 = vpop.f32.mrf.mxu1 }
 0x520   : > { %v4305_v6 = vmax.f32 %v4295_v28, 0.0 }
 0x522   : > { %v12572_v56 = vpack.c.bf16 %v4305_v6, %v4304_v50 }
 0x529   : > { %v10075_v39 = vpop.f32.mrf.mxu1 }
 0x52a   : > { %v4414_v42 = vadd.f32 %v10075_v39, %v12555_v44 }
 0x52b   : > { %v4405_v63 = vpop.f32.mrf.mxu1 }
 0x52d   : > { %v10076_v18 = vpop.f32.mrf.mxu1 }
 0x52e   : > { %v4417_v27 = vadd.f32 %v10076_v18, %v12555_v44  ;;  %v4438_v18 = vmax.f32 %v4414_v42, 0.0  ;;  %v10670_v42 = vld [vmem:[%s14067_s2 + $0x94] ss:$8 sps:$4 sm:$0xff]  }
 0x52f   : > { %v4408_v47 = vpop.f32.mrf.mxu1 }
 0x530   : > { %v4439_v17 = vmax.f32 %v4417_v27, 0.0  ;;  %v4409_v46 = vadd.f32 %v12555_v44, %v4408_v47  ;;  %v10661_v27 = vld [vmem:[%s14067_s2 + $0x64] ss:$8 sps:$4 sm:$0xff]  }
 0x531   : > { %v10079_v8 = vpop.f32.mrf.mxu1 }
 0x532   : > { %v4430_v35 = vadd.f32 %v10079_v8, %v12555_v44  ;;  %v4406_v8 = vadd.f32 %v12555_v44, %v4405_v63  ;;  %v4287_v63 = vadd.f32 %v12555_v44, %v12574_v34 }
 0x533   : > { %v4421_v7 = vpop.f32.mrf.mxu1 }
 0x534   : > { %v4442_v40 = vmax.f32 %v4430_v35, 0.0  ;;  %v4422_v41 = vadd.f32 %v12555_v44, %v4421_v7  ;;  %v4436_v47 = vmax.f32 %v4406_v8, 0.0  ;;  %v5177_v8 = vld [vmem:[#allocation2 + $0x1] sm:$0xff] }
 0x535   : > { %v10080_v5 = vpop.f32.mrf.mxu1 }
 0x536   : > { %v4433_v45 = vadd.f32 %v10080_v5, %v12555_v44  ;;  %v4440_v19 = vmax.f32 %v4422_v41, 0.0  ;;  %v4725_v5 = vpack.c.bf16 %v4439_v17, %v4438_v18  ;;  %v10650_v41 = vld [vmem:[%s14067_s2 + $0x30] ss:$8 sps:$4 sm:$0xff]  }
 0x537   : > { %v4424_v37 = vpop.f32.mrf.mxu1  ;;  %v10690_v17 = vld [vmem:[%s14074_s9 + $0x30] sm:$0xff]  }
 0x538   : > { %v4443_v9 = vmax.f32 %v4433_v45, 0.0  ;;  %v4425_v53 = vadd.f32 %v12555_v44, %v4424_v37  ;;  %v4437_v37 = vmax.f32 %v4409_v46, 0.0  ;;  %v10671_v46 = vld [vmem:[%s14067_s2 + $0xa0] ss:$8 sps:$4 sm:$0xff]   ;;  %v10694_v18 = vld [vmem:[%s14074_s9 + $0x70] sm:$0xff]  }
 0x53a   : > { %v4727_v52 = vpack.c.bf16 %v4443_v9, %v4442_v40  ;;  %v4441_v12 = vmax.f32 %v4425_v53, 0.0  ;;  %v10652_v40 = vld [vmem:[%s14067_s2 + $0x34] ss:$8 sps:$4 sm:$0xff]  }
 0x53c   : > { %v4726_v21 = vpack.c.bf16 %v4441_v12, %v4440_v19  ;;  %v10664_v12 = vld [vmem:[%s14067_s2 + $0x74] ss:$8 sps:$4 sm:$0xff]   ;;  %v10668_v19 = vld [vmem:[%s14067_s2 + $0x90] ss:$8 sps:$4 sm:$0xff]  }
 0x549   : > { %v12576_v3 = vpop.f32.mrf.mxu1 }
 0x54b   : > { %v12578_v24 = vpop.f32.mrf.mxu1 }
 0x54c   : > { %v4544_v9 = vadd.f32 %v12555_v44, %v12578_v24 }
 0x54d   : > { %v12580_v58 = vpop.f32.mrf.mxu1 }
 0x54f   : > { %v12582_v49 = vpop.f32.mrf.mxu1 }
 0x550   : > { %v4547_v34 = vadd.f32 %v12555_v44, %v12582_v49  ;;  %v4574_v49 = vmax.f32 %v4544_v9, 0.0 }
 0x551   : > { %v10103_v51 = vpop.f32.mrf.mxu1 }
 0x552   : > { %v4568_v39 = vadd.f32 %v10103_v51, %v12555_v44  ;;  %v4555_v51 = vadd.f32 %v12580_v58, %v12555_v44 }
 0x553   : > { %v4559_v16 = vpop.f32.mrf.mxu1 }
 0x555   : > { %v10104_v30 = vpop.f32.mrf.mxu1 }
 0x556   : > { %v4571_v28 = vadd.f32 %v10104_v30, %v12555_v44  ;;  %v4560_v30 = vadd.f32 %v12555_v44, %v4559_v16  ;;  %v4303_v16 = vmax.f32 %v4287_v63, 0.0  ;;  %v10683_v63 = vld [vmem:[%s14067_s2 + $0xe0] ss:$8 sps:$4 sm:$0xff]  }
 0x557   : > { %v4562_v26 = vpop.f32.mrf.mxu1 }
 0x558   : > { %v4578_v35 = vmax.f32 %v4560_v30, 0.0  ;;  %v10685_v30 = vld [vmem:[%s14067_s2 + $0xe4] ss:$8 sps:$4 sm:$0xff]  }
 0x569   : > { %v10123_v0 = vpop.f32.mrf.mxu1 }
 0x56a   : > { %v4690_v33 = vadd.f32 %v10123_v0, %v12555_v44  ;;  %v4581_v0 = vmax.f32 %v4571_v28, 0.0  ;;  %v10691_v28 = vld [vmem:[%s14074_s9 + $0x28] sm:$0xff]  }
 0x56b   : > { %v4681_v20 = vpop.f32.mrf.mxu1 }
 0x56c   : > { %v4714_v54 = vmax.f32 %v4690_v33, 0.0  ;;  %v4682_v32 = vadd.f32 %v12555_v44, %v4681_v20  ;;  %v4563_v20 = vadd.f32 %v12555_v44, %v4562_v26  ;;  %v4552_v26 = vadd.f32 %v12576_v3, %v12555_v44  ;;  %v10655_v33 = vld [vmem:[%s14067_s2 + $0x44] ss:$8 sps:$4 sm:$0xff]  }
 0x56d   : > { %v10124_v36 = vpop.f32.mrf.mxu1 }
 0x56e   : > { %v4693_v38 = vadd.f32 %v10124_v36, %v12555_v44  ;;  %v4712_v7 = vmax.f32 %v4682_v32, 0.0  ;;  %v4576_v58 = vmax.f32 %v4552_v26, 0.0  ;;  %v10689_v32 = vld [vmem:[%s14074_s9 + $0x38] sm:$0xff]  }
 0x56f   : > { %v4684_v1 = vpop.f32.mrf.mxu1  ;;  %10129 = vmatprep.subr.bf16.mxu1 %v10689_v32 }
 0x570   : > { %v4715_v2 = vmax.f32 %v4693_v38, 0.0  ;;  %v4685_v57 = vadd.f32 %v12555_v44, %v4684_v1  ;;  %v4580_v1 = vmax.f32 %v4568_v39, 0.0  ;;  %v4268_v38 = vadd.f32 %v12555_v44, %v12557_v62  ;;  %v10649_v62 = vld [vmem:[%s14067_s2 + $0x24] ss:$8 sps:$4 sm:$0xff]   ;;  %10130 = vmatpush3.bf16.msra.mxu1 %v10689_v32 }
 0x571   : > { %v10127_v60 = vpop.f32.mrf.mxu1  ;;  %10131 = vmatprep.subr.bf16.mxu1 %v10690_v17  ;;  %v5178_v39 = vld [vmem:[#allocation2 + $0x9] sm:$0xff] }
 0x572   : > { %v4706_v15 = vadd.f32 %v10127_v60, %v12555_v44  ;;  %v4733_v50 = vpack.c.bf16 %v4715_v2, %v4714_v54  ;;  %v4713_v6 = vmax.f32 %v4685_v57, 0.0  ;;  %v4724_v60 = vpack.c.bf16 %v4437_v37, %v4436_v47  ;;  %v10662_v2 = vld [vmem:[%s14067_s2 + $0x70] ss:$8 sps:$4 sm:$0xff]   ;;  %v10667_v57 = vld [vmem:[%s14067_s2 + $0x84] ss:$8 sps:$4 sm:$0xff]  }
 0x573   : > { %v4697_v48 = vpop.f32.mrf.mxu1  ;;  %v4731_v45 = vpack.c.bf16 %v4581_v0, %v4580_v1  ;;  %v10673_v54 = vld [vmem:[%s14067_s2 + $0xa4] ss:$8 sps:$4 sm:$0xff]   ;;  %v10682_v47 = vld [vmem:[%s14067_s2 + $0xd4] ss:$8 sps:$4 sm:$0xff]   ;;  %v10680_v1 = vld [vmem:[%s14067_s2 + $0xd0] ss:$8 sps:$4 sm:$0xff]  }
 0x574   : > { %v4698_v14 = vadd.f32 %v12555_v44, %v4697_v48  ;;  %v4718_v11 = vmax.f32 %v4706_v15, 0.0  ;;  %v4732_v36 = vpack.c.bf16 %v4713_v6, %v4712_v7  ;;  %v4579_v48 = vmax.f32 %v4563_v20, 0.0  ;;  %10132 = vmatpush3.bf16.msra.mxu1 %v10690_v17  ;;  %v10693_v6 = vld [vmem:[%s14074_s9 + $0x20] sm:$0xff]   ;;  %v10674_v7 = vld [vmem:[%s14067_s2 + $0xb0] ss:$8 sps:$4 sm:$0xff]   ;;  %v10695_v0 = vld [vmem:[%s14074_s9 + $0x68] sm:$0xff]  }
 0x575   : > { %v10128_v43 = vpop.f32.mrf.mxu1  ;;  %v4284_v15 = vadd.f32 %v12555_v44, %v12568_v23  ;;  %v4271_v23 = vadd.f32 %v12555_v44, %v12563_v29  ;;  %v10641_v29 = vld [vmem:[%s14067_s2] ss:$8 sps:$4 sm:$0xff]   ;;  %10133 = vmatprep.subr.bf16.mxu1 %v10691_v28  ;;  %v10679_v37 = vld [vmem:[%s14067_s2 + $0xc4] ss:$8 sps:$4 sm:$0xff]  }
 0x576   : > { %v4709_v55 = vadd.f32 %v10128_v43, %v12555_v44  ;;  %v4716_v22 = vmax.f32 %v4698_v14, 0.0  ;;  %v4577_v43 = vmax.f32 %v4555_v51, 0.0  ;;  %v4730_v14 = vpack.c.bf16 %v4579_v48, %v4578_v35  ;;  %v10696_v20 = vld [vmem:[%s14074_s9 + $0x60] sm:$0xff]   ;;  %v10686_v51 = vld [vmem:[%s14067_s2 + $0xf0] ss:$8 sps:$4 sm:$0xff]  }
 0x577   : > { %v4700_v59 = vpop.f32.mrf.mxu1  ;;  %v10700_v35 = vld [vmem:[%s14074_s9 + $0xb8] sm:$0xff]  }
 0x578   : > { %v4719_v10 = vmax.f32 %v4709_v55, 0.0  ;;  %v4701_v61 = vadd.f32 %v12555_v44, %v4700_v59  ;;  %v4302_v55 = vmax.f32 %v4284_v15, 0.0  ;;  %v4729_v53 = vpack.c.bf16 %v4577_v43, %v4576_v58  ;;  %v10644_v44 = vld [vmem:[%s14067_s2 + $0x10] ss:$8 sps:$4 sm:$0xff]   ;;  %10134 = vmatpush3.bf16.msra.mxu1 %v10691_v28 }
 0x579   : > { %v4575_v59 = vmax.f32 %v4547_v34, 0.0  ;;  %10135 = vmatprep.subr.bf16.mxu1 %v10693_v6 }
 0x57a   : > { %v4735_v25 = vpack.c.bf16 %v4719_v10, %v4718_v11  ;;  %v4717_v13 = vmax.f32 %v4701_v61, 0.0  ;;  %v4722_v3 = vpack.c.bf16 %v4303_v16, %v4302_v55  ;;  %v4299_v11 = vmax.f32 %v4271_v23, 0.0  ;;  %v10646_v61 = vld [vmem:[%s14067_s2 + $0x14] ss:$8 sps:$4 sm:$0xff]  }
 0x57b   : > { %v4728_v10 = vpack.c.bf16 %v4575_v59, %v4574_v49 }
 0x57c   : > { %9345 = vmatprep.subr.bf16.mxu0 %v4735_v25  ;;  %v4734_v31 = vpack.c.bf16 %v4717_v13, %v4716_v22  ;;  %v10653_v22 = vld [vmem:[%s14067_s2 + $0x40] ss:$8 sps:$4 sm:$0xff]   ;;  %v10658_v25 = vld [vmem:[%s14067_s2 + $0x54] ss:$8 sps:$4 sm:$0xff]   ;;  %v10656_v13 = vld [vmem:[%s14067_s2 + $0x50] ss:$8 sps:$4 sm:$0xff]   ;;  %10136 = vmatpush3.bf16.msra.mxu1 %v10693_v6 }
 0x57d   : > { %9346 = vmatpush3.bf16.msra.mxu0 %v4727_v52  ;;  %v10659_v52 = vld [vmem:[%s14067_s2 + $0x60] ss:$8 sps:$4 sm:$0xff]  }
 0x57e   : > { %9347 = vmatprep.subr.bf16.mxu0 %v4734_v31  ;;  %v10665_v31 = vld [vmem:[%s14067_s2 + $0x80] ss:$8 sps:$4 sm:$0xff]  }
 0x581   : > { %9348 = vmatpush3.bf16.msra.mxu0 %v4726_v21  ;;  %v10676_v21 = vld [vmem:[%s14067_s2 + $0xb4] ss:$8 sps:$4 sm:$0xff]  }
 0x582   : > { %9349 = vmatprep.subr.bf16.mxu0 %v4733_v50  ;;  %v10692_v50 = vld [vmem:[%s14074_s9 + $0x78] sm:$0xff]  }
 0x585   : > { %9350 = vmatpush3.bf16.msra.mxu0 %v4725_v5  ;;  %v5209_v5 = vpack.c.bf16 %v5178_v39, %v5177_v8  ;;  %v10704_v8 = vld [vmem:[%s14074_s9 + $0xa0] sm:$0xff]  }
 0x586   : > { %9351 = vmatprep.subr.bf16.mxu0 %v4732_v36  ;;  %v10677_v36 = vld [vmem:[%s14067_s2 + $0xc0] ss:$8 sps:$4 sm:$0xff]  }
 0x587   : > { %10137 = vmatprep.mubr.msk.bf16.mxu1 %vm388_vm2, %v5209_v5 }
 0x589   : > { %9352 = vmatpush3.bf16.msra.mxu0 %v4724_v60  ;;  %v10688_v60 = vld [vmem:[%s14067_s2 + $0xf4] ss:$8 sps:$4 sm:$0xff]  }
 0x58a   : > { %9353 = vmatprep.subr.bf16.mxu0 %v4731_v45  ;;  %v10697_v45 = vld [vmem:[%s14074_s9 + $0x18] sm:$0xff]  }
 0x58b   : > { %10169 = vmatprep.subr.bf16.mxu1 %v10697_v45 }
 0x58d   : > { %9354 = vmatpush3.bf16.msra.mxu0 %v12572_v56  ;;  %v4298_v56 = vmax.f32 %v4268_v38, 0.0 }
 0x58e   : > { %9355 = vmatprep.subr.bf16.mxu0 %v4730_v14 }
 0x58f   : > { %v4720_v24 = vpack.c.bf16 %v4299_v11, %v4298_v56 }
 0x591   : > { %9356 = vmatpush3.bf16.msra.mxu0 %v4722_v3 }
 0x592   : > { %9357 = vmatprep.subr.bf16.mxu0 %v4729_v53 }
 0x595   : > { %9358 = vmatpush3.bf16.msra.mxu0 %v12561_v4  ;;  %v10647_v4 = vld [vmem:[%s14067_s2 + $0x20] ss:$8 sps:$4 sm:$0xff]  }
 0x596   : > { %9359 = vmatprep.subr.bf16.mxu0 %v4728_v10 }
 0x599   : > { %9360 = vmatpush3.bf16.msra.mxu0 %v4720_v24  ;;  %v10698_v24 = vld [vmem:[%s14074_s9 + $0x10] sm:$0xff]  }
 0x59a   : > { %10249 = vmatprep.subr.bf16.mxu0 %v10692_v50 }
 0x59c   : > { %4961 = vmatmul.mubr.bf16.vlgmr.msra.gmra.mxu0 %v10641_v29 }
 0x59d   : > { %4968 = vmatprep.mubr.bf16.mxu0 %v10646_v61  ;;  %10250 = vmatpush3.bf16.msra.mxu0 %v10692_v50 }
 0x59e   : > { %10251 = vmatprep.subr.bf16.mxu0 %v10694_v18 }
 0x5a1   : > { %10252 = vmatpush3.bf16.msra.mxu0 %v10694_v18 }
 0x5a2   : > { %10253 = vmatprep.subr.bf16.mxu0 %v10695_v0 }
 0x5a4   : > { %4969 = vmatmul.mubr.bf16.gmra.mxu0 %v10644_v44 }
 0x5a5   : > { %4976 = vmatprep.mubr.bf16.mxu0 %v10649_v62  ;;  %10254 = vmatpush3.bf16.msra.mxu0 %v10695_v0  ;;  %v10699_v62 = vld [vmem:[%s14074_s9 + $0x8] sm:$0xff]  }
 0x5a6   : > { %10255 = vmatprep.subr.bf16.mxu0 %v10696_v20 }
 0x5a9   : > { %10256 = vmatpush3.bf16.msra.mxu0 %v10696_v20 }
 0x5aa   : > { %10329 = vmatprep.subr.bf16.mxu0 %v10700_v35 }
 0x5ac   : > { %4977 = vmatmul.mubr.bf16.gmra.mxu0 %v10647_v4 }
 0x5ad   : > { %4984 = vmatprep.mubr.bf16.mxu0 %v10652_v40 }
 0x5b4   : > { %4985 = vmatmul.mubr.bf16.gmra.mxu0 %v10650_v41 }
 0x5b5   : > { %4992 = vmatprep.mubr.bf16.mxu0 %v10655_v33 }
 0x5bc   : > { %4993 = vmatmul.mubr.bf16.gmra.mxu0 %v10653_v22 }
 0x5bd   : > { %5000 = vmatprep.mubr.bf16.mxu0 %v10658_v25 }
 0x5c4   : > { %5001 = vmatmul.mubr.bf16.gmra.mxu0 %v10656_v13 }
 0x5c5   : > { %5008 = vmatprep.mubr.bf16.mxu0 %v10661_v27 }
 0x5cc   : > { %5009 = vmatmul.mubr.bf16.gmra.mxu0 %v10659_v52 }
 0x5cd   : > { %5016 = vmatprep.mubr.bf16.mxu0 %v10664_v12  ;;  %v10701_v12 = vld [vmem:[%s14074_s9] sm:$0xff]  }
 0x5d4   : > { %5017 = vmatmul.mubr.bf16.gmra.mxu0 %v10662_v2  ;;  %v10702_v2 = vld [vmem:[%s14074_s9 + $0xb0] sm:$0xff]  }
 0x5d5   : > { %5024 = vmatprep.mubr.bf16.mxu0 %v10667_v57 }
 0x5dc   : > { %5025 = vmatmul.mubr.bf16.gmra.mxu0 %v10665_v31 }
 0x5dd   : > { %5032 = vmatprep.mubr.bf16.mxu0 %v10670_v42 }
 0x5e4   : > { %5033 = vmatmul.mubr.bf16.gmra.mxu0 %v10668_v19  ;;  %v10703_v19 = vld [vmem:[%s14074_s9 + $0xa8] sm:$0xff]  }
 0x5e5   : > { %5040 = vmatprep.mubr.bf16.mxu0 %v10673_v54 }
 0x5ec   : > { %5041 = vmatmul.mubr.bf16.gmra.mxu0 %v10671_v46 }
 0x5ed   : > { %5048 = vmatprep.mubr.bf16.mxu0 %v10676_v21 }
 0x5f4   : > { %5049 = vmatmul.mubr.bf16.gmra.mxu0 %v10674_v7 }
 0x5f5   : > { %5056 = vmatprep.mubr.bf16.mxu0 %v10679_v37 }
 0x5fc   : > { %5057 = vmatmul.mubr.bf16.gmra.mxu0 %v10677_v36 }
 0x5fd   : > { %5064 = vmatprep.mubr.bf16.mxu0 %v10682_v47 }
 0x604   : > { %5065 = vmatmul.mubr.bf16.gmra.mxu0 %v10680_v1 }
 0x605   : > { %5072 = vmatprep.mubr.bf16.mxu0 %v10685_v30 }
 0x60c   : > { %5073 = vmatmul.mubr.bf16.gmra.mxu0 %v10683_v63 }
 0x60d   : > { %5080 = vmatprep.mubr.bf16.mxu0 %v10688_v60 }
 0x614   : > { %5081 = vmatmul.mubr.bf16.gmra.mxu0 %v10686_v51 }
 0x65c   : > { %v9361_v48 = vpop.f32.mrf.mxu0 }
 0x65e   : > { %v9362_v15 = vpop.f32.mrf.mxu0 }
 0x65f   : > { %v9363_v26 = vadd.f32 %v9362_v15, %v9361_v48 }
 0x660   : > { %v9364_v16 = vpop.f32.mrf.mxu0 }
 0x661   : > { %5089 = vst.msk [vmem:[#allocation2 + $0x19] sm:$0xff] %vm388_vm2, %v9363_v26 }
 0x662   : > { %v9365_v43 = vpop.f32.mrf.mxu0 }
 0x663   : > { %v9366_v34 = vadd.f32 %v9365_v43, %v9364_v16 }
 0x664   : > { %v9367_v14 = vpop.f32.mrf.mxu0 }
 0x665   : > { %5090 = vst.msk [vmem:[#allocation2 + $0x21] sm:$0xff] %vm388_vm2, %v9366_v34 }
 0x666   : > { %v9368_v55 = vpop.f32.mrf.mxu0 }
 0x667   : > { %v9369_v58 = vadd.f32 %v9368_v55, %v9367_v14 }
 0x668   : > { %v9370_v9 = vpop.f32.mrf.mxu0  ;;  %v5179_v53 = vld [vmem:[#allocation2 + $0x19] sm:$0xff] }
 0x669   : > { %5091 = vst.msk [vmem:[#allocation2 + $0x31] sm:$0xff] %vm388_vm2, %v9369_v58  ;;  %v6022_v49 = vld [vmem:[#allocation2 + $0x18] sm:$0xff] }
 0x66a   : > { %v9371_v23 = vpop.f32.mrf.mxu0 }
 0x66b   : > { %v9372_v3 = vadd.f32 %v9371_v23, %v9370_v9 }
 0x66c   : > { %v9373_v59 = vpop.f32.mrf.mxu0  ;;  %v5180_v38 = vld [vmem:[#allocation2 + $0x21] sm:$0xff] }
 0x66d   : > { %v6023_v11 = vld [vmem:[#allocation2 + $0x20] sm:$0xff]  ;;  %5092 = vst.msk [vmem:[#allocation2 + $0x39] sm:$0xff] %vm388_vm2, %v9372_v3  ;;  %v5210_v10 = vpack.c.bf16 %v5180_v38, %v5179_v53 }
 0x66e   : > { %v12750_v56 = vpack.c.bf16 %v6023_v11, %v6022_v49  ;;  %v9374_v29 = vpop.f32.mrf.mxu0 }
 0x66f   : > { %v9375_v61 = vadd.f32 %v9374_v29, %v9373_v59  ;;  %10138 = vmatmul.mubr.msk.bf16.vlgmr.msra.gmra.mxu1 %vm388_vm2, %v5210_v10 }
 0x670   : > { %10257 = vmatprep.mubr.msk.bf16.mxu0 %vm388_vm2, %v12750_v56  ;;  %v9376_v44 = vpop.f32.mrf.mxu0  ;;  %10170 = vmatpush3.bf16.msra.mxu1 %v10697_v45  ;;  %v5181_v41 = vld [vmem:[#allocation2 + $0x31] sm:$0xff] }
 0x671   : > { %5093 = vst.msk [vmem:[#allocation2 + $0x49] sm:$0xff] %vm388_vm2, %v9375_v61  ;;  %10171 = vmatprep.subr.bf16.mxu1 %v10698_v24  ;;  %v6024_v25 = vld [vmem:[#allocation2 + $0x30] sm:$0xff] }
 0x672   : > { %v9377_v4 = vpop.f32.mrf.mxu0 }
 0x673   : > { %v9378_v40 = vadd.f32 %v9377_v4, %v9376_v44  ;;  %v12826_v4 = vld [vmem:[%s14074_s9 + $0x58] sm:$0xff]  }
 0x674   : > { %v9379_v33 = vpop.f32.mrf.mxu0  ;;  %v5182_v22 = vld [vmem:[#allocation2 + $0x39] sm:$0xff]  ;;  %10172 = vmatpush3.bf16.msra.mxu1 %v10698_v24 }
 0x675   : > { %v6025_v13 = vld [vmem:[#allocation2 + $0x38] sm:$0xff]  ;;  %5094 = vst.msk [vmem:[#allocation2 + $0x51] sm:$0xff] %vm388_vm2, %v9378_v40  ;;  %v12763_v27 = vpack.c.bf16 %v5182_v22, %v5181_v41  ;;  %10173 = vmatprep.subr.bf16.mxu1 %v10699_v62 }
 0x676   : > { %v12765_v52 = vpack.c.bf16 %v6025_v13, %v6024_v25  ;;  %v9380_v57 = vpop.f32.mrf.mxu0 }
 0x677   : > { %v9381_v31 = vadd.f32 %v9380_v57, %v9379_v33  ;;  %10141 = vmatprep.mubr.msk.bf16.mxu1 %vm388_vm2, %v12763_v27 }
 0x678   : > { %10258 = vmatmul.mubr.msk.bf16.vlgmr.msra.gmra.mxu0 %vm388_vm2, %v12765_v52  ;;  %v9382_v42 = vpop.f32.mrf.mxu0  ;;  %10174 = vmatpush3.bf16.msra.mxu1 %v10699_v62  ;;  %v5183_v17 = vld [vmem:[#allocation2 + $0x49] sm:$0xff] }
 0x679   : > { %10330 = vmatpush3.bf16.msra.mxu0 %v10700_v35  ;;  %5095 = vst.msk [vmem:[#allocation2 + $0x61] sm:$0xff] %vm388_vm2, %v9381_v31  ;;  %10175 = vmatprep.subr.bf16.mxu1 %v10701_v12  ;;  %v6026_v28 = vld [vmem:[#allocation2 + $0x48] sm:$0xff] }
 0x67a   : > { %10331 = vmatprep.subr.bf16.mxu0 %v10702_v2  ;;  %v9383_v54 = vpop.f32.mrf.mxu0 }
 0x67b   : > { %v9384_v32 = vadd.f32 %v9383_v54, %v9382_v42  ;;  %v12842_v54 = vld [vmem:[%s14074_s9 + $0xf8] sm:$0xff]  }
 0x67c   : > { %v9385_v46 = vpop.f32.mrf.mxu0  ;;  %v5184_v21 = vld [vmem:[#allocation2 + $0x51] sm:$0xff]  ;;  %10176 = vmatpush3.bf16.msra.mxu1 %v10701_v12 }
 0x67d   : > { %v6027_v50 = vld [vmem:[#allocation2 + $0x50] sm:$0xff]  ;;  %10332 = vmatpush3.bf16.msra.mxu0 %v10702_v2  ;;  %5096 = vst.msk [vmem:[#allocation2 + $0x69] sm:$0xff] %vm388_vm2, %v9384_v32  ;;  %v12782_v6 = vpack.c.bf16 %v5184_v21, %v5183_v17  ;;  %10209 = vmatprep.subr.bf16.mxu1 %v12826_v4 }
 0x67e   : > { %v12784_v18 = vpack.c.bf16 %v6027_v50, %v6026_v28  ;;  %10333 = vmatprep.subr.bf16.mxu0 %v10703_v19  ;;  %v9386_v39 = vpop.f32.mrf.mxu0 }
 0x67f   : > { %v9387_v7 = vadd.f32 %v9386_v39, %v9385_v46  ;;  %10142 = vmatmul.mubr.msk.bf16.gmra.mxu1 %vm388_vm2, %v12782_v6 }
 0x680   : > { %10261 = vmatprep.mubr.msk.bf16.mxu0 %vm388_vm2, %v12784_v18  ;;  %v9388_v5 = vpop.f32.mrf.mxu0  ;;  %v5185_v20 = vld [vmem:[#allocation2 + $0x61] sm:$0xff] }
 0x681   : > { %10334 = vmatpush3.bf16.msra.mxu0 %v10703_v19  ;;  %5097 = vst.msk [vmem:[#allocation2 + $0x79] sm:$0xff] %vm388_vm2, %v9387_v7  ;;  %v6028_v1 = vld [vmem:[#allocation2 + $0x60] sm:$0xff] }
 0x682   : > { %10335 = vmatprep.subr.bf16.mxu0 %v10704_v8  ;;  %v9389_v37 = vpop.f32.mrf.mxu0 }
 0x683   : > { %v9390_v0 = vadd.f32 %v9389_v37, %v9388_v5 }
 0x684   : > { %v9391_v36 = vpop.f32.mrf.mxu0  ;;  %v5186_v47 = vld [vmem:[#allocation2 + $0x69] sm:$0xff] }
 0x685   : > { %v6029_v30 = vld [vmem:[#allocation2 + $0x68] sm:$0xff]  ;;  %10336 = vmatpush3.bf16.msra.mxu0 %v10704_v8  ;;  %5098 = vst.msk [vmem:[#allocation2 + $0x81] sm:$0xff] %vm388_vm2, %v9390_v0  ;;  %v12795_v63 = vpack.c.bf16 %v5186_v47, %v5185_v20 }
 0x686   : > { %v12797_v60 = vpack.c.bf16 %v6029_v30, %v6028_v1  ;;  %v9392_v51 = vpop.f32.mrf.mxu0  ;;  %10409 = vmatprep.subr.bf16.mxu0 %v12842_v54 }
 0x687   : > { %v9393_v45 = vadd.f32 %v9392_v51, %v9391_v36  ;;  %10145 = vmatprep.mubr.msk.bf16.mxu1 %vm388_vm2, %v12795_v63 }
 0x688   : > { %10262 = vmatmul.mubr.msk.bf16.gmra.mxu0 %vm388_vm2, %v12797_v60  ;;  %v9394_v48 = vpop.f32.mrf.mxu0  ;;  %v5187_v35 = vld [vmem:[#allocation2 + $0x79] sm:$0xff] }
 0x689   : > { %5099 = vst.msk [vmem:[#allocation2 + $0x91] sm:$0xff] %vm388_vm2, %v9393_v45  ;;  %v6030_v34 = vld [vmem:[#allocation2 + $0x78] sm:$0xff] }
 0x68a   : > { %v9395_v15 = vpop.f32.mrf.mxu0 }
 0x68b   : > { %v9396_v26 = vadd.f32 %v9395_v15, %v9394_v48 }
 0x68c   : > { %v9397_v16 = vpop.f32.mrf.mxu0  ;;  %v5188_v43 = vld [vmem:[#allocation2 + $0x81] sm:$0xff] }
 0x68d   : > { %v6031_v14 = vld [vmem:[#allocation2 + $0x80] sm:$0xff]  ;;  %5100 = vst.msk [vmem:[#allocation2 + $0x99] sm:$0xff] %vm388_vm2, %v9396_v26  ;;  %v12805_v55 = vpack.c.bf16 %v5188_v43, %v5187_v35 }
 0x68e   : > { %v12807_v58 = vpack.c.bf16 %v6031_v14, %v6030_v34  ;;  %v9398_v9 = vpop.f32.mrf.mxu0 }
 0x68f   : > { %v9399_v23 = vadd.f32 %v9398_v9, %v9397_v16  ;;  %10146 = vmatmul.mubr.msk.bf16.gmra.mxu1 %vm388_vm2, %v12805_v55 }
 0x690   : > { %10265 = vmatprep.mubr.msk.bf16.mxu0 %vm388_vm2, %v12807_v58  ;;  %v9400_v3 = vpop.f32.mrf.mxu0  ;;  %v5189_v38 = vld [vmem:[#allocation2 + $0x91] sm:$0xff] }
 0x691   : > { %5101 = vst.msk [vmem:[#allocation2 + $0xa9] sm:$0xff] %vm388_vm2, %v9399_v23  ;;  %v6032_v10 = vld [vmem:[#allocation2 + $0x90] sm:$0xff] }
 0x692   : > { %v9401_v53 = vpop.f32.mrf.mxu0 }
 0x693   : > { %v9402_v59 = vadd.f32 %v9401_v53, %v9400_v3 }
 0x694   : > { %v9403_v49 = vpop.f32.mrf.mxu0  ;;  %v5190_v11 = vld [vmem:[#allocation2 + $0x99] sm:$0xff] }
 0x695   : > { %v6033_v24 = vld [vmem:[#allocation2 + $0x98] sm:$0xff]  ;;  %5102 = vst.msk [vmem:[#allocation2 + $0xb1] sm:$0xff] %vm388_vm2, %v9402_v59  ;;  %v12815_v29 = vpack.c.bf16 %v5190_v11, %v5189_v38 }
 0x696   : > { %v12817_v61 = vpack.c.bf16 %v6033_v24, %v6032_v10  ;;  %v9404_v44 = vpop.f32.mrf.mxu0 }
 0x697   : > { %v9405_v62 = vadd.f32 %v9404_v44, %v9403_v49  ;;  %10149 = vmatprep.mubr.msk.bf16.mxu1 %vm388_vm2, %v12815_v29 }
 0x698   : > { %10266 = vmatmul.mubr.msk.bf16.gmra.mxu0 %vm388_vm2, %v12817_v61  ;;  %v9406_v40 = vpop.f32.mrf.mxu0  ;;  %v5191_v22 = vld [vmem:[#allocation2 + $0xa9] sm:$0xff] }
 0x699   : > { %5103 = vst.msk [vmem:[#allocation2 + $0xc1] sm:$0xff] %vm388_vm2, %v9405_v62  ;;  %v6034_v12 = vld [vmem:[#allocation2 + $0xa8] sm:$0xff] }
 0x69a   : > { %v9407_v41 = vpop.f32.mrf.mxu0 }
 0x69b   : > { %v9408_v33 = vadd.f32 %v9407_v41, %v9406_v40 }
 0x69c   : > { %v9409_v25 = vpop.f32.mrf.mxu0  ;;  %v5192_v13 = vld [vmem:[#allocation2 + $0xb1] sm:$0xff] }
 0x69d   : > { %v6035_v2 = vld [vmem:[#allocation2 + $0xb0] sm:$0xff]  ;;  %5104 = vst.msk [vmem:[#allocation2 + $0xc9] sm:$0xff] %vm388_vm2, %v9408_v33  ;;  %v12831_v57 = vpack.c.bf16 %v5192_v13, %v5191_v22 }
 0x69e   : > { %v12833_v31 = vpack.c.bf16 %v6035_v2, %v6034_v12  ;;  %v9410_v42 = vpop.f32.mrf.mxu0 }
 0x69f   : > { %v9411_v19 = vadd.f32 %v9410_v42, %v9409_v25  ;;  %10150 = vmatmul.mubr.msk.bf16.gmra.mxu1 %vm388_vm2, %v12831_v57 }
 0x6a0   : > { %10269 = vmatprep.mubr.msk.bf16.mxu0 %vm388_vm2, %v12833_v31  ;;  %v9412_v32 = vpop.f32.mrf.mxu0  ;;  %v5193_v21 = vld [vmem:[#allocation2 + $0xc1] sm:$0xff] }
 0x6a1   : > { %5105 = vst.msk [vmem:[#allocation2 + $0xd9] sm:$0xff] %vm388_vm2, %v9411_v19  ;;  %v6036_v8 = vld [vmem:[#allocation2 + $0xc0] sm:$0xff] }
 0x6a2   : > { %v9413_v17 = vpop.f32.mrf.mxu0 }
 0x6a3   : > { %v9414_v46 = vadd.f32 %v9413_v17, %v9412_v32 }
 0x6a4   : > { %v9415_v28 = vpop.f32.mrf.mxu0  ;;  %v5194_v50 = vld [vmem:[#allocation2 + $0xc9] sm:$0xff] }
 0x6a5   : > { %v6037_v39 = vld [vmem:[#allocation2 + $0xc8] sm:$0xff]  ;;  %5106 = vst.msk [vmem:[#allocation2 + $0xe1] sm:$0xff] %vm388_vm2, %v9414_v46  ;;  %v12847_v7 = vpack.c.bf16 %v5194_v50, %v5193_v21 }
 0x6a6   : > { %v12849_v5 = vpack.c.bf16 %v6037_v39, %v6036_v8  ;;  %v9416_v37 = vpop.f32.mrf.mxu0 }
 0x6a7   : > { %v9417_v0 = vadd.f32 %v9416_v37, %v9415_v28  ;;  %10153 = vmatprep.mubr.msk.bf16.mxu1 %vm388_vm2, %v12847_v7 }
 0x6a8   : > { %10270 = vmatmul.mubr.msk.bf16.gmra.mxu0 %vm388_vm2, %v12849_v5  ;;  %v9418_v20 = vpop.f32.mrf.mxu0  ;;  %v5195_v1 = vld [vmem:[#allocation2 + $0xd9] sm:$0xff] }
 0x6a9   : > { %5107 = vst.msk [vmem:[#allocation2 + $0xf1] sm:$0xff] %vm388_vm2, %v9417_v0  ;;  %v6038_v45 = vld [vmem:[#allocation2 + $0xd8] sm:$0xff] }
 0x6aa   : > { %v9419_v36 = vpop.f32.mrf.mxu0 }
 0x6ab   : > { %v9420_v47 = vadd.f32 %v9419_v36, %v9418_v20 }
 0x6ac   : > { %v9421_v30 = vpop.f32.mrf.mxu0  ;;  %v5196_v51 = vld [vmem:[#allocation2 + $0xe1] sm:$0xff] }
 0x6ad   : > { %v6039_v48 = vld [vmem:[#allocation2 + $0xe0] sm:$0xff]  ;;  %5108 = vst.msk [vmem:[#allocation2 + $0xf9] sm:$0xff] %vm388_vm2, %v9420_v47  ;;  %v12857_v15 = vpack.c.bf16 %v5196_v51, %v5195_v1 }
 0x6ae   : > { %v12859_v26 = vpack.c.bf16 %v6039_v48, %v6038_v45  ;;  %v9422_v35 = vpop.f32.mrf.mxu0 }
 0x6af   : > { %v9423_v16 = vadd.f32 %v9422_v35, %v9421_v30  ;;  %10154 = vmatmul.mubr.msk.bf16.gmra.mxu1 %vm388_vm2, %v12857_v15 }
 0x6b0   : > { %10273 = vmatprep.mubr.msk.bf16.mxu0 %vm388_vm2, %v12859_v26  ;;  %v9424_v43 = vpop.f32.mrf.mxu0  ;;  %v5197_v9 = vld [vmem:[#allocation2 + $0xf1] sm:$0xff] }
 0x6b1   : > { %5109 = vst.msk [vmem:[#allocation2 + $0x109] sm:$0xff] %vm388_vm2, %v9423_v16  ;;  %v6040_v53 = vld [vmem:[#allocation2 + $0xf0] sm:$0xff] }
 0x6b2   : > { %v9425_v34 = vpop.f32.mrf.mxu0 }
 0x6b3   : > { %v9426_v14 = vadd.f32 %v9425_v34, %v9424_v43 }
 0x6b4   : > { %v9427_v23 = vpop.f32.mrf.mxu0  ;;  %v5198_v3 = vld [vmem:[#allocation2 + $0xf9] sm:$0xff] }
 0x6b5   : > { %v6041_v59 = vld [vmem:[#allocation2 + $0xf8] sm:$0xff]  ;;  %5110 = vst.msk [vmem:[#allocation2 + $0x111] sm:$0xff] %vm388_vm2, %v9426_v14  ;;  %v12867_v38 = vpack.c.bf16 %v5198_v3, %v5197_v9 }
 0x6b6   : > { %v12869_v49 = vpack.c.bf16 %v6041_v59, %v6040_v53  ;;  %v9428_v11 = vpop.f32.mrf.mxu0 }
 0x6b7   : > { %v9429_v10 = vadd.f32 %v9428_v11, %v9427_v23  ;;  %10157 = vmatprep.mubr.msk.bf16.mxu1 %vm388_vm2, %v12867_v38 }
 0x6b8   : > { %10274 = vmatmul.mubr.msk.bf16.gmra.mxu0 %vm388_vm2, %v12869_v49  ;;  %v9430_v24 = vpop.f32.mrf.mxu0  ;;  %v5199_v40 = vld [vmem:[#allocation2 + $0x109] sm:$0xff] }
 0x6b9   : > { %5111 = vst.msk [vmem:[#allocation2 + $0x121] sm:$0xff] %vm388_vm2, %v9429_v10  ;;  %v6042_v22 = vld [vmem:[#allocation2 + $0x108] sm:$0xff] }
 0x6ba   : > { %v9431_v44 = vpop.f32.mrf.mxu0 }
 0x6bb   : > { %v9432_v62 = vadd.f32 %v9431_v44, %v9430_v24 }
 0x6bc   : > { %v9433_v41 = vpop.f32.mrf.mxu0  ;;  %v5200_v33 = vld [vmem:[#allocation2 + $0x111] sm:$0xff] }
 0x6bd   : > { %v6043_v25 = vld [vmem:[#allocation2 + $0x110] sm:$0xff]  ;;  %5112 = vst.msk [vmem:[#allocation2 + $0x129] sm:$0xff] %vm388_vm2, %v9432_v62  ;;  %v12877_v13 = vpack.c.bf16 %v5200_v33, %v5199_v40 }
 0x6be   : > { %v12879_v12 = vpack.c.bf16 %v6043_v25, %v6042_v22  ;;  %v9434_v2 = vpop.f32.mrf.mxu0  ;;  %v5121_v22 = vld [vmem:[#allocation2] sm:$0xff]  ;;  %v5122_v25 = vld [vmem:[#allocation2 + $0x8] sm:$0xff] }
 0x6bf   : > { %v9435_v42 = vadd.f32 %v9434_v2, %v9433_v41  ;;  %10158 = vmatmul.mubr.msk.bf16.gmra.mxu1 %vm388_vm2, %v12877_v13 }
 0x6c0   : > { %10277 = vmatprep.mubr.msk.bf16.mxu0 %vm388_vm2, %v12879_v12  ;;  %v9436_v19 = vpop.f32.mrf.mxu0  ;;  %v5201_v46 = vld [vmem:[#allocation2 + $0x121] sm:$0xff] }
 0x6c1   : > { %5113 = vst.msk [vmem:[#allocation2 + $0x139] sm:$0xff] %vm388_vm2, %v9435_v42  ;;  %v6044_v50 = vld [vmem:[#allocation2 + $0x120] sm:$0xff] }
 0x6c2   : > { %v9437_v32 = vpop.f32.mrf.mxu0 }
 0x6c3   : > { %v9438_v17 = vadd.f32 %v9437_v32, %v9436_v19 }
 0x6c4   : > { %v9439_v21 = vpop.f32.mrf.mxu0  ;;  %v5202_v28 = vld [vmem:[#allocation2 + $0x129] sm:$0xff] }
 0x6c5   : > { %v6045_v8 = vld [vmem:[#allocation2 + $0x128] sm:$0xff]  ;;  %5114 = vst.msk [vmem:[#allocation2 + $0x141] sm:$0xff] %vm388_vm2, %v9438_v17  ;;  %v12887_v39 = vpack.c.bf16 %v5202_v28, %v5201_v46  ;;  %v5153_v17 = vpack.c.bf16 %v5122_v25, %v5121_v22  ;;  %v6682_v25 = vld [vmem:[#allocation2 + $0xda] sm:$0xff] }
 0x6c6   : > { %v12889_v37 = vpack.c.bf16 %v6045_v8, %v6044_v50  ;;  %v9440_v0 = vpop.f32.mrf.mxu0 }
 0x6c7   : > { %v9441_v20 = vadd.f32 %v9440_v0, %v9439_v21  ;;  %10161 = vmatprep.mubr.msk.bf16.mxu1 %vm388_vm2, %v12887_v39  ;;  %v6666_v0 = vld [vmem:[#allocation2 + $0x1a] sm:$0xff] }
 0x6c8   : > { %10278 = vmatmul.mubr.msk.bf16.gmra.mxu0 %vm388_vm2, %v12889_v37  ;;  %v9442_v36 = vpop.f32.mrf.mxu0  ;;  %v5203_v30 = vld [vmem:[#allocation2 + $0x139] sm:$0xff] }
 0x6c9   : > { %5115 = vst.msk [vmem:[#allocation2 + $0x151] sm:$0xff] %vm388_vm2, %v9441_v20  ;;  %v6046_v48 = vld [vmem:[#allocation2 + $0x138] sm:$0xff]  ;;  %v6667_v20 = vld [vmem:[#allocation2 + $0x22] sm:$0xff] }
 0x6ca   : > { %v9443_v47 = vpop.f32.mrf.mxu0 }
 0x6cb   : > { %v9444_v1 = vadd.f32 %v9443_v47, %v9442_v36 }
 0x6cc   : > { %v9445_v51 = vpop.f32.mrf.mxu0  ;;  %v5204_v45 = vld [vmem:[#allocation2 + $0x141] sm:$0xff] }
 0x6cd   : > { %v6047_v35 = vld [vmem:[#allocation2 + $0x140] sm:$0xff]  ;;  %5116 = vst.msk [vmem:[#allocation2 + $0x159] sm:$0xff] %vm388_vm2, %v9444_v1  ;;  %v12897_v16 = vpack.c.bf16 %v5204_v45, %v5203_v30  ;;  %v12926_v1 = vpack.c.bf16 %v6667_v20, %v6666_v0  ;;  %v10706_v30 = vld [vmem:[%s14074_s9 + $0x50] sm:$0xff]  }
 0x6ce   : > { %v12899_v43 = vpack.c.bf16 %v6047_v35, %v6046_v48  ;;  %v9446_v34 = vpop.f32.mrf.mxu0  ;;  %v6669_v45 = vld [vmem:[#allocation2 + $0x3a] sm:$0xff]  ;;  %v10707_v48 = vld [vmem:[%s14074_s9 + $0x48] sm:$0xff]  }
 0x6cf   : > { %v9447_v14 = vadd.f32 %v9446_v34, %v9445_v51  ;;  %10162 = vmatmul.mubr.msk.bf16.gmra.mxu1 %vm388_vm2, %v12897_v16  ;;  %v6668_v51 = vld [vmem:[#allocation2 + $0x32] sm:$0xff]  ;;  %v6670_v35 = vld [vmem:[#allocation2 + $0x4a] sm:$0xff]  ;;  %v6691_v0 = vld [vmem:[#allocation2 + $0x142] sm:$0xff] }
 0x6d0   : > { %10281 = vmatprep.mubr.msk.bf16.mxu0 %vm388_vm2, %v12899_v43  ;;  %v9448_v9 = vpop.f32.mrf.mxu0  ;;  %v5205_v53 = vld [vmem:[#allocation2 + $0x151] sm:$0xff] }
 0x6d1   : > { %5117 = vst.msk [vmem:[#allocation2 + $0x169] sm:$0xff] %vm388_vm2, %v9447_v14  ;;  %v6048_v10 = vld [vmem:[#allocation2 + $0x150] sm:$0xff] }
 0x6d2   : > { %v9449_v23 = vpop.f32.mrf.mxu0  ;;  %v6671_v34 = vld [vmem:[#allocation2 + $0x52] sm:$0xff] }
 0x6d3   : > { %v9450_v3 = vadd.f32 %v9449_v23, %v9448_v9  ;;  %v12944_v14 = vpack.c.bf16 %v6671_v34, %v6670_v35  ;;  %v6672_v9 = vld [vmem:[#allocation2 + $0x62] sm:$0xff]  ;;  %v6673_v23 = vld [vmem:[#allocation2 + $0x6a] sm:$0xff] }
 0x6d4   : > { %v9451_v59 = vpop.f32.mrf.mxu0  ;;  %v5206_v11 = vld [vmem:[#allocation2 + $0x159] sm:$0xff] }
 0x6d5   : > { %v6049_v24 = vld [vmem:[#allocation2 + $0x158] sm:$0xff]  ;;  %5118 = vst.msk [vmem:[#allocation2 + $0x171] sm:$0xff] %vm388_vm2, %v9450_v3  ;;  %v12907_v44 = vpack.c.bf16 %v5206_v11, %v5205_v53  ;;  %v6675_v53 = vld [vmem:[#allocation2 + $0x82] sm:$0xff] }
 0x6d6   : > { %v12909_v62 = vpack.c.bf16 %v6049_v24, %v6048_v10  ;;  %v9452_v40 = vpop.f32.mrf.mxu0  ;;  %v12967_v3 = vld [vmem:[%s14074_s9 + $0x98] sm:$0xff]  }
 0x6d7   : > { %v9453_v41 = vadd.f32 %v9452_v40, %v9451_v59  ;;  %10165 = vmatprep.mubr.msk.bf16.mxu1 %vm388_vm2, %v12907_v44  ;;  %v12969_v59 = vpack.c.bf16 %v6673_v23, %v6672_v9  ;;  %v6676_v10 = vld [vmem:[#allocation2 + $0x92] sm:$0xff]  ;;  %v6677_v24 = vld [vmem:[#allocation2 + $0x9a] sm:$0xff]  ;;  %v6678_v40 = vld [vmem:[#allocation2 + $0xaa] sm:$0xff] }
 0x6d8   : > { %10282 = vmatmul.mubr.msk.bf16.gmra.mxu0 %vm388_vm2, %v12909_v62  ;;  %v9454_v33 = vpop.f32.mrf.mxu0  ;;  %v5207_v19 = vld [vmem:[#allocation2 + $0x169] sm:$0xff] }
 0x6d9   : > { %5119 = vst.msk [vmem:[#allocation2 + $0x181] sm:$0xff] %vm388_vm2, %v9453_v41  ;;  %v6050_v46 = vld [vmem:[#allocation2 + $0x168] sm:$0xff]  ;;  %v6679_v41 = vld [vmem:[#allocation2 + $0xb2] sm:$0xff] }
 0x6da   : > { %v9455_v2 = vpop.f32.mrf.mxu0  ;;  %v12987_v22 = vpack.c.bf16 %v6679_v41, %v6678_v40 }
 0x6db   : > { %v9456_v42 = vadd.f32 %v9455_v2, %v9454_v33  ;;  %v12985_v33 = vpack.c.bf16 %v6677_v24, %v6676_v10  ;;  %v6683_v2 = vld [vmem:[#allocation2 + $0xe2] sm:$0xff]  ;;  %v6344_v24 = vld [vmem:[#allocation2 + $0x19] sm:$0xff] }
 0x6dc   : > { %v5208_v32 = vld [vmem:[#allocation2 + $0x171] sm:$0xff] }
 0x6dd   : > { %v6051_v21 = vld [vmem:[#allocation2 + $0x170] sm:$0xff]  ;;  %5120 = vst.msk [vmem:[#allocation2 + $0x189] sm:$0xff] %vm388_vm2, %v9456_v42  ;;  %v12917_v28 = vpack.c.bf16 %v5208_v32, %v5207_v19  ;;  %v12999_v19 = vpack.c.bf16 %v6683_v2, %v6682_v25 }
 0x6de   : > { %v12919_v50 = vpack.c.bf16 %v6051_v21, %v6050_v46  ;;  %v6686_v32 = vld [vmem:[#allocation2 + $0x10a] sm:$0xff] }
 0x6df   : > { %10166 = vmatmul.mubr.msk.bf16.gmra.mxu1 %vm388_vm2, %v12917_v28  ;;  %v6349_v25 = vld [vmem:[#allocation2 + $0x51] sm:$0xff] }
 0x6e0   : > { %10285 = vmatprep.mubr.msk.bf16.mxu0 %vm388_vm2, %v12919_v50  ;;  %10177 = vmatprep.mubr.msk.bf16.mxu1 %vm388_vm2, %v5153_v17  ;;  %v6052_v8 = vld [vmem:[#allocation2 + $0x180] sm:$0xff]  ;;  %v6687_v17 = vld [vmem:[#allocation2 + $0x112] sm:$0xff] }
 0x6e1   : > { %v13011_v21 = vpack.c.bf16 %v6687_v17, %v6686_v32  ;;  %v10718_v32 = vld [vmem:[%s14074_s9 + $0xd0] sm:$0xff]  }
 0x6e4   : > { %v6053_v36 = vld [vmem:[#allocation2 + $0x188] sm:$0xff] }
 0x6e5   : > { %v6069_v47 = vpack.c.bf16 %v6053_v36, %v6052_v8  ;;  %v6690_v8 = vld [vmem:[#allocation2 + $0x13a] sm:$0xff] }
 0x6e6   : > { %v13021_v36 = vpack.c.bf16 %v6691_v0, %v6690_v8  ;;  %v10721_v0 = vld [vmem:[%s14074_s9 + $0x118] sm:$0xff]  }
 0x6e7   : > { %10178 = vmatmul.mubr.msk.bf16.vlgmr.msra.gmra.mxu1 %vm388_vm2, %v12750_v56  ;;  %10286 = vmatmul.mubr.msk.bf16.gmra.mxu0 %vm388_vm2, %v6069_v47  ;;  %v12942_v56 = vpack.c.bf16 %v6669_v45, %v6668_v51  ;;  %v6692_v47 = vld [vmem:[#allocation2 + $0x152] sm:$0xff]  ;;  %v6694_v51 = vld [vmem:[#allocation2 + $0x16a] sm:$0xff] }
 0x6e8   : > { %10181 = vmatprep.mubr.msk.bf16.mxu1 %vm388_vm2, %v12765_v52  ;;  %10337 = vmatprep.mubr.msk.bf16.mxu0 %vm388_vm2, %v12926_v1  ;;  %v10709_v52 = vld [vmem:[%s14074_s9 + $0x40] sm:$0xff]   ;;  %v6695_v45 = vld [vmem:[#allocation2 + $0x172] sm:$0xff] }
 0x6e9   : > { %10210 = vmatpush3.bf16.msra.mxu1 %v12826_v4  ;;  %v10710_v4 = vld [vmem:[%s14074_s9 + $0xf0] sm:$0xff]   ;;  %v13030_v34 = vpack.c.bf16 %v6695_v45, %v6694_v51 }
 0x6ea   : > { %10211 = vmatprep.subr.bf16.mxu1 %v10706_v30 }
 0x6ed   : > { %10212 = vmatpush3.bf16.msra.mxu1 %v10706_v30  ;;  %v6693_v30 = vld [vmem:[#allocation2 + $0x15a] sm:$0xff] }
 0x6ee   : > { %10213 = vmatprep.subr.bf16.mxu1 %v10707_v48  ;;  %v6711_v35 = vpack.c.bf16 %v6693_v30, %v6692_v47 }
 0x6ef   : > { %10182 = vmatmul.mubr.msk.bf16.gmra.mxu1 %vm388_vm2, %v12784_v18  ;;  %10338 = vmatmul.mubr.msk.bf16.vlgmr.msra.gmra.mxu0 %vm388_vm2, %v12942_v56  ;;  %v10711_v18 = vld [vmem:[%s14074_s9 + $0xe8] sm:$0xff]  }
 0x6f0   : > { %10185 = vmatprep.mubr.msk.bf16.mxu1 %vm388_vm2, %v12797_v60  ;;  %10341 = vmatprep.mubr.msk.bf16.mxu0 %vm388_vm2, %v12944_v14  ;;  %v6674_v60 = vld [vmem:[#allocation2 + $0x7a] sm:$0xff] }
 0x6f1   : > { %10214 = vmatpush3.bf16.msra.mxu1 %v10707_v48  ;;  %10410 = vmatpush3.bf16.msra.mxu0 %v12842_v54  ;;  %v12971_v11 = vpack.c.bf16 %v6675_v53, %v6674_v60  ;;  %v10712_v54 = vld [vmem:[%s14074_s9 + $0xe0] sm:$0xff]  }
 0x6f2   : > { %10215 = vmatprep.subr.bf16.mxu1 %v10709_v52  ;;  %10411 = vmatprep.subr.bf16.mxu0 %v10710_v4 }
 0x6f5   : > { %10216 = vmatpush3.bf16.msra.mxu1 %v10709_v52  ;;  %10412 = vmatpush3.bf16.msra.mxu0 %v10710_v4  ;;  %v10714_v4 = vld [vmem:[%s14074_s9 + $0x90] sm:$0xff]  }
 0x6f6   : > { %10413 = vmatprep.subr.bf16.mxu0 %v10711_v18  ;;  %10289 = vmatprep.subr.bf16.mxu1 %v12967_v3 }
 0x6f7   : > { %10186 = vmatmul.mubr.msk.bf16.gmra.mxu1 %vm388_vm2, %v12807_v58  ;;  %10342 = vmatmul.mubr.msk.bf16.gmra.mxu0 %vm388_vm2, %v12969_v59  ;;  %v6680_v58 = vld [vmem:[#allocation2 + $0xc2] sm:$0xff] }
 0x6f8   : > { %10189 = vmatprep.mubr.msk.bf16.mxu1 %vm388_vm2, %v12817_v61  ;;  %10345 = vmatprep.mubr.msk.bf16.mxu0 %vm388_vm2, %v12971_v11  ;;  %v6681_v61 = vld [vmem:[#allocation2 + $0xca] sm:$0xff] }
 0x6f9   : > { %10414 = vmatpush3.bf16.msra.mxu0 %v10711_v18  ;;  %v12997_v42 = vpack.c.bf16 %v6681_v61, %v6680_v58  ;;  %v7340_v58 = vld [vmem:[#allocation2 + $0x199] sm:$0xff]  ;;  %v7341_v61 = vld [vmem:[#allocation2 + $0x1a1] sm:$0xff] }
 0x6fa   : > { %10415 = vmatprep.subr.bf16.mxu0 %v10712_v54  ;;  %v7357_v2 = vpack.c.bf16 %v7341_v61, %v7340_v58 }
 0x6fd   : > { %10416 = vmatpush3.bf16.msra.mxu0 %v10712_v54  ;;  %v6345_v54 = vld [vmem:[#allocation2 + $0x21] sm:$0xff] }
 0x6fe   : > { %v6376_v41 = vpack.c.bf16 %v6345_v54, %v6344_v24  ;;  %v6991_v54 = vld [vmem:[#allocation2 + $0x50] sm:$0xff] }
 0x6ff   : > { %10190 = vmatmul.mubr.msk.bf16.gmra.mxu1 %vm388_vm2, %v12833_v31  ;;  %10346 = vmatmul.mubr.msk.bf16.gmra.mxu0 %vm388_vm2, %v12985_v33  ;;  %v6684_v31 = vld [vmem:[#allocation2 + $0xf2] sm:$0xff] }
 0x700   : > { %10349 = vmatprep.mubr.msk.bf16.mxu0 %vm388_vm2, %v12987_v22  ;;  %10193 = vmatprep.mubr.msk.bf16.mxu1 %vm388_vm2, %v12849_v5  ;;  %v6685_v5 = vld [vmem:[#allocation2 + $0xfa] sm:$0xff] }
 0x701   : > { %v13009_v46 = vpack.c.bf16 %v6685_v5, %v6684_v31  ;;  %v6348_v31 = vld [vmem:[#allocation2 + $0x49] sm:$0xff] }
 0x702   : > { %v6378_v17 = vpack.c.bf16 %v6349_v25, %v6348_v31  ;;  %v6992_v25 = vld [vmem:[#allocation2 + $0x60] sm:$0xff] }
 0x707   : > { %10194 = vmatmul.mubr.msk.bf16.gmra.mxu1 %vm388_vm2, %v12859_v26  ;;  %10350 = vmatmul.mubr.msk.bf16.gmra.mxu0 %vm388_vm2, %v12997_v42  ;;  %v6688_v26 = vld [vmem:[#allocation2 + $0x122] sm:$0xff] }
 0x708   : > { %10353 = vmatprep.mubr.msk.bf16.mxu0 %vm388_vm2, %v12999_v19  ;;  %10197 = vmatprep.mubr.msk.bf16.mxu1 %vm388_vm2, %v12869_v49  ;;  %v6689_v49 = vld [vmem:[#allocation2 + $0x12a] sm:$0xff] }
 0x709   : > { %v6709_v20 = vpack.c.bf16 %v6689_v49, %v6688_v26  ;;  %v10720_v49 = vld [vmem:[%s14074_s9 + $0xc0] sm:$0xff]  }
 0x70f   : > { %10198 = vmatmul.mubr.msk.bf16.gmra.mxu1 %vm388_vm2, %v12879_v12  ;;  %10354 = vmatmul.mubr.msk.bf16.gmra.mxu0 %vm388_vm2, %v13009_v46  ;;  %v5700_v12 = vld [vmem:[#allocation2 + $0x2] sm:$0xff] }
 0x710   : > { %10201 = vmatprep.mubr.msk.bf16.mxu1 %vm388_vm2, %v12889_v37  ;;  %10357 = vmatprep.mubr.msk.bf16.mxu0 %vm388_vm2, %v13011_v21  ;;  %v5701_v37 = vld [vmem:[#allocation2 + $0xa] sm:$0xff] }
 0x711   : > { %v5732_v48 = vpack.c.bf16 %v5701_v37, %v5700_v12 }
 0x717   : > { %10202 = vmatmul.mubr.msk.bf16.gmra.mxu1 %vm388_vm2, %v12899_v43  ;;  %10358 = vmatmul.mubr.msk.bf16.gmra.mxu0 %vm388_vm2, %v6709_v20  ;;  %v6696_v43 = vld [vmem:[#allocation2 + $0x182] sm:$0xff] }
 0x718   : > { %10205 = vmatprep.mubr.msk.bf16.mxu1 %vm388_vm2, %v12909_v62  ;;  %10361 = vmatprep.mubr.msk.bf16.mxu0 %vm388_vm2, %v13021_v36  ;;  %v6697_v62 = vld [vmem:[#allocation2 + $0x18a] sm:$0xff] }
 0x719   : > { %v6713_v52 = vpack.c.bf16 %v6697_v62, %v6696_v43 }
 0x71f   : > { %10206 = vmatmul.mubr.msk.bf16.gmra.mxu1 %vm388_vm2, %v12919_v50  ;;  %10362 = vmatmul.mubr.msk.bf16.gmra.mxu0 %vm388_vm2, %v6711_v35  ;;  %v10715_v50 = vld [vmem:[%s14074_s9 + $0x88] sm:$0xff]  }
 0x720   : > { %10217 = vmatprep.mubr.msk.bf16.mxu1 %vm388_vm2, %v5732_v48  ;;  %10365 = vmatprep.mubr.msk.bf16.mxu0 %vm388_vm2, %v13030_v34 }
 0x727   : > { %10218 = vmatmul.mubr.msk.bf16.vlgmr.msra.gmra.mxu1 %vm388_vm2, %v12926_v1  ;;  %10366 = vmatmul.mubr.msk.bf16.gmra.mxu0 %vm388_vm2, %v6713_v52  ;;  %v10716_v1 = vld [vmem:[%s14074_s9 + $0x80] sm:$0xff]  }
 0x728   : > { %10221 = vmatprep.mubr.msk.bf16.mxu1 %vm388_vm2, %v12942_v56  ;;  %10417 = vmatprep.mubr.msk.bf16.mxu0 %vm388_vm2, %v12763_v27  ;;  %v10717_v27 = vld [vmem:[%s14074_s9 + $0xd8] sm:$0xff]  }
 0x729   : > { %10290 = vmatpush3.bf16.msra.mxu1 %v12967_v3 }
 0x72a   : > { %10291 = vmatprep.subr.bf16.mxu1 %v10714_v4 }
 0x72d   : > { %10292 = vmatpush3.bf16.msra.mxu1 %v10714_v4  ;;  %v6989_v4 = vld [vmem:[#allocation2 + $0x38] sm:$0xff] }
 0x72e   : > { %10293 = vmatprep.subr.bf16.mxu1 %v10715_v50 }
 0x72f   : > { %10222 = vmatmul.mubr.msk.bf16.gmra.mxu1 %vm388_vm2, %v12944_v14  ;;  %10418 = vmatmul.mubr.msk.bf16.vlgmr.msra.gmra.mxu0 %vm388_vm2, %v12782_v6  ;;  %v13074_v6 = vpop.f32.mrf.mxu1 }
 0x730   : > { %10225 = vmatprep.mubr.msk.bf16.mxu1 %vm388_vm2, %v12969_v59  ;;  %10421 = vmatprep.mubr.msk.bf16.mxu0 %vm388_vm2, %v12795_v63  ;;  %v6374_v59 = vld [vmem:[#allocation2 + $0x181] sm:$0xff] }
 0x731   : > { %10294 = vmatpush3.bf16.msra.mxu1 %v10715_v50  ;;  %v13084_v56 = vpop.f32.mrf.mxu1 }
 0x732   : > { %10295 = vmatprep.subr.bf16.mxu1 %v10716_v1 }
 0x733   : > { %v13086_v14 = vpop.f32.mrf.mxu1 }
 0x735   : > { %10296 = vmatpush3.bf16.msra.mxu1 %v10716_v1  ;;  %v13096_v9 = vpop.f32.mrf.mxu1  ;;  %v6988_v1 = vld [vmem:[#allocation2 + $0x30] sm:$0xff] }
 0x736   : > { %10369 = vmatprep.subr.bf16.mxu1 %v10717_v27 }
 0x737   : > { %10226 = vmatmul.mubr.msk.bf16.gmra.mxu1 %vm388_vm2, %v12971_v11  ;;  %10422 = vmatmul.mubr.msk.bf16.gmra.mxu0 %vm388_vm2, %v12805_v55  ;;  %v6375_v11 = vld [vmem:[#allocation2 + $0x189] sm:$0xff] }
 0x738   : > { %10229 = vmatprep.mubr.msk.bf16.mxu1 %vm388_vm2, %v12985_v33  ;;  %10425 = vmatprep.mubr.msk.bf16.mxu0 %vm388_vm2, %v12815_v29  ;;  %v13122_v10 = vpack.c.bf16 %v6375_v11, %v6374_v59  ;;  %v7020_v59 = vpack.c.bf16 %v6989_v4, %v6988_v1  ;;  %v6997_v4 = vld [vmem:[#allocation2 + $0x98] sm:$0xff] }
 0x73f   : > { %10230 = vmatmul.mubr.msk.bf16.gmra.mxu1 %vm388_vm2, %v12987_v22  ;;  %10426 = vmatmul.mubr.msk.bf16.gmra.mxu0 %vm388_vm2, %v12831_v57  ;;  %v13098_v23 = vpop.f32.mrf.mxu1  ;;  %v6347_v22 = vld [vmem:[#allocation2 + $0x39] sm:$0xff] }
 0x740   : > { %10233 = vmatprep.mubr.msk.bf16.mxu1 %vm388_vm2, %v12997_v42  ;;  %10429 = vmatprep.mubr.msk.bf16.mxu0 %vm388_vm2, %v12847_v7  ;;  %v6346_v42 = vld [vmem:[#allocation2 + $0x31] sm:$0xff] }
 0x741   : > { %v13104_v18 = vpop.f32.mrf.mxu1 }
 0x743   : > { %v13109_v3 = vpop.f32.mrf.mxu1 }
 0x745   : > { %v13115_v60 = vpop.f32.mrf.mxu1 }
 0x747   : > { %10234 = vmatmul.mubr.msk.bf16.gmra.mxu1 %vm388_vm2, %v12999_v19  ;;  %10430 = vmatmul.mubr.msk.bf16.gmra.mxu0 %vm388_vm2, %v12857_v15  ;;  %v6377_v19 = vpack.c.bf16 %v6347_v22, %v6346_v42  ;;  %v6990_v22 = vld [vmem:[#allocation2 + $0x48] sm:$0xff] }
 0x748   : > { %10237 = vmatprep.mubr.msk.bf16.mxu1 %vm388_vm2, %v13009_v46  ;;  %10433 = vmatprep.mubr.msk.bf16.mxu0 %vm388_vm2, %v12867_v38  ;;  %v7021_v61 = vpack.c.bf16 %v6991_v54, %v6990_v22  ;;  %v10724_v22 = vld [vmem:[%s14074_s9 + $0x100] sm:$0xff]  }
 0x74f   : > { %10238 = vmatmul.mubr.msk.bf16.gmra.mxu1 %vm388_vm2, %v13011_v21  ;;  %10434 = vmatmul.mubr.msk.bf16.gmra.mxu0 %vm388_vm2, %v12877_v13  ;;  %v13120_v53 = vpop.f32.mrf.mxu1  ;;  %v10719_v21 = vld [vmem:[%s14074_s9 + $0xc8] sm:$0xff]  }
 0x750   : > { %10241 = vmatprep.mubr.msk.bf16.mxu1 %vm388_vm2, %v6709_v20  ;;  %10437 = vmatprep.mubr.msk.bf16.mxu0 %vm388_vm2, %v12887_v39 }
 0x751   : > { %v13124_v40 = vpop.f32.mrf.mxu1 }
 0x753   : > { %v13133_v33 = vpop.f32.mrf.mxu1 }
 0x755   : > { %v13135_v5 = vpop.f32.mrf.mxu1 }
 0x757   : > { %10242 = vmatmul.mubr.msk.bf16.gmra.mxu1 %vm388_vm2, %v13021_v36  ;;  %10438 = vmatmul.mubr.msk.bf16.gmra.mxu0 %vm388_vm2, %v12897_v16  ;;  %v13164_v36 = vpop.f32.mrf.mxu0 }
 0x758   : > { %10245 = vmatprep.mubr.msk.bf16.mxu1 %vm388_vm2, %v6711_v35  ;;  %10441 = vmatprep.mubr.msk.bf16.mxu0 %vm388_vm2, %v12907_v44  ;;  %14145 = vst [vmem:[#allocation5_spill] sm:$0xff] %v13164_v36 }
 0x75f   : > { %10246 = vmatmul.mubr.msk.bf16.gmra.mxu1 %vm388_vm2, %v13030_v34  ;;  %10442 = vmatmul.mubr.msk.bf16.gmra.mxu0 %vm388_vm2, %v12917_v28  ;;  %v13141_v46 = vpop.f32.mrf.mxu1 }
 0x760   : > { %10297 = vmatprep.mubr.msk.bf16.mxu1 %vm388_vm2, %v6376_v41  ;;  %10445 = vmatprep.mubr.msk.bf16.mxu0 %vm388_vm2, %v13122_v10  ;;  %v6993_v41 = vld [vmem:[#allocation2 + $0x68] sm:$0xff] }
 0x761   : > { %v13148_v26 = vpop.f32.mrf.mxu1  ;;  %v7022_v42 = vpack.c.bf16 %v6993_v41, %v6992_v25  ;;  %v6996_v41 = vld [vmem:[#allocation2 + $0x90] sm:$0xff] }
 0x763   : > { %v13155_v8 = vpop.f32.mrf.mxu1 }
 0x765   : > { %v13162_v20 = vpop.f32.mrf.mxu1 }
 0x767   : > { %10298 = vmatmul.mubr.msk.bf16.vlgmr.msra.gmra.mxu1 %vm388_vm2, %v6377_v19  ;;  %10446 = vmatmul.mubr.msk.bf16.gmra.mxu0 %vm388_vm2, %v7357_v2  ;;  %v10722_v2 = vld [vmem:[%s14074_s9 + $0x110] sm:$0xff]  }
 0x768   : > { %10301 = vmatprep.mubr.msk.bf16.mxu1 %vm388_vm2, %v6378_v17  ;;  %10370 = vmatpush3.bf16.msra.mxu1 %v10717_v27 }
 0x769   : > { %10371 = vmatprep.subr.bf16.mxu1 %v10718_v32 }
 0x76c   : > { %10372 = vmatpush3.bf16.msra.mxu1 %v10718_v32  ;;  %v10723_v32 = vld [vmem:[%s14074_s9 + $0x108] sm:$0xff]  }
 0x76d   : > { %10373 = vmatprep.subr.bf16.mxu1 %v10719_v21 }
 0x76f   : > { %10302 = vmatmul.mubr.msk.bf16.gmra.mxu1 %vm388_vm2, %v12795_v63  ;;  %v13166_v12 = vpop.f32.mrf.mxu1  ;;  %v13170_v63 = vpop.f32.mrf.mxu0 }
 0x770   : > { %10305 = vmatprep.mubr.msk.bf16.mxu1 %vm388_vm2, %v12805_v55  ;;  %10374 = vmatpush3.bf16.msra.mxu1 %v10719_v21  ;;  %14146 = vst [vmem:[#allocation18_spill] sm:$0xff] %v13170_v63  ;;  %v6995_v21 = vld [vmem:[#allocation2 + $0x80] sm:$0xff] }
 0x771   : > { %10375 = vmatprep.subr.bf16.mxu1 %v10720_v49  ;;  %v13174_v55 = vpop.f32.mrf.mxu1  ;;  %v13176_v37 = vpop.f32.mrf.mxu0 }
 0x772   : > { %14147 = vst [vmem:[#allocation8_spill] sm:$0xff] %v13176_v37 }
 0x773   : > { %v13178_v47 = vpop.f32.mrf.mxu1  ;;  %v13182_v30 = vpop.f32.mrf.mxu0 }
 0x774   : > { %10376 = vmatpush3.bf16.msra.mxu1 %v10720_v49  ;;  %14148 = vst [vmem:[#allocation24_spill] sm:$0xff] %v13182_v30  ;;  %v7013_v30 = vld [vmem:[#allocation2 + $0x158] sm:$0xff] }
 0x775   : > { %10449 = vmatprep.subr.bf16.mxu1 %v10721_v0  ;;  %v13188_v51 = vpop.f32.mrf.mxu0 }
 0x776   : > { %14149 = vst [vmem:[#allocation23_spill] sm:$0xff] %v13188_v51 }
 0x777   : > { %10306 = vmatmul.mubr.msk.bf16.gmra.mxu1 %vm388_vm2, %v12815_v29  ;;  %v13186_v29 = vpop.f32.mrf.mxu1 }
 0x778   : > { %10309 = vmatprep.mubr.msk.bf16.mxu1 %vm388_vm2, %v12831_v57  ;;  %v13192_v57 = vpop.f32.mrf.mxu0 }
 0x779   : > { %14150 = vst [vmem:[#allocation11_spill] sm:$0xff] %v13192_v57 }
 0x77f   : > { %10310 = vmatmul.mubr.msk.bf16.gmra.mxu1 %vm388_vm2, %v12847_v7  ;;  %v13190_v45 = vpop.f32.mrf.mxu1  ;;  %v13200_v7 = vpop.f32.mrf.mxu0 }
 0x780   : > { %10313 = vmatprep.mubr.msk.bf16.mxu1 %vm388_vm2, %v12857_v15  ;;  %14151 = vst [vmem:[#allocation14_spill] sm:$0xff] %v13200_v7  ;;  %v7006_v7 = vld [vmem:[#allocation2 + $0x108] sm:$0xff] }
 0x781   : > { %v13196_v48 = vpop.f32.mrf.mxu1  ;;  %v13204_v15 = vpop.f32.mrf.mxu0 }
 0x782   : > { %14153 = vst [vmem:[#allocation3_spill] sm:$0xff] %v13204_v15  ;;  %v7009_v15 = vld [vmem:[#allocation2 + $0x128] sm:$0xff] }
 0x783   : > { %v13202_v35 = vpop.f32.mrf.mxu1  ;;  %v13210_v43 = vpop.f32.mrf.mxu0 }
 0x784   : > { %14152 = vst [vmem:[#allocation25_spill] sm:$0xff] %v13202_v35  ;;  %14155 = vst [vmem:[#allocation19_spill] sm:$0xff] %v13210_v43 }
 0x785   : > { %v13208_v34 = vpop.f32.mrf.mxu1  ;;  %v13216_v62 = vpop.f32.mrf.mxu0 }
 0x786   : > { %14154 = vst [vmem:[#allocation6_spill] sm:$0xff] %v13208_v34  ;;  %14157 = vst [vmem:[#allocation9_spill] sm:$0xff] %v13216_v62 }
 0x787   : > { %10314 = vmatmul.mubr.msk.bf16.gmra.mxu1 %vm388_vm2, %v12867_v38  ;;  %v13222_v52 = vpop.f32.mrf.mxu0 }
 0x788   : > { %10317 = vmatprep.mubr.msk.bf16.mxu1 %vm388_vm2, %v12877_v13  ;;  %14159 = vst [vmem:[#allocation27_spill] sm:$0xff] %v13222_v52  ;;  %v7002_v52 = vld [vmem:[#allocation2 + $0xd8] sm:$0xff] }
 0x789   : > { %v13228_v50 = vpop.f32.mrf.mxu0 }
 0x78a   : > { %14161 = vst [vmem:[#allocation15_spill] sm:$0xff] %v13228_v50 }
 0x78b   : > { %v13232_v27 = vpop.f32.mrf.mxu0 }
 0x78c   : > { %14162 = vst [vmem:[#allocation29_spill] sm:$0xff] %v13232_v27 }
 0x78f   : > { %10318 = vmatmul.mubr.msk.bf16.gmra.mxu1 %vm388_vm2, %v12887_v39  ;;  %v13214_v38 = vpop.f32.mrf.mxu1 }
 0x790   : > { %10321 = vmatprep.mubr.msk.bf16.mxu1 %vm388_vm2, %v12897_v16  ;;  %14156 = vst [vmem:[#allocation26_spill] sm:$0xff] %v13214_v38 }
 0x791   : > { %v13218_v13 = vpop.f32.mrf.mxu1 }
 0x792   : > { %14158 = vst [vmem:[#allocation28_spill] sm:$0xff] %v13218_v13 }
 0x793   : > { %v13226_v39 = vpop.f32.mrf.mxu1 }
 0x794   : > { %14160 = vst [vmem:[#allocation12_spill] sm:$0xff] %v13226_v39  ;;  %v7017_v39 = vld [vmem:[#allocation2 + $0x188] sm:$0xff] }
 0x795   : > { %v13230_v16 = vpop.f32.mrf.mxu1 }
 0x797   : > { %10322 = vmatmul.mubr.msk.bf16.gmra.mxu1 %vm388_vm2, %v12907_v44 }
 0x798   : > { %10325 = vmatprep.mubr.msk.bf16.mxu1 %vm388_vm2, %v12917_v28  ;;  %v13241_v28 = vpop.f32.mrf.mxu0 }
 0x799   : > { %14163 = vst [vmem:[#allocation4_spill] sm:$0xff] %v13241_v28 }
 0x79f   : > { %v13234_v11 = vpop.f32.mrf.mxu1  ;;  %10326 = vmatmul.mubr.msk.bf16.gmra.mxu1 %vm388_vm2, %v13122_v10  ;;  %v13250_v10 = vpop.f32.mrf.mxu0 }
 0x7a0   : > { %10377 = vmatprep.mubr.msk.bf16.mxu1 %vm388_vm2, %v7020_v59  ;;  %14164 = vst [vmem:[#allocation7_spill] sm:$0xff] %v13250_v10  ;;  %v6994_v59 = vld [vmem:[#allocation2 + $0x78] sm:$0xff]  ;;  %v6998_v10 = vld [vmem:[#allocation2 + $0xa8] sm:$0xff] }
 0x7a1   : > { %v13239_v44 = vpop.f32.mrf.mxu1  ;;  %v13261_v17 = vpop.f32.mrf.mxu0 }
 0x7a2   : > { %14165 = vst [vmem:[#allocation20_spill] sm:$0xff] %v13261_v17 }
 0x7a3   : > { %v13243_v24 = vpop.f32.mrf.mxu1  ;;  %v13265_v1 = vpop.f32.mrf.mxu0 }
 0x7a4   : > { %14166 = vst [vmem:[#allocation30_spill] sm:$0xff] %v13265_v1  ;;  %v7001_v1 = vld [vmem:[#allocation2 + $0xc8] sm:$0xff] }
 0x7a5   : > { %v13245_v58 = vpop.f32.mrf.mxu1 }
 0x7a7   : > { %v13252_v19 = vpop.f32.mrf.mxu1  ;;  %10378 = vmatmul.mubr.msk.bf16.vlgmr.msra.gmra.mxu1 %vm388_vm2, %v7021_v61  ;;  %v7024_v61 = vpack.c.bf16 %v6997_v4, %v6996_v41 }
 0x7a8   : > { %10381 = vmatprep.mubr.msk.bf16.mxu1 %vm388_vm2, %v7022_v42  ;;  %10450 = vmatpush3.bf16.msra.mxu1 %v10721_v0  ;;  %v7023_v0 = vpack.c.bf16 %v6995_v21, %v6994_v59  ;;  %v13275_v42 = vpop.f32.mrf.mxu0  ;;  %v6999_v21 = vld [vmem:[#allocation2 + $0xb0] sm:$0xff] }
 0x7a9   : > { %v13256_v31 = vpop.f32.mrf.mxu1  ;;  %10451 = vmatprep.subr.bf16.mxu1 %v10722_v2  ;;  %14167 = vst [vmem:[#allocation10_spill] sm:$0xff] %v13275_v42  ;;  %v7025_v41 = vpack.c.bf16 %v6999_v21, %v6998_v10  ;;  %v7004_v21 = vld [vmem:[#allocation2 + $0xf0] sm:$0xff] }
 0x7aa   : > { %v13282_v17 = vpop.f32.mrf.mxu0 }
 0x7ab   : > { %v13263_v49 = vpop.f32.mrf.mxu1  ;;  %14168 = vst [vmem:[#allocation32_spill] sm:$0xff] %v13282_v17  ;;  %v7003_v17 = vld [vmem:[#allocation2 + $0xe0] sm:$0xff] }
 0x7ac   : > { %10452 = vmatpush3.bf16.msra.mxu1 %v10722_v2 }
 0x7ad   : > { %v13267_v54 = vpop.f32.mrf.mxu1  ;;  %10453 = vmatprep.subr.bf16.mxu1 %v10723_v32 }
 0x7af   : > { %v13272_v25 = vpop.f32.mrf.mxu1  ;;  %10382 = vmatmul.mubr.msk.bf16.gmra.mxu1 %vm388_vm2, %v7023_v0  ;;  %v7000_v0 = vld [vmem:[#allocation2 + $0xc0] sm:$0xff] }
 0x7b0   : > { %10385 = vmatprep.mubr.msk.bf16.mxu1 %vm388_vm2, %v7024_v61  ;;  %10454 = vmatpush3.bf16.msra.mxu1 %v10723_v32  ;;  %v7026_v28 = vpack.c.bf16 %v7001_v1, %v7000_v0  ;;  %v13289_v32 = vpop.f32.mrf.mxu0  ;;  %v7027_v1 = vpack.c.bf16 %v7003_v17, %v7002_v52 }
 0x7b1   : > { %v13278_v2 = vpop.f32.mrf.mxu1  ;;  %10455 = vmatprep.subr.bf16.mxu1 %v10724_v22  ;;  %14169 = vst [vmem:[#allocation31_spill] sm:$0xff] %v13289_v32  ;;  %v7007_v32 = vld [vmem:[#allocation2 + $0x110] sm:$0xff] }
 0x7b2   : > { %v13294_v27 = vpop.f32.mrf.mxu0  ;;  %v7029_v17 = vpack.c.bf16 %v7007_v32, %v7006_v7  ;;  %v7010_v7 = vld [vmem:[#allocation2 + $0x138] sm:$0xff] }
 0x7b3   : > { %v13280_v59 = vpop.f32.mrf.mxu1  ;;  %14170 = vst [vmem:[#allocation13_spill] sm:$0xff] %v13294_v27 }
 0x7b4   : > { %10456 = vmatpush3.bf16.msra.mxu1 %v10724_v22  ;;  %v7005_v22 = vld [vmem:[#allocation2 + $0xf8] sm:$0xff]  ;;  %v13300_v0 = vpop.f32.mrf.mxu0 }
 0x7b5   : > { %v13284_v4 = vpop.f32.mrf.mxu1  ;;  %14171 = vst [vmem:[#allocation17_spill] sm:$0xff] %v13300_v0  ;;  %v7008_v0 = vld [vmem:[#allocation2 + $0x120] sm:$0xff] }
 0x7b6   : > { %v13308_v27 = vpop.f32.mrf.mxu0 }
 0x7b7   : > { %v13286_v42 = vpop.f32.mrf.mxu1  ;;  %10386 = vmatmul.mubr.msk.bf16.gmra.mxu1 %vm388_vm2, %v7025_v41  ;;  %v7028_v41 = vpack.c.bf16 %v7005_v22, %v7004_v21  ;;  %14172 = vst [vmem:[#allocation16_spill] sm:$0xff] %v13308_v27  ;;  %v7030_v21 = vpack.c.bf16 %v7009_v15, %v7008_v0  ;;  %v7011_v27 = vld [vmem:[#allocation2 + $0x140] sm:$0xff]  ;;  %v7012_v0 = vld [vmem:[#allocation2 + $0x150] sm:$0xff] }
 0x7b8   : > { %10389 = vmatprep.mubr.msk.bf16.mxu1 %vm388_vm2, %v7026_v28  ;;  %v13314_v22 = vpop.f32.mrf.mxu0  ;;  %v7031_v15 = vpack.c.bf16 %v7011_v27, %v7010_v7  ;;  %v7014_v27 = vld [vmem:[#allocation2 + $0x168] sm:$0xff] }
 0x7b9   : > { %v13292_v61 = vpop.f32.mrf.mxu1  ;;  %14173 = vst [vmem:[#allocation21_spill] sm:$0xff] %v13314_v22  ;;  %v7032_v22 = vpack.c.bf16 %v7013_v30, %v7012_v0 }
 0x7bb   : > { %v13296_v50 = vpop.f32.mrf.mxu1 }
 0x7bd   : > { %v13298_v10 = vpop.f32.mrf.mxu1 }
 0x7bf   : > { %v13302_v62 = vpop.f32.mrf.mxu1  ;;  %10390 = vmatmul.mubr.msk.bf16.gmra.mxu1 %vm388_vm2, %v7027_v1  ;;  %v13319_v1 = vpop.f32.mrf.mxu0 }
 0x7c0   : > { %10393 = vmatprep.mubr.msk.bf16.mxu1 %vm388_vm2, %v7028_v41  ;;  %14174 = vst [vmem:[#allocation33_spill] sm:$0xff] %v13319_v1  ;;  %v7015_v1 = vld [vmem:[#allocation2 + $0x170] sm:$0xff] }
 0x7c1   : > { %v13306_v28 = vpop.f32.mrf.mxu1  ;;  %v13326_v37 = vpop.f32.mrf.mxu0  ;;  %v7033_v30 = vpack.c.bf16 %v7015_v1, %v7014_v27  ;;  %v7633_v1 = vld [vmem:[#allocation2 + $0x3a] sm:$0xff] }
 0x7c2   : > { %14175 = vst [vmem:[#allocation22_spill] sm:$0xff] %v13326_v37  ;;  %v7016_v37 = vld [vmem:[#allocation2 + $0x180] sm:$0xff] }
 0x7c3   : > { %v13310_v43 = vpop.f32.mrf.mxu1 }
 0x7c5   : > { %v13312_v52 = vpop.f32.mrf.mxu1 }
 0x7c7   : > { %v13316_v57 = vpop.f32.mrf.mxu1  ;;  %10394 = vmatmul.mubr.msk.bf16.gmra.mxu1 %vm388_vm2, %v7029_v17  ;;  %v13333_v17 = vpop.f32.mrf.mxu0 }
 0x7c8   : > { %10397 = vmatprep.mubr.msk.bf16.mxu1 %vm388_vm2, %v7030_v21  ;;  %14176 = vst [vmem:[#allocation35_spill] sm:$0xff] %v13333_v17  ;;  %v7019_v17 = vld [vmem:[#allocation2 + $0x1a0] sm:$0xff] }
 0x7c9   : > { %v13322_v41 = vpop.f32.mrf.mxu1  ;;  %v13340_v13 = vpop.f32.mrf.mxu0 }
 0x7ca   : > { %14178 = vst [vmem:[#allocation36_spill] sm:$0xff] %v13340_v13 }
 0x7cb   : > { %v13324_v51 = vpop.f32.mrf.mxu1  ;;  %v13344_v0 = vpop.f32.mrf.mxu0 }
 0x7cc   : > { %14180 = vst [vmem:[#allocation38_spill] sm:$0xff] %v13344_v0 }
 0x7cd   : > { %v13328_v32 = vpop.f32.mrf.mxu1 }
 0x7cf   : > { %v13330_v63 = vpop.f32.mrf.mxu1  ;;  %10398 = vmatmul.mubr.msk.bf16.gmra.mxu1 %vm388_vm2, %v7031_v15  ;;  %v7034_v15 = vpack.c.bf16 %v7017_v39, %v7016_v37 }
 0x7d0   : > { %10401 = vmatprep.mubr.msk.bf16.mxu1 %vm388_vm2, %v7032_v22  ;;  %v7018_v22 = vld [vmem:[#allocation2 + $0x198] sm:$0xff] }
 0x7d1   : > { %v13336_v21 = vpop.f32.mrf.mxu1  ;;  %v7035_v35 = vpack.c.bf16 %v7019_v17, %v7018_v22  ;;  %v7634_v22 = vld [vmem:[#allocation2 + $0x4a] sm:$0xff] }
 0x7d3   : > { %v13338_v36 = vpop.f32.mrf.mxu1 }
 0x7d4   : > { %14177 = vst [vmem:[#allocation34_spill] sm:$0xff] %v13338_v36  ;;  %v13352_v36 = vpop.f32.mrf.mxu0 }
 0x7d5   : > { %v13342_v7 = vpop.f32.mrf.mxu1  ;;  %14182 = vst [vmem:[#allocation40_spill] sm:$0xff] %v13352_v36 }
 0x7d6   : > { %14179 = vst [vmem:[#allocation37_spill] sm:$0xff] %v13342_v7  ;;  %v7632_v7 = vld [vmem:[#allocation2 + $0x32] sm:$0xff]  ;;  %v13356_v0 = vpop.f32.mrf.mxu0 }
 0x7d7   : > { %v13346_v38 = vpop.f32.mrf.mxu1  ;;  %10402 = vmatmul.mubr.msk.bf16.gmra.mxu1 %vm388_vm2, %v7033_v30  ;;  %14184 = vst [vmem:[#allocation42_spill] sm:$0xff] %v13356_v0  ;;  %v7664_v39 = vpack.c.bf16 %v7633_v1, %v7632_v7  ;;  %v7635_v0 = vld [vmem:[#allocation2 + $0x52] sm:$0xff] }
 0x7d8   : > { %10405 = vmatprep.mubr.msk.bf16.mxu1 %vm388_vm2, %v7034_v15  ;;  %v7665_v1 = vpack.c.bf16 %v7635_v0, %v7634_v22  ;;  %v7639_v0 = vld [vmem:[#allocation2 + $0x82] sm:$0xff] }
 0x7d9   : > { %v13350_v34 = vpop.f32.mrf.mxu1 }
 0x7da   : > { %14181 = vst [vmem:[#allocation39_spill] sm:$0xff] %v13350_v34 }
 0x7db   : > { %v13354_v13 = vpop.f32.mrf.mxu1 }
 0x7dc   : > { %14183 = vst [vmem:[#allocation41_spill] sm:$0xff] %v13354_v13  ;;  %v13366_v13 = vpop.f32.mrf.mxu0 }
 0x7dd   : > { %v5672_v27 = vpop.f32.mrf.mxu1  ;;  %14185 = vst [vmem:[#allocation43_spill] sm:$0xff] %v13366_v13  ;;  %v5574_v13 = vadd.f32 %v13256_v31, %v13084_v56  ;;  %v5577_v56 = vadd.f32 %v13267_v54, %v13096_v9  ;;  %v5601_v54 = vadd.f32 %v13280_v59, %v13109_v3 }
 0x7de   : > { %v13359_v37 = vadd.f32 %v5672_v27, %v13230_v16  ;;  %v7636_v16 = vld [vmem:[#allocation2 + $0x62] sm:$0xff]  ;;  %v7637_v27 = vld [vmem:[#allocation2 + $0x6a] sm:$0xff] }
 0x7df   : > { %v10207_v30 = vpop.f32.mrf.mxu1  ;;  %10406 = vmatmul.mubr.msk.bf16.gmra.mxu1 %vm388_vm2, %v7035_v35 }
 0x7e0   : > { %v13363_v15 = vadd.f32 %v10207_v30, %v13234_v11  ;;  %10457 = vmatprep.mubr.msk.bf16.mxu1 %vm388_vm2, %v7664_v39  ;;  %v5582_v11 = vadd.f32 %v13252_v19, %v13074_v6  ;;  %v13376_v39 = vpop.f32.mrf.mxu0  ;;  %v5585_v6 = vadd.f32 %v13263_v49, %v13086_v14 }
 0x7e1   : > { %v5685_v36 = vpop.f32.mrf.mxu1 }
 0x7e2   : > { %v13369_v17 = vadd.f32 %v5685_v36, %v13239_v44  ;;  %v7666_v36 = vpack.c.bf16 %v7637_v27, %v7636_v16  ;;  %v7640_v16 = vld [vmem:[#allocation2 + $0x92] sm:$0xff]  ;;  %v7641_v27 = vld [vmem:[#allocation2 + $0x9a] sm:$0xff] }
 0x7e3   : > { %v10208_v34 = vpop.f32.mrf.mxu1 }
 0x7e4   : > { %14186 = vst [vmem:[#allocation44_spill] sm:$0xff] %v13369_v17  ;;  %v13372_v7 = vadd.f32 %v10208_v34, %v13243_v24  ;;  %v13389_v24 = vpop.f32.mrf.mxu0 }
 0x7e5   : > { %v5688_v35 = vpop.f32.mrf.mxu1 }
 0x7e6   : > { %v13379_v30 = vadd.f32 %v5688_v35, %v13245_v58  ;;  %v7638_v58 = vld [vmem:[#allocation2 + $0x7a] sm:$0xff]  ;;  %v13399_v14 = vpop.f32.mrf.mxu0 }
 0x7e7   : > { %v10219_v44 = vpop.f32.mrf.mxu1  ;;  %10458 = vmatmul.mubr.msk.bf16.vlgmr.msra.gmra.mxu1 %vm388_vm2, %v7665_v1  ;;  %v7667_v1 = vpack.c.bf16 %v7639_v0, %v7638_v58  ;;  %v7643_v58 = vld [vmem:[#allocation2 + $0xb2] sm:$0xff] }
 0x7e8   : > { %v13384_v17 = vadd.f32 %v10219_v44, %v5582_v11  ;;  %10461 = vmatprep.mubr.msk.bf16.mxu1 %vm388_vm2, %v7666_v36  ;;  %v5598_v11 = vadd.f32 %v13272_v25, %v13098_v23  ;;  %v5590_v44 = vadd.f32 %v13278_v2, %v13104_v18  ;;  %v13411_v23 = vpop.f32.mrf.mxu0  ;;  %v5593_v18 = vadd.f32 %v13284_v4, %v13115_v60 }
 0x7e9   : > { %v5863_v34 = vpop.f32.mrf.mxu1 }
 0x7ea   : > { %v13391_v19 = vadd.f32 %v5863_v34, %v5574_v13  ;;  %v7668_v13 = vpack.c.bf16 %v7641_v27, %v7640_v16  ;;  %v7645_v16 = vld [vmem:[#allocation2 + $0xca] sm:$0xff]  ;;  %v13421_v3 = vpop.f32.mrf.mxu0 }
 0x7eb   : > { %v10220_v22 = vpop.f32.mrf.mxu1 }
 0x7ec   : > { %v13395_v31 = vadd.f32 %v10220_v22, %v5585_v6  ;;  %v7642_v6 = vld [vmem:[#allocation2 + $0xaa] sm:$0xff]  ;;  %v7644_v22 = vld [vmem:[#allocation2 + $0xc2] sm:$0xff]  ;;  %v13431_v4 = vpop.f32.mrf.mxu0 }
 0x7ed   : > { %v5866_v35 = vpop.f32.mrf.mxu1 }
 0x7ee   : > { %v13401_v49 = vadd.f32 %v5866_v35, %v5577_v56  ;;  %v7669_v56 = vpack.c.bf16 %v7643_v58, %v7642_v6  ;;  %v5614_v35 = vadd.f32 %v13286_v42, %v13120_v53  ;;  %v5617_v53 = vadd.f32 %v13296_v50, %v13133_v33  ;;  %v7648_v6 = vld [vmem:[#allocation2 + $0xf2] sm:$0xff]  ;;  %v7649_v58 = vld [vmem:[#allocation2 + $0xfa] sm:$0xff] }
 0x7ef   : > { %v10223_v36 = vpop.f32.mrf.mxu1  ;;  %10462 = vmatmul.mubr.msk.bf16.gmra.mxu1 %vm388_vm2, %v7667_v1  ;;  %v7670_v1 = vpack.c.bf16 %v7645_v16, %v7644_v22  ;;  %v13441_v16 = vpop.f32.mrf.mxu0  ;;  %v7672_v50 = vpack.c.bf16 %v7649_v58, %v7648_v6  ;;  %v5646_v6 = vadd.f32 %v13316_v57, %v13166_v12  ;;  %v7654_v57 = vld [vmem:[#allocation2 + $0x13a] sm:$0xff] }
 0x7f0   : > { %v13406_v34 = vadd.f32 %v10223_v36, %v5598_v11  ;;  %10465 = vmatprep.mubr.msk.bf16.mxu1 %vm388_vm2, %v7668_v13  ;;  %v5606_v13 = vadd.f32 %v13292_v61, %v13124_v40  ;;  %v5609_v40 = vadd.f32 %v13298_v10, %v13135_v5 }
 0x7f1   : > { %v5879_v9 = vpop.f32.mrf.mxu1  ;;  %v13453_v10 = vpop.f32.mrf.mxu0 }
 0x7f2   : > { %v13413_v25 = vadd.f32 %v5879_v9, %v5590_v44  ;;  %v7646_v44 = vld [vmem:[#allocation2 + $0xda] sm:$0xff]  ;;  %v7647_v9 = vld [vmem:[#allocation2 + $0xe2] sm:$0xff] }
 0x7f3   : > { %v10224_v0 = vpop.f32.mrf.mxu1  ;;  %v7671_v22 = vpack.c.bf16 %v7647_v9, %v7646_v44 }
 0x7f4   : > { %v13417_v2 = vadd.f32 %v10224_v0, %v5601_v54 }
 0x7f5   : > { %v5882_v27 = vpop.f32.mrf.mxu1 }
 0x7f6   : > { %v13423_v59 = vadd.f32 %v5882_v27, %v5593_v18  ;;  %v5630_v18 = vadd.f32 %v13302_v62, %v13141_v46  ;;  %v7650_v62 = vld [vmem:[#allocation2 + $0x10a] sm:$0xff] }
 0x7f7   : > { %v10227_v11 = vpop.f32.mrf.mxu1  ;;  %10466 = vmatmul.mubr.msk.bf16.gmra.mxu1 %vm388_vm2, %v7669_v56  ;;  %v5622_v56 = vadd.f32 %v13306_v28, %v13148_v26  ;;  %v5625_v26 = vadd.f32 %v13312_v52, %v13162_v20 }
 0x7f8   : > { %v13428_v36 = vadd.f32 %v10227_v11, %v5614_v35  ;;  %10469 = vmatprep.mubr.msk.bf16.mxu1 %vm388_vm2, %v7670_v1  ;;  %v5633_v1 = vadd.f32 %v13310_v43, %v13155_v8  ;;  %v7651_v11 = vld [vmem:[#allocation2 + $0x112] sm:$0xff] }
 0x7f9   : > { %v5895_v60 = vpop.f32.mrf.mxu1  ;;  %v7673_v9 = vpack.c.bf16 %v7651_v11, %v7650_v62  ;;  %v5662_v11 = vadd.f32 %v13330_v63, %v13190_v45  ;;  %v7658_v45 = vld [vmem:[#allocation2 + $0x16a] sm:$0xff] }
 0x7fa   : > { %v13435_v42 = vadd.f32 %v5895_v60, %v5606_v13  ;;  %v7652_v60 = vld [vmem:[#allocation2 + $0x122] sm:$0xff] }
 0x7fb   : > { %v10228_v54 = vpop.f32.mrf.mxu1 }
 0x7fc   : > { %v13439_v61 = vadd.f32 %v10228_v54, %v5617_v53  ;;  %v7653_v53 = vld [vmem:[#allocation2 + $0x12a] sm:$0xff]  ;;  %v13463_v54 = vpop.f32.mrf.mxu0 }
 0x7fd   : > { %v5898_v0 = vpop.f32.mrf.mxu1  ;;  %v7674_v43 = vpack.c.bf16 %v7653_v53, %v7652_v60  ;;  %v5654_v60 = vadd.f32 %v13336_v21, %v13196_v48 }
 0x7fe   : > { %v13445_v33 = vadd.f32 %v5898_v0, %v5609_v40  ;;  %v5638_v40 = vadd.f32 %v13322_v41, %v13174_v55  ;;  %v13475_v52 = vpop.f32.mrf.mxu0  ;;  %v5641_v55 = vadd.f32 %v13328_v32, %v13186_v29 }
 0x7ff   : > { %v10231_v27 = vpop.f32.mrf.mxu1  ;;  %10470 = vmatmul.mubr.msk.bf16.gmra.mxu1 %vm388_vm2, %v7671_v22  ;;  %v5649_v22 = vadd.f32 %v13324_v51, %v13178_v47 }
 0x800   : > { %v13450_v35 = vadd.f32 %v10231_v27, %v5630_v18  ;;  %10473 = vmatprep.mubr.msk.bf16.mxu1 %vm388_vm2, %v7672_v50  ;;  %v7655_v18 = vld [vmem:[#allocation2 + $0x142] sm:$0xff]  ;;  %v7656_v27 = vld [vmem:[#allocation2 + $0x152] sm:$0xff]  ;;  %v13485_v62 = vpop.f32.mrf.mxu0 }
 0x801   : > { %v5911_v5 = vpop.f32.mrf.mxu1 }
 0x802   : > { %v13457_v46 = vadd.f32 %v5911_v5, %v5622_v56  ;;  %v7657_v56 = vld [vmem:[#allocation2 + $0x15a] sm:$0xff]  ;;  %v13497_v32 = vpop.f32.mrf.mxu0 }
 0x803   : > { %v10232_v13 = vpop.f32.mrf.mxu1  ;;  %v7676_v51 = vpack.c.bf16 %v7657_v56, %v7656_v27  ;;  %v14191_v27 = vld [vmem:[#allocation26_spill] sm:$0xff] }
 0x804   : > { %v13461_v28 = vadd.f32 %v10232_v13, %v5633_v1  ;;  %v7675_v1 = vpack.c.bf16 %v7655_v18, %v7654_v57  ;;  %v5678_v56 = vadd.f32 %v13346_v38, %v14191_v27  ;;  %v14195_v38 = vld [vmem:[#allocation41_spill] sm:$0xff] }
 0x805   : > { %v5914_v44 = vpop.f32.mrf.mxu1 }
 0x806   : > { %v13467_v8 = vadd.f32 %v5914_v44, %v5625_v26  ;;  %v14187_v26 = vld [vmem:[#allocation25_spill] sm:$0xff]  ;;  %v14188_v44 = vld [vmem:[#allocation34_spill] sm:$0xff] }
 0x807   : > { %v10235_v58 = vpop.f32.mrf.mxu1  ;;  %10474 = vmatmul.mubr.msk.bf16.gmra.mxu1 %vm388_vm2, %v7673_v9  ;;  %v5665_v9 = vadd.f32 %v14188_v44, %v14187_v26  ;;  %v7663_v26 = vld [vmem:[#allocation2 + $0x1a2] sm:$0xff] }
 0x808   : > { %v13472_v0 = vadd.f32 %v10235_v58, %v5646_v6  ;;  %10477 = vmatprep.mubr.msk.bf16.mxu1 %vm388_vm2, %v7674_v43  ;;  %v7659_v6 = vld [vmem:[#allocation2 + $0x172] sm:$0xff]  ;;  %v7660_v58 = vld [vmem:[#allocation2 + $0x182] sm:$0xff] }
 0x809   : > { %v5927_v20 = vpop.f32.mrf.mxu1  ;;  %v7677_v18 = vpack.c.bf16 %v7659_v6, %v7658_v45  ;;  %v14194_v45 = vld [vmem:[#allocation12_spill] sm:$0xff] }
 0x80a   : > { %v13479_v12 = vadd.f32 %v5927_v20, %v5638_v40  ;;  %v7661_v40 = vld [vmem:[#allocation2 + $0x18a] sm:$0xff]  ;;  %v5681_v6 = vadd.f32 %v14195_v38, %v14194_v45 }
 0x80b   : > { %v10236_v50 = vpop.f32.mrf.mxu1  ;;  %v14189_v20 = vld [vmem:[#allocation6_spill] sm:$0xff] }
 0x80c   : > { %v13483_v41 = vadd.f32 %v10236_v50, %v5649_v22  ;;  %v14190_v22 = vld [vmem:[#allocation37_spill] sm:$0xff]  ;;  %v13507_v50 = vpop.f32.mrf.mxu0 }
 0x80d   : > { %v5930_v5 = vpop.f32.mrf.mxu1  ;;  %v5657_v48 = vadd.f32 %v14190_v22, %v14189_v20 }
 0x80e   : > { %v13489_v47 = vadd.f32 %v5930_v5, %v5641_v55  ;;  %v7678_v5 = vpack.c.bf16 %v7661_v40, %v7660_v58 }
 0x80f   : > { %v10239_v13 = vpop.f32.mrf.mxu1  ;;  %10478 = vmatmul.mubr.msk.bf16.gmra.mxu1 %vm388_vm2, %v7675_v1 }
 0x810   : > { %v13494_v53 = vadd.f32 %v10239_v13, %v5662_v11  ;;  %10481 = vmatprep.mubr.msk.bf16.mxu1 %vm388_vm2, %v7676_v51  ;;  %v14192_v11 = vld [vmem:[#allocation28_spill] sm:$0xff]  ;;  %v14193_v51 = vld [vmem:[#allocation39_spill] sm:$0xff] }
 0x811   : > { %v5943_v29 = vpop.f32.mrf.mxu1  ;;  %v5670_v13 = vadd.f32 %v14193_v51, %v14192_v11 }
 0x812   : > { %v13501_v63 = vadd.f32 %v5943_v29, %v5654_v60  ;;  %v7662_v29 = vld [vmem:[#allocation2 + $0x19a] sm:$0xff] }
 0x813   : > { %v10240_v43 = vpop.f32.mrf.mxu1  ;;  %v7679_v40 = vpack.c.bf16 %v7663_v26, %v7662_v29 }
 0x814   : > { %v13505_v21 = vadd.f32 %v10240_v43, %v5665_v9  ;;  %v13519_v9 = vpop.f32.mrf.mxu0 }
 0x815   : > { %v5946_v57 = vpop.f32.mrf.mxu1 }
 0x816   : > { %v13511_v55 = vadd.f32 %v5946_v57, %v5657_v48  ;;  %v13527_v48 = vpop.f32.mrf.mxu0 }
 0x817   : > { %v10243_v1 = vpop.f32.mrf.mxu1  ;;  %10482 = vmatmul.mubr.msk.bf16.gmra.mxu1 %vm388_vm2, %v7677_v18 }
 0x818   : > { %v13516_v60 = vadd.f32 %v10243_v1, %v5678_v56  ;;  %10485 = vmatprep.mubr.msk.bf16.mxu1 %vm388_vm2, %v7678_v5  ;;  %v13536_v5 = vpop.f32.mrf.mxu0  ;;  %v14196_v1 = vld [vmem:[#allocation44_spill] sm:$0xff] }
 0x819   : > { %v5959_v44 = vpop.f32.mrf.mxu1 }
 0x81a   : > { %v13523_v43 = vadd.f32 %v5959_v44, %v5670_v13  ;;  %v13544_v26 = vpop.f32.mrf.mxu0  ;;  %v14197_v44 = vld [vmem:[#allocation5_spill] sm:$0xff] }
 0x81b   : > { %v10244_v58 = vpop.f32.mrf.mxu1 }
 0x81c   : > { %v13525_v20 = vadd.f32 %v10244_v58, %v5681_v6  ;;  %v14198_v6 = vld [vmem:[#allocation18_spill] sm:$0xff] }
 0x81d   : > { %v5962_v22 = vpop.f32.mrf.mxu1  ;;  %v6312_v58 = vadd.f32 %v14198_v6, %v13391_v19  ;;  %v14202_v19 = vld [vmem:[#allocation23_spill] sm:$0xff] }
 0x81e   : > { %v13530_v57 = vadd.f32 %v5962_v22, %v13359_v37  ;;  %v13555_v22 = vpop.f32.mrf.mxu0 }
 0x81f   : > { %v10247_v18 = vpop.f32.mrf.mxu1  ;;  %10486 = vmatmul.mubr.msk.bf16.gmra.mxu1 %vm388_vm2, %v7679_v40 }
 0x820   : > { %v13534_v27 = vadd.f32 %v10247_v18, %v13363_v15  ;;  %v6314_v15 = vadd.f32 %v14197_v44, %v13384_v17  ;;  %v14199_v18 = vld [vmem:[#allocation8_spill] sm:$0xff]  ;;  %v13565_v44 = vpop.f32.mrf.mxu0 }
 0x821   : > { %v5975_v56 = vpop.f32.mrf.mxu1  ;;  %14201 = vst [vmem:[#allocation25_spill] sm:$0xff] %v13565_v44 }
 0x822   : > { %v13539_v11 = vadd.f32 %v5975_v56, %v14196_v1  ;;  %v6315_v56 = vadd.f32 %v14199_v18, %v13395_v31 }
 0x823   : > { %v10248_v51 = vpop.f32.mrf.mxu1 }
 0x824   : > { %v13542_v13 = vadd.f32 %v10248_v51, %v13372_v7  ;;  %v14200_v51 = vld [vmem:[#allocation24_spill] sm:$0xff] }
 0x825   : > { %v5978_v29 = vpop.f32.mrf.mxu1  ;;  %v6313_v17 = vadd.f32 %v14200_v51, %v13401_v49  ;;  %v14205_v49 = vld [vmem:[#allocation14_spill] sm:$0xff] }
 0x826   : > { %v13547_v37 = vadd.f32 %v5978_v29, %v13379_v30  ;;  %v6319_v51 = vadd.f32 %v14205_v49, %v13417_v2 }
 0x827   : > { %v10299_v45 = vpop.f32.mrf.mxu1 }
 0x828   : > { %v13551_v38 = vadd.f32 %v10299_v45, %v6314_v15  ;;  %v6318_v45 = vadd.f32 %v14202_v19, %v13406_v34 }
 0x829   : > { %v6507_v40 = vpop.f32.mrf.mxu1 }
 0x82a   : > { %v13557_v7 = vadd.f32 %v6507_v40, %v6312_v58  ;;  %v14203_v40 = vld [vmem:[#allocation11_spill] sm:$0xff] }
 0x82b   : > { %v10300_v1 = vpop.f32.mrf.mxu1  ;;  %v6316_v31 = vadd.f32 %v14203_v40, %v13413_v25  ;;  %v14208_v25 = vld [vmem:[#allocation19_spill] sm:$0xff] }
 0x82c   : > { %v13561_v30 = vadd.f32 %v10300_v1, %v6315_v56  ;;  %v13575_v56 = vpop.f32.mrf.mxu0  ;;  %v6322_v40 = vadd.f32 %v14208_v25, %v13428_v36 }
 0x82d   : > { %v6510_v29 = vpop.f32.mrf.mxu1  ;;  %14204 = vst [vmem:[#allocation34_spill] sm:$0xff] %v13575_v56 }
 0x82e   : > { %v13567_v15 = vadd.f32 %v6510_v29, %v6313_v17  ;;  %v14206_v29 = vld [vmem:[#allocation3_spill] sm:$0xff] }
 0x82f   : > { %v10303_v6 = vpop.f32.mrf.mxu1  ;;  %v6317_v34 = vadd.f32 %v14206_v29, %v13423_v59  ;;  %v14211_v59 = vld [vmem:[#allocation27_spill] sm:$0xff] }
 0x830   : > { %v13571_v58 = vadd.f32 %v10303_v6, %v6318_v45  ;;  %v13585_v45 = vpop.f32.mrf.mxu0  ;;  %v6323_v29 = vadd.f32 %v14211_v59, %v13439_v61 }
 0x831   : > { %v6523_v18 = vpop.f32.mrf.mxu1  ;;  %14207 = vst [vmem:[#allocation6_spill] sm:$0xff] %v13585_v45 }
 0x832   : > { %v13577_v1 = vadd.f32 %v6523_v18, %v6316_v31  ;;  %v14209_v18 = vld [vmem:[#allocation9_spill] sm:$0xff] }
 0x833   : > { %v10304_v44 = vpop.f32.mrf.mxu1  ;;  %v6320_v2 = vadd.f32 %v14209_v18, %v13435_v42  ;;  %v14214_v42 = vld [vmem:[#allocation29_spill] sm:$0xff] }
 0x834   : > { %v13581_v17 = vadd.f32 %v10304_v44, %v6319_v51  ;;  %v13595_v44 = vpop.f32.mrf.mxu0  ;;  %v6326_v18 = vadd.f32 %v14214_v42, %v13450_v35 }
 0x835   : > { %v6526_v19 = vpop.f32.mrf.mxu1  ;;  %14210 = vst [vmem:[#allocation37_spill] sm:$0xff] %v13595_v44 }
 0x836   : > { %v13587_v6 = vadd.f32 %v6526_v19, %v6317_v34  ;;  %v14212_v19 = vld [vmem:[#allocation15_spill] sm:$0xff] }
 0x837   : > { %v10307_v56 = vpop.f32.mrf.mxu1  ;;  %v6321_v36 = vadd.f32 %v14212_v19, %v13445_v33  ;;  %v14217_v33 = vld [vmem:[#allocation7_spill] sm:$0xff] }
 0x838   : > { %v13591_v31 = vadd.f32 %v10307_v56, %v6322_v40  ;;  %v13605_v56 = vpop.f32.mrf.mxu0  ;;  %v6327_v19 = vadd.f32 %v14217_v33, %v13461_v28 }
 0x839   : > { %v6539_v49 = vpop.f32.mrf.mxu1  ;;  %14213 = vst [vmem:[#allocation26_spill] sm:$0xff] %v13605_v56 }
 0x83a   : > { %v13597_v51 = vadd.f32 %v6539_v49, %v6320_v2  ;;  %v14215_v49 = vld [vmem:[#allocation4_spill] sm:$0xff] }
 0x83b   : > { %v10308_v45 = vpop.f32.mrf.mxu1  ;;  %v6324_v61 = vadd.f32 %v14215_v49, %v13457_v46  ;;  %v14220_v46 = vld [vmem:[#allocation30_spill] sm:$0xff] }
 0x83c   : > { %v13601_v34 = vadd.f32 %v10308_v45, %v6323_v29  ;;  %v13615_v45 = vpop.f32.mrf.mxu0  ;;  %v6330_v49 = vadd.f32 %v14220_v46, %v13472_v0 }
 0x83d   : > { %v6542_v25 = vpop.f32.mrf.mxu1  ;;  %14216 = vst [vmem:[#allocation28_spill] sm:$0xff] %v13615_v45 }
 0x83e   : > { %v13607_v40 = vadd.f32 %v6542_v25, %v6321_v36  ;;  %v14218_v25 = vld [vmem:[#allocation20_spill] sm:$0xff] }
 0x83f   : > { %v10311_v44 = vpop.f32.mrf.mxu1  ;;  %v6325_v35 = vadd.f32 %v14218_v25, %v13467_v8  ;;  %v14223_v8 = vld [vmem:[#allocation32_spill] sm:$0xff] }
 0x840   : > { %v13611_v2 = vadd.f32 %v10311_v44, %v6326_v18  ;;  %v13625_v44 = vpop.f32.mrf.mxu0  ;;  %v6331_v25 = vadd.f32 %v14223_v8, %v13483_v41 }
 0x841   : > { %v6555_v59 = vpop.f32.mrf.mxu1  ;;  %14219 = vst [vmem:[#allocation39_spill] sm:$0xff] %v13625_v44 }
 0x842   : > { %v13617_v29 = vadd.f32 %v6555_v59, %v6324_v61  ;;  %v14221_v59 = vld [vmem:[#allocation10_spill] sm:$0xff] }
 0x843   : > { %v10312_v56 = vpop.f32.mrf.mxu1  ;;  %v6328_v28 = vadd.f32 %v14221_v59, %v13479_v12  ;;  %v14227_v12 = vld [vmem:[#allocation13_spill] sm:$0xff] }
 0x844   : > { %v13621_v36 = vadd.f32 %v10312_v56, %v6327_v19  ;;  %v13635_v56 = vpop.f32.mrf.mxu0  ;;  %v6334_v59 = vadd.f32 %v14227_v12, %v13494_v53 }
 0x845   : > { %v6558_v42 = vpop.f32.mrf.mxu1  ;;  %14222 = vst [vmem:[#allocation12_spill] sm:$0xff] %v13635_v56 }
 0x846   : > { %v13627_v18 = vadd.f32 %v6558_v42, %v6325_v35  ;;  %v14224_v42 = vld [vmem:[#allocation31_spill] sm:$0xff] }
 0x847   : > { %v10315_v45 = vpop.f32.mrf.mxu1  ;;  %v6329_v0 = vadd.f32 %v14224_v42, %v13489_v47  ;;  %v14232_v47 = vld [vmem:[#allocation16_spill] sm:$0xff] }
 0x848   : > { %v13631_v61 = vadd.f32 %v10315_v45, %v6330_v49  ;;  %v13645_v45 = vpop.f32.mrf.mxu0  ;;  %v6335_v42 = vadd.f32 %v14232_v47, %v13505_v21 }
 0x849   : > { %v6571_v33 = vpop.f32.mrf.mxu1  ;;  %14225 = vst [vmem:[#allocation41_spill] sm:$0xff] %v13645_v45 }
 0x84a   : > { %v13637_v19 = vadd.f32 %v6571_v33, %v6328_v28  ;;  %v14229_v33 = vld [vmem:[#allocation17_spill] sm:$0xff] }
 0x84b   : > { %v10316_v44 = vpop.f32.mrf.mxu1  ;;  %v6332_v41 = vadd.f32 %v14229_v33, %v13501_v63  ;;  %v14237_v63 = vld [vmem:[#allocation33_spill] sm:$0xff] }
 0x84c   : > { %v13641_v35 = vadd.f32 %v10316_v44, %v6331_v25  ;;  %v13655_v44 = vpop.f32.mrf.mxu0  ;;  %v6338_v33 = vadd.f32 %v14237_v63, %v13516_v60 }
 0x84d   : > { %v6574_v46 = vpop.f32.mrf.mxu1  ;;  %14230 = vst [vmem:[#allocation18_spill] sm:$0xff] %v13655_v44 }
 0x84e   : > { %v13647_v49 = vadd.f32 %v6574_v46, %v6329_v0  ;;  %v14234_v46 = vld [vmem:[#allocation21_spill] sm:$0xff] }
 0x84f   : > { %v10319_v56 = vpop.f32.mrf.mxu1  ;;  %v6333_v53 = vadd.f32 %v14234_v46, %v13511_v55  ;;  %v14242_v55 = vld [vmem:[#allocation35_spill] sm:$0xff] }
 0x850   : > { %14226 = vst [vmem:[#allocation44_spill] sm:$0xff] %v13647_v49  ;;  %v13651_v28 = vadd.f32 %v10319_v56, %v6334_v59  ;;  %v13665_v56 = vpop.f32.mrf.mxu0  ;;  %v6339_v46 = vadd.f32 %v14242_v55, %v13525_v20 }
 0x851   : > { %v6587_v8 = vpop.f32.mrf.mxu1  ;;  %14235 = vst [vmem:[#allocation23_spill] sm:$0xff] %v13665_v56 }
 0x852   : > { %14228 = vst [vmem:[#allocation5_spill] sm:$0xff] %v13651_v28  ;;  %v13657_v25 = vadd.f32 %v6587_v8, %v6332_v41  ;;  %v14239_v8 = vld [vmem:[#allocation22_spill] sm:$0xff] }
 0x853   : > { %v10320_v45 = vpop.f32.mrf.mxu1  ;;  %v6336_v21 = vadd.f32 %v14239_v8, %v13523_v43  ;;  %v14247_v43 = vld [vmem:[#allocation38_spill] sm:$0xff] }
 0x854   : > { %14231 = vst [vmem:[#allocation8_spill] sm:$0xff] %v13657_v25  ;;  %v13661_v0 = vadd.f32 %v10320_v45, %v6335_v42  ;;  %v13675_v45 = vpop.f32.mrf.mxu0  ;;  %v6342_v8 = vadd.f32 %v14247_v43, %v13534_v27 }
 0x855   : > { %v6590_v12 = vpop.f32.mrf.mxu1  ;;  %14240 = vst [vmem:[#allocation3_spill] sm:$0xff] %v13675_v45 }
 0x856   : > { %14233 = vst [vmem:[#allocation24_spill] sm:$0xff] %v13661_v0  ;;  %v13667_v59 = vadd.f32 %v6590_v12, %v6333_v53  ;;  %v14244_v12 = vld [vmem:[#allocation36_spill] sm:$0xff] }
 0x857   : > { %v10323_v44 = vpop.f32.mrf.mxu1  ;;  %v6337_v60 = vadd.f32 %v14244_v12, %v13530_v57  ;;  %v14252_v57 = vld [vmem:[#allocation42_spill] sm:$0xff] }
 0x858   : > { %14236 = vst [vmem:[#allocation11_spill] sm:$0xff] %v13667_v59  ;;  %v13671_v41 = vadd.f32 %v10323_v44, %v6338_v33  ;;  %v13685_v44 = vpop.f32.mrf.mxu0  ;;  %v6343_v12 = vadd.f32 %v14252_v57, %v13542_v13 }
 0x859   : > { %v6603_v47 = vpop.f32.mrf.mxu1  ;;  %14245 = vst [vmem:[#allocation27_spill] sm:$0xff] %v13685_v44 }
 0x85a   : > { %14238 = vst [vmem:[#allocation14_spill] sm:$0xff] %v13671_v41  ;;  %v13677_v42 = vadd.f32 %v6603_v47, %v6336_v21  ;;  %v14249_v47 = vld [vmem:[#allocation40_spill] sm:$0xff] }
 0x85b   : > { %v10324_v56 = vpop.f32.mrf.mxu1  ;;  %v6340_v20 = vadd.f32 %v14249_v47, %v13539_v11 }
 0x85c   : > { %14241 = vst [vmem:[#allocation19_spill] sm:$0xff] %v13677_v42  ;;  %v13681_v53 = vadd.f32 %v10324_v56, %v6339_v46  ;;  %v13695_v56 = vpop.f32.mrf.mxu0 }
 0x85d   : > { %v6606_v63 = vpop.f32.mrf.mxu1  ;;  %14250 = vst [vmem:[#allocation4_spill] sm:$0xff] %v13695_v56 }
 0x85e   : > { %14243 = vst [vmem:[#allocation9_spill] sm:$0xff] %v13681_v53  ;;  %v13687_v33 = vadd.f32 %v6606_v63, %v6337_v60  ;;  %v14254_v63 = vld [vmem:[#allocation43_spill] sm:$0xff] }
 0x85f   : > { %v10327_v45 = vpop.f32.mrf.mxu1  ;;  %v6341_v27 = vadd.f32 %v14254_v63, %v13547_v37 }
 0x860   : > { %14246 = vst [vmem:[#allocation15_spill] sm:$0xff] %v13687_v33  ;;  %v13691_v21 = vadd.f32 %v10327_v45, %v6342_v8  ;;  %v10419_v45 = vpop.f32.mrf.mxu0 }
 0x861   : > { %v6619_v55 = vpop.f32.mrf.mxu1 }
 0x862   : > { %14248 = vst [vmem:[#allocation29_spill] sm:$0xff] %v13691_v21  ;;  %v13697_v46 = vadd.f32 %v6619_v55, %v6340_v20  ;;  %v7473_v47 = vpop.f32.mrf.mxu0 }
 0x863   : > { %v10328_v44 = vpop.f32.mrf.mxu1 }
 0x864   : > { %14251 = vst [vmem:[#allocation7_spill] sm:$0xff] %v13697_v46  ;;  %v13701_v60 = vadd.f32 %v10328_v44, %v6343_v12  ;;  %v13707_v20 = vpop.f32.mrf.mxu0 }
 0x865   : > { %v6622_v43 = vpop.f32.mrf.mxu1 }
 0x866   : > { %14253 = vst [vmem:[#allocation20_spill] sm:$0xff] %v13701_v60  ;;  %v13705_v8 = vadd.f32 %v6622_v43, %v6341_v27  ;;  %v13711_v13 = vpop.f32.mrf.mxu0 }
 0x867   : > { %v10379_v21 = vpop.f32.mrf.mxu1 }
 0x868   : > { %14255 = vst [vmem:[#allocation30_spill] sm:$0xff] %v13705_v8  ;;  %v13717_v37 = vpop.f32.mrf.mxu0 }
 0x869   : > { %v7151_v11 = vpop.f32.mrf.mxu1 }
 0x86a   : > { %v13723_v27 = vpop.f32.mrf.mxu0 }
 0x86b   : > { %v10380_v33 = vpop.f32.mrf.mxu1 }
 0x86c   : > { %v13729_v60 = vpop.f32.mrf.mxu0 }
 0x86d   : > { %v7154_v56 = vpop.f32.mrf.mxu1 }
 0x86e   : > { %v13735_v41 = vpop.f32.mrf.mxu0 }
 0x86f   : > { %v10383_v55 = vpop.f32.mrf.mxu1  ;;  %14261 = vst [vmem:[#allocation16_spill] sm:$0xff] %v13735_v41 }
 0x870   : > { %v13741_v25 = vpop.f32.mrf.mxu0 }
 0x871   : > { %v13709_v46 = vpop.f32.mrf.mxu1  ;;  %14264 = vst [vmem:[#allocation22_spill] sm:$0xff] %v13741_v25 }
 0x873   : > { %v13713_v44 = vpop.f32.mrf.mxu1 }
 0x875   : > { %v13715_v57 = vpop.f32.mrf.mxu1 }
 0x877   : > { %v13719_v12 = vpop.f32.mrf.mxu1 }
 0x879   : > { %v13721_v63 = vpop.f32.mrf.mxu1 }
 0x87a   : > { %14256 = vst [vmem:[#allocation10_spill] sm:$0xff] %v13721_v63 }
 0x87b   : > { %v13725_v43 = vpop.f32.mrf.mxu1 }
 0x87c   : > { %14257 = vst [vmem:[#allocation32_spill] sm:$0xff] %v13725_v43  ;;  %v13747_v43 = vpop.f32.mrf.mxu0 }
 0x87d   : > { %v13727_v8 = vpop.f32.mrf.mxu1  ;;  %14267 = vst [vmem:[#allocation38_spill] sm:$0xff] %v13747_v43 }
 0x87e   : > { %14258 = vst [vmem:[#allocation31_spill] sm:$0xff] %v13727_v8 }
 0x87f   : > { %v13731_v53 = vpop.f32.mrf.mxu1 }
 0x880   : > { %14259 = vst [vmem:[#allocation13_spill] sm:$0xff] %v13731_v53  ;;  %v13753_v53 = vpop.f32.mrf.mxu0 }
 0x881   : > { %v13733_v42 = vpop.f32.mrf.mxu1  ;;  %14270 = vst [vmem:[#allocation43_spill] sm:$0xff] %v13753_v53 }
 0x882   : > { %14260 = vst [vmem:[#allocation17_spill] sm:$0xff] %v13733_v42 }
 0x883   : > { %v13737_v59 = vpop.f32.mrf.mxu1 }
 0x884   : > { %14262 = vst [vmem:[#allocation21_spill] sm:$0xff] %v13737_v59  ;;  %v13759_v59 = vpop.f32.mrf.mxu0 }
 0x885   : > { %v13739_v0 = vpop.f32.mrf.mxu1  ;;  %14273 = vst [vmem:[#allocation47_spill] sm:$0xff] %v13759_v59 }
 0x886   : > { %14263 = vst [vmem:[#allocation33_spill] sm:$0xff] %v13739_v0 }
 0x887   : > { %v13743_v28 = vpop.f32.mrf.mxu1 }
 0x888   : > { %14265 = vst [vmem:[#allocation35_spill] sm:$0xff] %v13743_v28  ;;  %v13765_v28 = vpop.f32.mrf.mxu0 }
 0x889   : > { %v13745_v49 = vpop.f32.mrf.mxu1  ;;  %14276 = vst [vmem:[#allocation50_spill] sm:$0xff] %v13765_v28 }
 0x88a   : > { %14266 = vst [vmem:[#allocation36_spill] sm:$0xff] %v13745_v49 }
 0x88b   : > { %v13749_v8 = vpop.f32.mrf.mxu1 }
 0x88c   : > { %14268 = vst [vmem:[#allocation40_spill] sm:$0xff] %v13749_v8  ;;  %v13771_v8 = vpop.f32.mrf.mxu0 }
 0x88d   : > { %v13751_v63 = vpop.f32.mrf.mxu1  ;;  %14279 = vst [vmem:[#allocation53_spill] sm:$0xff] %v13771_v8 }
 0x88e   : > { %14269 = vst [vmem:[#allocation42_spill] sm:$0xff] %v13751_v63 }
 0x88f   : > { %v13755_v42 = vpop.f32.mrf.mxu1 }
 0x890   : > { %14271 = vst [vmem:[#allocation45_spill] sm:$0xff] %v13755_v42  ;;  %v13777_v42 = vpop.f32.mrf.mxu0 }
 0x891   : > { %v13757_v41 = vpop.f32.mrf.mxu1  ;;  %14282 = vst [vmem:[#allocation56_spill] sm:$0xff] %v13777_v42 }
 0x892   : > { %14272 = vst [vmem:[#allocation46_spill] sm:$0xff] %v13757_v41  ;;  %v13785_v28 = vpop.f32.mrf.mxu0 }
 0x893   : > { %v13761_v0 = vpop.f32.mrf.mxu1 }
 0x894   : > { %14274 = vst [vmem:[#allocation48_spill] sm:$0xff] %v13761_v0  ;;  %v6958_v0 = vadd.f32 %v13376_v39, %v13551_v38  ;;  %v6957_v39 = vadd.f32 %v13411_v23, %v13567_v15  ;;  %v6963_v23 = vadd.f32 %v13441_v16, %v13581_v17  ;;  %v6961_v15 = vadd.f32 %v13453_v10, %v13587_v6 }
 0x895   : > { %v13763_v25 = vpop.f32.mrf.mxu1  ;;  %v6967_v16 = vadd.f32 %v13485_v62, %v13601_v34  ;;  %v6965_v10 = vadd.f32 %v13497_v32, %v13607_v40  ;;  %v13838_v62 = vadd.f32 %v13527_v48, %v13621_v36  ;;  %v13851_v48 = vadd.f32 %v13544_v26, %v13631_v61 }
 0x896   : > { %14275 = vst [vmem:[#allocation49_spill] sm:$0xff] %v13763_v25 }
 0x897   : > { %v13767_v49 = vpop.f32.mrf.mxu1 }
 0x898   : > { %14277 = vst [vmem:[#allocation51_spill] sm:$0xff] %v13767_v49  ;;  %v7280_v49 = vadd.f32 %v10379_v21, %v6958_v0  ;;  %v6962_v0 = vadd.f32 %v13421_v3, %v13571_v58  ;;  %v6966_v3 = vadd.f32 %v13463_v54, %v13591_v31  ;;  %v13827_v54 = vadd.f32 %v13507_v50, %v13611_v2 }
 0x899   : > { %v13769_v43 = vpop.f32.mrf.mxu1 }
 0x89a   : > { %14278 = vst [vmem:[#allocation52_spill] sm:$0xff] %v13769_v43  ;;  %v6956_v43 = vadd.f32 %v13389_v24, %v13557_v7  ;;  %v7602_v38 = vadd.f32 %v10419_v45, %v7280_v49  ;;  %v13804_v24 = vld [vmem:[%s14075_s10] ss:$0 sm:$0xff]  ;;  %v7279_v7 = vadd.f32 %v7154_v56, %v6957_v39 }
 0x89b   : > { %v13773_v63 = vpop.f32.mrf.mxu1 }
 0x89c   : > { %14280 = vst [vmem:[#allocation54_spill] sm:$0xff] %v13773_v63  ;;  %v7278_v63 = vadd.f32 %v7151_v11, %v6956_v43 }
 0x89d   : > { %v13775_v53 = vpop.f32.mrf.mxu1 }
 0x89e   : > { %14281 = vst [vmem:[#allocation55_spill] sm:$0xff] %v13775_v53  ;;  %v6959_v53 = vadd.f32 %v13399_v14, %v13561_v30  ;;  %v6960_v14 = vadd.f32 %v13431_v4, %v13577_v1  ;;  %v7600_v11 = vadd.f32 %v7473_v47, %v7278_v63 }
 0x89f   : > { %v13779_v41 = vpop.f32.mrf.mxu1 }
 0x8a0   : > { %14283 = vst [vmem:[#allocation57_spill] sm:$0xff] %v13779_v41  ;;  %v13795_v41 = vpop.f32.mrf.mxu0  ;;  %v7281_v59 = vadd.f32 %v10380_v33, %v6959_v53  ;;  %v7284_v53 = vadd.f32 %v10383_v55, %v6962_v0  ;;  %v6964_v33 = vadd.f32 %v13475_v52, %v13597_v51  ;;  %v7282_v45 = vadd.f32 %v13709_v46, %v6960_v14  ;;  %v14286_v0 = vld [vmem:[#allocation44_spill] sm:$0xff] }
 0x8a1   : > { %v13783_v25 = vpop.f32.mrf.mxu1  ;;  %v7601_v51 = vadd.f32 %v13711_v13, %v7279_v7  ;;  %v13834_v46 = vadd.f32 %v13519_v9, %v13617_v29  ;;  %v13847_v9 = vadd.f32 %v13536_v5, %v13627_v18  ;;  %v14284_v5 = vld [vmem:[#allocation25_spill] sm:$0xff]  ;;  %v14289_v7 = vld [vmem:[#allocation6_spill] sm:$0xff] }
 0x8a2   : > { %v13814_v49 = vpop.f32.mrf.mxu0  ;;  %v7603_v56 = vadd.f32 %v13707_v20, %v7281_v59  ;;  %v7285_v59 = vadd.f32 %v13713_v44, %v6963_v23  ;;  %v7606_v50 = vadd.f32 %v13717_v37, %v7284_v53  ;;  %v7283_v20 = vadd.f32 %v13715_v57, %v6961_v15  ;;  %v14291_v15 = vld [vmem:[#allocation8_spill] sm:$0xff] }
 0x8a3   : > { %v13789_v8 = vpop.f32.mrf.mxu1  ;;  %v7604_v36 = vadd.f32 %v13723_v27, %v7282_v45  ;;  %v7288_v37 = vadd.f32 %v13719_v12, %v6966_v3  ;;  %v13858_v57 = vadd.f32 %v13555_v22, %v13637_v19  ;;  %v13862_v18 = vadd.f32 %v14284_v5, %v13641_v35  ;;  %v14288_v19 = vld [vmem:[#allocation5_spill] sm:$0xff]  ;;  %v14296_v45 = vld [vmem:[#allocation28_spill] sm:$0xff] }
 0x8a4   : > { %v13841_v34 = vpop.f32.mrf.mxu0  ;;  %v7607_v61 = vadd.f32 %v13729_v60, %v7285_v59  ;;  %v13875_v35 = vadd.f32 %v14289_v7, %v14288_v19  ;;  %v14292_v3 = vld [vmem:[#allocation37_spill] sm:$0xff]  ;;  %v14308_v19 = vld [vmem:[#allocation15_spill] sm:$0xff]  ;;  %v14309_v7 = vld [vmem:[#allocation18_spill] sm:$0xff] }
 0x8a5   : > { %v13793_v42 = vpop.f32.mrf.mxu1 }
 0x8a6   : > { %v13865_v63 = vpop.f32.mrf.mxu0 }
 0x8a7   : > { %v10459_v21 = vpop.f32.mrf.mxu1 }
 0x8a8   : > { %v7924_v30 = vadd.f32 %v10459_v21, %v7602_v38  ;;  %v14285_v38 = vld [vmem:[#allocation10_spill] sm:$0xff] }
 0x8a9   : > { %v7795_v58 = vpop.f32.mrf.mxu1  ;;  %v7286_v12 = vadd.f32 %v14285_v38, %v6964_v33  ;;  %v14287_v21 = vld [vmem:[#allocation34_spill] sm:$0xff]  ;;  %v14293_v33 = vld [vmem:[#allocation24_spill] sm:$0xff] }
 0x8aa   : > { %v7963_v4 = vadd.f32 %v13804_v24, %v7924_v30  ;;  %v7922_v1 = vadd.f32 %v7795_v58, %v7600_v11  ;;  %v13871_v22 = vadd.f32 %v14287_v21, %v14286_v0  ;;  %v14290_v30 = vld [vmem:[#allocation16_spill] sm:$0xff]  ;;  %v13881_v58 = vadd.f32 %v14292_v3, %v14291_v15  ;;  %v14307_v0 = vld [vmem:[#allocation41_spill] sm:$0xff] }
 0x8ab   : > { %v10460_v17 = vpop.f32.mrf.mxu1  ;;  %v7605_v60 = vadd.f32 %v14290_v30, %v7283_v20  ;;  %v14305_v38 = vld [vmem:[#allocation12_spill] sm:$0xff]  ;;  %v14311_v3 = vld [vmem:[#allocation29_spill] sm:$0xff] }
 0x8ac   : > { %v8953_v6 = vmul.f32 -1.442695, %v7963_v4  ;;  %v7961_v52 = vadd.f32 %v13804_v24, %v7922_v1  ;;  %v7925_v31 = vadd.f32 %v10460_v17, %v7603_v56  ;;  %v14294_v4 = vld [vmem:[#allocation26_spill] sm:$0xff]  ;;  %v14295_v56 = vld [vmem:[#allocation11_spill] sm:$0xff] }
 0x8ad   : > { %v7798_v32 = vpop.f32.mrf.mxu1  ;;  %v13885_v1 = vadd.f32 %v14294_v4, %v14293_v33  ;;  %v13889_v17 = vadd.f32 %v14296_v45, %v14295_v56  ;;  %v14312_v33 = vld [vmem:[#allocation23_spill] sm:$0xff] }
 0x8ae   : > { %10725 = vpow2.f32 %v8953_v6  ;;  %v8951_v40 = vmul.f32 -1.442695, %v7961_v52  ;;  %v7964_v2 = vadd.f32 %v13804_v24, %v7925_v31  ;;  %v7923_v47 = vadd.f32 %v7798_v32, %v7601_v51  ;;  %v14297_v52 = vld [vmem:[#allocation22_spill] sm:$0xff]  ;;  %v13892_v51 = vpop.f32.mrf.mxu0  ;;  %v14313_v56 = vld [vmem:[#allocation43_spill] sm:$0xff] }
 0x8af   : > { %v10463_v29 = vpop.f32.mrf.mxu1  ;;  %v7610_v31 = vadd.f32 %v14297_v52, %v7288_v37  ;;  %v13924_v4 = vadd.f32 %v14312_v33, %v14311_v3  ;;  %v14314_v52 = vld [vmem:[#allocation47_spill] sm:$0xff]  ;;  %v14322_v33 = vld [vmem:[#allocation56_spill] sm:$0xff] }
 0x8b0   : > { %10727 = vpow2.f32 %v8951_v40  ;;  %v8954_v55 = vmul.f32 -1.442695, %v7964_v2  ;;  %v7962_v13 = vadd.f32 %v13804_v24, %v7923_v47  ;;  %v7928_v44 = vadd.f32 %v10463_v29, %v7606_v50  ;;  %v14298_v40 = vld [vmem:[#allocation32_spill] sm:$0xff]  ;;  %v14299_v47 = vld [vmem:[#allocation31_spill] sm:$0xff]  ;;  %v14300_v29 = vld [vmem:[#allocation14_spill] sm:$0xff]  ;;  %v13917_v30 = vpop.f32.mrf.mxu0 }
 0x8b1   : > { %v7811_v26 = vpop.f32.mrf.mxu1  ;;  %v7289_v2 = vadd.f32 %v14298_v40, %v6967_v16  ;;  %v7287_v20 = vadd.f32 %v14299_v47, %v6965_v10  ;;  %v14306_v10 = vld [vmem:[#allocation9_spill] sm:$0xff] }
 0x8b2   : > { %10729 = vpow2.f32 %v8954_v55  ;;  %v8952_v27 = vmul.f32 -1.442695, %v7962_v13  ;;  %v7967_v43 = vadd.f32 %v13804_v24, %v7928_v44  ;;  %v7926_v39 = vadd.f32 %v7811_v26, %v7604_v36  ;;  %v14301_v36 = vld [vmem:[#allocation39_spill] sm:$0xff]  ;;  %v14302_v44 = vld [vmem:[#allocation38_spill] sm:$0xff]  ;;  %v14315_v47 = vld [vmem:[#allocation21_spill] sm:$0xff] }
 0x8b3   : > { %v10464_v14 = vpop.f32.mrf.mxu1  ;;  %v13899_v55 = vadd.f32 %v14301_v36, %v14300_v29  ;;  %v7608_v5 = vadd.f32 %v14302_v44, %v7286_v12  ;;  %v13911_v21 = vadd.f32 %v14307_v0, %v14306_v10  ;;  %v7611_v45 = vadd.f32 %v14313_v56, %v7289_v2  ;;  %v14316_v36 = vld [vmem:[#allocation7_spill] sm:$0xff] }
 0x8b4   : > { %10731 = vpow2.f32 %v8952_v27  ;;  %v8957_v11 = vmul.f32 -1.442695, %v7967_v43  ;;  %v7965_v53 = vadd.f32 %v13804_v24, %v7926_v39  ;;  %v7929_v23 = vadd.f32 %v10464_v14, %v7607_v61  ;;  %v14303_v27 = vld [vmem:[#allocation13_spill] sm:$0xff]  ;;  %v14304_v39 = vld [vmem:[#allocation19_spill] sm:$0xff] }
 0x8b5   : > { %v7814_v6 = vpop.f32.mrf.mxu1  ;;  %v7292_v43 = vadd.f32 %v14303_v27, %v13827_v54  ;;  %v13907_v16 = vadd.f32 %v14305_v38, %v14304_v39  ;;  %v13915_v14 = vadd.f32 %v14309_v7, %v14308_v19  ;;  %v7293_v29 = vadd.f32 %v14315_v47, %v13838_v62  ;;  %v14319_v38 = vld [vmem:[#allocation33_spill] sm:$0xff] }
 0x8b6   : > { %10733 = vpow2.f32 %v8957_v11  ;;  %v8955_v59 = vmul.f32 -1.442695, %v7965_v53  ;;  %v7968_v32 = vadd.f32 %v13804_v24, %v7929_v23  ;;  %v7927_v50 = vadd.f32 %v7814_v6, %v7605_v60  ;;  %v14310_v23 = vld [vmem:[#allocation17_spill] sm:$0xff] }
 0x8b7   : > { %v10467_v13 = vpop.f32.mrf.mxu1  ;;  %v7290_v15 = vadd.f32 %v14310_v23, %v13834_v46  ;;  %v14317_v46 = vld [vmem:[#allocation3_spill] sm:$0xff]  ;;  %v7291_v10 = vadd.f32 %v14319_v38, %v13847_v9  ;;  %v14320_v19 = vld [vmem:[#allocation53_spill] sm:$0xff]  ;;  %v7615_v9 = vadd.f32 %v14322_v33, %v7293_v29  ;;  %v14327_v33 = vld [vmem:[#allocation46_spill] sm:$0xff] }
 0x8b8   : > { %10735 = vpow2.f32 %v8955_v59  ;;  %v8958_v37 = vmul.f32 -1.442695, %v7968_v32  ;;  %v7966_v26 = vadd.f32 %v13804_v24, %v7927_v50  ;;  %v7932_v61 = vadd.f32 %v10467_v13, %v7610_v31 }
 0x8b9   : > { %v7827_v12 = vpop.f32.mrf.mxu1  ;;  %v7609_v31 = vadd.f32 %v14314_v52, %v7287_v20  ;;  %v13933_v13 = vadd.f32 %v14317_v46, %v14316_v36  ;;  %v7612_v7 = vadd.f32 %v14320_v19, %v7290_v15  ;;  %v14324_v46 = vld [vmem:[#allocation40_spill] sm:$0xff] }
 0x8ba   : > { %10737 = vpow2.f32 %v8958_v37  ;;  %v8956_v60 = vmul.f32 -1.442695, %v7966_v26  ;;  %v7971_v11 = vadd.f32 %v13804_v24, %v7932_v61  ;;  %v7930_v54 = vadd.f32 %v7827_v12, %v7608_v5  ;;  %v14318_v37 = vld [vmem:[#allocation50_spill] sm:$0xff]  ;;  %v13936_v26 = vpop.f32.mrf.mxu0 }
 0x8bb   : > { %v10726_v53 = vpop.eup %10725  ;;  %v10468_v6 = vpop.f32.mrf.mxu1  ;;  %v7614_v2 = vadd.f32 %v14318_v37, %v7292_v43 }
 0x8bc   : > { %v8091_v59 = vadd.f32 1.0, %v10726_v53  ;;  %10739 = vpow2.f32 %v8956_v60  ;;  %v8961_v32 = vmul.f32 -1.442695, %v7971_v11  ;;  %v7969_v50 = vadd.f32 %v13804_v24, %v7930_v54  ;;  %v14321_v54 = vld [vmem:[#allocation35_spill] sm:$0xff]  ;;  %v13946_v56 = vpop.f32.mrf.mxu0 }
 0x8bd   : > { %v10728_v40 = vpop.eup %10727  ;;  %v7933_v44 = vadd.f32 %v10468_v6, %v7611_v45  ;;  %v7830_v5 = vpop.f32.mrf.mxu1  ;;  %v7296_v53 = vadd.f32 %v14321_v54, %v13851_v48 }
 0x8be   : > { %10741 = vrcp.f32 %v8091_v59  ;;  %v8089_v20 = vadd.f32 1.0, %v10728_v40  ;;  %v8959_v61 = vmul.f32 -1.442695, %v7969_v50  ;;  %v7931_v27 = vadd.f32 %v7830_v5, %v7609_v31  ;;  %v14323_v31 = vld [vmem:[#allocation36_spill] sm:$0xff] }
 0x8bf   : > { %v10730_v39 = vpop.eup %10729  ;;  %10743 = vpow2.f32 %v8961_v32  ;;  %v7972_v62 = vadd.f32 %v13804_v24, %v7933_v44  ;;  %v10471_v0 = vpop.f32.mrf.mxu1  ;;  %v7294_v59 = vadd.f32 %v14323_v31, %v13858_v57  ;;  %v7613_v50 = vadd.f32 %v13785_v28, %v7291_v10 }
 0x8c0   : > { %10745 = vrcp.f32 %v8089_v20  ;;  %v8092_v12 = vadd.f32 1.0, %v10730_v39  ;;  %v7970_v43 = vadd.f32 %v13804_v24, %v7931_v27  ;;  %v7936_v60 = vadd.f32 %v10471_v0, %v7614_v2  ;;  %v13957_v57 = vpop.f32.mrf.mxu0  ;;  %v14325_v39 = vld [vmem:[#allocation42_spill] sm:$0xff] }
 0x8c1   : > { %v10732_v11 = vpop.eup %10731  ;;  %10747 = vpow2.f32 %v8959_v61  ;;  %v8962_v23 = vmul.f32 -1.442695, %v7972_v62  ;;  %v7843_v3 = vpop.f32.mrf.mxu1  ;;  %v7297_v44 = vadd.f32 %v14324_v46, %v13862_v18  ;;  %v7618_v2 = vadd.f32 %v13795_v41, %v7296_v53 }
 0x8c2   : > { %10749 = vrcp.f32 %v8092_v12  ;;  %v8090_v45 = vadd.f32 1.0, %v10732_v11  ;;  %v8960_v6 = vmul.f32 -1.442695, %v7970_v43  ;;  %v7975_v15 = vadd.f32 %v13804_v24, %v7936_v60  ;;  %v14326_v12 = vld [vmem:[#allocation45_spill] sm:$0xff]  ;;  %v13972_v11 = vpop.f32.mrf.mxu0 }
 0x8c3   : > { %v10734_v52 = vpop.eup %10733  ;;  %10751 = vpow2.f32 %v8962_v23  ;;  %v7934_v32 = vadd.f32 %v7843_v3, %v7612_v7  ;;  %v10472_v48 = vpop.f32.mrf.mxu1  ;;  %v7295_v38 = vadd.f32 %v14325_v39, %v13871_v22  ;;  %v7616_v62 = vadd.f32 %v13814_v49, %v7294_v59 }
 0x8c4   : > { %10753 = vrcp.f32 %v8090_v45  ;;  %v8095_v40 = vadd.f32 1.0, %v10734_v52  ;;  %v8965_v47 = vmul.f32 -1.442695, %v7975_v15  ;;  %v7937_v29 = vadd.f32 %v10472_v48, %v7615_v9  ;;  %v14328_v45 = vld [vmem:[#allocation20_spill] sm:$0xff]  ;;  %v13986_v46 = vpop.f32.mrf.mxu0 }
 0x8c5   : > { %v10736_v36 = vpop.eup %10735  ;;  %10755 = vpow2.f32 %v8960_v6  ;;  %v7973_v5 = vadd.f32 %v13804_v24, %v7934_v32  ;;  %v7846_v37 = vpop.f32.mrf.mxu1  ;;  %v7300_v43 = vadd.f32 %v14326_v12, %v13875_v35  ;;  %v7619_v49 = vadd.f32 %v13841_v34, %v7297_v44  ;;  %v14329_v6 = vld [vmem:[#allocation27_spill] sm:$0xff] }
 0x8c6   : > { %10757 = vrcp.f32 %v8095_v40  ;;  %v8093_v20 = vadd.f32 1.0, %v10736_v36  ;;  %v7976_v28 = vadd.f32 %v13804_v24, %v7937_v29  ;;  %v7935_v61 = vadd.f32 %v7846_v37, %v7613_v50  ;;  %v13999_v12 = vpop.f32.mrf.mxu0 }
 0x8c7   : > { %v10738_v27 = vpop.eup %10737  ;;  %10759 = vpow2.f32 %v8965_v47  ;;  %v8963_v18 = vmul.f32 -1.442695, %v7973_v5  ;;  %v10475_v10 = vpop.f32.mrf.mxu1  ;;  %v7298_v9 = vadd.f32 %v14327_v33, %v13881_v58  ;;  %v13978_v15 = vadd.f32 %v14329_v6, %v14328_v45  ;;  %v14330_v58 = vld [vmem:[#allocation48_spill] sm:$0xff] }
 0x8c8   : > { %10761 = vrcp.f32 %v8093_v20  ;;  %v8096_v0 = vadd.f32 1.0, %v10738_v27  ;;  %v8966_v41 = vmul.f32 -1.442695, %v7976_v28  ;;  %v7974_v19 = vadd.f32 %v13804_v24, %v7935_v61  ;;  %v14331_v20 = vld [vmem:[#allocation49_spill] sm:$0xff] }
 0x8c9   : > { %v10740_v7 = vpop.eup %10739  ;;  %10763 = vpow2.f32 %v8963_v18  ;;  %v7940_v22 = vadd.f32 %v10475_v10, %v7618_v2  ;;  %v7859_v60 = vpop.f32.mrf.mxu1  ;;  %v7617_v32 = vadd.f32 %v13865_v63, %v7295_v38  ;;  %v7301_v50 = vadd.f32 %v14330_v58, %v13885_v1 }
 0x8ca   : > { %10765 = vrcp.f32 %v8096_v0  ;;  %v8094_v54 = vadd.f32 1.0, %v10740_v7  ;;  %v8964_v53 = vmul.f32 -1.442695, %v7974_v19  ;;  %v7938_v23 = vadd.f32 %v7859_v60, %v7616_v62 }
 0x8cb   : > { %v10742_v3 = vpop.eup %10741  ;;  %10767 = vpow2.f32 %v8966_v41  ;;  %v7979_v35 = vadd.f32 %v13804_v24, %v7940_v22  ;;  %v10476_v52 = vpop.f32.mrf.mxu1  ;;  %v7622_v2 = vadd.f32 %v13892_v51, %v7300_v43  ;;  %v7299_v28 = vadd.f32 %v14331_v20, %v13889_v17  ;;  %v14332_v51 = vld [vmem:[#allocation51_spill] sm:$0xff] }
 0x8cc   : > { %v10744_v34 = vpop.eup %10743  ;;  %8187 = vst [vmem:[%s13967_s14 + $0x10] sm:$0xff] %v10742_v3  ;;  %10769 = vrcp.f32 %v8094_v54  ;;  %v7977_v31 = vadd.f32 %v13804_v24, %v7938_v23  ;;  %v7941_v59 = vadd.f32 %v10476_v52, %v7619_v49  ;;  %v7620_v27 = vadd.f32 %v13917_v30, %v7298_v9  ;;  %v14333_v49 = vld [vmem:[#allocation52_spill] sm:$0xff]  ;;  %v10447_v3 = vpop.f32.mrf.mxu0 }
 0x8cd   : > { %v10746_v48 = vpop.eup %10745  ;;  %v8099_v40 = vadd.f32 1.0, %v10744_v34  ;;  %10771 = vpow2.f32 %v8964_v53  ;;  %v8969_v47 = vmul.f32 -1.442695, %v7979_v35  ;;  %v7862_v29 = vpop.f32.mrf.mxu1  ;;  %v7304_v0 = vadd.f32 %v14332_v51, %v13899_v55  ;;  %v14334_v35 = vld [vmem:[#allocation54_spill] sm:$0xff] }
 0x8ce   : > { %v10748_v36 = vpop.eup %10747  ;;  %8185 = vst [vmem:[%s13967_s14] sm:$0xff] %v10746_v48  ;;  %v8967_v44 = vmul.f32 -1.442695, %v7977_v31  ;;  %v7980_v5 = vadd.f32 %v13804_v24, %v7941_v59  ;;  %v7939_v37 = vadd.f32 %v7862_v29, %v7617_v32  ;;  %v7623_v19 = vadd.f32 %v13936_v26, %v7301_v50  ;;  %v14335_v50 = vld [vmem:[#allocation55_spill] sm:$0xff] }
 0x8cf   : > { %v10750_v63 = vpop.eup %10749  ;;  %10773 = vrcp.f32 %v8099_v40  ;;  %v8097_v1 = vadd.f32 1.0, %v10748_v36  ;;  %v10479_v61 = vpop.f32.mrf.mxu1  ;;  %v7302_v54 = vadd.f32 %v14333_v49, %v13907_v16  ;;  %v7621_v26 = vadd.f32 %v13946_v56, %v7299_v28 }
 0x8d0   : > { %v10752_v39 = vpop.eup %10751  ;;  %8188 = vst [vmem:[%s13967_s14 + $0x18] sm:$0xff] %v10750_v63  ;;  %10775 = vpow2.f32 %v8969_v47  ;;  %v8970_v38 = vmul.f32 -1.442695, %v7980_v5  ;;  %v7978_v18 = vadd.f32 %v13804_v24, %v7939_v37  ;;  %v7944_v10 = vadd.f32 %v10479_v61, %v7622_v2  ;;  %v14336_v63 = vld [vmem:[#allocation57_spill] sm:$0xff] }
 0x8d1   : > { %v10754_v62 = vpop.eup %10753  ;;  %10777 = vrcp.f32 %v8097_v1  ;;  %v8100_v41 = vadd.f32 1.0, %v10752_v39  ;;  %v7875_v17 = vpop.f32.mrf.mxu1  ;;  %v7305_v52 = vadd.f32 %v14334_v35, %v13911_v21  ;;  %v7626_v31 = vadd.f32 %v13957_v57, %v7304_v0 }
 0x8d2   : > { %v10756_v7 = vpop.eup %10755  ;;  %8186 = vst [vmem:[%s13967_s14 + $0x8] sm:$0xff] %v10754_v62  ;;  %10779 = vpow2.f32 %v8967_v44  ;;  %v8968_v30 = vmul.f32 -1.442695, %v7978_v18  ;;  %v7983_v43 = vadd.f32 %v13804_v24, %v7944_v10  ;;  %v7942_v22 = vadd.f32 %v7875_v17, %v7620_v27  ;;  %v7585_v44 = vpop.f32.mrf.mxu0  ;;  %v14337_v18 = vld [vmem:[#allocation30_spill] sm:$0xff]  ;;  %v14338_v10 = vld [vmem:[#allocation4_spill] sm:$0xff] }
 0x8d3   : > { %v10758_v60 = vpop.eup %10757  ;;  %10781 = vrcp.f32 %v8100_v41  ;;  %v8098_v55 = vadd.f32 1.0, %v10756_v7  ;;  %v10480_v53 = vpop.f32.mrf.mxu1  ;;  %v7303_v40 = vadd.f32 %v14335_v50, %v13915_v14  ;;  %v7624_v29 = vadd.f32 %v13972_v11, %v7302_v54 }
 0x8d4   : > { %v10760_v23 = vpop.eup %10759  ;;  %8191 = vst [vmem:[%s13967_s14 + $0x30] sm:$0xff] %v10758_v60  ;;  %10783 = vpow2.f32 %v8970_v38  ;;  %v8973_v33 = vmul.f32 -1.442695, %v7983_v43  ;;  %v7981_v9 = vadd.f32 %v13804_v24, %v7942_v22  ;;  %v7945_v45 = vadd.f32 %v10480_v53, %v7623_v19  ;;  %v10448_v41 = vpop.f32.mrf.mxu0 }
 0x8d5   : > { %v10762_v6 = vpop.eup %10761  ;;  %10785 = vrcp.f32 %v8098_v55  ;;  %v8103_v16 = vadd.f32 1.0, %v10760_v23  ;;  %v7878_v34 = vpop.f32.mrf.mxu1  ;;  %v7308_v20 = vadd.f32 %v14336_v63, %v13924_v4  ;;  %v7627_v1 = vadd.f32 %v13986_v46, %v7305_v52 }
 0x8d6   : > { %v10764_v59 = vpop.eup %10763  ;;  %8189 = vst [vmem:[%s13967_s14 + $0x20] sm:$0xff] %v10762_v6  ;;  %10787 = vpow2.f32 %v8968_v30  ;;  %v8971_v56 = vmul.f32 -1.442695, %v7981_v9  ;;  %v7984_v32 = vadd.f32 %v13804_v24, %v7945_v45  ;;  %v7943_v48 = vadd.f32 %v7878_v34, %v7621_v26 }
 0x8d7   : > { %v10766_v58 = vpop.eup %10765  ;;  %10789 = vrcp.f32 %v8103_v16  ;;  %v8101_v47 = vadd.f32 1.0, %v10764_v59  ;;  %v10483_v21 = vpop.f32.mrf.mxu1  ;;  %v7306_v38 = vadd.f32 %v13783_v25, %v13933_v13  ;;  %v6985_v62 = vadd.f32 %v14338_v10, %v14337_v18 }
 0x8d8   : > { %v10768_v36 = vpop.eup %10767  ;;  %8192 = vst [vmem:[%s13967_s14 + $0x38] sm:$0xff] %v10766_v58  ;;  %10791 = vpow2.f32 %v8973_v33  ;;  %v8974_v57 = vmul.f32 -1.442695, %v7984_v32  ;;  %v7982_v5 = vadd.f32 %v13804_v24, %v7943_v48  ;;  %v7948_v37 = vadd.f32 %v10483_v21, %v7626_v31 }
 0x8d9   : > { %v10770_v2 = vpop.eup %10769  ;;  %10793 = vrcp.f32 %v8101_v47  ;;  %v8104_v14 = vadd.f32 1.0, %v10768_v36  ;;  %v7891_v28 = vpop.f32.mrf.mxu1  ;;  %v7630_v30 = vadd.f32 %v10447_v3, %v7308_v20  ;;  %v7309_v43 = vadd.f32 %v13789_v8, %v13978_v15 }
 0x8da   : > { %v10772_v61 = vpop.eup %10771  ;;  %8190 = vst [vmem:[%s13967_s14 + $0x28] sm:$0xff] %v10770_v2  ;;  %10795 = vpow2.f32 %v8971_v56  ;;  %v8972_v11 = vmul.f32 -1.442695, %v7982_v5  ;;  %v7987_v27 = vadd.f32 %v13804_v24, %v7948_v37  ;;  %v7946_v39 = vadd.f32 %v7891_v28, %v7624_v29  ;;  %v7588_v3 = vpop.f32.mrf.mxu0 }
 0x8db   : > { %10797 = vrcp.f32 %v8104_v14  ;;  %v8102_v4 = vadd.f32 1.0, %v10772_v61  ;;  %v10484_v51 = vpop.f32.mrf.mxu1  ;;  %v7625_v25 = vadd.f32 %v13999_v12, %v7303_v40  ;;  %v7628_v53 = vadd.f32 %v7585_v44, %v7306_v38 }
 0x8dc   : > { %v10774_v0 = vpop.eup %10773  ;;  %10799 = vpow2.f32 %v8974_v57  ;;  %v8977_v46 = vmul.f32 -1.442695, %v7987_v27  ;;  %v7985_v17 = vadd.f32 %v13804_v24, %v7946_v39  ;;  %v7949_v19 = vadd.f32 %v10484_v51, %v7627_v1 }
 0x8dd   : > { %v10776_v7 = vpop.eup %10775  ;;  %8195 = vst [vmem:[%s13967_s14 + $0x50] sm:$0xff] %v10774_v0  ;;  %10801 = vrcp.f32 %v8102_v4  ;;  %v7894_v13 = vpop.f32.mrf.mxu1  ;;  %v7307_v26 = vadd.f32 %v13793_v42, %v6985_v62  ;;  %v7631_v59 = vadd.f32 %v10448_v41, %v7309_v43 }
 0x8de   : > { %v10778_v22 = vpop.eup %10777  ;;  %v8107_v60 = vadd.f32 1.0, %v10776_v7  ;;  %10803 = vpow2.f32 %v8972_v11  ;;  %v8975_v49 = vmul.f32 -1.442695, %v7985_v17  ;;  %v7988_v54 = vadd.f32 %v13804_v24, %v7949_v19 }
 0x8df   : > { %v10780_v55 = vpop.eup %10779  ;;  %8193 = vst [vmem:[%s13967_s14 + $0x40] sm:$0xff] %v10778_v22  ;;  %10805 = vpow2.f32 %v8977_v46  ;;  %v7947_v23 = vadd.f32 %v7894_v13, %v7625_v25  ;;  %v10487_v8 = vpop.f32.mrf.mxu1  ;;  %v7629_v56 = vadd.f32 %v7588_v3, %v7307_v26 }
 0x8e0   : > { %v10782_v15 = vpop.eup %10781  ;;  %10807 = vrcp.f32 %v8107_v60  ;;  %v8105_v12 = vadd.f32 1.0, %v10780_v55  ;;  %v8978_v33 = vmul.f32 -1.442695, %v7988_v54  ;;  %v7952_v9 = vadd.f32 %v10487_v8, %v7630_v30 }
 0x8e1   : > { %v10784_v45 = vpop.eup %10783  ;;  %8196 = vst [vmem:[%s13967_s14 + $0x58] sm:$0xff] %v10782_v15  ;;  %10809 = vpow2.f32 %v8975_v49  ;;  %v7986_v6 = vadd.f32 %v13804_v24, %v7947_v23  ;;  %v7907_v35 = vpop.f32.mrf.mxu1 }
 0x8e2   : > { %v10786_v52 = vpop.eup %10785  ;;  %10811 = vrcp.f32 %v8105_v12  ;;  %v8108_v42 = vadd.f32 1.0, %v10784_v45  ;;  %v7991_v16 = vadd.f32 %v13804_v24, %v7952_v9  ;;  %v7950_v34 = vadd.f32 %v7907_v35, %v7628_v53 }
 0x8e3   : > { %v10788_v31 = vpop.eup %10787  ;;  %8194 = vst [vmem:[%s13967_s14 + $0x48] sm:$0xff] %v10786_v52  ;;  %10813 = vpow2.f32 %v8978_v33  ;;  %v8976_v32 = vmul.f32 -1.442695, %v7986_v6  ;;  %v10488_v48 = vpop.f32.mrf.mxu1 }
 0x8e4   : > { %v10790_v58 = vpop.eup %10789  ;;  %10815 = vrcp.f32 %v8108_v42  ;;  %v8106_v50 = vadd.f32 1.0, %v10788_v31  ;;  %v8981_v40 = vmul.f32 -1.442695, %v7991_v16  ;;  %v7989_v47 = vadd.f32 %v13804_v24, %v7950_v34 }
 0x8e5   : > { %v10792_v21 = vpop.eup %10791  ;;  %8199 = vst [vmem:[%s13967_s14 + $0x70] sm:$0xff] %v10790_v58  ;;  %10817 = vpow2.f32 %v8976_v32  ;;  %v7953_v29 = vadd.f32 %v10488_v48, %v7631_v59  ;;  %v7910_v36 = vpop.f32.mrf.mxu1 }
 0x8e6   : > { %v10794_v44 = vpop.eup %10793  ;;  %10819 = vrcp.f32 %v8106_v50  ;;  %v8111_v57 = vadd.f32 1.0, %v10792_v21  ;;  %v8979_v5 = vmul.f32 -1.442695, %v7989_v47  ;;  %v7951_v37 = vadd.f32 %v7910_v36, %v7629_v56 }
 0x8e7   : > { %v10796_v2 = vpop.eup %10795  ;;  %8197 = vst [vmem:[%s13967_s14 + $0x60] sm:$0xff] %v10794_v44  ;;  %10821 = vpow2.f32 %v8981_v40  ;;  %v7992_v63 = vadd.f32 %v13804_v24, %v7953_v29 }
 0x8e8   : > { %v10798_v20 = vpop.eup %10797  ;;  %10823 = vrcp.f32 %v8111_v57  ;;  %v8109_v14 = vadd.f32 1.0, %v10796_v2  ;;  %v7990_v28 = vadd.f32 %v13804_v24, %v7951_v37 }
 0x8e9   : > { %v10800_v1 = vpop.eup %10799  ;;  %8200 = vst [vmem:[%s13967_s14 + $0x78] sm:$0xff] %v10798_v20  ;;  %10825 = vpow2.f32 %v8979_v5  ;;  %v8982_v61 = vmul.f32 -1.442695, %v7992_v63 }
 0x8ea   : > { %v10802_v11 = vpop.eup %10801  ;;  %10827 = vrcp.f32 %v8109_v14  ;;  %v8112_v27 = vadd.f32 1.0, %v10800_v1  ;;  %v8980_v39 = vmul.f32 -1.442695, %v7990_v28 }
 0x8eb   : > { %v10804_v38 = vpop.eup %10803  ;;  %8198 = vst [vmem:[%s13967_s14 + $0x68] sm:$0xff] %v10802_v11  ;;  %10829 = vpow2.f32 %v8982_v61 }
 0x8ec   : > { %v10806_v18 = vpop.eup %10805  ;;  %10831 = vrcp.f32 %v8112_v27  ;;  %v8110_v10 = vadd.f32 1.0, %v10804_v38 }
 0x8ed   : > { %v10808_v62 = vpop.eup %10807  ;;  %v8115_v4 = vadd.f32 1.0, %v10806_v18  ;;  %10833 = vpow2.f32 %v8980_v39 }
 0x8ee   : > { %v10810_v24 = vpop.eup %10809  ;;  %8203 = vst [vmem:[%s13967_s14 + $0x90] sm:$0xff] %v10808_v62  ;;  %10835 = vrcp.f32 %v8110_v10 }
 0x8ef   : > { %v10812_v51 = vpop.eup %10811  ;;  %10837 = vrcp.f32 %v8115_v4  ;;  %v8113_v0 = vadd.f32 1.0, %v10810_v24 }
 0x8f0   : > { %v10814_v41 = vpop.eup %10813  ;;  %8201 = vst [vmem:[%s13967_s14 + $0x80] sm:$0xff] %v10812_v51 }
 0x8f1   : > { %v10816_v46 = vpop.eup %10815  ;;  %10839 = vrcp.f32 %v8113_v0  ;;  %v8116_v17 = vadd.f32 1.0, %v10814_v41 }
 0x8f2   : > { %v10818_v19 = vpop.eup %10817  ;;  %8204 = vst [vmem:[%s13967_s14 + $0x98] sm:$0xff] %v10816_v46 }
 0x8f3   : > { %v10820_v7 = vpop.eup %10819  ;;  %10841 = vrcp.f32 %v8116_v17  ;;  %v8114_v30 = vadd.f32 1.0, %v10818_v19 }
 0x8f4   : > { %v10822_v43 = vpop.eup %10821  ;;  %8202 = vst [vmem:[%s13967_s14 + $0x88] sm:$0xff] %v10820_v7 }
 0x8f5   : > { %v10824_v25 = vpop.eup %10823  ;;  %10843 = vrcp.f32 %v8114_v30  ;;  %v8119_v13 = vadd.f32 1.0, %v10822_v43 }
 0x8f6   : > { %v10826_v22 = vpop.eup %10825  ;;  %8207 = vst [vmem:[%s13967_s14 + $0xb0] sm:$0xff] %v10824_v25 }
 0x8f7   : > { %v10828_v60 = vpop.eup %10827  ;;  %10845 = vrcp.f32 %v8119_v13  ;;  %v8117_v49 = vadd.f32 1.0, %v10826_v22 }
 0x8f8   : > { %v10830_v54 = vpop.eup %10829  ;;  %8205 = vst [vmem:[%s13967_s14 + $0xa0] sm:$0xff] %v10828_v60 }
 0x8f9   : > { %v10832_v55 = vpop.eup %10831  ;;  %10847 = vrcp.f32 %v8117_v49  ;;  %v8120_v53 = vadd.f32 1.0, %v10830_v54 }
 0x8fa   : > { %v10834_v26 = vpop.eup %10833  ;;  %8208 = vst [vmem:[%s13967_s14 + $0xb8] sm:$0xff] %v10832_v55 }
 0x8fb   : > { %v10836_v23 = vpop.eup %10835  ;;  %10849 = vrcp.f32 %v8120_v53  ;;  %v8118_v8 = vadd.f32 1.0, %v10834_v26 }
 0x8fc   : > { %v10838_v15 = vpop.eup %10837  ;;  %8206 = vst [vmem:[%s13967_s14 + $0xa8] sm:$0xff] %v10836_v23 }
 0x8fd   : > { %8211 = vst [vmem:[%s13967_s14 + $0xd0] sm:$0xff] %v10838_v15  ;;  %10851 = vrcp.f32 %v8118_v8 }
 0x8fe   : > { %v10840_v3 = vpop.eup %10839 }
 0x8ff   : > { %8209 = vst [vmem:[%s13967_s14 + $0xc0] sm:$0xff] %v10840_v3 }
 0x900   : > { %v10842_v12 = vpop.eup %10841 }
 0x901   : > { %8212 = vst [vmem:[%s13967_s14 + $0xd8] sm:$0xff] %v10842_v12 }
 0x902   : > { %v10844_v33 = vpop.eup %10843 }
 0x903   : > { %8210 = vst [vmem:[%s13967_s14 + $0xc8] sm:$0xff] %v10844_v33 }
 0x904   : > { %v10846_v9 = vpop.eup %10845 }
 0x905   : > { %8215 = vst [vmem:[%s13967_s14 + $0xf0] sm:$0xff] %v10846_v9 }
 0x906   : > { %v10848_v45 = vpop.eup %10847 }
 0x907   : > { %8213 = vst [vmem:[%s13967_s14 + $0xe0] sm:$0xff] %v10848_v45 }
 0x908   : > { %v10850_v6 = vpop.eup %10849 }
 0x909   : > { %8216 = vst [vmem:[%s13967_s14 + $0xf8] sm:$0xff] %v10850_v6 }
 0x90a   : > { %v10852_v35 = vpop.eup %10851 }
 0x90b   : > { %8214 = vst [vmem:[%s13967_s14 + $0xe8] sm:$0xff] %v10852_v35 }
 0x90c PF: > { %s21_s17 = sadd.s32 1, %s10859_s17  }
 0x90d   : > { %p18_p4 = scmp.ge.s32.totalorder %s21_s17, 4  }
 0x90f   :  { %20 = sbr.rel (!%p18_p4) target bundleno = 1 (0x1), region = 115 }

</bundles_post_ra>
